<compile_context>
chip_gen: v7x
topology: tpu7x:2x2x1
jax: 0.10.0
libtpu: 0.0.40
codegen_flags: <defaults>
</compile_context>

<pallas_src>
from functools import partial

import jax
import jax.numpy as jnp
from jax.experimental import pallas as pl
from jax.experimental.pallas import tpu as pltpu

EPS = 1e-5


def _is_v5e():
    # Perf-only switch between the two (numerically equivalent) MXU feeding
    # strategies; falls back to im2col if the device kind is unrecognizable.
    try:
        kind = jax.devices()[0].device_kind.lower()
    except Exception:
        return False
    return ("v5 lite" in kind) or ("v5e" in kind) or ("v5litepod" in kind)


# --------------------------------------------------------------------------
# Stage A / B kernel: [optional fused bn+relu on input] -> 3x3 conv (pad 1)
# --------------------------------------------------------------------------
def _conv3x3_kernel(x_ref, scale_ref, shift_ref, w_ref, y_ref, stats_ref,
                    *scratch, fuse_bn_relu, use_im2col):
    """One batch element.

    x_ref:     (1, H, W, C)      f32 (stage A) / bf16 (stage B) input
    scale_ref: (1, C)            f32  fused input affine (unused if not fuse_bn_relu)
    shift_ref: (1, C)            f32
    w_ref:     (9*C, P)          bf16 conv weight, 3x3 taps folded into K
    y_ref:     (1, H, W, P)      bf16 raw conv output (pre-BN)
    stats_ref: (1, 2, P)         f32  [sum, sum_of_squares] of the f32 conv output
    scratch:   xpad (1, H+2, W+2, C) bf16  [+ patch (H*W, 9*C) bf16 if use_im2col]
    """
    if use_im2col:
        xpad, patch = scratch
    else:
        (xpad,) = scratch

    _, hp2, wp2, C = xpad.shape
    H, W = hp2 - 2, wp2 - 2
    P = w_ref.shape[1]

    z = x_ref[0]                                               # (H, W, C)
    if fuse_bn_relu:
        # fused bn1 + relu on the input -- f32 VPU math (v5e has no bf16 VALU)
        z = jnp.maximum(z.astype(jnp.float32) * scale_ref[...] + shift_ref[...], 0.0)

    # Zero only the 1-pixel halo strips of the padded bf16 scratch; the
    # interior is fully overwritten each step (no full-tensor zero pass).
    xpad[0, 0:1, :, :] = jnp.zeros((1, W + 2, C), jnp.bfloat16)
    xpad[0, H + 1:H + 2, :, :] = jnp.zeros((1, W + 2, C), jnp.bfloat16)
    xpad[0, 1:H + 1, 0:1, :] = jnp.zeros((H, 1, C), jnp.bfloat16)
    xpad[0, 1:H + 1, W + 1:W + 2, :] = jnp.zeros((H, 1, C), jnp.bfloat16)
    xpad[0, 1:H + 1, 1:W + 1, :] = z.astype(jnp.bfloat16)      # single cast

    taps = [(dh, dw) for dh in range(3) for dw in range(3)]
    if use_im2col:
        # im2col: write each tap window straight into the preallocated bf16
        # patch at lane offset tap*C (multiple of 128 -> unmasked full-width
        # stores), then a single MXU matmul with K = 9*C (f32 accumulation).
        for t, (dh, dw) in enumerate(taps):
            patch[:, t * C:(t + 1) * C] = (
                xpad[0, dh:dh + H, dw:dw + W, :].reshape(H * W, C))
        acc = jnp.dot(patch[...], w_ref[...], preferred_element_type=jnp.float32)
    else:
        # v5e path: 128x128 MXU is already full at K=C=128, so skip the patch
        # build and accumulate nine per-tap matmuls directly from xpad.
        acc = jnp.zeros((H * W, P), jnp.float32)
        for t, (dh, dw) in enumerate(taps):
            win = xpad[0, dh:dh + H, dw:dw + W, :].reshape(H * W, C)
            acc = acc + jnp.dot(win, w_ref[t * C:(t + 1) * C, :],
                                preferred_element_type=jnp.float32)

    # Single-pass BN moments of the f32 accumulator for this image (reduced
    # across the batch grid in JAX afterwards).
    s = jnp.sum(acc, axis=0, keepdims=True)                    # (1, P)
    ss = jnp.sum(acc * acc, axis=0, keepdims=True)             # (1, P)
    stats_ref[0] = jnp.concatenate([s, ss], axis=0)            # (2, P)

    y_ref[0] = acc.reshape(H, W, P).astype(y_ref.dtype)        # bf16 store


def _conv3x3_stage(x, scale, shift, w_flat, *, fuse_bn_relu, use_im2col):
    B, H, W, C = x.shape
    KC, P = w_flat.shape
    assert KC == 9 * C

    scratch_shapes = [pltpu.VMEM((1, H + 2, W + 2, C), jnp.bfloat16)]
    if use_im2col:
        scratch_shapes.append(pltpu.VMEM((H * W, 9 * C), jnp.bfloat16))

    kernel = partial(_conv3x3_kernel, fuse_bn_relu=fuse_bn_relu,
                     use_im2col=use_im2col)
    y, stats = pl.pallas_call(
        kernel,
        grid=(B,),
        in_specs=[
            pl.BlockSpec((1, H, W, C), lambda b: (b, 0, 0, 0)),
            pl.BlockSpec((1, C), lambda b: (0, 0)),
            pl.BlockSpec((1, C), lambda b: (0, 0)),
            pl.BlockSpec((KC, P), lambda b: (0, 0)),
        ],
        out_specs=[
            pl.BlockSpec((1, H, W, P), lambda b: (b, 0, 0, 0)),
            pl.BlockSpec((1, 2, P), lambda b: (b, 0, 0)),
        ],
        out_shape=[
            jax.ShapeDtypeStruct((B, H, W, P), jnp.bfloat16),   # bf16 inter-stage
            jax.ShapeDtypeStruct((B, 2, P), jnp.float32),
        ],
        scratch_shapes=scratch_shapes,
        compiler_params=pltpu.CompilerParams(
            dimension_semantics=("parallel",),
            vmem_limit_bytes=32 * 1024 * 1024,
        ),
    )(x, scale, shift, w_flat)
    return y, stats


# --------------------------------------------------------------------------
# Stage C kernel: bn2 + identity residual + relu (pure elementwise)
# --------------------------------------------------------------------------
def _finalize_kernel(y2_ref, x_ref, scale_ref, shift_ref, out_ref):
    y = y2_ref[0].astype(jnp.float32) * scale_ref[...] + shift_ref[...]
    out_ref[0] = jnp.maximum(y + x_ref[0], 0.0).astype(out_ref.dtype)


def _finalize_stage(y2, x, scale, shift):
    B, H, W, P = y2.shape
    return pl.pallas_call(
        _finalize_kernel,
        grid=(B,),
        in_specs=[
            pl.BlockSpec((1, H, W, P), lambda b: (b, 0, 0, 0)),
            pl.BlockSpec((1, H, W, P), lambda b: (b, 0, 0, 0)),
            pl.BlockSpec((1, P), lambda b: (0, 0)),
            pl.BlockSpec((1, P), lambda b: (0, 0)),
        ],
        out_specs=pl.BlockSpec((1, H, W, P), lambda b: (b, 0, 0, 0)),
        out_shape=jax.ShapeDtypeStruct((B, H, W, P), jnp.float32),
        compiler_params=pltpu.CompilerParams(
            dimension_semantics=("parallel",),
            vmem_limit_bytes=32 * 1024 * 1024,
        ),
    )(y2, x, scale, shift)


# --------------------------------------------------------------------------
# Tiny JAX glue: fold batch moments + (gamma, beta) into scale/shift
# --------------------------------------------------------------------------
def _bn_scale_shift(stats, gamma, beta, count):
    s = jnp.sum(stats[:, 0, :], axis=0)                 # (C,)
    ss = jnp.sum(stats[:, 1, :], axis=0)                # (C,)
    mean = s / count
    var = jnp.maximum(ss / count - mean * mean, 0.0)    # biased variance (training-mode BN)
    scale = gamma.reshape(-1) * jax.lax.rsqrt(var + EPS)
    shift = beta.reshape(-1) - mean * scale
    return scale.reshape(1, -1), shift.reshape(1, -1)


def basic_block_forward(x_nchw, params):
    """x_nchw: (B, C, H, W) f32.  Returns (B, C, H, W). stride=1 / no downsample."""
    # TODO(synk): NCHW<->NHWC transposes stay at the PyTorch boundary; a full
    # network would keep activations NHWC (channels-on-lanes) end to end.
    x = jnp.transpose(x_nchw, (0, 2, 3, 1)).astype(jnp.float32)   # NHWC
    B, H, W, C = x.shape
    P = params["w1"].shape[-1]
    assert C == P, "identity shortcut requires inplanes == planes"
    use_im2col = not _is_v5e()

    # HWIO (3,3,Cin,P) -> (9*Cin, P), bf16 for the MXU.
    w1f = params["w1"].reshape(9 * C, P).astype(jnp.bfloat16)
    w2f = params["w2"].reshape(9 * P, P).astype(jnp.bfloat16)
    ones = jnp.ones((1, C), jnp.float32)    # placeholders: conv1 fuses no input affine
    zeros = jnp.zeros((1, C), jnp.float32)
    n = B * H * W

    # stage A: conv1 (+ per-image BN moments)
    y1, s1 = _conv3x3_stage(x, ones, zeros, w1f,
                            fuse_bn_relu=False, use_im2col=use_im2col)
    scale1, shift1 = _bn_scale_shift(s1, params["g1"], params["b1"], n)

    # stage B: bn1 + relu fused on input, then conv2 (+ per-image BN moments)
    y2, s2 = _conv3x3_stage(y1, scale1, shift1, w2f,
                            fuse_bn_relu=True, use_im2col=use_im2col)
    scale2, shift2 = _bn_scale_shift(s2, params["g2"], params["b2"], n)

    # stage C: bn2 + identity residual + relu
    out = _finalize_stage(y2, x, scale2, shift2)
    return jnp.transpose(out, (0, 3, 1, 2))                      # back to NCHW


# --------------------------------------------------------------------------
# Pure-JAX reference (training-mode BN; bf16 conv operands like the kernel)
# --------------------------------------------------------------------------
def ref_forward(x_nchw, params):
    x = jnp.transpose(x_nchw, (0, 2, 3, 1))

    def conv(inp, w):
        return jax.lax.conv_general_dilated(
            inp.astype(jnp.bfloat16), w.astype(jnp.bfloat16), (1, 1), "SAME",
            dimension_numbers=("NHWC", "HWIO", "NHWC"),
            preferred_element_type=jnp.float32)

    def bn(inp, g, b):
        m = jnp.mean(inp, axis=(0, 1, 2))
        v = jnp.mean((inp - m) ** 2, axis=(0, 1, 2))
        return (inp - m) * jax.lax.rsqrt(v + EPS) * g + b

    y = jax.nn.relu(bn(conv(x, params["w1"]), params["g1"][0], params["b1"][0]))
    y = bn(conv(y, params["w2"]), params["g2"][0], params["b2"][0])
    out = jax.nn.relu(y + x)
    return jnp.transpose(out, (0, 3, 1, 2))


if __name__ == "__main__":
    key = jax.random.PRNGKey(0)
    B, C, H, W = 2, 128, 16, 16          # inplanes == planes == 128, stride == 1
    k_x, k_w1, k_w2, k_g1, k_b1, k_g2, k_b2 = jax.random.split(key, 7)

    x = jax.random.normal(k_x, (B, C, H, W), jnp.float32)

    # conv weights in HWIO layout (3, 3, in, out); deterministic init.
    w_scale = 1.0 / (3 * 3 * C) ** 0.5
    params = {
        "w1": w_scale * jax.random.normal(k_w1, (3, 3, C, C), jnp.float32),
        "w2": w_scale * jax.random.normal(k_w2, (3, 3, C, C), jnp.float32),
        "g1": 1.0 + 0.1 * jax.random.normal(k_g1, (1, C), jnp.float32),
        "b1": 0.1 * jax.random.normal(k_b1, (1, C), jnp.float32),
        "g2": 1.0 + 0.1 * jax.random.normal(k_g2, (1, C), jnp.float32),
        "b2": 0.1 * jax.random.normal(k_b2, (1, C), jnp.float32),
    }

    fwd = jax.jit(basic_block_forward)
    out = jax.block_until_ready(fwd(x, params))
    ref = jax.block_until_ready(ref_forward(x, params))

    assert out.shape == (B, C, H, W)
    max_err = float(jnp.max(jnp.abs(out - ref)))
    # bf16 conv operands + bf16 inter-stage storage => loose tolerance vs f32 ref.
    assert jnp.allclose(out, ref, atol=2e-2, rtol=2e-2), (
        "mismatch vs JAX reference, max abs err = %g" % max_err)

    print("KERNEL_OK")
</pallas_src>

<mosaic_0001>
module attributes {stable_mosaic.version = 11 : i64} {
  func.func @_conv3x3_kernel(%arg0: i32, %arg1: memref<1x16x16x128xf32, #tpu.memory_space<vmem>>, %arg2: memref<1x128xf32, #tpu.memory_space<vmem>>, %arg3: memref<1x128xf32, #tpu.memory_space<vmem>>, %arg4: memref<1152x128xbf16, #tpu.memory_space<vmem>>, %arg5: memref<1x16x16x128xbf16, #tpu.memory_space<vmem>>, %arg6: memref<1x2x128xf32, #tpu.memory_space<vmem>>, %arg7: memref<1x18x18x128xbf16, #tpu.memory_space<vmem>>, %arg8: memref<256x1152xbf16, #tpu.memory_space<vmem>>) attributes {dimension_semantics = [#tpu.dimension_semantics<parallel>], iteration_bounds = array<i64: 2>, scalar_prefetch = 0 : i64, scratch_operands = 2 : i64, tpu.core_type = #tpu.core_type<tc>, window_params = [{transform_indices = @transform_0, window_bounds = array<i64: 1, 16, 16, 128>}, {pipeline_mode = #tpu.pipeline_mode<synchronous>, transform_indices = @transform_1, window_bounds = array<i64: 1, 128>}, {pipeline_mode = #tpu.pipeline_mode<synchronous>, transform_indices = @transform_2, window_bounds = array<i64: 1, 128>}, {pipeline_mode = #tpu.pipeline_mode<synchronous>, transform_indices = @transform_3, window_bounds = array<i64: 1152, 128>}, {transform_indices = @transform_4, window_bounds = array<i64: 1, 16, 16, 128>}, {transform_indices = @transform_5, window_bounds = array<i64: 1, 2, 128>}]} {
    %c0 = arith.constant 0 : index
    %c0_0 = arith.constant 0 : index
    %c0_1 = arith.constant 0 : index
    %c0_2 = arith.constant 0 : index
    %0 = vector.load %arg1[%c0, %c0_0, %c0_1, %c0_2] : memref<1x16x16x128xf32, #tpu.memory_space<vmem>>, vector<1x16x16x128xf32>
    %1 = vector.shape_cast %0 : vector<1x16x16x128xf32> to vector<16x16x128xf32>
    %cst = arith.constant 0.000000e+00 : bf16
    %2 = vector.broadcast %cst : bf16 to vector<1x18x128xbf16>
    %c0_3 = arith.constant 0 : index
    %c0_4 = arith.constant 0 : index
    %c0_5 = arith.constant 0 : index
    %c0_6 = arith.constant 0 : index
    %3 = vector.load %arg7[%c0_3, %c0_4, %c0_5, %c0_6] : memref<1x18x18x128xbf16, #tpu.memory_space<vmem>>, vector<1x1x18x128xbf16>
    %4 = vector.shape_cast %3 : vector<1x1x18x128xbf16> to vector<1x18x128xbf16>
    %5 = vector.shape_cast %2 : vector<1x18x128xbf16> to vector<1x1x18x128xbf16>
    tpu.vector_store %arg7[%c0_3, %c0_4, %c0_5, %c0_6], %5 {strides = array<i32>} : memref<1x18x18x128xbf16, #tpu.memory_space<vmem>>, vector<1x1x18x128xbf16>,
    %cst_7 = arith.constant 0.000000e+00 : bf16
    %6 = vector.broadcast %cst_7 : bf16 to vector<1x18x128xbf16>
    %c0_8 = arith.constant 0 : index
    %c17 = arith.constant 17 : index
    %c0_9 = arith.constant 0 : index
    %c0_10 = arith.constant 0 : index
    %7 = vector.load %arg7[%c0_8, %c17, %c0_9, %c0_10] : memref<1x18x18x128xbf16, #tpu.memory_space<vmem>>, vector<1x1x18x128xbf16>
    %8 = vector.shape_cast %7 : vector<1x1x18x128xbf16> to vector<1x18x128xbf16>
    %9 = vector.shape_cast %6 : vector<1x18x128xbf16> to vector<1x1x18x128xbf16>
    tpu.vector_store %arg7[%c0_8, %c17, %c0_9, %c0_10], %9 {strides = array<i32>} : memref<1x18x18x128xbf16, #tpu.memory_space<vmem>>, vector<1x1x18x128xbf16>,
    %cst_11 = arith.constant 0.000000e+00 : bf16
    %10 = vector.broadcast %cst_11 : bf16 to vector<16x1x128xbf16>
    %c0_12 = arith.constant 0 : index
    %c1 = arith.constant 1 : index
    %c0_13 = arith.constant 0 : index
    %c0_14 = arith.constant 0 : index
    %11 = vector.load %arg7[%c0_12, %c1, %c0_13, %c0_14] : memref<1x18x18x128xbf16, #tpu.memory_space<vmem>>, vector<1x16x1x128xbf16>
    %12 = vector.shape_cast %11 : vector<1x16x1x128xbf16> to vector<16x1x128xbf16>
    %13 = vector.shape_cast %10 : vector<16x1x128xbf16> to vector<1x16x1x128xbf16>
    tpu.vector_store %arg7[%c0_12, %c1, %c0_13, %c0_14], %13 {strides = array<i32>} : memref<1x18x18x128xbf16, #tpu.memory_space<vmem>>, vector<1x16x1x128xbf16>,
    %cst_15 = arith.constant 0.000000e+00 : bf16
    %14 = vector.broadcast %cst_15 : bf16 to vector<16x1x128xbf16>
    %c0_16 = arith.constant 0 : index
    %c1_17 = arith.constant 1 : index
    %c17_18 = arith.constant 17 : index
    %c0_19 = arith.constant 0 : index
    %15 = vector.load %arg7[%c0_16, %c1_17, %c17_18, %c0_19] : memref<1x18x18x128xbf16, #tpu.memory_space<vmem>>, vector<1x16x1x128xbf16>
    %16 = vector.shape_cast %15 : vector<1x16x1x128xbf16> to vector<16x1x128xbf16>
    %17 = vector.shape_cast %14 : vector<16x1x128xbf16> to vector<1x16x1x128xbf16>
    tpu.vector_store %arg7[%c0_16, %c1_17, %c17_18, %c0_19], %17 {strides = array<i32>} : memref<1x18x18x128xbf16, #tpu.memory_space<vmem>>, vector<1x16x1x128xbf16>,
    %18 = arith.truncf %1 : vector<16x16x128xf32> to vector<16x16x128xbf16>
    %c0_20 = arith.constant 0 : index
    %c1_21 = arith.constant 1 : index
    %c1_22 = arith.constant 1 : index
    %c0_23 = arith.constant 0 : index
    %19 = vector.load %arg7[%c0_20, %c1_21, %c1_22, %c0_23] : memref<1x18x18x128xbf16, #tpu.memory_space<vmem>>, vector<1x16x16x128xbf16>
    %20 = vector.shape_cast %19 : vector<1x16x16x128xbf16> to vector<16x16x128xbf16>
    %21 = vector.shape_cast %18 : vector<16x16x128xbf16> to vector<1x16x16x128xbf16>
    tpu.vector_store %arg7[%c0_20, %c1_21, %c1_22, %c0_23], %21 {strides = array<i32>} : memref<1x18x18x128xbf16, #tpu.memory_space<vmem>>, vector<1x16x16x128xbf16>,
    %c0_24 = arith.constant 0 : index
    %c0_25 = arith.constant 0 : index
    %c0_26 = arith.constant 0 : index
    %c0_27 = arith.constant 0 : index
    %22 = vector.load %arg7[%c0_24, %c0_25, %c0_26, %c0_27] : memref<1x18x18x128xbf16, #tpu.memory_space<vmem>>, vector<1x16x16x128xbf16>
    %23 = vector.shape_cast %22 : vector<1x16x16x128xbf16> to vector<16x16x128xbf16>
    %24 = vector.shape_cast %23 : vector<16x16x128xbf16> to vector<256x128xbf16>
    %c0_28 = arith.constant 0 : index
    %c0_29 = arith.constant 0 : index
    %25 = vector.load %arg8[%c0_28, %c0_29] : memref<256x1152xbf16, #tpu.memory_space<vmem>>, vector<256x128xbf16>
    tpu.vector_store %arg8[%c0_28, %c0_29], %24 {strides = array<i32>} : memref<256x1152xbf16, #tpu.memory_space<vmem>>, vector<256x128xbf16>,
    %c0_30 = arith.constant 0 : index
    %c0_31 = arith.constant 0 : index
    %c1_32 = arith.constant 1 : index
    %c0_33 = arith.constant 0 : index
    %26 = vector.load %arg7[%c0_30, %c0_31, %c1_32, %c0_33] : memref<1x18x18x128xbf16, #tpu.memory_space<vmem>>, vector<1x16x16x128xbf16>
    %27 = vector.shape_cast %26 : vector<1x16x16x128xbf16> to vector<16x16x128xbf16>
    %28 = vector.shape_cast %27 : vector<16x16x128xbf16> to vector<256x128xbf16>
    %c0_34 = arith.constant 0 : index
    %c128 = arith.constant 128 : index
    %29 = vector.load %arg8[%c0_34, %c128] : memref<256x1152xbf16, #tpu.memory_space<vmem>>, vector<256x128xbf16>
    tpu.vector_store %arg8[%c0_34, %c128], %28 {strides = array<i32>} : memref<256x1152xbf16, #tpu.memory_space<vmem>>, vector<256x128xbf16>,
    %c0_35 = arith.constant 0 : index
    %c0_36 = arith.constant 0 : index
    %c2 = arith.constant 2 : index
    %c0_37 = arith.constant 0 : index
    %30 = vector.load %arg7[%c0_35, %c0_36, %c2, %c0_37] : memref<1x18x18x128xbf16, #tpu.memory_space<vmem>>, vector<1x16x16x128xbf16>
    %31 = vector.shape_cast %30 : vector<1x16x16x128xbf16> to vector<16x16x128xbf16>
    %32 = vector.shape_cast %31 : vector<16x16x128xbf16> to vector<256x128xbf16>
    %c0_38 = arith.constant 0 : index
    %c256 = arith.constant 256 : index
    %33 = vector.load %arg8[%c0_38, %c256] : memref<256x1152xbf16, #tpu.memory_space<vmem>>, vector<256x128xbf16>
    tpu.vector_store %arg8[%c0_38, %c256], %32 {strides = array<i32>} : memref<256x1152xbf16, #tpu.memory_space<vmem>>, vector<256x128xbf16>,
    %c0_39 = arith.constant 0 : index
    %c1_40 = arith.constant 1 : index
    %c0_41 = arith.constant 0 : index
    %c0_42 = arith.constant 0 : index
    %34 = vector.load %arg7[%c0_39, %c1_40, %c0_41, %c0_42] : memref<1x18x18x128xbf16, #tpu.memory_space<vmem>>, vector<1x16x16x128xbf16>
    %35 = vector.shape_cast %34 : vector<1x16x16x128xbf16> to vector<16x16x128xbf16>
    %36 = vector.shape_cast %35 : vector<16x16x128xbf16> to vector<256x128xbf16>
    %c0_43 = arith.constant 0 : index
    %c384 = arith.constant 384 : index
    %37 = vector.load %arg8[%c0_43, %c384] : memref<256x1152xbf16, #tpu.memory_space<vmem>>, vector<256x128xbf16>
    tpu.vector_store %arg8[%c0_43, %c384], %36 {strides = array<i32>} : memref<256x1152xbf16, #tpu.memory_space<vmem>>, vector<256x128xbf16>,
    %c0_44 = arith.constant 0 : index
    %c1_45 = arith.constant 1 : index
    %c1_46 = arith.constant 1 : index
    %c0_47 = arith.constant 0 : index
    %38 = vector.load %arg7[%c0_44, %c1_45, %c1_46, %c0_47] : memref<1x18x18x128xbf16, #tpu.memory_space<vmem>>, vector<1x16x16x128xbf16>
    %39 = vector.shape_cast %38 : vector<1x16x16x128xbf16> to vector<16x16x128xbf16>
    %40 = vector.shape_cast %39 : vector<16x16x128xbf16> to vector<256x128xbf16>
    %c0_48 = arith.constant 0 : index
    %c512 = arith.constant 512 : index
    %41 = vector.load %arg8[%c0_48, %c512] : memref<256x1152xbf16, #tpu.memory_space<vmem>>, vector<256x128xbf16>
    tpu.vector_store %arg8[%c0_48, %c512], %40 {strides = array<i32>} : memref<256x1152xbf16, #tpu.memory_space<vmem>>, vector<256x128xbf16>,
    %c0_49 = arith.constant 0 : index
    %c1_50 = arith.constant 1 : index
    %c2_51 = arith.constant 2 : index
    %c0_52 = arith.constant 0 : index
    %42 = vector.load %arg7[%c0_49, %c1_50, %c2_51, %c0_52] : memref<1x18x18x128xbf16, #tpu.memory_space<vmem>>, vector<1x16x16x128xbf16>
    %43 = vector.shape_cast %42 : vector<1x16x16x128xbf16> to vector<16x16x128xbf16>
    %44 = vector.shape_cast %43 : vector<16x16x128xbf16> to vector<256x128xbf16>
    %c0_53 = arith.constant 0 : index
    %c640 = arith.constant 640 : index
    %45 = vector.load %arg8[%c0_53, %c640] : memref<256x1152xbf16, #tpu.memory_space<vmem>>, vector<256x128xbf16>
    tpu.vector_store %arg8[%c0_53, %c640], %44 {strides = array<i32>} : memref<256x1152xbf16, #tpu.memory_space<vmem>>, vector<256x128xbf16>,
    %c0_54 = arith.constant 0 : index
    %c2_55 = arith.constant 2 : index
    %c0_56 = arith.constant 0 : index
    %c0_57 = arith.constant 0 : index
    %46 = vector.load %arg7[%c0_54, %c2_55, %c0_56, %c0_57] : memref<1x18x18x128xbf16, #tpu.memory_space<vmem>>, vector<1x16x16x128xbf16>
    %47 = vector.shape_cast %46 : vector<1x16x16x128xbf16> to vector<16x16x128xbf16>
    %48 = vector.shape_cast %47 : vector<16x16x128xbf16> to vector<256x128xbf16>
    %c0_58 = arith.constant 0 : index
    %c768 = arith.constant 768 : index
    %49 = vector.load %arg8[%c0_58, %c768] : memref<256x1152xbf16, #tpu.memory_space<vmem>>, vector<256x128xbf16>
    tpu.vector_store %arg8[%c0_58, %c768], %48 {strides = array<i32>} : memref<256x1152xbf16, #tpu.memory_space<vmem>>, vector<256x128xbf16>,
    %c0_59 = arith.constant 0 : index
    %c2_60 = arith.constant 2 : index
    %c1_61 = arith.constant 1 : index
    %c0_62 = arith.constant 0 : index
    %50 = vector.load %arg7[%c0_59, %c2_60, %c1_61, %c0_62] : memref<1x18x18x128xbf16, #tpu.memory_space<vmem>>, vector<1x16x16x128xbf16>
    %51 = vector.shape_cast %50 : vector<1x16x16x128xbf16> to vector<16x16x128xbf16>
    %52 = vector.shape_cast %51 : vector<16x16x128xbf16> to vector<256x128xbf16>
    %c0_63 = arith.constant 0 : index
    %c896 = arith.constant 896 : index
    %53 = vector.load %arg8[%c0_63, %c896] : memref<256x1152xbf16, #tpu.memory_space<vmem>>, vector<256x128xbf16>
    tpu.vector_store %arg8[%c0_63, %c896], %52 {strides = array<i32>} : memref<256x1152xbf16, #tpu.memory_space<vmem>>, vector<256x128xbf16>,
    %c0_64 = arith.constant 0 : index
    %c2_65 = arith.constant 2 : index
    %c2_66 = arith.constant 2 : index
    %c0_67 = arith.constant 0 : index
    %54 = vector.load %arg7[%c0_64, %c2_65, %c2_66, %c0_67] : memref<1x18x18x128xbf16, #tpu.memory_space<vmem>>, vector<1x16x16x128xbf16>
    %55 = vector.shape_cast %54 : vector<1x16x16x128xbf16> to vector<16x16x128xbf16>
    %56 = vector.shape_cast %55 : vector<16x16x128xbf16> to vector<256x128xbf16>
    %c0_68 = arith.constant 0 : index
    %c1024 = arith.constant 1024 : index
    %57 = vector.load %arg8[%c0_68, %c1024] : memref<256x1152xbf16, #tpu.memory_space<vmem>>, vector<256x128xbf16>
    tpu.vector_store %arg8[%c0_68, %c1024], %56 {strides = array<i32>} : memref<256x1152xbf16, #tpu.memory_space<vmem>>, vector<256x128xbf16>,
    %c0_69 = arith.constant 0 : index
    %c0_70 = arith.constant 0 : index
    %58 = vector.load %arg8[%c0_69, %c0_70] : memref<256x1152xbf16, #tpu.memory_space<vmem>>, vector<256x1152xbf16>
    %c0_71 = arith.constant 0 : index
    %c0_72 = arith.constant 0 : index
    %59 = vector.load %arg4[%c0_71, %c0_72] : memref<1152x128xbf16, #tpu.memory_space<vmem>>, vector<1152x128xbf16>
    %cst_73 = arith.constant dense<0.000000e+00> : vector<256x128xf32>
    %60 = tpu.matmul %58, %59, %cst_73 {dimension_numbers = #tpu.dot_dimension_numbers<[1], [0], [0], [1], [0, 0, 1, 1], [], []>} : vector<256x1152xbf16>, vector<1152x128xbf16>, vector<256x128xf32> -> vector<256x128xf32>
    %cst_74 = arith.constant dense<0.000000e+00> : vector<128xf32>
    %61 = vector.multi_reduction <add>, %60, %cst_74 [0] : vector<256x128xf32> to vector<128xf32>
    %62 = vector.shape_cast %61 : vector<128xf32> to vector<1x128xf32>
    %63 = arith.mulf %60, %60 : vector<256x128xf32>
    %cst_75 = arith.constant dense<0.000000e+00> : vector<128xf32>
    %64 = vector.multi_reduction <add>, %63, %cst_75 [0] : vector<256x128xf32> to vector<128xf32>
    %65 = vector.shape_cast %64 : vector<128xf32> to vector<1x128xf32>
    %66 = tpu.concatenate %62, %65 in 0 : vector<1x128xf32>, vector<1x128xf32> -> vector<2x128xf32>
    %c0_76 = arith.constant 0 : index
    %c0_77 = arith.constant 0 : index
    %c0_78 = arith.constant 0 : index
    %67 = vector.load %arg6[%c0_76, %c0_77, %c0_78] : memref<1x2x128xf32, #tpu.memory_space<vmem>>, vector<1x2x128xf32>
    %68 = vector.shape_cast %67 : vector<1x2x128xf32> to vector<2x128xf32>
    %69 = vector.shape_cast %66 : vector<2x128xf32> to vector<1x2x128xf32>
    tpu.vector_store %arg6[%c0_76, %c0_77, %c0_78], %69 {strides = array<i32>} : memref<1x2x128xf32, #tpu.memory_space<vmem>>, vector<1x2x128xf32>,
    %70 = vector.shape_cast %60 : vector<256x128xf32> to vector<16x16x128xf32>
    %71 = arith.truncf %70 : vector<16x16x128xf32> to vector<16x16x128xbf16>
    %c0_79 = arith.constant 0 : index
    %c0_80 = arith.constant 0 : index
    %c0_81 = arith.constant 0 : index
    %c0_82 = arith.constant 0 : index
    %72 = vector.load %arg5[%c0_79, %c0_80, %c0_81, %c0_82] : memref<1x16x16x128xbf16, #tpu.memory_space<vmem>>, vector<1x16x16x128xbf16>
    %73 = vector.shape_cast %72 : vector<1x16x16x128xbf16> to vector<16x16x128xbf16>
    %74 = vector.shape_cast %71 : vector<16x16x128xbf16> to vector<1x16x16x128xbf16>
    tpu.vector_store %arg5[%c0_79, %c0_80, %c0_81, %c0_82], %74 {strides = array<i32>} : memref<1x16x16x128xbf16, #tpu.memory_space<vmem>>, vector<1x16x16x128xbf16>,
    return
  }
  func.func @transform_0(%arg0: i32) -> (i32, i32, i32, i32) {
    %c0_i32 = arith.constant 0 : i32
    %c0_i32_0 = arith.constant 0 : i32
    %c0_i32_1 = arith.constant 0 : i32
    %c0_i32_2 = arith.constant 0 : i32
    return %arg0, %c0_i32, %c0_i32_0, %c0_i32_1 : i32, i32, i32, i32
  }
  func.func @transform_1(%arg0: i32) -> (i32, i32) {
    %c0_i32 = arith.constant 0 : i32
    %c0_i32_0 = arith.constant 0 : i32
    %c0_i32_1 = arith.constant 0 : i32
    return %c0_i32, %c0_i32_0 : i32, i32
  }
  func.func @transform_2(%arg0: i32) -> (i32, i32) {
    %c0_i32 = arith.constant 0 : i32
    %c0_i32_0 = arith.constant 0 : i32
    %c0_i32_1 = arith.constant 0 : i32
    return %c0_i32, %c0_i32_0 : i32, i32
  }
  func.func @transform_3(%arg0: i32) -> (i32, i32) {
    %c0_i32 = arith.constant 0 : i32
    %c0_i32_0 = arith.constant 0 : i32
    %c0_i32_1 = arith.constant 0 : i32
    return %c0_i32, %c0_i32_0 : i32, i32
  }
  func.func @transform_4(%arg0: i32) -> (i32, i32, i32, i32) {
    %c0_i32 = arith.constant 0 : i32
    %c0_i32_0 = arith.constant 0 : i32
    %c0_i32_1 = arith.constant 0 : i32
    %c0_i32_2 = arith.constant 0 : i32
    return %arg0, %c0_i32, %c0_i32_0, %c0_i32_1 : i32, i32, i32, i32
  }
  func.func @transform_5(%arg0: i32) -> (i32, i32, i32) {
    %c0_i32 = arith.constant 0 : i32
    %c0_i32_0 = arith.constant 0 : i32
    %c0_i32_1 = arith.constant 0 : i32
    return %arg0, %c0_i32, %c0_i32_0 : i32, i32, i32
  }
}

module attributes {stable_mosaic.version = 11 : i64} {
  func.func @_finalize_kernel(%arg0: i32, %arg1: memref<1x16x16x128xbf16, #tpu.memory_space<vmem>>, %arg2: memref<1x16x16x128xf32, #tpu.memory_space<vmem>>, %arg3: memref<1x128xf32, #tpu.memory_space<vmem>>, %arg4: memref<1x128xf32, #tpu.memory_space<vmem>>, %arg5: memref<1x16x16x128xf32, #tpu.memory_space<vmem>>) attributes {dimension_semantics = [#tpu.dimension_semantics<parallel>], iteration_bounds = array<i64: 2>, scalar_prefetch = 0 : i64, scratch_operands = 0 : i64, tpu.core_type = #tpu.core_type<tc>, window_params = [{transform_indices = @transform_0, window_bounds = array<i64: 1, 16, 16, 128>}, {transform_indices = @transform_1, window_bounds = array<i64: 1, 16, 16, 128>}, {pipeline_mode = #tpu.pipeline_mode<synchronous>, transform_indices = @transform_2, window_bounds = array<i64: 1, 128>}, {pipeline_mode = #tpu.pipeline_mode<synchronous>, transform_indices = @transform_3, window_bounds = array<i64: 1, 128>}, {transform_indices = @transform_4, window_bounds = array<i64: 1, 16, 16, 128>}]} {
    %c0 = arith.constant 0 : index
    %c0_0 = arith.constant 0 : index
    %c0_1 = arith.constant 0 : index
    %c0_2 = arith.constant 0 : index
    %0 = vector.load %arg1[%c0, %c0_0, %c0_1, %c0_2] : memref<1x16x16x128xbf16, #tpu.memory_space<vmem>>, vector<1x16x16x128xbf16>
    %1 = vector.shape_cast %0 : vector<1x16x16x128xbf16> to vector<16x16x128xbf16>
    %2 = arith.extf %1 : vector<16x16x128xbf16> to vector<16x16x128xf32>
    %c0_3 = arith.constant 0 : index
    %c0_4 = arith.constant 0 : index
    %3 = vector.load %arg3[%c0_3, %c0_4] : memref<1x128xf32, #tpu.memory_space<vmem>>, vector<1x128xf32>
    %4 = vector.shape_cast %3 : vector<1x128xf32> to vector<1x1x128xf32>
    %5 = vector.broadcast %4 : vector<1x1x128xf32> to vector<16x16x128xf32>
    %6 = arith.mulf %2, %5 : vector<16x16x128xf32>
    %c0_5 = arith.constant 0 : index
    %c0_6 = arith.constant 0 : index
    %7 = vector.load %arg4[%c0_5, %c0_6] : memref<1x128xf32, #tpu.memory_space<vmem>>, vector<1x128xf32>
    %8 = vector.shape_cast %7 : vector<1x128xf32> to vector<1x1x128xf32>
    %9 = vector.broadcast %8 : vector<1x1x128xf32> to vector<16x16x128xf32>
    %10 = arith.addf %6, %9 : vector<16x16x128xf32>
    %c0_7 = arith.constant 0 : index
    %c0_8 = arith.constant 0 : index
    %c0_9 = arith.constant 0 : index
    %c0_10 = arith.constant 0 : index
    %11 = vector.load %arg2[%c0_7, %c0_8, %c0_9, %c0_10] : memref<1x16x16x128xf32, #tpu.memory_space<vmem>>, vector<1x16x16x128xf32>
    %12 = vector.shape_cast %11 : vector<1x16x16x128xf32> to vector<16x16x128xf32>
    %13 = arith.addf %10, %12 : vector<16x16x128xf32>
    %cst = arith.constant 0.000000e+00 : f32
    %14 = vector.broadcast %cst : f32 to vector<16x16x128xf32>
    %15 = arith.maximumf %13, %14 : vector<16x16x128xf32>
    %c0_11 = arith.constant 0 : index
    %c0_12 = arith.constant 0 : index
    %c0_13 = arith.constant 0 : index
    %c0_14 = arith.constant 0 : index
    %16 = vector.load %arg5[%c0_11, %c0_12, %c0_13, %c0_14] : memref<1x16x16x128xf32, #tpu.memory_space<vmem>>, vector<1x16x16x128xf32>
    %17 = vector.shape_cast %16 : vector<1x16x16x128xf32> to vector<16x16x128xf32>
    %18 = vector.shape_cast %15 : vector<16x16x128xf32> to vector<1x16x16x128xf32>
    tpu.vector_store %arg5[%c0_11, %c0_12, %c0_13, %c0_14], %18 {strides = array<i32>} : memref<1x16x16x128xf32, #tpu.memory_space<vmem>>, vector<1x16x16x128xf32>,
    return
  }
  func.func @transform_0(%arg0: i32) -> (i32, i32, i32, i32) {
    %c0_i32 = arith.constant 0 : i32
    %c0_i32_0 = arith.constant 0 : i32
    %c0_i32_1 = arith.constant 0 : i32
    %c0_i32_2 = arith.constant 0 : i32
    return %arg0, %c0_i32, %c0_i32_0, %c0_i32_1 : i32, i32, i32, i32
  }
  func.func @transform_1(%arg0: i32) -> (i32, i32, i32, i32) {
    %c0_i32 = arith.constant 0 : i32
    %c0_i32_0 = arith.constant 0 : i32
    %c0_i32_1 = arith.constant 0 : i32
    %c0_i32_2 = arith.constant 0 : i32
    return %arg0, %c0_i32, %c0_i32_0, %c0_i32_1 : i32, i32, i32, i32
  }
  func.func @transform_2(%arg0: i32) -> (i32, i32) {
    %c0_i32 = arith.constant 0 : i32
    %c0_i32_0 = arith.constant 0 : i32
    %c0_i32_1 = arith.constant 0 : i32
    return %c0_i32, %c0_i32_0 : i32, i32
  }
  func.func @transform_3(%arg0: i32) -> (i32, i32) {
    %c0_i32 = arith.constant 0 : i32
    %c0_i32_0 = arith.constant 0 : i32
    %c0_i32_1 = arith.constant 0 : i32
    return %c0_i32, %c0_i32_0 : i32, i32
  }
  func.func @transform_4(%arg0: i32) -> (i32, i32, i32, i32) {
    %c0_i32 = arith.constant 0 : i32
    %c0_i32_0 = arith.constant 0 : i32
    %c0_i32_1 = arith.constant 0 : i32
    %c0_i32_2 = arith.constant 0 : i32
    return %arg0, %c0_i32, %c0_i32_0, %c0_i32_1 : i32, i32, i32, i32
  }
}

module attributes {stable_mosaic.version = 11 : i64} {
  func.func @_conv3x3_kernel(%arg0: i32, %arg1: memref<1x16x16x128xbf16, #tpu.memory_space<vmem>>, %arg2: memref<1x128xf32, #tpu.memory_space<vmem>>, %arg3: memref<1x128xf32, #tpu.memory_space<vmem>>, %arg4: memref<1152x128xbf16, #tpu.memory_space<vmem>>, %arg5: memref<1x16x16x128xbf16, #tpu.memory_space<vmem>>, %arg6: memref<1x2x128xf32, #tpu.memory_space<vmem>>, %arg7: memref<1x18x18x128xbf16, #tpu.memory_space<vmem>>, %arg8: memref<256x1152xbf16, #tpu.memory_space<vmem>>) attributes {dimension_semantics = [#tpu.dimension_semantics<parallel>], iteration_bounds = array<i64: 2>, scalar_prefetch = 0 : i64, scratch_operands = 2 : i64, tpu.core_type = #tpu.core_type<tc>, window_params = [{transform_indices = @transform_0, window_bounds = array<i64: 1, 16, 16, 128>}, {pipeline_mode = #tpu.pipeline_mode<synchronous>, transform_indices = @transform_1, window_bounds = array<i64: 1, 128>}, {pipeline_mode = #tpu.pipeline_mode<synchronous>, transform_indices = @transform_2, window_bounds = array<i64: 1, 128>}, {pipeline_mode = #tpu.pipeline_mode<synchronous>, transform_indices = @transform_3, window_bounds = array<i64: 1152, 128>}, {transform_indices = @transform_4, window_bounds = array<i64: 1, 16, 16, 128>}, {transform_indices = @transform_5, window_bounds = array<i64: 1, 2, 128>}]} {
    %c0 = arith.constant 0 : index
    %c0_0 = arith.constant 0 : index
    %c0_1 = arith.constant 0 : index
    %c0_2 = arith.constant 0 : index
    %0 = vector.load %arg1[%c0, %c0_0, %c0_1, %c0_2] : memref<1x16x16x128xbf16, #tpu.memory_space<vmem>>, vector<1x16x16x128xbf16>
    %1 = vector.shape_cast %0 : vector<1x16x16x128xbf16> to vector<16x16x128xbf16>
    %2 = arith.extf %1 : vector<16x16x128xbf16> to vector<16x16x128xf32>
    %c0_3 = arith.constant 0 : index
    %c0_4 = arith.constant 0 : index
    %3 = vector.load %arg2[%c0_3, %c0_4] : memref<1x128xf32, #tpu.memory_space<vmem>>, vector<1x128xf32>
    %4 = vector.shape_cast %3 : vector<1x128xf32> to vector<1x1x128xf32>
    %5 = vector.broadcast %4 : vector<1x1x128xf32> to vector<16x16x128xf32>
    %6 = arith.mulf %2, %5 : vector<16x16x128xf32>
    %c0_5 = arith.constant 0 : index
    %c0_6 = arith.constant 0 : index
    %7 = vector.load %arg3[%c0_5, %c0_6] : memref<1x128xf32, #tpu.memory_space<vmem>>, vector<1x128xf32>
    %8 = vector.shape_cast %7 : vector<1x128xf32> to vector<1x1x128xf32>
    %9 = vector.broadcast %8 : vector<1x1x128xf32> to vector<16x16x128xf32>
    %10 = arith.addf %6, %9 : vector<16x16x128xf32>
    %cst = arith.constant 0.000000e+00 : f32
    %11 = vector.broadcast %cst : f32 to vector<16x16x128xf32>
    %12 = arith.maximumf %10, %11 : vector<16x16x128xf32>
    %cst_7 = arith.constant 0.000000e+00 : bf16
    %13 = vector.broadcast %cst_7 : bf16 to vector<1x18x128xbf16>
    %c0_8 = arith.constant 0 : index
    %c0_9 = arith.constant 0 : index
    %c0_10 = arith.constant 0 : index
    %c0_11 = arith.constant 0 : index
    %14 = vector.load %arg7[%c0_8, %c0_9, %c0_10, %c0_11] : memref<1x18x18x128xbf16, #tpu.memory_space<vmem>>, vector<1x1x18x128xbf16>
    %15 = vector.shape_cast %14 : vector<1x1x18x128xbf16> to vector<1x18x128xbf16>
    %16 = vector.shape_cast %13 : vector<1x18x128xbf16> to vector<1x1x18x128xbf16>
    tpu.vector_store %arg7[%c0_8, %c0_9, %c0_10, %c0_11], %16 {strides = array<i32>} : memref<1x18x18x128xbf16, #tpu.memory_space<vmem>>, vector<1x1x18x128xbf16>,
    %cst_12 = arith.constant 0.000000e+00 : bf16
    %17 = vector.broadcast %cst_12 : bf16 to vector<1x18x128xbf16>
    %c0_13 = arith.constant 0 : index
    %c17 = arith.constant 17 : index
    %c0_14 = arith.constant 0 : index
    %c0_15 = arith.constant 0 : index
    %18 = vector.load %arg7[%c0_13, %c17, %c0_14, %c0_15] : memref<1x18x18x128xbf16, #tpu.memory_space<vmem>>, vector<1x1x18x128xbf16>
    %19 = vector.shape_cast %18 : vector<1x1x18x128xbf16> to vector<1x18x128xbf16>
    %20 = vector.shape_cast %17 : vector<1x18x128xbf16> to vector<1x1x18x128xbf16>
    tpu.vector_store %arg7[%c0_13, %c17, %c0_14, %c0_15], %20 {strides = array<i32>} : memref<1x18x18x128xbf16, #tpu.memory_space<vmem>>, vector<1x1x18x128xbf16>,
    %cst_16 = arith.constant 0.000000e+00 : bf16
    %21 = vector.broadcast %cst_16 : bf16 to vector<16x1x128xbf16>
    %c0_17 = arith.constant 0 : index
    %c1 = arith.constant 1 : index
    %c0_18 = arith.constant 0 : index
    %c0_19 = arith.constant 0 : index
    %22 = vector.load %arg7[%c0_17, %c1, %c0_18, %c0_19] : memref<1x18x18x128xbf16, #tpu.memory_space<vmem>>, vector<1x16x1x128xbf16>
    %23 = vector.shape_cast %22 : vector<1x16x1x128xbf16> to vector<16x1x128xbf16>
    %24 = vector.shape_cast %21 : vector<16x1x128xbf16> to vector<1x16x1x128xbf16>
    tpu.vector_store %arg7[%c0_17, %c1, %c0_18, %c0_19], %24 {strides = array<i32>} : memref<1x18x18x128xbf16, #tpu.memory_space<vmem>>, vector<1x16x1x128xbf16>,
    %cst_20 = arith.constant 0.000000e+00 : bf16
    %25 = vector.broadcast %cst_20 : bf16 to vector<16x1x128xbf16>
    %c0_21 = arith.constant 0 : index
    %c1_22 = arith.constant 1 : index
    %c17_23 = arith.constant 17 : index
    %c0_24 = arith.constant 0 : index
    %26 = vector.load %arg7[%c0_21, %c1_22, %c17_23, %c0_24] : memref<1x18x18x128xbf16, #tpu.memory_space<vmem>>, vector<1x16x1x128xbf16>
    %27 = vector.shape_cast %26 : vector<1x16x1x128xbf16> to vector<16x1x128xbf16>
    %28 = vector.shape_cast %25 : vector<16x1x128xbf16> to vector<1x16x1x128xbf16>
    tpu.vector_store %arg7[%c0_21, %c1_22, %c17_23, %c0_24], %28 {strides = array<i32>} : memref<1x18x18x128xbf16, #tpu.memory_space<vmem>>, vector<1x16x1x128xbf16>,
    %29 = arith.truncf %12 : vector<16x16x128xf32> to vector<16x16x128xbf16>
    %c0_25 = arith.constant 0 : index
    %c1_26 = arith.constant 1 : index
    %c1_27 = arith.constant 1 : index
    %c0_28 = arith.constant 0 : index
    %30 = vector.load %arg7[%c0_25, %c1_26, %c1_27, %c0_28] : memref<1x18x18x128xbf16, #tpu.memory_space<vmem>>, vector<1x16x16x128xbf16>
    %31 = vector.shape_cast %30 : vector<1x16x16x128xbf16> to vector<16x16x128xbf16>
    %32 = vector.shape_cast %29 : vector<16x16x128xbf16> to vector<1x16x16x128xbf16>
    tpu.vector_store %arg7[%c0_25, %c1_26, %c1_27, %c0_28], %32 {strides = array<i32>} : memref<1x18x18x128xbf16, #tpu.memory_space<vmem>>, vector<1x16x16x128xbf16>,
    %c0_29 = arith.constant 0 : index
    %c0_30 = arith.constant 0 : index
    %c0_31 = arith.constant 0 : index
    %c0_32 = arith.constant 0 : index
    %33 = vector.load %arg7[%c0_29, %c0_30, %c0_31, %c0_32] : memref<1x18x18x128xbf16, #tpu.memory_space<vmem>>, vector<1x16x16x128xbf16>
    %34 = vector.shape_cast %33 : vector<1x16x16x128xbf16> to vector<16x16x128xbf16>
    %35 = vector.shape_cast %34 : vector<16x16x128xbf16> to vector<256x128xbf16>
    %c0_33 = arith.constant 0 : index
    %c0_34 = arith.constant 0 : index
    %36 = vector.load %arg8[%c0_33, %c0_34] : memref<256x1152xbf16, #tpu.memory_space<vmem>>, vector<256x128xbf16>
    tpu.vector_store %arg8[%c0_33, %c0_34], %35 {strides = array<i32>} : memref<256x1152xbf16, #tpu.memory_space<vmem>>, vector<256x128xbf16>,
    %c0_35 = arith.constant 0 : index
    %c0_36 = arith.constant 0 : index
    %c1_37 = arith.constant 1 : index
    %c0_38 = arith.constant 0 : index
    %37 = vector.load %arg7[%c0_35, %c0_36, %c1_37, %c0_38] : memref<1x18x18x128xbf16, #tpu.memory_space<vmem>>, vector<1x16x16x128xbf16>
    %38 = vector.shape_cast %37 : vector<1x16x16x128xbf16> to vector<16x16x128xbf16>
    %39 = vector.shape_cast %38 : vector<16x16x128xbf16> to vector<256x128xbf16>
    %c0_39 = arith.constant 0 : index
    %c128 = arith.constant 128 : index
    %40 = vector.load %arg8[%c0_39, %c128] : memref<256x1152xbf16, #tpu.memory_space<vmem>>, vector<256x128xbf16>
    tpu.vector_store %arg8[%c0_39, %c128], %39 {strides = array<i32>} : memref<256x1152xbf16, #tpu.memory_space<vmem>>, vector<256x128xbf16>,
    %c0_40 = arith.constant 0 : index
    %c0_41 = arith.constant 0 : index
    %c2 = arith.constant 2 : index
    %c0_42 = arith.constant 0 : index
    %41 = vector.load %arg7[%c0_40, %c0_41, %c2, %c0_42] : memref<1x18x18x128xbf16, #tpu.memory_space<vmem>>, vector<1x16x16x128xbf16>
    %42 = vector.shape_cast %41 : vector<1x16x16x128xbf16> to vector<16x16x128xbf16>
    %43 = vector.shape_cast %42 : vector<16x16x128xbf16> to vector<256x128xbf16>
    %c0_43 = arith.constant 0 : index
    %c256 = arith.constant 256 : index
    %44 = vector.load %arg8[%c0_43, %c256] : memref<256x1152xbf16, #tpu.memory_space<vmem>>, vector<256x128xbf16>
    tpu.vector_store %arg8[%c0_43, %c256], %43 {strides = array<i32>} : memref<256x1152xbf16, #tpu.memory_space<vmem>>, vector<256x128xbf16>,
    %c0_44 = arith.constant 0 : index
    %c1_45 = arith.constant 1 : index
    %c0_46 = arith.constant 0 : index
    %c0_47 = arith.constant 0 : index
    %45 = vector.load %arg7[%c0_44, %c1_45, %c0_46, %c0_47] : memref<1x18x18x128xbf16, #tpu.memory_space<vmem>>, vector<1x16x16x128xbf16>
    %46 = vector.shape_cast %45 : vector<1x16x16x128xbf16> to vector<16x16x128xbf16>
    %47 = vector.shape_cast %46 : vector<16x16x128xbf16> to vector<256x128xbf16>
    %c0_48 = arith.constant 0 : index
    %c384 = arith.constant 384 : index
    %48 = vector.load %arg8[%c0_48, %c384] : memref<256x1152xbf16, #tpu.memory_space<vmem>>, vector<256x128xbf16>
    tpu.vector_store %arg8[%c0_48, %c384], %47 {strides = array<i32>} : memref<256x1152xbf16, #tpu.memory_space<vmem>>, vector<256x128xbf16>,
    %c0_49 = arith.constant 0 : index
    %c1_50 = arith.constant 1 : index
    %c1_51 = arith.constant 1 : index
    %c0_52 = arith.constant 0 : index
    %49 = vector.load %arg7[%c0_49, %c1_50, %c1_51, %c0_52] : memref<1x18x18x128xbf16, #tpu.memory_space<vmem>>, vector<1x16x16x128xbf16>
    %50 = vector.shape_cast %49 : vector<1x16x16x128xbf16> to vector<16x16x128xbf16>
    %51 = vector.shape_cast %50 : vector<16x16x128xbf16> to vector<256x128xbf16>
    %c0_53 = arith.constant 0 : index
    %c512 = arith.constant 512 : index
    %52 = vector.load %arg8[%c0_53, %c512] : memref<256x1152xbf16, #tpu.memory_space<vmem>>, vector<256x128xbf16>
    tpu.vector_store %arg8[%c0_53, %c512], %51 {strides = array<i32>} : memref<256x1152xbf16, #tpu.memory_space<vmem>>, vector<256x128xbf16>,
    %c0_54 = arith.constant 0 : index
    %c1_55 = arith.constant 1 : index
    %c2_56 = arith.constant 2 : index
    %c0_57 = arith.constant 0 : index
    %53 = vector.load %arg7[%c0_54, %c1_55, %c2_56, %c0_57] : memref<1x18x18x128xbf16, #tpu.memory_space<vmem>>, vector<1x16x16x128xbf16>
    %54 = vector.shape_cast %53 : vector<1x16x16x128xbf16> to vector<16x16x128xbf16>
    %55 = vector.shape_cast %54 : vector<16x16x128xbf16> to vector<256x128xbf16>
    %c0_58 = arith.constant 0 : index
    %c640 = arith.constant 640 : index
    %56 = vector.load %arg8[%c0_58, %c640] : memref<256x1152xbf16, #tpu.memory_space<vmem>>, vector<256x128xbf16>
    tpu.vector_store %arg8[%c0_58, %c640], %55 {strides = array<i32>} : memref<256x1152xbf16, #tpu.memory_space<vmem>>, vector<256x128xbf16>,
    %c0_59 = arith.constant 0 : index
    %c2_60 = arith.constant 2 : index
    %c0_61 = arith.constant 0 : index
    %c0_62 = arith.constant 0 : index
    %57 = vector.load %arg7[%c0_59, %c2_60, %c0_61, %c0_62] : memref<1x18x18x128xbf16, #tpu.memory_space<vmem>>, vector<1x16x16x128xbf16>
    %58 = vector.shape_cast %57 : vector<1x16x16x128xbf16> to vector<16x16x128xbf16>
    %59 = vector.shape_cast %58 : vector<16x16x128xbf16> to vector<256x128xbf16>
    %c0_63 = arith.constant 0 : index
    %c768 = arith.constant 768 : index
    %60 = vector.load %arg8[%c0_63, %c768] : memref<256x1152xbf16, #tpu.memory_space<vmem>>, vector<256x128xbf16>
    tpu.vector_store %arg8[%c0_63, %c768], %59 {strides = array<i32>} : memref<256x1152xbf16, #tpu.memory_space<vmem>>, vector<256x128xbf16>,
    %c0_64 = arith.constant 0 : index
    %c2_65 = arith.constant 2 : index
    %c1_66 = arith.constant 1 : index
    %c0_67 = arith.constant 0 : index
    %61 = vector.load %arg7[%c0_64, %c2_65, %c1_66, %c0_67] : memref<1x18x18x128xbf16, #tpu.memory_space<vmem>>, vector<1x16x16x128xbf16>
    %62 = vector.shape_cast %61 : vector<1x16x16x128xbf16> to vector<16x16x128xbf16>
    %63 = vector.shape_cast %62 : vector<16x16x128xbf16> to vector<256x128xbf16>
    %c0_68 = arith.constant 0 : index
    %c896 = arith.constant 896 : index
    %64 = vector.load %arg8[%c0_68, %c896] : memref<256x1152xbf16, #tpu.memory_space<vmem>>, vector<256x128xbf16>
    tpu.vector_store %arg8[%c0_68, %c896], %63 {strides = array<i32>} : memref<256x1152xbf16, #tpu.memory_space<vmem>>, vector<256x128xbf16>,
    %c0_69 = arith.constant 0 : index
    %c2_70 = arith.constant 2 : index
    %c2_71 = arith.constant 2 : index
    %c0_72 = arith.constant 0 : index
    %65 = vector.load %arg7[%c0_69, %c2_70, %c2_71, %c0_72] : memref<1x18x18x128xbf16, #tpu.memory_space<vmem>>, vector<1x16x16x128xbf16>
    %66 = vector.shape_cast %65 : vector<1x16x16x128xbf16> to vector<16x16x128xbf16>
    %67 = vector.shape_cast %66 : vector<16x16x128xbf16> to vector<256x128xbf16>
    %c0_73 = arith.constant 0 : index
    %c1024 = arith.constant 1024 : index
    %68 = vector.load %arg8[%c0_73, %c1024] : memref<256x1152xbf16, #tpu.memory_space<vmem>>, vector<256x128xbf16>
    tpu.vector_store %arg8[%c0_73, %c1024], %67 {strides = array<i32>} : memref<256x1152xbf16, #tpu.memory_space<vmem>>, vector<256x128xbf16>,
    %c0_74 = arith.constant 0 : index
    %c0_75 = arith.constant 0 : index
    %69 = vector.load %arg8[%c0_74, %c0_75] : memref<256x1152xbf16, #tpu.memory_space<vmem>>, vector<256x1152xbf16>
    %c0_76 = arith.constant 0 : index
    %c0_77 = arith.constant 0 : index
    %70 = vector.load %arg4[%c0_76, %c0_77] : memref<1152x128xbf16, #tpu.memory_space<vmem>>, vector<1152x128xbf16>
    %cst_78 = arith.constant dense<0.000000e+00> : vector<256x128xf32>
    %71 = tpu.matmul %69, %70, %cst_78 {dimension_numbers = #tpu.dot_dimension_numbers<[1], [0], [0], [1], [0, 0, 1, 1], [], []>} : vector<256x1152xbf16>, vector<1152x128xbf16>, vector<256x128xf32> -> vector<256x128xf32>
    %cst_79 = arith.constant dense<0.000000e+00> : vector<128xf32>
    %72 = vector.multi_reduction <add>, %71, %cst_79 [0] : vector<256x128xf32> to vector<128xf32>
    %73 = vector.shape_cast %72 : vector<128xf32> to vector<1x128xf32>
    %74 = arith.mulf %71, %71 : vector<256x128xf32>
    %cst_80 = arith.constant dense<0.000000e+00> : vector<128xf32>
    %75 = vector.multi_reduction <add>, %74, %cst_80 [0] : vector<256x128xf32> to vector<128xf32>
    %76 = vector.shape_cast %75 : vector<128xf32> to vector<1x128xf32>
    %77 = tpu.concatenate %73, %76 in 0 : vector<1x128xf32>, vector<1x128xf32> -> vector<2x128xf32>
    %c0_81 = arith.constant 0 : index
    %c0_82 = arith.constant 0 : index
    %c0_83 = arith.constant 0 : index
    %78 = vector.load %arg6[%c0_81, %c0_82, %c0_83] : memref<1x2x128xf32, #tpu.memory_space<vmem>>, vector<1x2x128xf32>
    %79 = vector.shape_cast %78 : vector<1x2x128xf32> to vector<2x128xf32>
    %80 = vector.shape_cast %77 : vector<2x128xf32> to vector<1x2x128xf32>
    tpu.vector_store %arg6[%c0_81, %c0_82, %c0_83], %80 {strides = array<i32>} : memref<1x2x128xf32, #tpu.memory_space<vmem>>, vector<1x2x128xf32>,
    %81 = vector.shape_cast %71 : vector<256x128xf32> to vector<16x16x128xf32>
    %82 = arith.truncf %81 : vector<16x16x128xf32> to vector<16x16x128xbf16>
    %c0_84 = arith.constant 0 : index
    %c0_85 = arith.constant 0 : index
    %c0_86 = arith.constant 0 : index
    %c0_87 = arith.constant 0 : index
    %83 = vector.load %arg5[%c0_84, %c0_85, %c0_86, %c0_87] : memref<1x16x16x128xbf16, #tpu.memory_space<vmem>>, vector<1x16x16x128xbf16>
    %84 = vector.shape_cast %83 : vector<1x16x16x128xbf16> to vector<16x16x128xbf16>
    %85 = vector.shape_cast %82 : vector<16x16x128xbf16> to vector<1x16x16x128xbf16>
    tpu.vector_store %arg5[%c0_84, %c0_85, %c0_86, %c0_87], %85 {strides = array<i32>} : memref<1x16x16x128xbf16, #tpu.memory_space<vmem>>, vector<1x16x16x128xbf16>,
    return
  }
  func.func @transform_0(%arg0: i32) -> (i32, i32, i32, i32) {
    %c0_i32 = arith.constant 0 : i32
    %c0_i32_0 = arith.constant 0 : i32
    %c0_i32_1 = arith.constant 0 : i32
    %c0_i32_2 = arith.constant 0 : i32
    return %arg0, %c0_i32, %c0_i32_0, %c0_i32_1 : i32, i32, i32, i32
  }
  func.func @transform_1(%arg0: i32) -> (i32, i32) {
    %c0_i32 = arith.constant 0 : i32
    %c0_i32_0 = arith.constant 0 : i32
    %c0_i32_1 = arith.constant 0 : i32
    return %c0_i32, %c0_i32_0 : i32, i32
  }
  func.func @transform_2(%arg0: i32) -> (i32, i32) {
    %c0_i32 = arith.constant 0 : i32
    %c0_i32_0 = arith.constant 0 : i32
    %c0_i32_1 = arith.constant 0 : i32
    return %c0_i32, %c0_i32_0 : i32, i32
  }
  func.func @transform_3(%arg0: i32) -> (i32, i32) {
    %c0_i32 = arith.constant 0 : i32
    %c0_i32_0 = arith.constant 0 : i32
    %c0_i32_1 = arith.constant 0 : i32
    return %c0_i32, %c0_i32_0 : i32, i32
  }
  func.func @transform_4(%arg0: i32) -> (i32, i32, i32, i32) {
    %c0_i32 = arith.constant 0 : i32
    %c0_i32_0 = arith.constant 0 : i32
    %c0_i32_1 = arith.constant 0 : i32
    %c0_i32_2 = arith.constant 0 : i32
    return %arg0, %c0_i32, %c0_i32_0, %c0_i32_1 : i32, i32, i32, i32
  }
  func.func @transform_5(%arg0: i32) -> (i32, i32, i32) {
    %c0_i32 = arith.constant 0 : i32
    %c0_i32_0 = arith.constant 0 : i32
    %c0_i32_1 = arith.constant 0 : i32
    return %arg0, %c0_i32, %c0_i32_0 : i32, i32, i32
  }
}

</mosaic_0001>

<bundles_post_ra>
// kernel: basic_block_forward.5
= control target key start
LH: loop header
LB: loop body
LE: loop exit
PB: predicated region body
PF: predicated region fallthrough
CT: control target
= control target key end

     0   :  { %9 = vsyncpa [#allocation3], 0  ;;  %s1079_s0 = inlined_call_operand.vmem [shape: bf16[2,16,16,128], index: 0, kind: input, shape index: {}]   ;;  %s1080_s1 = inlined_call_operand.vmem [shape: f32[2,16,16,128], index: 1, kind: input, shape index: {}]   ;;  %s1081_s2 = inlined_call_operand.vmem [shape: f32[1,128], index: 2, kind: input, shape index: {}]   ;;  %s1082_s3 = inlined_call_operand.vmem [shape: f32[1,128], index: 3, kind: input, shape index: {}]   ;;  %s1083_s4 = inlined_call_operand.hbm [shape: f32[2,16,16,128], index: 4, kind: output, shape index: {}]  }
   0x1   :  { %11 = vsyncpa [#allocation3 + $0x1], 0  ;;  %s805_s15 = smov 0   ;;  %s807_s16 = smov 0  }
   0x2   :  { %s809_s17 = smov 0   ;;  %s811_s18 = smov 0  }
   0x3 LB: > { %s826_s19 = sadd.s32 4294967295, %s775_s18   ;;  %s574_s20 = sadd.s32 4294967294, %s775_s18   ;;  %s775_s18 = sphi %s811_s18, %s1089_s18   ;;  %s771_s17 = sphi %s809_s17, %s1088_s17   ;;  %s767_s16 = sphi %s807_s16, %s1087_s16   ;;  %s763_s15 = sphi %s805_s15, %s1086_s15  }
   0x4   : > { %s830_s21 = sadd.s32 1, %s775_s18   ;;  %s118_s22 = sadd.s32 1, %s771_s17 }
   0x5   : > { %s115_s23 = ssub.s32 %s775_s18, %s830_s21  ;;  %p128_p0 = scmp.ne.s32.totalorder %s771_s17, %s767_s16 }
   0x6   : > { %p116_p1 = scmp.eq.s32.totalorder %s115_s23, 0  ;;  %p129_p2 = scmp.eq.s32.totalorder %s826_s19, 1 }
   0x7   : > { %p134_p3 = scmp.ne.s32.totalorder %s767_s16, %s763_s15  ;;  %p135_p4 = scmp.eq.s32.totalorder %s574_s20, 1 }
   0x8   : > { %s841_s24 = scalar_select %p116_p1, %s771_s17, %s118_s22  }
   0x9   : > { %p843_p5 = por %p129_p2, %p128_p0  ;;  %p847_p6 = por %p135_p4, %p134_p3 }
   0xa   : > { %p577_p7 = scmp.ge.s32.totalorder %s775_s18, 1  ;;  %p175_p8 = scmp.lt.s32.totalorder %s775_s18, 3 }
   0xc   : > { %p176_p9 = pnand %p577_p7, %p175_p8 }
   0xd   : > { %p206_p10 = scmp.lt.s32.totalorder (!%p176_p9), %s826_s19, 1  ;;  %v864_v1 = vld [vmem:[%s1081_s2] ss:$0 sm:$0xff] (!%p176_p9)  ;;  %s203_s12 = sand.u32 (!%p176_p9), 1, %s767_s16  }
   0xe   : > { %179 = sbr.rel (%p176_p9) target bundleno = 83 (0x53), region = 36  ;;  %v876_v5 = vld [vmem:[%s1082_s3] ss:$0 sm:$0xff] (!%p176_p9)  ;;  %s888_s20 = sshll.u32 (!%p176_p9), %s203_s12, 8 }
   0xf   : > { %s912_s22 = scalar_lea.vmem (!%p176_p9), [#allocation2], %s888_s20  ;;  %s592_s23 = sshll.u32 (!%p176_p9), %s826_s19, 12 }
  0x10   : > { %s1038_s30 = scalar_lea.sflag (!%p176_p9), [#allocation3], %s203_s12 }
  0x15   : > { %s207_s27 = scalar_select %p206_p10, %s826_s19, 1 }
  0x17   : > { %s590_s28 = sshll.u32 %s207_s27, 7  ;;  %s591_s29 = sshll.u32 %s207_s27, 8 }
  0x18   : > { %s858_s6 = scalar_lea.vmem %s1079_s0, %s590_s28  ;;  %s869_s11 = scalar_lea.vmem %s1080_s1, %s591_s29 }
  0x19   : > { %v594_v0 = vld [vmem:[%s858_s6] sm:$0xff]   ;;  %v657_v4 = vld [vmem:[%s858_s6 + $0x8] sm:$0xff]   ;;  %v658_v8 = vld [vmem:[%s858_s6 + $0x10] sm:$0xff]   ;;  %s500_s27 = sshll.u32 %s912_s22, 4  ;;  %s1026_s29 = scalar_lea.hbm %s1083_s4, %s592_s23  ;;  %s1028_s27 = int_to_ptr.vmem [resolvable:$true] %s500_s27 }
  0x1a   : > { %v595_v2 = vunpack.c.l.bf16 %v594_v0  ;;  %v596_v3 = vunpack.c.h.bf16 %v594_v0  ;;  %v599_v6 = vunpack.c.l.bf16 %v657_v4  ;;  %v600_v7 = vunpack.c.h.bf16 %v657_v4  ;;  %v659_v13 = vld [vmem:[%s858_s6 + $0x18] sm:$0xff]   ;;  %v358_v14 = vld [vmem:[%s869_s11] sm:$0xff]  ;;  %v359_v15 = vld [vmem:[%s869_s11 + $0x8] sm:$0xff]  ;;  %s713_s5 = scalar_lea.vmem %s1028_s27, 4096 }
  0x1b   : > { %v603_v11 = vunpack.c.l.bf16 %v658_v8  ;;  %v604_v12 = vunpack.c.h.bf16 %v658_v8  ;;  %v607_v18 = vunpack.c.l.bf16 %v659_v13  ;;  %v608_v19 = vunpack.c.h.bf16 %v659_v13  ;;  %v360_v22 = vld [vmem:[%s869_s11 + $0x10] sm:$0xff]  ;;  %v361_v23 = vld [vmem:[%s869_s11 + $0x18] sm:$0xff]  ;;  %v362_v28 = vld [vmem:[%s869_s11 + $0x20] sm:$0xff]  ;;  %p714_p11 = scmp.ne.s32.totalorder %s1028_s27, %s713_s5 }
  0x1c   : > { %v287_v9 = vmul.f32 %v595_v2, %v864_v1  ;;  %v288_v10 = vmul.f32 %v596_v3, %v864_v1  ;;  %v289_v16 = vmul.f32 %v599_v6, %v864_v1  ;;  %v290_v17 = vmul.f32 %v600_v7, %v864_v1  ;;  %v363_v29 = vld [vmem:[%s869_s11 + $0x28] sm:$0xff]  ;;  %v364_v36 = vld [vmem:[%s869_s11 + $0x30] sm:$0xff]  ;;  %v365_v37 = vld [vmem:[%s869_s11 + $0x38] sm:$0xff] }
  0x1d   : > { %v291_v24 = vmul.f32 %v603_v11, %v864_v1  ;;  %v292_v25 = vmul.f32 %v604_v12, %v864_v1  ;;  %v293_v30 = vmul.f32 %v607_v18, %v864_v1  ;;  %v294_v31 = vmul.f32 %v608_v19, %v864_v1  ;;  %v660_v42 = vld [vmem:[%s858_s6 + $0x20] sm:$0xff]   ;;  %v661_v47 = vld [vmem:[%s858_s6 + $0x28] sm:$0xff]   ;;  %v662_v52 = vld [vmem:[%s858_s6 + $0x30] sm:$0xff]   ;;  %p715_p12 = pnand %p714_p11, %p843_p5 }
  0x1e   : > { %v326_v20 = vadd.f32 %v876_v5, %v287_v9  ;;  %v327_v21 = vadd.f32 %v876_v5, %v288_v10  ;;  %v328_v26 = vadd.f32 %v876_v5, %v289_v16  ;;  %v329_v27 = vadd.f32 %v876_v5, %v290_v17  ;;  %v663_v57 = vld [vmem:[%s858_s6 + $0x38] sm:$0xff]   ;;  %v366_v3 = vld [vmem:[%s869_s11 + $0x40] sm:$0xff]  ;;  %v367_v4 = vld [vmem:[%s869_s11 + $0x48] sm:$0xff] }
  0x1f   : > { %v330_v34 = vadd.f32 %v876_v5, %v291_v24  ;;  %v331_v35 = vadd.f32 %v876_v5, %v292_v25  ;;  %v332_v40 = vadd.f32 %v876_v5, %v293_v30  ;;  %v333_v41 = vadd.f32 %v876_v5, %v294_v31  ;;  %v368_v12 = vld [vmem:[%s869_s11 + $0x50] sm:$0xff]  ;;  %v369_v13 = vld [vmem:[%s869_s11 + $0x58] sm:$0xff]  ;;  %v370_v18 = vld [vmem:[%s869_s11 + $0x60] sm:$0xff]  ;;  %p716_p13 = pneg %p715_p12 }
  0x20   : > { %v390_v32 = vadd.f32 %v358_v14, %v326_v20  ;;  %v391_v33 = vadd.f32 %v359_v15, %v327_v21  ;;  %v392_v38 = vadd.f32 %v360_v22, %v328_v26  ;;  %v393_v39 = vadd.f32 %v361_v23, %v329_v27  ;;  %v371_v19 = vld [vmem:[%s869_s11 + $0x68] sm:$0xff]  ;;  %v372_v26 = vld [vmem:[%s869_s11 + $0x70] sm:$0xff]  ;;  %v373_v27 = vld [vmem:[%s869_s11 + $0x78] sm:$0xff] }
  0x21   : > { %v394_v45 = vadd.f32 %v362_v28, %v330_v34  ;;  %v395_v46 = vadd.f32 %v363_v29, %v331_v35  ;;  %v396_v50 = vadd.f32 %v364_v36, %v332_v40  ;;  %v397_v51 = vadd.f32 %v365_v37, %v333_v41  ;;  %v665_v37 = vld [vmem:[%s858_s6 + $0x48] sm:$0xff]  }
  0x22   : > { %v422_v43 = vmax.f32 %v390_v32, 0.0  ;;  %v423_v44 = vmax.f32 %v391_v33, 0.0  ;;  %v424_v48 = vmax.f32 %v392_v38, 0.0  ;;  %v425_v49 = vmax.f32 %v393_v39, 0.0  ;;  %v664_v32 = vld [vmem:[%s858_s6 + $0x40] sm:$0xff]  }
  0x23   : > { %v426_v53 = vmax.f32 %v394_v45, 0.0  ;;  %v427_v54 = vmax.f32 %v395_v46, 0.0  ;;  %v611_v55 = vunpack.c.l.bf16 %v660_v42  ;;  %v612_v56 = vunpack.c.h.bf16 %v660_v42  ;;  %v666_v42 = vld [vmem:[%s858_s6 + $0x50] sm:$0xff]  }
  0x24   : > { %454 = vst [vmem:[%s912_s22] sm:$0xff] %v422_v43  ;;  %455 = vst [vmem:[%s912_s22 + $0x8] sm:$0xff] %v423_v44  ;;  %v428_v58 = vmax.f32 %v396_v50, 0.0  ;;  %v429_v59 = vmax.f32 %v397_v51, 0.0  ;;  %v615_v60 = vunpack.c.l.bf16 %v661_v47  ;;  %v616_v61 = vunpack.c.h.bf16 %v661_v47  ;;  %v667_v47 = vld [vmem:[%s858_s6 + $0x58] sm:$0xff]  }
  0x25   : > { %456 = vst [vmem:[%s912_s22 + $0x10] sm:$0xff] %v424_v48  ;;  %457 = vst [vmem:[%s912_s22 + $0x18] sm:$0xff] %v425_v49  ;;  %v295_v62 = vmul.f32 %v611_v55, %v864_v1  ;;  %v296_v63 = vmul.f32 %v612_v56, %v864_v1  ;;  %v619_v0 = vunpack.c.l.bf16 %v662_v52  ;;  %v620_v2 = vunpack.c.h.bf16 %v662_v52  ;;  %v374_v56 = vld [vmem:[%s869_s11 + $0x80] sm:$0xff] }
  0x26   : > { %458 = vst [vmem:[%s912_s22 + $0x20] sm:$0xff] %v426_v53  ;;  %459 = vst [vmem:[%s912_s22 + $0x28] sm:$0xff] %v427_v54  ;;  %v297_v6 = vmul.f32 %v615_v60, %v864_v1  ;;  %v298_v7 = vmul.f32 %v616_v61, %v864_v1  ;;  %v623_v8 = vunpack.c.l.bf16 %v663_v57  ;;  %v624_v9 = vunpack.c.h.bf16 %v663_v57  ;;  %v375_v57 = vld [vmem:[%s869_s11 + $0x88] sm:$0xff] }
  0x27   : > { %460 = vst [vmem:[%s912_s22 + $0x30] sm:$0xff] %v428_v58  ;;  %461 = vst [vmem:[%s912_s22 + $0x38] sm:$0xff] %v429_v59  ;;  %v334_v10 = vadd.f32 %v876_v5, %v295_v62  ;;  %v335_v11 = vadd.f32 %v876_v5, %v296_v63  ;;  %v299_v14 = vmul.f32 %v619_v0, %v864_v1  ;;  %v627_v45 = vunpack.c.l.bf16 %v664_v32  ;;  %v376_v0 = vld [vmem:[%s869_s11 + $0x90] sm:$0xff] }
  0x28   : > { %v300_v15 = vmul.f32 %v620_v2, %v864_v1  ;;  %v336_v16 = vadd.f32 %v876_v5, %v297_v6  ;;  %v337_v17 = vadd.f32 %v876_v5, %v298_v7  ;;  %v301_v20 = vmul.f32 %v623_v8, %v864_v1  ;;  %v377_v2 = vld [vmem:[%s869_s11 + $0x98] sm:$0xff]  ;;  %v378_v8 = vld [vmem:[%s869_s11 + $0xa0] sm:$0xff] }
  0x29   : > { %v302_v21 = vmul.f32 %v624_v9, %v864_v1  ;;  %v398_v22 = vadd.f32 %v366_v3, %v334_v10  ;;  %v399_v23 = vadd.f32 %v367_v4, %v335_v11  ;;  %v338_v24 = vadd.f32 %v876_v5, %v299_v14  ;;  %v379_v9 = vld [vmem:[%s869_s11 + $0xa8] sm:$0xff] }
  0x2a   : > { %v339_v25 = vadd.f32 %v876_v5, %v300_v15  ;;  %v400_v28 = vadd.f32 %v368_v12, %v336_v16  ;;  %v401_v29 = vadd.f32 %v369_v13, %v337_v17  ;;  %v340_v30 = vadd.f32 %v876_v5, %v301_v20  ;;  %v380_v16 = vld [vmem:[%s869_s11 + $0xb0] sm:$0xff]  ;;  %v381_v17 = vld [vmem:[%s869_s11 + $0xb8] sm:$0xff] }
  0x2b   : > { %v341_v31 = vadd.f32 %v876_v5, %v302_v21  ;;  %v430_v33 = vmax.f32 %v398_v22, 0.0  ;;  %v431_v34 = vmax.f32 %v399_v23, 0.0  ;;  %v402_v35 = vadd.f32 %v370_v18, %v338_v24  ;;  %v668_v22 = vld [vmem:[%s858_s6 + $0x60] sm:$0xff]  }
  0x2c   : > { %v403_v36 = vadd.f32 %v371_v19, %v339_v25  ;;  %v432_v38 = vmax.f32 %v400_v28, 0.0  ;;  %v433_v39 = vmax.f32 %v401_v29, 0.0  ;;  %v404_v40 = vadd.f32 %v372_v26, %v340_v30 }
  0x2d   : > { %v405_v41 = vadd.f32 %v373_v27, %v341_v31  ;;  %462 = vst [vmem:[%s912_s22 + $0x40] sm:$0xff] %v430_v33  ;;  %463 = vst [vmem:[%s912_s22 + $0x48] sm:$0xff] %v431_v34  ;;  %v434_v43 = vmax.f32 %v402_v35, 0.0  ;;  %v628_v46 = vunpack.c.h.bf16 %v664_v32  ;;  %v631_v50 = vunpack.c.l.bf16 %v665_v37  ;;  %v669_v27 = vld [vmem:[%s858_s6 + $0x68] sm:$0xff]   ;;  %v670_v32 = vld [vmem:[%s858_s6 + $0x70] sm:$0xff]  }
  0x2e   : > { %v435_v44 = vmax.f32 %v403_v36, 0.0  ;;  %464 = vst [vmem:[%s912_s22 + $0x50] sm:$0xff] %v432_v38  ;;  %465 = vst [vmem:[%s912_s22 + $0x58] sm:$0xff] %v433_v39  ;;  %v436_v48 = vmax.f32 %v404_v40, 0.0  ;;  %v632_v51 = vunpack.c.h.bf16 %v665_v37  ;;  %v303_v52 = vmul.f32 %v627_v45, %v864_v1  ;;  %v671_v37 = vld [vmem:[%s858_s6 + $0x78] sm:$0xff]   ;;  %s777_s6 = smov [#allocation2]  }
  0x2f   : > { %v437_v49 = vmax.f32 %v405_v41, 0.0  ;;  %466 = vst [vmem:[%s912_s22 + $0x60] sm:$0xff] %v434_v43  ;;  %v304_v53 = vmul.f32 %v628_v46, %v864_v1  ;;  %v635_v54 = vunpack.c.l.bf16 %v666_v42  ;;  %v636_v55 = vunpack.c.h.bf16 %v666_v42  ;;  %v382_v46 = vld [vmem:[%s869_s11 + $0xc0] sm:$0xff]  ;;  %s717_s7 = sshll.u32 %s777_s6, 4  ;;  %s718_s7 = int_to_ptr.vmem [resolvable:$false] %s717_s7 }
  0x30   : > { %467 = vst [vmem:[%s912_s22 + $0x68] sm:$0xff] %v435_v44  ;;  %468 = vst [vmem:[%s912_s22 + $0x70] sm:$0xff] %v436_v48  ;;  %v305_v58 = vmul.f32 %v631_v50, %v864_v1  ;;  %v306_v59 = vmul.f32 %v632_v51, %v864_v1  ;;  %v639_v60 = vunpack.c.l.bf16 %v667_v47  ;;  %v640_v61 = vunpack.c.h.bf16 %v667_v47  ;;  %v383_v47 = vld [vmem:[%s869_s11 + $0xc8] sm:$0xff]  ;;  %s719_s8 = scalar_lea.vmem %s718_s7, 8192  ;;  %p720_p0 = scmp.lt.s32.totalorder %s1028_s27, %s718_s7 }
  0x31   : > { %469 = vst [vmem:[%s912_s22 + $0x78] sm:$0xff] %v437_v49  ;;  %v342_v62 = vadd.f32 %v876_v5, %v303_v52  ;;  %v343_v63 = vadd.f32 %v876_v5, %v304_v53  ;;  %v307_v3 = vmul.f32 %v635_v54, %v864_v1  ;;  %v308_v4 = vmul.f32 %v636_v55, %v864_v1  ;;  %v384_v54 = vld [vmem:[%s869_s11 + $0xd0] sm:$0xff]  ;;  %v385_v55 = vld [vmem:[%s869_s11 + $0xd8] sm:$0xff]  ;;  %p721_p1 = scmp.lt.s32.totalorder %s719_s8, %s713_s5 }
  0x32   : > { %v344_v6 = vadd.f32 %v876_v5, %v305_v58  ;;  %v345_v7 = vadd.f32 %v876_v5, %v306_v59  ;;  %v309_v10 = vmul.f32 %v639_v60, %v864_v1  ;;  %v310_v11 = vmul.f32 %v640_v61, %v864_v1  ;;  %v386_v60 = vld [vmem:[%s869_s11 + $0xe0] sm:$0xff]  ;;  %v387_v61 = vld [vmem:[%s869_s11 + $0xe8] sm:$0xff] }
  0x33   : > { %v406_v12 = vadd.f32 %v374_v56, %v342_v62  ;;  %v407_v13 = vadd.f32 %v375_v57, %v343_v63  ;;  %v346_v14 = vadd.f32 %v876_v5, %v307_v3  ;;  %v347_v15 = vadd.f32 %v876_v5, %v308_v4  ;;  %p722_p2 = por %p721_p1, %p720_p0 }
  0x34   : > { %v408_v18 = vadd.f32 %v376_v0, %v344_v6  ;;  %v409_v19 = vadd.f32 %v377_v2, %v345_v7  ;;  %v348_v20 = vadd.f32 %v876_v5, %v309_v10  ;;  %v349_v21 = vadd.f32 %v876_v5, %v310_v11  ;;  %v388_v6 = vld [vmem:[%s869_s11 + $0xf0] sm:$0xff]  ;;  %v389_v7 = vld [vmem:[%s869_s11 + $0xf8] sm:$0xff] }
  0x35   : > { %v438_v23 = vmax.f32 %v406_v12, 0.0  ;;  %v439_v24 = vmax.f32 %v407_v13, 0.0  ;;  %v410_v25 = vadd.f32 %v378_v8, %v346_v14  ;;  %v411_v26 = vadd.f32 %v379_v9, %v347_v15  ;;  %p723_p3 = pnand %p722_p2, %p716_p13 }
  0x36   : > { %v440_v28 = vmax.f32 %v408_v18, 0.0  ;;  %v441_v29 = vmax.f32 %v409_v19, 0.0  ;;  %v412_v30 = vadd.f32 %v380_v16, %v348_v20  ;;  %v413_v31 = vadd.f32 %v381_v17, %v349_v21 }
  0x37   : > { %470 = vst [vmem:[%s912_s22 + $0x80] sm:$0xff] %v438_v23  ;;  %471 = vst [vmem:[%s912_s22 + $0x88] sm:$0xff] %v439_v24  ;;  %v442_v33 = vmax.f32 %v410_v25, 0.0  ;;  %v443_v34 = vmax.f32 %v411_v26, 0.0  ;;  %v643_v35 = vunpack.c.l.bf16 %v668_v22  ;;  %v644_v36 = vunpack.c.h.bf16 %v668_v22 }
  0x38   : > { %472 = vst [vmem:[%s912_s22 + $0x90] sm:$0xff] %v440_v28  ;;  %473 = vst [vmem:[%s912_s22 + $0x98] sm:$0xff] %v441_v29  ;;  %v444_v38 = vmax.f32 %v412_v30, 0.0  ;;  %v445_v39 = vmax.f32 %v413_v31, 0.0  ;;  %v647_v40 = vunpack.c.l.bf16 %v669_v27  ;;  %v648_v41 = vunpack.c.h.bf16 %v669_v27 }
  0x39   : > { %474 = vst [vmem:[%s912_s22 + $0xa0] sm:$0xff] %v442_v33  ;;  %475 = vst [vmem:[%s912_s22 + $0xa8] sm:$0xff] %v443_v34  ;;  %v311_v42 = vmul.f32 %v643_v35, %v864_v1  ;;  %v312_v43 = vmul.f32 %v644_v36, %v864_v1  ;;  %v651_v44 = vunpack.c.l.bf16 %v670_v32  ;;  %v652_v45 = vunpack.c.h.bf16 %v670_v32 }
  0x3a   : > { %476 = vst [vmem:[%s912_s22 + $0xb0] sm:$0xff] %v444_v38  ;;  %477 = vst [vmem:[%s912_s22 + $0xb8] sm:$0xff] %v445_v39  ;;  %v313_v48 = vmul.f32 %v647_v40, %v864_v1  ;;  %v314_v49 = vmul.f32 %v648_v41, %v864_v1  ;;  %v655_v50 = vunpack.c.l.bf16 %v671_v37  ;;  %v656_v51 = vunpack.c.h.bf16 %v671_v37 }
  0x3b   : > { %v350_v52 = vadd.f32 %v876_v5, %v311_v42  ;;  %v351_v53 = vadd.f32 %v876_v5, %v312_v43  ;;  %v315_v56 = vmul.f32 %v651_v44, %v864_v1  ;;  %v316_v57 = vmul.f32 %v652_v45, %v864_v1 }
  0x3c   : > { %v352_v58 = vadd.f32 %v876_v5, %v313_v48  ;;  %v353_v59 = vadd.f32 %v876_v5, %v314_v49  ;;  %v317_v62 = vmul.f32 %v655_v50, %v864_v1  ;;  %v318_v63 = vmul.f32 %v656_v51, %v864_v1 }
  0x3d   : > { %v414_v0 = vadd.f32 %v382_v46, %v350_v52  ;;  %v415_v2 = vadd.f32 %v383_v47, %v351_v53  ;;  %v354_v3 = vadd.f32 %v876_v5, %v315_v56  ;;  %v355_v4 = vadd.f32 %v876_v5, %v316_v57 }
  0x3e   : > { %v416_v8 = vadd.f32 %v384_v54, %v352_v58  ;;  %v417_v9 = vadd.f32 %v385_v55, %v353_v59  ;;  %v356_v10 = vadd.f32 %v876_v5, %v317_v62  ;;  %v357_v11 = vadd.f32 %v876_v5, %v318_v63 }
  0x3f   : > { %v446_v1 = vmax.f32 %v414_v0, 0.0  ;;  %v447_v12 = vmax.f32 %v415_v2, 0.0  ;;  %v418_v13 = vadd.f32 %v386_v60, %v354_v3  ;;  %v419_v14 = vadd.f32 %v387_v61, %v355_v4 }
  0x40   : > { %v448_v15 = vmax.f32 %v416_v8, 0.0  ;;  %v449_v16 = vmax.f32 %v417_v9, 0.0  ;;  %v420_v17 = vadd.f32 %v388_v6, %v356_v10  ;;  %v421_v18 = vadd.f32 %v389_v7, %v357_v11 }
  0x41   : > { %478 = vst [vmem:[%s912_s22 + $0xc0] sm:$0xff] %v446_v1  ;;  %479 = vst [vmem:[%s912_s22 + $0xc8] sm:$0xff] %v447_v12  ;;  %v450_v5 = vmax.f32 %v418_v13, 0.0  ;;  %v451_v19 = vmax.f32 %v419_v14, 0.0 }
  0x42   : > { %480 = vst [vmem:[%s912_s22 + $0xd0] sm:$0xff] %v448_v15  ;;  %481 = vst [vmem:[%s912_s22 + $0xd8] sm:$0xff] %v449_v16  ;;  %v452_v20 = vmax.f32 %v420_v17, 0.0  ;;  %v453_v21 = vmax.f32 %v421_v18, 0.0 }
  0x43   : > { %482 = vst [vmem:[%s912_s22 + $0xe0] sm:$0xff] %v450_v5  ;;  %483 = vst [vmem:[%s912_s22 + $0xe8] sm:$0xff] %v451_v19 }
  0x44   : > { %484 = vst [vmem:[%s912_s22 + $0xf0] sm:$0xff] %v452_v20  ;;  %485 = vst [vmem:[%s912_s22 + $0xf8] sm:$0xff] %v453_v21 }
  0x45   : > { %726 = shalt.err (!%p723_p3)
}
  0x46   : > { %s727_s9 = scalar_lea.hbm %s1026_s29, 4096  ;;  %s731_s12 = scalar_lea.hbm %s1083_s4, 8192 }
  0x47   : > { %p728_p4 = scmp.ne.s32.totalorder %s1026_s29, %s727_s9  ;;  %p732_p9 = scmp.lt.u32.totalorder %s1026_s29, %s1083_s4 }
  0x48   : > { %p733_p10 = scmp.lt.u32.totalorder %s731_s12, %s727_s9  ;;  %p735_p12 = scmp.lt.u32.totalorder %s727_s9, %s1026_s29 }
  0x49   : > { %p729_p7 = pnand %p728_p4, %p843_p5 }
  0x4a   : > { %p734_p11 = por %p733_p10, %p732_p9 }
  0x4b   : > { %p730_p8 = pneg %p729_p7 }
  0x4c   : > { %p736_p13 = por %p735_p12, %p734_p11 }
  0x4e   : > { %p737_p0 = pnand %p736_p13, %p730_p8 }
  0x50   : > { %740 = shalt.err (!%p737_p0)
}
  0x51   : > { %s778_s20 = smov 128   ;;  %s779_s22 = smov 8  }
  0x52   : > { %672 = dma.vmem_to_hbm [thread:$0]  (%p843_p5), %s1028_s27, 4096, %s1026_s29, %s1038_s30, %s778_s20, %s778_s20, %s779_s22  }
  0x53 PF: > { %p678_p1 = scmp.ge.s32.totalorder %s775_s18, 2  ;;  %s515_s23 = sand.u32 1, %s763_s15  }
  0x54   : > { %s516_s19 = scalar_lea.sflag [#allocation3], %s515_s23 }
  0x55   : > { %p675_p2 = pnand %p678_p1, %p847_p6 }
  0x57   : > { %758 = dma.done.wait (!%p675_p2), %s516_s19, 4096  }
  0x58   : > { %760 = vsyncadd (!%p675_p2), %s516_s19, 4294963200  ;;  %p14_p3 = scmp.ge.s32.totalorder %s830_s21, 4   ;;  %s1086_s15 = smov %s767_s16 }
  0x59   : > { %s1087_s16 = smov %s771_s17  ;;  %s1088_s17 = smov %s841_s24 }
  0x5a   : > { %s1089_s18 = smov %s830_s21  ;;  %16 = sbr.rel (!%p14_p3) target bundleno = 3 (0x3), region = 74 }
  0x61   :  { %521 = vsyncpa [#allocation3], 1 }
  0x62   :  { %523 = vsyncpa [#allocation3 + $0x1], 1 }

// kernel: basic_block_forward.3
= control target key start
LH: loop header
LB: loop body
LE: loop exit
PB: predicated region body
PF: predicated region fallthrough
CT: control target
= control target key end

     0   :  { %s6834_s18 = smov 0   ;;  %s8463_s0 = inlined_call_operand.vmem [shape: f32[2,16,16,128], index: 0, kind: input, shape index: {}]   ;;  %s8464_s1 = inlined_call_operand.vmem [shape: f32[1,128], index: 1, kind: input, shape index: {}]   ;;  %s8465_s2 = inlined_call_operand.vmem [shape: f32[1,128], index: 2, kind: input, shape index: {}]   ;;  %s8466_s3 = inlined_call_operand.vmem [shape: bf16[1152,128], index: 3, kind: input, shape index: {}]   ;;  %s8467_s4 = inlined_call_operand.vmem [shape: bf16[2,16,16,128], index: 4, kind: output, shape index: {0}]   ;;  %s8468_s5 = inlined_call_operand.vmem [shape: f32[2,2,128], index: 5, kind: output, shape index: {1}]  }
   0x1 LB: > { %s5629_s1 = sadd.s32 4294967295, %s6801_s18   ;;  %p5633_p0 = scmp.ge.s32.totalorder %s6801_s18, 1  ;;  %s6801_s18 = sphi %s6834_s18, %s16_s18  }
   0x2   : > { %p190_p1 = scmp.lt.s32.totalorder %s6801_s18, 3 }
   0x4   : > { %p191_p2 = pnand %p5633_p0, %p190_p1 }
   0x6   : > { %194 = sbr.rel (%p191_p2) target bundleno = 647 (0x287), region = 36 }
   0xd   : > { %v6675_v0 = vld [vmem:[%s8466_s3 + $0x40] sm:$0xff]   ;;  %v6803_v2 = vmov 0   ;;  %v6677_v3 = vld [vmem:[%s8466_s3 + $0x48] sm:$0xff]   ;;  %v6679_v5 = vld [vmem:[%s8466_s3 + $0x50] sm:$0xff]   ;;  %p222_p3 = scmp.lt.s32.totalorder %s5629_s1, 1  ;;  %vm277_vm0 = vcmask 1040384  }
   0xe   : > { %v6676_v1 = vld [vmem:[%s8466_s3] sm:$0xff]   ;;  %269 = vst [vmem:[#allocation2] sm:$0xf] %v6803_v2  ;;  %270 = vst [vmem:[#allocation2 + $0x4] sm:$0xf] %v6803_v2  ;;  %6130 = vmatprep.subr.bf16.mxu0 %v6675_v0  ;;  %6650 = vmatprep.subr.bf16.mxu1 %v6675_v0  ;;  %v6678_v4 = vld [vmem:[%s8466_s3 + $0x8] sm:$0xff]  }
   0xf   : > { %271 = vst [vmem:[#allocation2 + $0x8] sm:$0x1] %v6803_v2  ;;  %273 = vst [vmem:[#allocation2 + $0xcc] sm:$0xf] %v6803_v2  ;;  %6131 = vmatpush3.bf16.msra.mxu0 %v6676_v1  ;;  %6658 = vmatpush3.bf16.msra.mxu1 %v6676_v1  ;;  %v6680_v6 = vld [vmem:[%s8466_s3 + $0x10] sm:$0xff]   ;;  %v6681_v7 = vld [vmem:[%s8466_s3 + $0x58] sm:$0xff]  }
  0x10   : > { %274 = vst [vmem:[#allocation2 + $0xd0] sm:$0xf] %v6803_v2  ;;  %275 = vst [vmem:[#allocation2 + $0xd4] sm:$0x1] %v6803_v2  ;;  %6132 = vmatprep.subr.bf16.mxu0 %v6677_v3  ;;  %6651 = vmatprep.subr.bf16.mxu1 %v6677_v3  ;;  %s8515_s1 = smov (!%p222_p3, %s5629_s1), 1  ;;  %v6682_v8 = vld [vmem:[%s8466_s3 + $0x18] sm:$0xff]  }
  0x11   : > { %v6683_v9 = vld [vmem:[%s8466_s3 + $0x60] sm:$0xff]   ;;  %s5969_s11 = sshll.u32 %s8515_s1, 8  ;;  %v6685_v11 = vld [vmem:[%s8466_s3 + $0x68] sm:$0xff]   ;;  %vm1102_vm1 = vsmask.f32 3328  ;;  %v6687_v25 = vld [vmem:[%s8466_s3 + $0x70] sm:$0xff]  }
  0x12   : > { %v6684_v10 = vld [vmem:[%s8466_s3 + $0x20] sm:$0xff]   ;;  %s6885_s2 = scalar_lea.vmem %s8463_s0, %s5969_s11  ;;  %vm1103_vm2 = vsmask.f32 7440  ;;  %v6686_v17 = vld [vmem:[%s8466_s3 + $0x28] sm:$0xff]   ;;  %vm278_vm4 = vsmask.f32 256 }
  0x13   : > { %6133 = vmatpush3.bf16.msra.mxu0 %v6678_v4  ;;  %6659 = vmatpush3.bf16.msra.mxu1 %v6678_v4  ;;  %v259_v23 = vld [vmem:[%s6885_s2 + $0xb0] sm:$0xff]  ;;  %v260_v24 = vld [vmem:[%s6885_s2 + $0xb8] sm:$0xff]  ;;  %vm6897_vm3 = vmor %vm1102_vm1, %vm1103_vm2  ;;  %vm796_vm5 = vcmask 1043456   ;;  %vm328_vm7 = vsmask.f32 7938  ;;  %vm1665_vm12 = vcmask 1042432  }
  0x14   : > { %6134 = vmatprep.subr.bf16.mxu0 %v6679_v5  ;;  %6652 = vmatprep.subr.bf16.mxu1 %v6679_v5  ;;  %v6688_v29 = vld [vmem:[%s8466_s3 + $0x30] sm:$0xff]   ;;  %vm6906_vm6 = vmand %vm277_vm0, %vm278_vm4  ;;  %v363_v33 = vld [vmem:[#allocation2 + $0x98] sm:$0x1]  ;;  %v5993_v34 = vpack.c.bf16 %v259_v23, %v259_v23  ;;  %v5994_v35 = vpack.c.bf16 %v260_v24, %v260_v24  ;;  %vm474_vm9 = vsmask.f32 4368  ;;  %vm1666_vm13 = vcmask 1046532  }
  0x15   : > { %v1054_v12 = vld [vmem:[#allocation2] sm:$0xf]  ;;  %v1055_v13 = vld [vmem:[#allocation2 + $0x4] sm:$0xf]  ;;  %v313_v32 = vld [vmem:[#allocation2 + $0x90] sm:$0x1] }
  0x16   : > { %v1056_v14 = vld [vmem:[#allocation2 + $0x8] sm:$0x1]  ;;  %v1106_v15 = vshrl.u32 %v1054_v12, 16  ;;  %v1109_v16 = vshll.u32 %v1054_v12, 16  ;;  %v1115_v18 = vshll.u32 %v1055_v13, 16  ;;  %v1119_v19 = vshrl.u32 %v1055_v13, 16  ;;  %vm6914_vm8 = vmand %vm277_vm0, %vm328_vm7 }
  0x17   : > { %6135 = vmatpush3.bf16.msra.mxu0 %v6680_v6  ;;  %6660 = vmatpush3.bf16.msra.mxu1 %v6680_v6  ;;  %v1125_v20 = vshll.u32 %v1056_v14, 16  ;;  %v314_v38 = vsel %vm6906_vm6, 0, %v313_v32  ;;  %v364_v41 = vsel %vm6914_vm8, 0, %v363_v33  ;;  %v664_v42 = vshrl.u32 %v5993_v34, 16  ;;  %v6689_v44 = vld [vmem:[%s8466_s3 + $0x78] sm:$0xff]   ;;  %vm6932_vm10 = vmor %vm278_vm4, %vm474_vm9  ;;  %v6692_v54 = vld [vmem:[%s8466_s3 + $0xc0] sm:$0xff]  }
  0x18   : > { %6136 = vmatprep.subr.bf16.mxu0 %v6681_v7  ;;  %6653 = vmatprep.subr.bf16.mxu1 %v6681_v7  ;;  %v1108_v21 = vrot.slane %v1106_v15, 4  ;;  %v1111_v22 = vrot.slane %v1109_v16, 5  ;;  %v1117_v27 = vrot.slane %v1115_v18, 5  ;;  %v1121_v28 = vrot.slane %v1119_v19, 4  ;;  %315 = vst [vmem:[#allocation2 + $0x90] sm:$0x1] %v314_v38  ;;  %vm6944_vm11 = vmand %vm796_vm5, %vm328_vm7 }
  0x19   : > { %v1127_v37 = vrot.slane %v1125_v20, 5  ;;  %v667_v43 = vshll.u32 %v5993_v34, 16  ;;  %365 = vst [vmem:[#allocation2 + $0x98] sm:$0x1] %v364_v41  ;;  %v672_v46 = vshrl.u32 %v5994_v35, 16  ;;  %v675_v47 = vshll.u32 %v5994_v35, 16  ;;  %vm7161_vm14 = vmor %vm1665_vm12, %vm1666_vm13 }
  0x1a   : > { %v1112_v30 = vor.u32 %v1111_v22, %v1108_v21  ;;  %v1122_v36 = vor.u32 %v1121_v28, %v1117_v27  ;;  %v6690_v48 = vld [vmem:[%s8466_s3 + $0x38] sm:$0xff]   ;;  %v666_v50 = vrot.slane %v664_v42, 7  ;;  %v6693_v55 = vld [vmem:[%s8466_s3 + $0x140] sm:$0xff]   ;;  %v238_v1 = vld [vmem:[%s6885_s2 + $0x8] sm:$0xff]  ;;  %s5970_s20 = sshll.u32 %s8515_s1, 7  ;;  %s5638_s24 = sshll.u32 %s8515_s1, 1 }
  0x1b   : > { %6137 = vmatpush3.bf16.msra.mxu0 %v6682_v8  ;;  %6661 = vmatpush3.bf16.msra.mxu1 %v6682_v8  ;;  %v674_v53 = vrot.slane %v672_v46, 7  ;;  %v6691_v60 = vld [vmem:[#allocation2] sm:$0xff]   ;;  %v280_v2 = vld [vmem:[#allocation2 + $0xc] sm:$0x1]  ;;  %v330_v7 = vld [vmem:[#allocation2 + $0x14] sm:$0x1]  ;;  %v5972_v8 = vpack.c.bf16 %v238_v1, %v238_v1  ;;  %s8396_s23 = scalar_lea.vmem %s8467_s4, %s5970_s20  ;;  %s235_s27 = scalar_lea.vmem %s8468_s5, %s5638_s24 }
  0x1c   : > { %6138 = vmatprep.subr.bf16.mxu0 %v6683_v9  ;;  %6654 = vmatprep.subr.bf16.mxu1 %v6683_v9  ;;  %v1113_v40 = vrot.slane %v1112_v30, 4  ;;  %v1123_v45 = vrot.slane %v1122_v36, 4  ;;  %v669_v57 = vor.u32 %v667_v43, %v666_v50  ;;  %v670_v58 = vrot.slane %v666_v50, 4  ;;  %v237_v63 = vld [vmem:[%s6885_s2] sm:$0xff]  ;;  %v262_v15 = vld [vmem:[%s6885_s2 + $0xc8] sm:$0xff] }
  0x1d   : > { %v677_v61 = vor.u32 %v675_v47, %v674_v53  ;;  %v679_v62 = vrot.slane %v674_v53, 4  ;;  %v6696_v0 = vld [vmem:[%s8466_s3 + $0x100] sm:$0xff]   ;;  %v5971_v3 = vpack.c.bf16 %v237_v63, %v237_v63  ;;  %v281_v6 = vsel %vm6906_vm6, 0, %v280_v2  ;;  %v316_v19 = vld [vmem:[#allocation2 + $0x9c] sm:$0x1] }
  0x1e   : > { %v1118_v49 = vsel %vm6897_vm3, %v1113_v40, %v1117_v27  ;;  %v1128_v51 = vsel %vm6897_vm3, %v1123_v45, %v1127_v37  ;;  %v261_v9 = vld [vmem:[%s6885_s2 + $0xc0] sm:$0xff]  ;;  %282 = vst [vmem:[#allocation2 + $0xc] sm:$0x1] %v281_v6  ;;  %v331_v12 = vsel %vm6914_vm8, 0, %v330_v7  ;;  %v488_v18 = vshll.u32 %v5972_v8, 16  ;;  %v6704_v40 = vld [vmem:[%s8466_s3 + $0x148] sm:$0xff]  }
  0x1f   : > { %6139 = vmatpush3.bf16.msra.mxu0 %v6684_v10  ;;  %6662 = vmatpush3.bf16.msra.mxu1 %v6684_v10  ;;  %v5687_v56 = vcombine.low %v1118_v49, %v1128_v51  ;;  %v678_v4 = vsel %vm6932_vm10, %v670_v58, %v677_v61  ;;  %v875_v5 = vld [vmem:[#allocation2 + $0x90] sm:$0xf]  ;;  %v477_v13 = vshrl.u32 %v5971_v3, 16  ;;  %v480_v14 = vshll.u32 %v5971_v3, 16  ;;  %332 = vst [vmem:[#allocation2 + $0x14] sm:$0x1] %v331_v12 }
  0x20   : > { %6140 = vmatprep.subr.bf16.mxu0 %v6685_v11  ;;  %6655 = vmatprep.subr.bf16.mxu1 %v6685_v11  ;;  %v876_v10 = vsel %vm6944_vm11, %v669_v57, %v875_v5  ;;  %878 = vst [vmem:[#allocation2 + $0x94] sm:$0xf] %v678_v4  ;;  %v879_v11 = vld [vmem:[#allocation2 + $0x98] sm:$0x1]  ;;  %v366_v20 = vld [vmem:[#allocation2 + $0xa4] sm:$0x1]  ;;  %v5995_v21 = vpack.c.bf16 %v261_v9, %v261_v9 }
  0x21   : > { %4501 = vmatprep.mubr.bf16.mxu0 %v5687_v56  ;;  %877 = vst [vmem:[#allocation2 + $0x90] sm:$0xf] %v876_v10  ;;  %v880_v16 = vsel %vm6906_vm6, %v679_v62, %v879_v11  ;;  %v479_v22 = vrot.slane %v477_v13, 7  ;;  %v317_v23 = vsel %vm6906_vm6, 0, %v316_v19  ;;  %v367_v24 = vsel %vm6914_vm8, 0, %v366_v20  ;;  %v6706_v9 = vld [vmem:[%s8466_s3 + $0x108] sm:$0xff]  }
  0x22   : > { %881 = vst [vmem:[#allocation2 + $0x98] sm:$0x1] %v880_v16  ;;  %318 = vst [vmem:[#allocation2 + $0x9c] sm:$0x1] %v317_v23  ;;  %v681_v28 = vshrl.u32 %v5995_v21, 16  ;;  %v239_v10 = vld [vmem:[%s6885_s2 + $0x10] sm:$0xff] }
  0x23   : > { %6141 = vmatpush3.bf16.msra.mxu0 %v6686_v17  ;;  %6663 = vmatpush3.bf16.msra.mxu1 %v6686_v17  ;;  %v485_v17 = vshrl.u32 %v5972_v8, 16  ;;  %368 = vst [vmem:[#allocation2 + $0xa4] sm:$0x1] %v367_v24  ;;  %v482_v30 = vor.u32 %v480_v14, %v479_v22  ;;  %v483_v32 = vrot.slane %v479_v22, 4  ;;  %v240_v11 = vld [vmem:[%s6885_s2 + $0x18] sm:$0xff]  ;;  %v6989_v14 = vpack.c.bf16 %v239_v10, %v239_v10 }
  0x24   : > { %6142 = vmatprep.subr.bf16.mxu0 %v6687_v25  ;;  %6656 = vmatprep.subr.bf16.mxu1 %v6687_v25  ;;  %v5996_v25 = vpack.c.bf16 %v262_v15, %v262_v15  ;;  %v683_v37 = vrot.slane %v681_v28, 7  ;;  %v263_v15 = vld [vmem:[%s6885_s2 + $0xd0] sm:$0xff]  ;;  %v283_v24 = vld [vmem:[#allocation2 + $0x18] sm:$0x1]  ;;  %v6695_v28 = vld [vmem:[%s8466_s3 + $0x80] sm:$0xff]  }
  0x25   : > { %v487_v27 = vrot.slane %v485_v17, 7  ;;  %v798_v43 = vld [vmem:[#allocation2 + $0xc] sm:$0xf] }
  0x26   : > { %v689_v33 = vshrl.u32 %v5996_v25, 16  ;;  %v692_v34 = vshll.u32 %v5996_v25, 16  ;;  %v802_v58 = vld [vmem:[#allocation2 + $0x14] sm:$0x1]  ;;  %v494_v25 = vshrl.u32 %v6989_v14, 16 }
  0x27   : > { %6143 = vmatpush3.bf16.msra.mxu0 %v6688_v29  ;;  %6664 = vmatpush3.bf16.msra.mxu1 %v6688_v29  ;;  %v684_v29 = vshll.u32 %v5995_v21, 16  ;;  %v490_v35 = vor.u32 %v488_v18, %v487_v27  ;;  %v492_v36 = vrot.slane %v487_v27, 4  ;;  %v1091_v41 = vld [vmem:[#allocation2 + $0x94] sm:$0xf] }
  0x28   : > { %6144 = vmatprep.subr.bf16.mxu0 %v6689_v44  ;;  %6657 = vmatprep.subr.bf16.mxu1 %v6689_v44  ;;  %v691_v38 = vrot.slane %v689_v33, 7  ;;  %v1090_v45 = vld [vmem:[#allocation2 + $0x90] sm:$0xf]  ;;  %v1403_v46 = vshll.u32 %v1091_v41, 16  ;;  %v1407_v47 = vshrl.u32 %v1091_v41, 16  ;;  %v284_v33 = vsel %vm6906_vm6, 0, %v283_v24 }
  0x29   : > { %v491_v42 = vsel %vm6932_vm10, %v483_v32, %v490_v35  ;;  %v686_v44 = vor.u32 %v684_v29, %v683_v37  ;;  %v1092_v50 = vld [vmem:[#allocation2 + $0x98] sm:$0x1]  ;;  %v1394_v51 = vshrl.u32 %v1090_v45, 16  ;;  %v1397_v53 = vshll.u32 %v1090_v45, 16  ;;  %v882_v1 = vld [vmem:[#allocation2 + $0x9c] sm:$0xf] }
  0x2a   : > { %801 = vst [vmem:[#allocation2 + $0x10] sm:$0xf] %v491_v42  ;;  %v694_v49 = vor.u32 %v692_v34, %v691_v38  ;;  %v1409_v56 = vrot.slane %v1407_v47, 4  ;;  %v1413_v57 = vshll.u32 %v1092_v50, 16  ;;  %v803_v63 = vsel %vm6906_vm6, %v492_v36, %v802_v58  ;;  %v886_v2 = vld [vmem:[#allocation2 + $0xa4] sm:$0x1] }
  0x2b   : > { %6145 = vmatpush3.bf16.msra.mxu0 %v6690_v48  ;;  %6665 = vmatpush3.bf16.msra.mxu1 %v6690_v48  ;;  %v799_v48 = vsel %vm6944_vm11, %v482_v30, %v798_v43  ;;  %v1396_v61 = vrot.slane %v1394_v51, 4  ;;  %v1399_v62 = vrot.slane %v1397_v53, 5  ;;  %804 = vst [vmem:[#allocation2 + $0x14] sm:$0x1] %v803_v63  ;;  %v883_v5 = vsel %vm6944_vm11, %v686_v44, %v882_v1  ;;  %v6694_v21 = vld [vmem:[#allocation2 + $0x90] sm:$0xff]   ;;  %v6697_v29 = vld [vmem:[%s8466_s3 + $0xc8] sm:$0xff]  }
  0x2c   : > { %6242 = vmatprep.subr.bf16.mxu1 %v6692_v54  ;;  %6354 = vmatprep.subr.bf16.mxu0 %v6693_v55  ;;  %800 = vst [vmem:[#allocation2 + $0xc] sm:$0xf] %v799_v48  ;;  %v687_v54 = vrot.slane %v683_v37, 4  ;;  %v1405_v55 = vrot.slane %v1403_v46, 5  ;;  %v1415_v4 = vrot.slane %v1413_v57, 5  ;;  %v264_v34 = vld [vmem:[%s6885_s2 + $0xd8] sm:$0xff]  ;;  %v7006_v41 = vpack.c.bf16 %v240_v11, %v240_v11 }
  0x2d   : > { %v1400_v7 = vor.u32 %v1399_v62, %v1396_v61  ;;  %884 = vst [vmem:[#allocation2 + $0x9c] sm:$0xf] %v883_v5  ;;  %285 = vst [vmem:[#allocation2 + $0x18] sm:$0x1] %v284_v33  ;;  %v7008_v42 = vpack.c.bf16 %v263_v15, %v263_v15  ;;  %v6698_v43 = vld [vmem:[%s8466_s3 + $0x88] sm:$0xff]   ;;  %v6703_v15 = vld [vmem:[%s8466_s3 + $0xd8] sm:$0xff]  }
  0x2e   : > { %4502 = vmatmul.mubr.bf16.vlgmr.msra.gmra.mrb[0].mxu0 %v6691_v60  ;;  %v696_v60 = vrot.slane %v691_v38, 4  ;;  %v1410_v3 = vor.u32 %v1409_v56, %v1405_v55  ;;  %v319_v1 = vld [vmem:[#allocation2 + $0xa8] sm:$0x1]  ;;  %v6705_v24 = vld [vmem:[%s8466_s3 + $0x98] sm:$0xff]  }
  0x2f   : > { %6355 = vmatpush3.bf16.msra.mxu0 %v6696_v0  ;;  %v695_v0 = vsel %vm6932_vm10, %v687_v54, %v694_v49  ;;  %v1401_v12 = vrot.slane %v1400_v7, 4  ;;  %v7013_v49 = vpack.c.bf16 %v264_v34, %v264_v34  ;;  %v369_v7 = vld [vmem:[#allocation2 + $0xb0] sm:$0x1] }
  0x30   : > { %6356 = vmatprep.subr.bf16.mxu0 %v6704_v40  ;;  %885 = vst [vmem:[#allocation2 + $0xa0] sm:$0xf] %v695_v0  ;;  %v887_v6 = vsel %vm6906_vm6, %v696_v60, %v886_v2  ;;  %v1411_v8 = vrot.slane %v1410_v3, 4  ;;  %v333_v40 = vld [vmem:[#allocation2 + $0x20] sm:$0x1] }
  0x31   : > { %888 = vst [vmem:[#allocation2 + $0xa4] sm:$0x1] %v887_v6  ;;  %v1058_v13 = vld [vmem:[#allocation2 + $0x10] sm:$0xf]  ;;  %v1406_v20 = vsel %vm6897_vm3, %v1401_v12, %v1405_v55  ;;  %v334_v5 = vsel %vm6914_vm8, 0, %v333_v40  ;;  %v496_v6 = vrot.slane %v494_v25, 7 }
  0x32   : > { %v1416_v16 = vsel %vm6897_vm3, %v1411_v8, %v1415_v4  ;;  %v1139_v18 = vshll.u32 %v1058_v13, 16  ;;  %v1143_v19 = vshrl.u32 %v1058_v13, 16  ;;  %v1059_v35 = vld [vmem:[#allocation2 + $0x14] sm:$0x1]  ;;  %335 = vst [vmem:[#allocation2 + $0x20] sm:$0x1] %v334_v5 }
  0x33   : > { %v1057_v17 = vld [vmem:[#allocation2 + $0xc] sm:$0xf]  ;;  %6357 = vmatpush3.bf16.msra.mxu0 %v6706_v9  ;;  %v5699_v27 = vcombine.low %v1406_v20, %v1416_v16  ;;  %v1149_v45 = vshll.u32 %v1059_v35, 16  ;;  %v6700_v55 = vld [vmem:[%s8466_s3 + $0xd0] sm:$0xff]   ;;  %v497_v12 = vshll.u32 %v6989_v14, 16  ;;  %v500_v16 = vrot.slane %v496_v6, 4 }
  0x34   : > { %v1130_v22 = vshrl.u32 %v1057_v17, 16  ;;  %v1133_v23 = vshll.u32 %v1057_v17, 16  ;;  %v1141_v30 = vrot.slane %v1139_v18, 5  ;;  %v1145_v32 = vrot.slane %v1143_v19, 4  ;;  %v1093_v46 = vld [vmem:[#allocation2 + $0x9c] sm:$0xf] }
  0x35   : > { %4597 = vmatprep.mubr.bf16.mxu1 %v5699_v27  ;;  %v1418_v51 = vshrl.u32 %v1093_v46, 16  ;;  %v1421_v53 = vshll.u32 %v1093_v46, 16  ;;  %v1151_v57 = vrot.slane %v1149_v45, 5  ;;  %v6702_v4 = vld [vmem:[%s8466_s3 + $0x90] sm:$0xff]   ;;  %v502_v17 = vshrl.u32 %v7006_v41, 16  ;;  %v6708_v35 = vld [vmem:[%s8466_s3 + $0xe0] sm:$0xff]  }
  0x36   : > { %v1132_v36 = vrot.slane %v1130_v22, 4  ;;  %v1135_v37 = vrot.slane %v1133_v23, 5  ;;  %v1146_v44 = vor.u32 %v1145_v32, %v1141_v30  ;;  %4598 = vmatmul.mubr.bf16.vlgmr.msra.gmra.mrb[0].mxu1 %v6694_v21  ;;  %v6699_v9 = vld [vmem:[#allocation2 + $0xc] sm:$0xff]   ;;  %v505_v18 = vshll.u32 %v7006_v41, 16  ;;  %v805_v19 = vld [vmem:[#allocation2 + $0x18] sm:$0xf] }
  0x37   : > { %v1094_v38 = vld [vmem:[#allocation2 + $0xa0] sm:$0xf]  ;;  %6243 = vmatpush3.bf16.msra.mxu1 %v6695_v28  ;;  %v1420_v62 = vrot.slane %v1418_v51, 4  ;;  %v1423_v63 = vrot.slane %v1421_v53, 5  ;;  %v499_v23 = vor.u32 %v497_v12, %v496_v6  ;;  %v320_v14 = vsel %vm6906_vm6, 0, %v319_v1 }
  0x38   : > { %v1095_v47 = vld [vmem:[#allocation2 + $0xa4] sm:$0x1]  ;;  %v1427_v48 = vshll.u32 %v1094_v38, 16  ;;  %v1136_v50 = vor.u32 %v1135_v37, %v1132_v36  ;;  %v1431_v54 = vshrl.u32 %v1094_v38, 16  ;;  %v1147_v56 = vrot.slane %v1146_v44, 4  ;;  %6244 = vmatprep.subr.bf16.mxu1 %v6697_v29  ;;  %v6701_v22 = vld [vmem:[#allocation2 + $0x9c] sm:$0xff]  }
  0x39   : > { %v1437_v60 = vshll.u32 %v1095_v47, 16  ;;  %v1424_v10 = vor.u32 %v1423_v63, %v1420_v62  ;;  %v504_v25 = vrot.slane %v502_v17, 7  ;;  %321 = vst [vmem:[#allocation2 + $0xa8] sm:$0x1] %v320_v14  ;;  %v370_v27 = vsel %vm6914_vm8, 0, %v369_v7  ;;  %v241_v36 = vld [vmem:[%s6885_s2 + $0x20] sm:$0xff] }
  0x3a   : > { %v1429_v58 = vrot.slane %v1427_v48, 5  ;;  %v1137_v61 = vrot.slane %v1136_v50, 4  ;;  %v1433_v0 = vrot.slane %v1431_v54, 4  ;;  %v1152_v2 = vsel %vm6897_vm3, %v1147_v56, %v1151_v57  ;;  %371 = vst [vmem:[#allocation2 + $0xb0] sm:$0x1] %v370_v27  ;;  %v242_v44 = vld [vmem:[%s6885_s2 + $0x28] sm:$0xff] }
  0x3b   : > { %v1439_v3 = vrot.slane %v1437_v60, 5  ;;  %6245 = vmatpush3.bf16.msra.mxu1 %v6698_v43  ;;  %v1425_v20 = vrot.slane %v1424_v10, 4  ;;  %v698_v28 = vshrl.u32 %v7008_v42, 16  ;;  %v701_v29 = vshll.u32 %v7008_v42, 16  ;;  %v286_v45 = vld [vmem:[#allocation2 + $0x24] sm:$0x1] }
  0x3c   : > { %v1142_v8 = vsel %vm6897_vm3, %v1137_v61, %v1141_v30  ;;  %v1434_v11 = vor.u32 %v1433_v0, %v1429_v58  ;;  %6246 = vmatprep.subr.bf16.mxu1 %v6700_v55  ;;  %v806_v33 = vsel %vm6944_vm11, %v499_v23, %v805_v19  ;;  %v706_v34 = vshrl.u32 %v7013_v49, 16  ;;  %v265_v47 = vld [vmem:[%s6885_s2 + $0xe0] sm:$0xff]  ;;  %v336_v55 = vld [vmem:[#allocation2 + $0x2c] sm:$0x1]  ;;  %v322_v62 = vld [vmem:[#allocation2 + $0xb4] sm:$0x1] }
  0x3d   : > { %v5688_v13 = vcombine.low %v1142_v8, %v1152_v2  ;;  %v1430_v30 = vsel %vm6897_vm3, %v1425_v20, %v1429_v58  ;;  %v507_v38 = vor.u32 %v505_v18, %v504_v25  ;;  %v509_v40 = vrot.slane %v504_v25, 4  ;;  %807 = vst [vmem:[#allocation2 + $0x18] sm:$0xf] %v806_v33  ;;  %v809_v50 = vld [vmem:[#allocation2 + $0x20] sm:$0x1]  ;;  %v266_v61 = vld [vmem:[%s6885_s2 + $0xe8] sm:$0xff] }
  0x3e   : > { %v1435_v21 = vrot.slane %v1434_v11, 4  ;;  %v700_v41 = vrot.slane %v698_v28, 7  ;;  %v708_v42 = vrot.slane %v706_v34, 7  ;;  %v709_v43 = vshll.u32 %v7013_v49, 16  ;;  %v6710_v58 = vld [vmem:[%s8466_s3 + $0xa0] sm:$0xff]   ;;  %v6711_v7 = vld [vmem:[%s8466_s3 + $0xe8] sm:$0xff]  }
  0x3f   : > { %4509 = vmatprep.mubr.bf16.mxu0 %v5688_v13  ;;  %6247 = vmatpush3.bf16.msra.mxu1 %v6702_v4  ;;  %v5975_v46 = vpack.c.bf16 %v241_v36, %v241_v36  ;;  %v508_v48 = vsel %vm6932_vm10, %v500_v16, %v507_v38  ;;  %v287_v54 = vsel %vm6906_vm6, 0, %v286_v45  ;;  %v810_v49 = vsel %vm6906_vm6, %v509_v40, %v809_v50  ;;  %v6715_v4 = vld [vmem:[%s8466_s3 + $0x150] sm:$0xff]   ;;  %v6712_v13 = vld [vmem:[%s8466_s3 + $0xa8] sm:$0xff]  }
  0x40   : > { %4510 = vmatmul.mubr.bf16.gmra.mrb[4].mxu0 %v6699_v9  ;;  %v1440_v32 = vsel %vm6897_vm3, %v1435_v21, %v1439_v3  ;;  %6248 = vmatprep.subr.bf16.mxu1 %v6703_v15  ;;  %v703_v51 = vor.u32 %v701_v29, %v700_v41  ;;  %v704_v53 = vrot.slane %v700_v41, 4  ;;  %808 = vst [vmem:[#allocation2 + $0x1c] sm:$0xf] %v508_v48  ;;  %v713_v57 = vrot.slane %v708_v42, 4  ;;  %v372_v3 = vld [vmem:[#allocation2 + $0xbc] sm:$0x1] }
  0x41   : > { %v5700_v37 = vcombine.low %v1430_v30, %v1440_v32  ;;  %v711_v56 = vor.u32 %v709_v43, %v708_v42  ;;  %288 = vst [vmem:[#allocation2 + $0x24] sm:$0x1] %v287_v54  ;;  %v337_v60 = vsel %vm6914_vm8, 0, %v336_v55  ;;  %811 = vst [vmem:[#allocation2 + $0x20] sm:$0x1] %v810_v49  ;;  %v5976_v63 = vpack.c.bf16 %v242_v44, %v242_v44  ;;  %v6718_v18 = vld [vmem:[%s8466_s3 + $0x110] sm:$0xff]  }
  0x42   : > { %338 = vst [vmem:[#allocation2 + $0x2c] sm:$0x1] %v337_v60  ;;  %v511_v0 = vshrl.u32 %v5975_v46, 16  ;;  %v514_v1 = vshll.u32 %v5975_v46, 16  ;;  %v323_v2 = vsel %vm6906_vm6, 0, %v322_v62  ;;  %v373_v8 = vsel %vm6914_vm8, 0, %v372_v3  ;;  %6358 = vmatprep.subr.bf16.mxu0 %v6715_v4 }
  0x43   : > { %4605 = vmatprep.mubr.bf16.mxu1 %v5700_v37  ;;  %6249 = vmatpush3.bf16.msra.mxu1 %v6705_v24  ;;  %v712_v5 = vsel %vm6932_vm10, %v704_v53, %v711_v56  ;;  %v889_v6 = vld [vmem:[#allocation2 + $0xa8] sm:$0xf]  ;;  %324 = vst [vmem:[#allocation2 + $0xb4] sm:$0x1] %v323_v2  ;;  %v5999_v9 = vpack.c.bf16 %v265_v47, %v265_v47  ;;  %v893_v12 = vld [vmem:[#allocation2 + $0xb0] sm:$0x1] }
  0x44   : > { %4606 = vmatmul.mubr.bf16.gmra.mrb[4].mxu1 %v6701_v22  ;;  %6250 = vmatprep.subr.bf16.mxu1 %v6708_v35  ;;  %v7080_v10 = vpack.c.bf16 %v266_v61, %v266_v61  ;;  %v890_v11 = vsel %vm6944_vm11, %v703_v51, %v889_v6  ;;  %892 = vst [vmem:[#allocation2 + $0xac] sm:$0xf] %v712_v5  ;;  %v513_v15 = vrot.slane %v511_v0, 7  ;;  %v519_v16 = vshrl.u32 %v5976_v63, 16  ;;  %v1060_v19 = vld [vmem:[#allocation2 + $0x18] sm:$0xf] }
  0x45   : > { %v522_v17 = vshll.u32 %v5976_v63, 16  ;;  %374 = vst [vmem:[#allocation2 + $0xbc] sm:$0x1] %v373_v8  ;;  %891 = vst [vmem:[#allocation2 + $0xa8] sm:$0xf] %v890_v11  ;;  %v894_v20 = vsel %vm6906_vm6, %v713_v57, %v893_v12  ;;  %v715_v21 = vshrl.u32 %v5999_v9, 16  ;;  %6359 = vmatpush3.bf16.msra.mxu0 %v6718_v18 }
  0x46   : > { %v718_v22 = vshll.u32 %v5999_v9, 16  ;;  %v1154_v23 = vshrl.u32 %v1060_v19, 16  ;;  %v1157_v14 = vshll.u32 %v1060_v19, 16  ;;  %895 = vst [vmem:[#allocation2 + $0xb0] sm:$0x1] %v894_v20  ;;  %v516_v24 = vor.u32 %v514_v1, %v513_v15  ;;  %v6714_v27 = vld [vmem:[%s8466_s3 + $0xf0] sm:$0xff]  }
  0x47   : > { %6251 = vmatpush3.bf16.msra.mxu1 %v6710_v58  ;;  %v517_v25 = vrot.slane %v513_v15, 4  ;;  %v521_v28 = vrot.slane %v519_v16, 7  ;;  %v7095_v29 = vrot.slane %v715_v21, 7  ;;  %v723_v30 = vshrl.u32 %v7080_v10, 16  ;;  %v1061_v33 = vld [vmem:[#allocation2 + $0x1c] sm:$0xf] }
  0x48   : > { %6252 = vmatprep.subr.bf16.mxu1 %v6711_v7  ;;  %v726_v32 = vshll.u32 %v7080_v10, 16  ;;  %v1156_v34 = vrot.slane %v1154_v23, 4  ;;  %v1159_v35 = vrot.slane %v1157_v14, 5  ;;  %v6717_v36 = vld [vmem:[%s8466_s3 + $0xb0] sm:$0xff]   ;;  %v1062_v37 = vld [vmem:[#allocation2 + $0x20] sm:$0x1] }
  0x49   : > { %v1163_v38 = vshll.u32 %v1061_v33, 16  ;;  %v1167_v40 = vshrl.u32 %v1061_v33, 16  ;;  %v524_v41 = vor.u32 %v522_v17, %v521_v28  ;;  %v526_v42 = vrot.slane %v521_v28, 4  ;;  %v6719_v43 = vld [vmem:[%s8466_s3 + $0xf8] sm:$0xff]   ;;  %v812_v46 = vld [vmem:[#allocation2 + $0x24] sm:$0xf] }
  0x4a   : > { %v1160_v44 = vor.u32 %v1159_v35, %v1156_v34  ;;  %v1173_v45 = vshll.u32 %v1062_v37, 16  ;;  %v816_v47 = vld [vmem:[#allocation2 + $0x2c] sm:$0x1]  ;;  %v720_v48 = vor.u32 %v718_v22, %v7095_v29  ;;  %v721_v50 = vrot.slane %v7095_v29, 4  ;;  %v896_v7 = vld [vmem:[#allocation2 + $0xb4] sm:$0xf] }
  0x4b   : > { %6253 = vmatpush3.bf16.msra.mxu1 %v6712_v13  ;;  %v1165_v51 = vrot.slane %v1163_v38, 5  ;;  %v1169_v53 = vrot.slane %v1167_v40, 4  ;;  %v1097_v54 = vld [vmem:[#allocation2 + $0xac] sm:$0xf]  ;;  %v525_v55 = vsel %vm6932_vm10, %v517_v25, %v524_v41  ;;  %v813_v49 = vsel %vm6944_vm11, %v516_v24, %v812_v46  ;;  %v6707_v9 = vld [vmem:[#allocation2 + $0x18] sm:$0xff]   ;;  %v243_v23 = vld [vmem:[%s6885_s2 + $0x30] sm:$0xff] }
  0x4c   : > { %6254 = vmatprep.subr.bf16.mxu1 %v6714_v27  ;;  %v1161_v56 = vrot.slane %v1160_v44, 4  ;;  %v1175_v57 = vrot.slane %v1173_v45, 5  ;;  %v1096_v58 = vld [vmem:[#allocation2 + $0xa8] sm:$0xf]  ;;  %v1451_v60 = vshll.u32 %v1097_v54, 16  ;;  %v1455_v61 = vshrl.u32 %v1097_v54, 16 }
  0x4d   : > { %814 = vst [vmem:[#allocation2 + $0x24] sm:$0xf] %v813_v49  ;;  %815 = vst [vmem:[#allocation2 + $0x28] sm:$0xf] %v525_v55  ;;  %v1170_v62 = vor.u32 %v1169_v53, %v1165_v51  ;;  %v1098_v63 = vld [vmem:[#allocation2 + $0xb0] sm:$0x1]  ;;  %v817_v2 = vsel %vm6906_vm6, %v526_v42, %v816_v47  ;;  %v897_v17 = vsel %vm6944_vm11, %v720_v48, %v896_v7 }
  0x4e   : > { %v1442_v0 = vshrl.u32 %v1096_v58, 16  ;;  %v1445_v1 = vshll.u32 %v1096_v58, 16  ;;  %v1166_v3 = vsel %vm6897_vm3, %v1161_v56, %v1165_v51  ;;  %v1453_v4 = vrot.slane %v1451_v60, 5  ;;  %818 = vst [vmem:[#allocation2 + $0x2c] sm:$0x1] %v817_v2  ;;  %v6720_v18 = vld [vmem:[%s8466_s3 + $0xb8] sm:$0xff]  }
  0x4f   : > { %v1457_v5 = vrot.slane %v1455_v61, 4  ;;  %v1461_v6 = vshll.u32 %v1098_v63, 16  ;;  %6255 = vmatpush3.bf16.msra.mxu1 %v6717_v36  ;;  %v1171_v8 = vrot.slane %v1170_v62, 4  ;;  %v725_v12 = vrot.slane %v723_v30, 7  ;;  %v900_v13 = vld [vmem:[#allocation2 + $0xbc] sm:$0x1] }
  0x50   : > { %v1444_v10 = vrot.slane %v1442_v0, 4  ;;  %v1447_v11 = vrot.slane %v1445_v1, 5  ;;  %6256 = vmatprep.subr.bf16.mxu1 %v6719_v43  ;;  %898 = vst [vmem:[#allocation2 + $0xb4] sm:$0xf] %v897_v17  ;;  %v7123_v25 = vpack.c.bf16 %v243_v23, %v243_v23  ;;  %v6709_v34 = vld [vmem:[#allocation2 + $0xa8] sm:$0xff]   ;;  %v244_v47 = vld [vmem:[%s6885_s2 + $0x38] sm:$0xff] }
  0x51   : > { %v1458_v15 = vor.u32 %v1457_v5, %v1453_v4  ;;  %v1463_v16 = vrot.slane %v1461_v6, 5  ;;  %v1176_v19 = vsel %vm6897_vm3, %v1171_v8, %v1175_v57  ;;  %v728_v21 = vor.u32 %v726_v32, %v725_v12  ;;  %v6723_v48 = vld [vmem:[%s8466_s3 + $0x1c0] sm:$0xff]   ;;  %v289_v55 = vld [vmem:[#allocation2 + $0x30] sm:$0x1]  ;;  %v339_v60 = vld [vmem:[#allocation2 + $0x38] sm:$0x1] }
  0x52   : > { %v1448_v20 = vor.u32 %v1447_v11, %v1444_v10  ;;  %v730_v22 = vrot.slane %v725_v12, 4  ;;  %v5689_v14 = vcombine.low %v1166_v3, %v1176_v19  ;;  %v528_v42 = vshrl.u32 %v7123_v25, 16 }
  0x53   : > { %v1459_v24 = vrot.slane %v1458_v15, 4  ;;  %6257 = vmatpush3.bf16.msra.mxu1 %v6720_v18  ;;  %v729_v30 = vsel %vm6932_vm10, %v721_v50, %v728_v21  ;;  %v290_v62 = vsel %vm6906_vm6, 0, %v289_v55  ;;  %v340_v63 = vsel %vm6914_vm8, 0, %v339_v60  ;;  %v6725_v15 = vld [vmem:[%s8466_s3 + $0x158] sm:$0xff]   ;;  %v342_v60 = vld [vmem:[#allocation2 + $0x44] sm:$0x1] }
  0x54   : > { %v1449_v27 = vrot.slane %v1448_v20, 4  ;;  %v1063_v28 = vld [vmem:[#allocation2 + $0x24] sm:$0xf]  ;;  %v1064_v29 = vld [vmem:[#allocation2 + $0x28] sm:$0xf]  ;;  %v901_v33 = vsel %vm6906_vm6, %v730_v22, %v900_v13  ;;  %4517 = vmatprep.mubr.bf16.mxu0 %v5689_v14  ;;  %6466 = vmatprep.subr.bf16.mxu1 %v6723_v48  ;;  %v530_v0 = vrot.slane %v528_v42, 7  ;;  %v5978_v5 = vpack.c.bf16 %v244_v47, %v244_v47 }
  0x55   : > { %v1464_v32 = vsel %vm6897_vm3, %v1459_v24, %v1463_v16  ;;  %v1178_v35 = vshrl.u32 %v1063_v28, 16  ;;  %v1181_v36 = vshll.u32 %v1063_v28, 16  ;;  %v1187_v37 = vshll.u32 %v1064_v29, 16  ;;  %899 = vst [vmem:[#allocation2 + $0xb8] sm:$0xf] %v729_v30  ;;  %4518 = vmatmul.mubr.bf16.gmra.mrb[8].mxu0 %v6707_v9  ;;  %v6713_v11 = vld [vmem:[#allocation2 + $0x24] sm:$0xff]   ;;  %6360 = vmatprep.subr.bf16.mxu0 %v6725_v15 }
  0x56   : > { %902 = vst [vmem:[#allocation2 + $0xbc] sm:$0x1] %v901_v33  ;;  %v1454_v38 = vsel %vm6897_vm3, %v1449_v27, %v1453_v4  ;;  %v1065_v40 = vld [vmem:[#allocation2 + $0x2c] sm:$0x1]  ;;  %v1191_v41 = vshrl.u32 %v1064_v29, 16  ;;  %v531_v13 = vshll.u32 %v7123_v25, 16 }
  0x57   : > { %v5701_v43 = vcombine.low %v1454_v38, %v1464_v32  ;;  %v1180_v44 = vrot.slane %v1178_v35, 4  ;;  %v1183_v45 = vrot.slane %v1181_v36, 5  ;;  %v1189_v46 = vrot.slane %v1187_v37, 5  ;;  %v1099_v54 = vld [vmem:[#allocation2 + $0xb4] sm:$0xf]  ;;  %v6726_v24 = vld [vmem:[%s8466_s3 + $0x118] sm:$0xff]  }
  0x58   : > { %v1193_v50 = vrot.slane %v1191_v41, 4  ;;  %v1197_v51 = vshll.u32 %v1065_v40, 16  ;;  %v1466_v57 = vshrl.u32 %v1099_v54, 16  ;;  %v1469_v58 = vshll.u32 %v1099_v54, 16  ;;  %291 = vst [vmem:[#allocation2 + $0x30] sm:$0x1] %v290_v62  ;;  %6361 = vmatpush3.bf16.msra.mxu0 %v6726_v24 }
  0x59   : > { %4613 = vmatprep.mubr.bf16.mxu1 %v5701_v43  ;;  %v1184_v53 = vor.u32 %v1183_v45, %v1180_v44  ;;  %341 = vst [vmem:[#allocation2 + $0x38] sm:$0x1] %v340_v63  ;;  %v533_v20 = vor.u32 %v531_v13, %v530_v0  ;;  %v534_v21 = vrot.slane %v530_v0, 4  ;;  %v536_v22 = vshrl.u32 %v5978_v5, 16  ;;  %v1569_v14 = vld [vmem:[#allocation2] sm:$0xe] }
  0x5a   : > { %4614 = vmatmul.mubr.bf16.gmra.mrb[8].mxu1 %v6709_v34  ;;  %v1194_v49 = vor.u32 %v1193_v50, %v1189_v46  ;;  %v1199_v56 = vrot.slane %v1197_v51, 5  ;;  %v1468_v4 = vrot.slane %v1466_v57, 4  ;;  %v1471_v7 = vrot.slane %v1469_v58, 5  ;;  %v1570_v29 = vld [vmem:[#allocation2 + $0x4] sm:$0xf]  ;;  %v246_v42 = vld [vmem:[%s6885_s2 + $0x48] sm:$0xff] }
  0x5b   : > { %v1185_v61 = vrot.slane %v1184_v53, 4  ;;  %v539_v23 = vshll.u32 %v5978_v5, 16  ;;  %v1571_v30 = vld [vmem:[#allocation2 + $0x8] sm:$0x1]  ;;  %v538_v33 = vrot.slane %v536_v22, 7  ;;  %v5703_v32 = vrot.slane %v1569_v14, 9 }
  0x5c   : > { %v1195_v1 = vrot.slane %v1194_v49, 4  ;;  %v1100_v2 = vld [vmem:[#allocation2 + $0xb8] sm:$0xf]  ;;  %v1472_v17 = vor.u32 %v1471_v7, %v1468_v4  ;;  %v1670_v34 = vrot.slane %v1570_v29, 5  ;;  %v245_v35 = vld [vmem:[%s6885_s2 + $0x40] sm:$0xff]  ;;  %v6722_v47 = vld [vmem:[#allocation2 + $0xc] sm:$0xff]   ;;  %v5980_v54 = vpack.c.bf16 %v246_v42, %v246_v42 }
  0x5d   : > { %v1101_v3 = vld [vmem:[#allocation2 + $0xbc] sm:$0x1]  ;;  %v1190_v6 = vsel %vm6897_vm3, %v1185_v61, %v1189_v46  ;;  %v1475_v8 = vshll.u32 %v1100_v2, 16  ;;  %v1479_v9 = vshrl.u32 %v1100_v2, 16  ;;  %v6716_v38 = vld [vmem:[#allocation2 + $0xb4] sm:$0xff]   ;;  %v5979_v43 = vpack.c.bf16 %v245_v35, %v245_v35 }
  0x5e   : > { %v1200_v10 = vsel %vm6897_vm3, %v1195_v1, %v1199_v56  ;;  %v1485_v12 = vshll.u32 %v1101_v3, 16  ;;  %v1473_v25 = vrot.slane %v1472_v17, 4  ;;  %v541_v44 = vor.u32 %v539_v23, %v538_v33  ;;  %v292_v58 = vld [vmem:[#allocation2 + $0x3c] sm:$0x1]  ;;  %v247_v1 = vld [vmem:[%s6885_s2 + $0x50] sm:$0xff]  ;;  %v6724_v23 = vld [vmem:[%s8466_s3 + $0x180] sm:$0xff]  }
  0x5f   : > { %v5690_v16 = vcombine.low %v1190_v6, %v1200_v10  ;;  %v1477_v18 = vrot.slane %v1475_v8, 5  ;;  %v1481_v19 = vrot.slane %v1479_v9, 4  ;;  %v819_v40 = vld [vmem:[#allocation2 + $0x30] sm:$0xf]  ;;  %v543_v45 = vrot.slane %v538_v33, 4  ;;  %v248_v9 = vld [vmem:[%s6885_s2 + $0x58] sm:$0xff] }
  0x60   : > { %v1487_v28 = vrot.slane %v1485_v12, 5  ;;  %v823_v41 = vld [vmem:[#allocation2 + $0x38] sm:$0x1]  ;;  %v820_v46 = vsel %vm6944_vm11, %v533_v20, %v819_v40  ;;  %v1673_v50 = vrot.slane %v1571_v30, 5  ;;  %v1672_v53 = vrot.slane %v1670_v34, 4 }
  0x61   : > { %4525 = vmatprep.mubr.bf16.mxu0 %v5690_v16  ;;  %v1482_v27 = vor.u32 %v1481_v19, %v1477_v18  ;;  %v1478_v36 = vsel %vm6897_vm3, %v1473_v25, %v1477_v18  ;;  %821 = vst [vmem:[#allocation2 + $0x30] sm:$0xf] %v820_v46  ;;  %v545_v55 = vshrl.u32 %v5979_v43, 16  ;;  %v542_v56 = vsel %vm6932_vm10, %v534_v21, %v541_v44  ;;  %v1572_v7 = vld [vmem:[#allocation2 + $0xc] sm:$0xe]  ;;  %v6731_v16 = vld [vmem:[%s8466_s3 + $0x160] sm:$0xff]  }
  0x62   : > { %4526 = vmatmul.mubr.bf16.gmra.mrb[12].mxu0 %v6713_v11  ;;  %v824_v57 = vsel %vm6906_vm6, %v543_v45, %v823_v41  ;;  %822 = vst [vmem:[#allocation2 + $0x34] sm:$0xf] %v542_v56  ;;  %v1671_v61 = vsel %vm7161_vm14, %v5703_v32, %v1670_v34  ;;  %v293_v62 = vsel %vm6906_vm6, 0, %v292_v58  ;;  %v343_v63 = vsel %vm6914_vm8, 0, %v342_v60  ;;  %v1573_v8 = vld [vmem:[#allocation2 + $0x10] sm:$0xf]  ;;  %6362 = vmatprep.subr.bf16.mxu0 %v6731_v16 }
  0x63   : > { %v1483_v37 = vrot.slane %v1482_v27, 4  ;;  %825 = vst [vmem:[#allocation2 + $0x38] sm:$0x1] %v824_v57  ;;  %v547_v0 = vrot.slane %v545_v55, 7  ;;  %v1674_v2 = vsel %vm7161_vm14, %v1672_v53, %v1673_v50  ;;  %294 = vst [vmem:[#allocation2 + $0x3c] sm:$0x1] %v293_v62  ;;  %v7181_v10 = vpack.c.bf16 %v247_v1, %v247_v1 }
  0x64   : > { %344 = vst [vmem:[#allocation2 + $0x44] sm:$0x1] %v343_v63  ;;  %v548_v3 = vshll.u32 %v5979_v43, 16  ;;  %v553_v4 = vshrl.u32 %v5980_v54, 16  ;;  %v556_v5 = vshll.u32 %v5980_v54, 16  ;;  %v5704_v13 = vrot.slane %v1572_v7, 9 }
  0x65   : > { %v1488_v51 = vsel %vm6897_vm3, %v1483_v37, %v1487_v28  ;;  %v551_v6 = vrot.slane %v547_v0, 4  ;;  %v1574_v12 = vld [vmem:[#allocation2 + $0x14] sm:$0x1]  ;;  %v1677_v15 = vrot.slane %v1573_v8, 5  ;;  %v5719_v17 = vcombine.low %v1671_v61, %v1674_v2  ;;  %v295_v19 = vld [vmem:[#allocation2 + $0x48] sm:$0x1] }
  0x66   : > { %v5702_v49 = vcombine.low %v1478_v36, %v1488_v51  ;;  %v555_v11 = vrot.slane %v553_v4, 7  ;;  %v1680_v18 = vrot.slane %v1574_v12, 5  ;;  %v345_v20 = vld [vmem:[#allocation2 + $0x50] sm:$0x1]  ;;  %v562_v21 = vshrl.u32 %v7181_v10, 16  ;;  %v6728_v27 = vld [vmem:[#allocation2 + $0x18] sm:$0xff]  }
  0x67   : > { %v550_v14 = vor.u32 %v548_v3, %v547_v0  ;;  %v1679_v28 = vrot.slane %v1677_v15, 4  ;;  %v296_v33 = vsel %vm6906_vm6, 0, %v295_v19  ;;  %v346_v32 = vsel %vm6914_vm8, 0, %v345_v20  ;;  %v6732_v43 = vld [vmem:[%s8466_s3 + $0x1c8] sm:$0xff]   ;;  %v6733_v61 = vld [vmem:[%s8466_s3 + $0x120] sm:$0xff]  }
  0x68   : > { %4621 = vmatprep.mubr.bf16.mxu1 %v5702_v49  ;;  %v1066_v22 = vld [vmem:[#allocation2 + $0x30] sm:$0xf]  ;;  %v558_v24 = vor.u32 %v556_v5, %v555_v11  ;;  %v560_v25 = vrot.slane %v555_v11, 4  ;;  %297 = vst [vmem:[#allocation2 + $0x48] sm:$0x1] %v296_v33  ;;  %v5982_v37 = vpack.c.bf16 %v248_v9, %v248_v9  ;;  %v564_v51 = vrot.slane %v562_v21, 7  ;;  %6363 = vmatpush3.bf16.msra.mxu0 %v6733_v61 }
  0x69   : > { %4622 = vmatmul.mubr.bf16.gmra.mrb[12].mxu1 %v6716_v38  ;;  %v1202_v29 = vshrl.u32 %v1066_v22, 16  ;;  %v1205_v30 = vshll.u32 %v1066_v22, 16  ;;  %v1067_v34 = vld [vmem:[#allocation2 + $0x34] sm:$0xf]  ;;  %347 = vst [vmem:[#allocation2 + $0x50] sm:$0x1] %v346_v32  ;;  %v1681_v50 = vsel %vm7161_vm14, %v1679_v28, %v1680_v18 }
  0x6a   : > { %4662 = vmatprep.mubr.bf16.mxu1 %v6722_v47  ;;  %v1068_v35 = vld [vmem:[#allocation2 + $0x38] sm:$0x1]  ;;  %v559_v36 = vsel %vm6932_vm10, %v551_v6, %v558_v24  ;;  %v1211_v41 = vshll.u32 %v1067_v34, 16  ;;  %v1215_v42 = vshrl.u32 %v1067_v34, 16  ;;  %v826_v45 = vld [vmem:[#allocation2 + $0x3c] sm:$0xf]  ;;  %v1678_v47 = vsel %vm7161_vm14, %v5704_v13, %v1677_v15 }
  0x6b   : > { %v1204_v38 = vrot.slane %v1202_v29, 4  ;;  %v1207_v40 = vrot.slane %v1205_v30, 5  ;;  %829 = vst [vmem:[#allocation2 + $0x40] sm:$0xf] %v559_v36  ;;  %v1221_v44 = vshll.u32 %v1068_v35, 16  ;;  %v827_v49 = vsel %vm6944_vm11, %v550_v14, %v826_v45  ;;  %v6734_v2 = vld [vmem:[%s8466_s3 + $0x188] sm:$0xff]  }
  0x6c   : > { %v830_v46 = vld [vmem:[#allocation2 + $0x44] sm:$0x1]  ;;  %v1213_v54 = vrot.slane %v1211_v41, 5  ;;  %v1217_v55 = vrot.slane %v1215_v42, 4  ;;  %828 = vst [vmem:[#allocation2 + $0x3c] sm:$0xf] %v827_v49 }
  0x6d   : > { %v1208_v53 = vor.u32 %v1207_v40, %v1204_v38  ;;  %v1223_v56 = vrot.slane %v1221_v44, 5  ;;  %v831_v57 = vsel %vm6906_vm6, %v560_v25, %v830_v46  ;;  %v565_v58 = vshll.u32 %v7181_v10, 16  ;;  %v6730_v4 = vld [vmem:[#allocation2 + $0x24] sm:$0xff]   ;;  %v1575_v5 = vld [vmem:[#allocation2 + $0x18] sm:$0xe]  ;;  %v6721_v9 = vld [vmem:[#allocation2 + $0x30] sm:$0xff]  }
  0x6e   : > { %v568_v60 = vrot.slane %v564_v51, 4  ;;  %v1218_v63 = vor.u32 %v1217_v55, %v1213_v54  ;;  %832 = vst [vmem:[#allocation2 + $0x44] sm:$0x1] %v831_v57  ;;  %v570_v0 = vshrl.u32 %v5982_v37, 16  ;;  %v573_v1 = vshll.u32 %v5982_v37, 16  ;;  %v249_v25 = vld [vmem:[%s6885_s2 + $0x60] sm:$0xff] }
  0x6f   : > { %v1209_v62 = vrot.slane %v1208_v53, 4  ;;  %v567_v3 = vor.u32 %v565_v58, %v564_v51  ;;  %v1576_v6 = vld [vmem:[#allocation2 + $0x1c] sm:$0xf]  ;;  %v5720_v10 = vcombine.low %v1678_v47, %v1681_v50  ;;  %v833_v12 = vld [vmem:[#allocation2 + $0x48] sm:$0xf]  ;;  %v5705_v14 = vrot.slane %v1575_v5, 9 }
  0x70   : > { %v1219_v8 = vrot.slane %v1218_v63, 4  ;;  %v572_v11 = vrot.slane %v570_v0, 7  ;;  %v837_v13 = vld [vmem:[#allocation2 + $0x50] sm:$0x1]  ;;  %v1684_v24 = vrot.slane %v1576_v6, 5  ;;  %v5983_v33 = vpack.c.bf16 %v249_v25, %v249_v25  ;;  %v250_v38 = vld [vmem:[%s6885_s2 + $0x68] sm:$0xff] }
  0x71   : > { %4663 = vmatmul.mubr.bf16.vlgmr.msra.gmra.mrb[16].mxu1 %v5719_v17  ;;  %v1214_v7 = vsel %vm6897_vm3, %v1209_v62, %v1213_v54  ;;  %v834_v16 = vsel %vm6944_vm11, %v567_v3, %v833_v12  ;;  %v1577_v17 = vld [vmem:[#allocation2 + $0x20] sm:$0x1]  ;;  %v298_v46 = vld [vmem:[#allocation2 + $0x54] sm:$0x1]  ;;  %v348_v47 = vld [vmem:[#allocation2 + $0x5c] sm:$0x1]  ;;  %v5984_v50 = vpack.c.bf16 %v250_v38, %v250_v38 }
  0x72   : > { %6467 = vmatpush3.bf16.msra.mxu1 %v6724_v23  ;;  %4670 = vmatprep.mubr.bf16.mxu1 %v6728_v27  ;;  %v1070_v15 = vld [vmem:[#allocation2 + $0x40] sm:$0xf]  ;;  %v1224_v18 = vsel %vm6897_vm3, %v1219_v8, %v1223_v56  ;;  %v575_v21 = vor.u32 %v573_v1, %v572_v11  ;;  %835 = vst [vmem:[#allocation2 + $0x48] sm:$0xf] %v834_v16  ;;  %v577_v23 = vrot.slane %v572_v11, 4  ;;  %v1686_v42 = vrot.slane %v1684_v24, 4 }
  0x73   : > { %6468 = vmatprep.subr.bf16.mxu1 %v6732_v43  ;;  %v1235_v19 = vshll.u32 %v1070_v15, 16  ;;  %v1239_v20 = vshrl.u32 %v1070_v15, 16  ;;  %v5691_v22 = vcombine.low %v1214_v7, %v1224_v18  ;;  %v1069_v27 = vld [vmem:[#allocation2 + $0x3c] sm:$0xf]  ;;  %v1685_v37 = vsel %vm7161_vm14, %v5705_v14, %v1684_v24  ;;  %v6736_v51 = vld [vmem:[#allocation2 + $0x30] sm:$0xff]   ;;  %v6737_v56 = vld [vmem:[%s8466_s3 + $0x168] sm:$0xff]  }
  0x74   : > { %v576_v30 = vsel %vm6932_vm10, %v568_v60, %v575_v21  ;;  %v1226_v34 = vshrl.u32 %v1069_v27, 16  ;;  %v1229_v35 = vshll.u32 %v1069_v27, 16  ;;  %v838_v36 = vsel %vm6906_vm6, %v577_v23, %v837_v13  ;;  %6364 = vmatprep.subr.bf16.mxu0 %v6737_v56  ;;  %v6738_v3 = vld [vmem:[%s8466_s3 + $0x128] sm:$0xff]   ;;  %v1578_v8 = vld [vmem:[#allocation2 + $0x24] sm:$0xe]  ;;  %v6727_v13 = vld [vmem:[#allocation2 + $0x3c] sm:$0xff]  }
  0x75   : > { %v7221_v28 = vrot.slane %v1235_v19, 5  ;;  %v1241_v29 = vrot.slane %v1239_v20, 4  ;;  %4533 = vmatprep.mubr.bf16.mxu0 %v5691_v22  ;;  %v1071_v32 = vld [vmem:[#allocation2 + $0x44] sm:$0x1]  ;;  %836 = vst [vmem:[#allocation2 + $0x4c] sm:$0xf] %v576_v30  ;;  %6365 = vmatpush3.bf16.msra.mxu0 %v6738_v3 }
  0x76   : > { %6469 = vmatpush3.bf16.msra.mxu1 %v6734_v2  ;;  %4534 = vmatmul.mubr.bf16.gmra.mrb[16].mxu0 %v6721_v9  ;;  %v1245_v41 = vshll.u32 %v1071_v32, 16  ;;  %839 = vst [vmem:[#allocation2 + $0x50] sm:$0x1] %v838_v36  ;;  %v1687_v43 = vrot.slane %v1577_v17, 5  ;;  %v1228_v44 = vrot.slane %v1226_v34, 4  ;;  %v1231_v45 = vrot.slane %v1229_v35, 5 }
  0x77   : > { %v1242_v40 = vor.u32 %v1241_v29, %v7221_v28  ;;  %v299_v49 = vsel %vm6906_vm6, 0, %v298_v46  ;;  %v349_v61 = vsel %vm6914_vm8, 0, %v348_v47  ;;  %v579_v62 = vshrl.u32 %v5983_v33, 16  ;;  %v251_v19 = vld [vmem:[%s6885_s2 + $0x70] sm:$0xff]  ;;  %v1579_v14 = vld [vmem:[#allocation2 + $0x28] sm:$0xf] }
  0x78   : > { %v1247_v54 = vrot.slane %v1245_v41, 5  ;;  %v1688_v55 = vsel %vm7161_vm14, %v1686_v42, %v1687_v43  ;;  %v1232_v57 = vor.u32 %v1231_v45, %v1228_v44  ;;  %300 = vst [vmem:[#allocation2 + $0x54] sm:$0x1] %v299_v49  ;;  %350 = vst [vmem:[#allocation2 + $0x5c] sm:$0x1] %v349_v61  ;;  %v582_v2 = vshll.u32 %v5983_v33, 16 }
  0x79   : > { %4671 = vmatmul.mubr.bf16.gmra.mrb[20].mxu1 %v5720_v10  ;;  %v1243_v53 = vrot.slane %v1242_v40, 4  ;;  %v1072_v58 = vld [vmem:[#allocation2 + $0x48] sm:$0xf]  ;;  %v5721_v60 = vcombine.low %v1685_v37, %v1688_v55  ;;  %v581_v5 = vrot.slane %v579_v62, 7  ;;  %v587_v6 = vshrl.u32 %v5984_v50, 16  ;;  %v252_v42 = vld [vmem:[%s6885_s2 + $0x78] sm:$0xff] }
  0x7a   : > { %4678 = vmatprep.mubr.bf16.mxu1 %v6730_v4  ;;  %v1250_v0 = vshrl.u32 %v1072_v58, 16  ;;  %v1253_v1 = vshll.u32 %v1072_v58, 16  ;;  %v1233_v4 = vrot.slane %v1232_v57, 4  ;;  %v590_v7 = vshll.u32 %v5984_v50, 16  ;;  %v1580_v24 = vld [vmem:[#allocation2 + $0x2c] sm:$0x1] }
  0x7b   : > { %v1248_v63 = vsel %vm6897_vm3, %v1243_v53, %v1247_v54  ;;  %v584_v18 = vor.u32 %v582_v2, %v581_v5  ;;  %v585_v23 = vrot.slane %v581_v5, 4  ;;  %v589_v29 = vrot.slane %v587_v6, 7  ;;  %v6740_v47 = vld [vmem:[#allocation2 + $0x3c] sm:$0xff]   ;;  %v351_v49 = vld [vmem:[#allocation2 + $0x68] sm:$0x1]  ;;  %v6741_v57 = vld [vmem:[%s8466_s3 + $0x1d0] sm:$0xff]  }
  0x7c   : > { %v1073_v9 = vld [vmem:[#allocation2 + $0x4c] sm:$0xf]  ;;  %v1252_v10 = vrot.slane %v1250_v0, 4  ;;  %v1255_v11 = vrot.slane %v1253_v1, 5  ;;  %v1238_v12 = vsel %vm6897_vm3, %v1233_v4, %v7221_v28  ;;  %v5706_v30 = vrot.slane %v1578_v8, 9  ;;  %6470 = vmatprep.subr.bf16.mxu1 %v6741_v57 }
  0x7d   : > { %v1074_v15 = vld [vmem:[#allocation2 + $0x50] sm:$0x1]  ;;  %v1259_v16 = vshll.u32 %v1073_v9, 16  ;;  %v1263_v17 = vshrl.u32 %v1073_v9, 16  ;;  %v5692_v20 = vcombine.low %v1238_v12, %v1248_v63  ;;  %v1691_v34 = vrot.slane %v1579_v14, 5 }
  0x7e   : > { %v1256_v21 = vor.u32 %v1255_v11, %v1252_v10  ;;  %v1269_v22 = vshll.u32 %v1074_v15, 16  ;;  %v1694_v35 = vrot.slane %v1580_v24, 5  ;;  %v592_v37 = vor.u32 %v590_v7, %v589_v29  ;;  %v301_v55 = vld [vmem:[#allocation2 + $0x60] sm:$0x1]  ;;  %v6742_v63 = vld [vmem:[%s8466_s3 + $0x190] sm:$0xff]   ;;  %v254_v24 = vld [vmem:[%s6885_s2 + $0x88] sm:$0xff] }
  0x7f   : > { %v1261_v25 = vrot.slane %v1259_v16, 5  ;;  %v1265_v27 = vrot.slane %v1263_v17, 4  ;;  %4541 = vmatprep.mubr.bf16.mxu0 %v5692_v20  ;;  %v840_v32 = vld [vmem:[#allocation2 + $0x54] sm:$0xf]  ;;  %v594_v38 = vrot.slane %v589_v29, 4  ;;  %v1692_v44 = vsel %vm7161_vm14, %v5706_v30, %v1691_v34  ;;  %6471 = vmatpush3.bf16.msra.mxu1 %v6742_v63  ;;  %v253_v15 = vld [vmem:[%s6885_s2 + $0x80] sm:$0xff] }
  0x80   : > { %v1257_v28 = vrot.slane %v1256_v21, 4  ;;  %v1271_v33 = vrot.slane %v1269_v22, 5  ;;  %4542 = vmatmul.mubr.bf16.gmra.mrb[20].mxu0 %v6727_v13  ;;  %v841_v40 = vsel %vm6944_vm11, %v584_v18, %v840_v32  ;;  %v844_v41 = vld [vmem:[#allocation2 + $0x5c] sm:$0x1]  ;;  %v1693_v45 = vrot.slane %v1691_v34, 4 }
  0x81   : > { %4679 = vmatmul.mubr.bf16.gmra.mrb[24].mxu1 %v5721_v60  ;;  %v1266_v36 = vor.u32 %v1265_v27, %v1261_v25  ;;  %842 = vst [vmem:[#allocation2 + $0x54] sm:$0xf] %v841_v40  ;;  %v5985_v46 = vpack.c.bf16 %v251_v19, %v251_v19  ;;  %v593_v53 = vsel %vm6932_vm10, %v585_v23, %v592_v37  ;;  %v302_v60 = vsel %vm6906_vm6, 0, %v301_v55  ;;  %v1581_v7 = vld [vmem:[#allocation2 + $0x30] sm:$0xe] }
  0x82   : > { %4686 = vmatprep.mubr.bf16.mxu1 %v6736_v51  ;;  %v1262_v43 = vsel %vm6897_vm3, %v1257_v28, %v1261_v25  ;;  %v6729_v51 = vld [vmem:[#allocation2 + $0x48] sm:$0xff]   ;;  %v845_v54 = vsel %vm6906_vm6, %v594_v38, %v844_v41  ;;  %v5986_v56 = vpack.c.bf16 %v252_v42, %v252_v42  ;;  %843 = vst [vmem:[#allocation2 + $0x58] sm:$0xf] %v593_v53  ;;  %v352_v61 = vsel %vm6914_vm8, 0, %v351_v49  ;;  %v1582_v9 = vld [vmem:[#allocation2 + $0x34] sm:$0xf] }
  0x83   : > { %v1267_v50 = vrot.slane %v1266_v36, 4  ;;  %846 = vst [vmem:[#allocation2 + $0x5c] sm:$0x1] %v845_v54  ;;  %v1695_v58 = vsel %vm7161_vm14, %v1693_v45, %v1694_v35  ;;  %v596_v62 = vshrl.u32 %v5985_v46, 16  ;;  %303 = vst [vmem:[#allocation2 + $0x60] sm:$0x1] %v302_v60  ;;  %v5987_v20 = vpack.c.bf16 %v253_v15, %v253_v15 }
  0x84   : > { %v5722_v1 = vcombine.low %v1692_v44, %v1695_v58  ;;  %353 = vst [vmem:[#allocation2 + $0x68] sm:$0x1] %v352_v61  ;;  %v599_v2 = vshll.u32 %v5985_v46, 16  ;;  %v604_v3 = vshrl.u32 %v5986_v56, 16  ;;  %v607_v6 = vshll.u32 %v5986_v56, 16  ;;  %v6744_v35 = vld [vmem:[#allocation2 + $0x48] sm:$0xff]  }
  0x85   : > { %v1272_v0 = vsel %vm6897_vm3, %v1267_v50, %v1271_v33  ;;  %v598_v5 = vrot.slane %v596_v62, 7  ;;  %v1583_v10 = vld [vmem:[#allocation2 + $0x38] sm:$0x1]  ;;  %v5707_v11 = vrot.slane %v1581_v7, 9  ;;  %v1698_v13 = vrot.slane %v1582_v9, 5  ;;  %v6745_v36 = vld [vmem:[%s8466_s3 + $0x170] sm:$0xff]  }
  0x86   : > { %v5693_v4 = vcombine.low %v1262_v43, %v1272_v0  ;;  %v606_v8 = vrot.slane %v604_v3, 7  ;;  %v1701_v19 = vrot.slane %v1583_v10, 5  ;;  %v5988_v42 = vpack.c.bf16 %v254_v24, %v254_v24  ;;  %v304_v50 = vld [vmem:[#allocation2 + $0x6c] sm:$0x1]  ;;  %6366 = vmatprep.subr.bf16.mxu0 %v6745_v36  ;;  %v6746_v61 = vld [vmem:[%s8466_s3 + $0x130] sm:$0xff]  }
  0x87   : > { %v602_v12 = vrot.slane %v598_v5, 4  ;;  %v601_v23 = vor.u32 %v599_v2, %v598_v5  ;;  %v1700_v14 = vrot.slane %v1698_v13, 4  ;;  %v1699_v30 = vsel %vm7161_vm14, %v5707_v11, %v1698_v13  ;;  %v1585_v7 = vld [vmem:[#allocation2 + $0x40] sm:$0xf]  ;;  %6367 = vmatpush3.bf16.msra.mxu0 %v6746_v61 }
  0x88   : > { %4549 = vmatprep.mubr.bf16.mxu0 %v5693_v4  ;;  %v1075_v16 = vld [vmem:[#allocation2 + $0x54] sm:$0xf]  ;;  %v609_v17 = vor.u32 %v607_v6, %v606_v8  ;;  %v611_v18 = vrot.slane %v606_v8, 4  ;;  %v613_v43 = vshrl.u32 %v5987_v20, 16  ;;  %v305_v49 = vsel %vm6906_vm6, 0, %v304_v50 }
  0x89   : > { %4687 = vmatmul.mubr.bf16.gmra.mrb[28].mxu1 %v5722_v1  ;;  %4550 = vmatmul.mubr.bf16.gmra.mrb[24].mxu0 %v6729_v51  ;;  %v1274_v21 = vshrl.u32 %v1075_v16, 16  ;;  %v1277_v22 = vshll.u32 %v1075_v16, 16  ;;  %v1076_v25 = vld [vmem:[#allocation2 + $0x58] sm:$0xf]  ;;  %v1702_v41 = vsel %vm7161_vm14, %v1700_v14, %v1701_v19  ;;  %v354_v51 = vld [vmem:[#allocation2 + $0x74] sm:$0x1] }
  0x8a   : > { %4694 = vmatprep.mubr.bf16.mxu1 %v6740_v47  ;;  %v1077_v27 = vld [vmem:[#allocation2 + $0x5c] sm:$0x1]  ;;  %v610_v29 = vsel %vm6932_vm10, %v602_v12, %v609_v17  ;;  %v1283_v32 = vshll.u32 %v1076_v25, 16  ;;  %v1287_v34 = vshrl.u32 %v1076_v25, 16  ;;  %v847_v38 = vld [vmem:[#allocation2 + $0x60] sm:$0xf]  ;;  %v5723_v55 = vcombine.low %v1699_v30, %v1702_v41 }
  0x8b   : > { %v1276_v28 = vrot.slane %v1274_v21, 4  ;;  %v1279_v33 = vrot.slane %v1277_v22, 5  ;;  %850 = vst [vmem:[#allocation2 + $0x64] sm:$0xf] %v610_v29  ;;  %v1293_v37 = vshll.u32 %v1077_v27, 16  ;;  %v848_v47 = vsel %vm6944_vm11, %v601_v23, %v847_v38  ;;  %v255_v1 = vld [vmem:[%s6885_s2 + $0x90] sm:$0xff] }
  0x8c   : > { %v851_v40 = vld [vmem:[#allocation2 + $0x68] sm:$0x1]  ;;  %v1285_v45 = vrot.slane %v1283_v32, 5  ;;  %v1289_v46 = vrot.slane %v1287_v34, 4  ;;  %849 = vst [vmem:[#allocation2 + $0x60] sm:$0xf] %v848_v47  ;;  %v7299_v12 = vpack.c.bf16 %v255_v1, %v255_v1 }
  0x8d   : > { %v1280_v44 = vor.u32 %v1279_v33, %v1276_v28  ;;  %v1295_v53 = vrot.slane %v1293_v37, 5  ;;  %v852_v54 = vsel %vm6906_vm6, %v611_v18, %v851_v40  ;;  %306 = vst [vmem:[#allocation2 + $0x6c] sm:$0x1] %v305_v49  ;;  %v355_v58 = vsel %vm6914_vm8, 0, %v354_v51  ;;  %v6735_v4 = vld [vmem:[#allocation2 + $0x54] sm:$0xff]  }
  0x8e   : > { %v1290_v57 = vor.u32 %v1289_v46, %v1285_v45  ;;  %853 = vst [vmem:[#allocation2 + $0x68] sm:$0x1] %v852_v54  ;;  %v615_v60 = vrot.slane %v613_v43, 7  ;;  %356 = vst [vmem:[#allocation2 + $0x74] sm:$0x1] %v355_v58  ;;  %v616_v62 = vshll.u32 %v5987_v20, 16 }
  0x8f   : > { %v1281_v56 = vrot.slane %v1280_v44, 4  ;;  %v621_v63 = vshrl.u32 %v5988_v42, 16  ;;  %v624_v0 = vshll.u32 %v5988_v42, 16  ;;  %v1584_v6 = vld [vmem:[#allocation2 + $0x3c] sm:$0xe]  ;;  %v1705_v18 = vrot.slane %v1585_v7, 5 }
  0x90   : > { %v1291_v3 = vrot.slane %v1290_v57, 4  ;;  %v619_v5 = vrot.slane %v615_v60, 4  ;;  %v618_v9 = vor.u32 %v616_v62, %v615_v60  ;;  %v5708_v11 = vrot.slane %v1584_v6, 9  ;;  %v1586_v17 = vld [vmem:[#allocation2 + $0x44] sm:$0x1]  ;;  %v256_v19 = vld [vmem:[%s6885_s2 + $0x98] sm:$0xff] }
  0x91   : > { %4695 = vmatmul.mubr.bf16.gmra.mrb[32].mxu1 %v5723_v55  ;;  %v1286_v2 = vsel %vm6897_vm3, %v1281_v56, %v1285_v45  ;;  %v623_v10 = vrot.slane %v621_v63, 7  ;;  %v1708_v23 = vrot.slane %v1586_v17, 5  ;;  %v1707_v32 = vrot.slane %v1705_v18, 4  ;;  %v307_v45 = vld [vmem:[#allocation2 + $0x78] sm:$0x1] }
  0x92   : > { %4702 = vmatprep.mubr.bf16.mxu1 %v6744_v35  ;;  %v1079_v8 = vld [vmem:[#allocation2 + $0x64] sm:$0xf]  ;;  %v1296_v13 = vsel %vm6897_vm3, %v1291_v3, %v1295_v53  ;;  %v1706_v27 = vsel %vm7161_vm14, %v5708_v11, %v1705_v18  ;;  %v5990_v38 = vpack.c.bf16 %v256_v19, %v256_v19  ;;  %v630_v40 = vshrl.u32 %v7299_v12, 16  ;;  %v357_v46 = vld [vmem:[#allocation2 + $0x80] sm:$0x1]  ;;  %v6748_v54 = vld [vmem:[#allocation2 + $0x54] sm:$0xff]  }
  0x93   : > { %v1307_v15 = vshll.u32 %v1079_v8, 16  ;;  %v1311_v16 = vshrl.u32 %v1079_v8, 16  ;;  %v5694_v20 = vcombine.low %v1286_v2, %v1296_v13  ;;  %v626_v21 = vor.u32 %v624_v0, %v623_v10  ;;  %v1078_v14 = vld [vmem:[#allocation2 + $0x60] sm:$0xf]  ;;  %v6749_v62 = vld [vmem:[%s8466_s3 + $0x1d8] sm:$0xff]  }
  0x94   : > { %v628_v22 = vrot.slane %v623_v10, 4  ;;  %v1298_v30 = vshrl.u32 %v1078_v14, 16  ;;  %v1301_v28 = vshll.u32 %v1078_v14, 16  ;;  %v854_v36 = vld [vmem:[#allocation2 + $0x6c] sm:$0xf]  ;;  %v1709_v51 = vsel %vm7161_vm14, %v1707_v32, %v1708_v23  ;;  %v6739_v1 = vld [vmem:[#allocation2 + $0x60] sm:$0xff]   ;;  %6472 = vmatprep.subr.bf16.mxu1 %v6749_v62 }
  0x95   : > { %v1309_v24 = vrot.slane %v1307_v15, 5  ;;  %v1313_v25 = vrot.slane %v1311_v16, 4  ;;  %4557 = vmatprep.mubr.bf16.mxu0 %v5694_v20  ;;  %v1080_v29 = vld [vmem:[#allocation2 + $0x68] sm:$0x1]  ;;  %v627_v33 = vsel %vm6932_vm10, %v619_v5, %v626_v21  ;;  %v858_v37 = vld [vmem:[#allocation2 + $0x74] sm:$0x1]  ;;  %v855_v43 = vsel %vm6944_vm11, %v618_v9, %v854_v36 }
  0x96   : > { %4558 = vmatmul.mubr.bf16.gmra.mrb[28].mxu0 %v6735_v4  ;;  %v1317_v35 = vshll.u32 %v1080_v29, 16  ;;  %857 = vst [vmem:[#allocation2 + $0x70] sm:$0xf] %v627_v33  ;;  %v1300_v41 = vrot.slane %v1298_v30, 4  ;;  %v1303_v42 = vrot.slane %v1301_v28, 5  ;;  %v859_v44 = vsel %vm6906_vm6, %v628_v22, %v858_v37  ;;  %v6750_v9 = vld [vmem:[%s8466_s3 + $0x198] sm:$0xff]  }
  0x97   : > { %v1314_v34 = vor.u32 %v1313_v25, %v1309_v24  ;;  %856 = vst [vmem:[#allocation2 + $0x6c] sm:$0xf] %v855_v43  ;;  %860 = vst [vmem:[#allocation2 + $0x74] sm:$0x1] %v859_v44  ;;  %v308_v53 = vsel %vm6906_vm6, 0, %v307_v45  ;;  %v5724_v49 = vcombine.low %v1706_v27, %v1709_v51  ;;  %v358_v56 = vsel %vm6914_vm8, 0, %v357_v46  ;;  %6473 = vmatpush3.bf16.msra.mxu1 %v6750_v9 }
  0x98   : > { %v1319_v50 = vrot.slane %v1317_v35, 5  ;;  %v1304_v55 = vor.u32 %v1303_v42, %v1300_v41  ;;  %309 = vst [vmem:[#allocation2 + $0x78] sm:$0x1] %v308_v53  ;;  %v632_v57 = vrot.slane %v630_v40, 7  ;;  %359 = vst [vmem:[#allocation2 + $0x80] sm:$0x1] %v358_v56 }
  0x99   : > { %v1315_v47 = vrot.slane %v1314_v34, 4  ;;  %v633_v58 = vshll.u32 %v7299_v12, 16  ;;  %v638_v60 = vshrl.u32 %v5990_v38, 16  ;;  %v641_v61 = vshll.u32 %v5990_v38, 16  ;;  %4703 = vmatmul.mubr.bf16.gmra.mrb[36].mxu1 %v5724_v49  ;;  %v1587_v3 = vld [vmem:[#allocation2 + $0x48] sm:$0xe] }
  0x9a   : > { %v1305_v63 = vrot.slane %v1304_v55, 4  ;;  %v636_v2 = vrot.slane %v632_v57, 4  ;;  %v1588_v4 = vld [vmem:[#allocation2 + $0x4c] sm:$0xf]  ;;  %4710 = vmatprep.mubr.bf16.mxu1 %v6748_v54  ;;  %v1589_v6 = vld [vmem:[#allocation2 + $0x50] sm:$0x1] }
  0x9b   : > { %v1320_v0 = vsel %vm6897_vm3, %v1315_v47, %v1319_v50  ;;  %v640_v5 = vrot.slane %v638_v60, 7  ;;  %v5709_v7 = vrot.slane %v1587_v3, 9  ;;  %v1712_v8 = vrot.slane %v1588_v4, 5  ;;  %v6751_v15 = vld [vmem:[%s8466_s3 + $0x178] sm:$0xff]   ;;  %v257_v44 = vld [vmem:[%s6885_s2 + $0xa0] sm:$0xff]  ;;  %v258_v45 = vld [vmem:[%s6885_s2 + $0xa8] sm:$0xff] }
  0x9c   : > { %v1310_v10 = vsel %vm6897_vm3, %v1305_v63, %v1309_v24  ;;  %v635_v12 = vor.u32 %v633_v58, %v632_v57  ;;  %v1715_v13 = vrot.slane %v1589_v6, 5  ;;  %6368 = vmatprep.subr.bf16.mxu0 %v6751_v15  ;;  %v6752_v25 = vld [vmem:[%s8466_s3 + $0x138] sm:$0xff]   ;;  %v310_v46 = vld [vmem:[#allocation2 + $0x84] sm:$0x1]  ;;  %v360_v51 = vld [vmem:[#allocation2 + $0x8c] sm:$0x1]  ;;  %v5991_v53 = vpack.c.bf16 %v257_v44, %v257_v44 }
  0x9d   : > { %v1082_v11 = vld [vmem:[#allocation2 + $0x70] sm:$0xf]  ;;  %v5695_v16 = vcombine.low %v1310_v10, %v1320_v0  ;;  %v643_v19 = vor.u32 %v641_v61, %v640_v5  ;;  %v645_v30 = vrot.slane %v640_v5, 4  ;;  %6369 = vmatpush3.bf16.msra.mxu0 %v6752_v25  ;;  %v1713_v40 = vsel %vm7161_vm14, %v5709_v7, %v1712_v8  ;;  %v6754_v55 = vld [vmem:[#allocation2 + $0x60] sm:$0xff]   ;;  %v1590_v60 = vld [vmem:[#allocation2 + $0x54] sm:$0xe] }
  0x9e   : > { %v1331_v17 = vshll.u32 %v1082_v11, 16  ;;  %v1335_v18 = vshrl.u32 %v1082_v11, 16  ;;  %v1081_v20 = vld [vmem:[#allocation2 + $0x6c] sm:$0xf]  ;;  %v1083_v21 = vld [vmem:[#allocation2 + $0x74] sm:$0x1]  ;;  %v5992_v54 = vpack.c.bf16 %v258_v45, %v258_v45 }
  0x9f   : > { %4565 = vmatprep.mubr.bf16.mxu0 %v5695_v16  ;;  %v1322_v22 = vshrl.u32 %v1081_v20, 16  ;;  %v1325_v23 = vshll.u32 %v1081_v20, 16  ;;  %v1341_v27 = vshll.u32 %v1083_v21, 16  ;;  %v644_v29 = vsel %vm6932_vm10, %v636_v2, %v643_v19  ;;  %v861_v28 = vld [vmem:[#allocation2 + $0x78] sm:$0xf]  ;;  %v6743_v2 = vld [vmem:[#allocation2 + $0x6c] sm:$0xff]  }
  0xa0   : > { %v1333_v14 = vrot.slane %v1331_v17, 5  ;;  %v1337_v24 = vrot.slane %v1335_v18, 4  ;;  %4566 = vmatmul.mubr.bf16.gmra.mrb[32].mxu0 %v6739_v1  ;;  %v865_v33 = vld [vmem:[#allocation2 + $0x80] sm:$0x1]  ;;  %v862_v36 = vsel %vm6944_vm11, %v635_v12, %v861_v28  ;;  %864 = vst [vmem:[#allocation2 + $0x7c] sm:$0xf] %v644_v29 }
  0xa1   : > { %v1324_v32 = vrot.slane %v1322_v22, 4  ;;  %v1327_v34 = vrot.slane %v1325_v23, 5  ;;  %v1343_v37 = vrot.slane %v1341_v27, 5  ;;  %863 = vst [vmem:[#allocation2 + $0x78] sm:$0xf] %v862_v36  ;;  %v866_v38 = vsel %vm6906_vm6, %v645_v30, %v865_v33  ;;  %v6755_v45 = vld [vmem:[#allocation2 + $0x6c] sm:$0xff]  }
  0xa2   : > { %v1338_v35 = vor.u32 %v1337_v24, %v1333_v14  ;;  %v1714_v41 = vrot.slane %v1712_v8, 4  ;;  %867 = vst [vmem:[#allocation2 + $0x80] sm:$0x1] %v866_v38  ;;  %v311_v50 = vsel %vm6906_vm6, 0, %v310_v46  ;;  %v361_v58 = vsel %vm6914_vm8, 0, %v360_v51 }
  0xa3   : > { %v1328_v42 = vor.u32 %v1327_v34, %v1324_v32  ;;  %312 = vst [vmem:[#allocation2 + $0x84] sm:$0x1] %v311_v50  ;;  %362 = vst [vmem:[#allocation2 + $0x8c] sm:$0x1] %v361_v58  ;;  %v647_v61 = vshrl.u32 %v5991_v53, 16  ;;  %v650_v62 = vshll.u32 %v5991_v53, 16 }
  0xa4   : > { %v1339_v43 = vrot.slane %v1338_v35, 4  ;;  %v1716_v47 = vsel %vm7161_vm14, %v1714_v41, %v1715_v13  ;;  %v655_v63 = vshrl.u32 %v5992_v54, 16  ;;  %v1591_v0 = vld [vmem:[#allocation2 + $0x58] sm:$0xf]  ;;  %v658_v3 = vshll.u32 %v5992_v54, 16  ;;  %v7373_v53 = vld [vmem:[%s8466_s3 + $0x200] sm:$0xff]  }
  0xa5   : > { %v1329_v49 = vrot.slane %v1328_v42, 4  ;;  %v5725_v57 = vcombine.low %v1713_v40, %v1716_v47  ;;  %v5710_v4 = vrot.slane %v1590_v60, 9  ;;  %v1719_v5 = vrot.slane %v1591_v0, 5  ;;  %v1592_v13 = vld [vmem:[#allocation2 + $0x5c] sm:$0x1]  ;;  %v6756_v40 = vld [vmem:[%s8466_s3 + $0x1e0] sm:$0xff]   ;;  %6602 = vmatprep.subr.bf16.mxu0 %v7373_v53 }
  0xa6   : > { %v1344_v56 = vsel %vm6897_vm3, %v1339_v43, %v1343_v37  ;;  %v649_v8 = vrot.slane %v647_v61, 7  ;;  %v657_v9 = vrot.slane %v655_v63, 7  ;;  %v7358_v16 = vld [vmem:[#allocation2 + $0xc] sm:$0xe]  ;;  %v2517_v25 = vld [vmem:[#allocation2 + $0x10] sm:$0xf]  ;;  %6474 = vmatprep.subr.bf16.mxu1 %v6756_v40 }
  0xa7   : > { %v1334_v1 = vsel %vm6897_vm3, %v1329_v49, %v1333_v14  ;;  %4711 = vmatmul.mubr.bf16.gmra.mrb[40].mxu1 %v5725_v57  ;;  %v1085_v7 = vld [vmem:[#allocation2 + $0x7c] sm:$0xf]  ;;  %v1720_v15 = vsel %vm7161_vm14, %v5710_v4, %v1719_v5  ;;  %v1721_v33 = vrot.slane %v1719_v5, 4  ;;  %v2518_v38 = vld [vmem:[#allocation2 + $0x14] sm:$0x1]  ;;  %v1722_v43 = vrot.slane %v1592_v13, 5 }
  0xa8   : > { %v5696_v6 = vcombine.low %v1334_v1, %v1344_v56  ;;  %4718 = vmatprep.mubr.bf16.mxu1 %v6754_v55  ;;  %v1084_v10 = vld [vmem:[#allocation2 + $0x78] sm:$0xf]  ;;  %v1355_v11 = vshll.u32 %v1085_v7, 16  ;;  %v1359_v12 = vshrl.u32 %v1085_v7, 16  ;;  %v652_v20 = vor.u32 %v650_v62, %v649_v8  ;;  %v2004_v51 = vld [vmem:[#allocation2 + $0xc] sm:$0xf] }
  0xa9   : > { %v1086_v17 = vld [vmem:[#allocation2 + $0x80] sm:$0x1]  ;;  %v1346_v18 = vshrl.u32 %v1084_v10, 16  ;;  %v1349_v19 = vshll.u32 %v1084_v10, 16  ;;  %v653_v21 = vrot.slane %v649_v8, 4  ;;  %v660_v24 = vor.u32 %v658_v3, %v657_v9  ;;  %v6747_v0 = vld [vmem:[#allocation2 + $0x78] sm:$0xff]  }
  0xaa   : > { %4573 = vmatprep.mubr.bf16.mxu0 %v5696_v6  ;;  %v1357_v22 = vrot.slane %v1355_v11, 5  ;;  %v1361_v23 = vrot.slane %v1359_v12, 4  ;;  %v1365_v14 = vshll.u32 %v1086_v17, 16  ;;  %v662_v30 = vrot.slane %v657_v9, 4  ;;  %v868_v28 = vld [vmem:[#allocation2 + $0x84] sm:$0xf] }
  0xab   : > { %4574 = vmatmul.mubr.bf16.gmra.mrb[36].mxu0 %v6743_v2  ;;  %v1348_v27 = vrot.slane %v1346_v18, 4  ;;  %v1351_v29 = vrot.slane %v1349_v19, 5  ;;  %v661_v35 = vsel %vm6932_vm10, %v653_v21, %v660_v24  ;;  %v869_v36 = vsel %vm6944_vm11, %v652_v20, %v868_v28  ;;  %v872_v37 = vld [vmem:[#allocation2 + $0x8c] sm:$0x1]  ;;  %v2005_v49 = vld [vmem:[#allocation2 + $0x10] sm:$0xf] }
  0xac   : > { %v1362_v32 = vor.u32 %v1361_v23, %v1357_v22  ;;  %v1367_v34 = vrot.slane %v1365_v14, 5  ;;  %870 = vst [vmem:[#allocation2 + $0x84] sm:$0xf] %v869_v36  ;;  %871 = vst [vmem:[#allocation2 + $0x88] sm:$0xf] %v661_v35  ;;  %v873_v42 = vsel %vm6906_vm6, %v662_v30, %v872_v37  ;;  %v5767_v44 = vrot.slane %v7358_v16, 9 }
  0xad   : > { %v1352_v41 = vor.u32 %v1351_v29, %v1348_v27  ;;  %874 = vst [vmem:[#allocation2 + $0x8c] sm:$0x1] %v873_v42  ;;  %v2614_v47 = vrot.slane %v2517_v25, 5  ;;  %v2617_v50 = vrot.slane %v2518_v38, 5  ;;  %v1723_v55 = vsel %vm7161_vm14, %v1721_v33, %v1722_v43  ;;  %v2006_v56 = vld [vmem:[#allocation2 + $0x14] sm:$0x1] }
  0xae   : > { %v1363_v46 = vrot.slane %v1362_v32, 4  ;;  %v2053_v57 = vshrl.u32 %v2004_v51, 16  ;;  %v5726_v60 = vcombine.low %v1720_v15, %v1723_v55  ;;  %v6758_v62 = vld [vmem:[%s8466_s3 + $0x1a0] sm:$0xff]   ;;  %v2056_v1 = vshll.u32 %v2004_v51, 16  ;;  %v1595_v16 = vld [vmem:[#allocation2 + $0x68] sm:$0x1] }
  0xaf   : > { %v1353_v54 = vrot.slane %v1352_v41, 4  ;;  %v2616_v61 = vrot.slane %v2614_v47, 4  ;;  %v2062_v2 = vshll.u32 %v2005_v49, 16  ;;  %v2066_v5 = vshrl.u32 %v2005_v49, 16  ;;  %v1593_v9 = vld [vmem:[#allocation2 + $0x60] sm:$0xe]  ;;  %6475 = vmatpush3.bf16.msra.mxu1 %v6758_v62 }
  0xb0   : > { %v1368_v58 = vsel %vm6897_vm3, %v1363_v46, %v1367_v34  ;;  %4719 = vmatmul.mubr.bf16.gmra.mrb[44].mxu1 %v5726_v60  ;;  %v2055_v4 = vrot.slane %v2053_v57, 4  ;;  %v2072_v6 = vshll.u32 %v2006_v56, 16  ;;  %v2058_v7 = vrot.slane %v2056_v1, 5  ;;  %v1594_v15 = vld [vmem:[#allocation2 + $0x64] sm:$0xf]  ;;  %v6761_v46 = vld [vmem:[%s8466_s3 + $0x1e8] sm:$0xff]  }
  0xb1   : > { %v1358_v63 = vsel %vm6897_vm3, %v1353_v54, %v1357_v22  ;;  %4726 = vmatprep.mubr.bf16.mxu1 %v6755_v45  ;;  %v7385_v8 = vrot.slane %v2062_v2, 5  ;;  %v7389_v12 = vsel %vm7161_vm14, %v5767_v44, %v2614_v47  ;;  %v7393_v13 = vsel %vm7161_vm14, %v2616_v61, %v2617_v50  ;;  %v2519_v40 = vld [vmem:[#allocation2 + $0x18] sm:$0xe]  ;;  %v2520_v41 = vld [vmem:[#allocation2 + $0x1c] sm:$0xf]  ;;  %6476 = vmatprep.subr.bf16.mxu1 %v6761_v46 }
  0xb2   : > { %v5697_v3 = vcombine.low %v1358_v63, %v1368_v58  ;;  %v2059_v23 = vor.u32 %v2058_v7, %v2055_v4  ;;  %v2068_v14 = vrot.slane %v2066_v5, 4  ;;  %v7395_v24 = vrot.slane %v2072_v6, 5  ;;  %v2521_v43 = vld [vmem:[#allocation2 + $0x20] sm:$0x1]  ;;  %v6759_v49 = vld [vmem:[#allocation2 + $0x78] sm:$0xff]  }
  0xb3   : > { %v1087_v10 = vld [vmem:[#allocation2 + $0x84] sm:$0xf]  ;;  %v1088_v11 = vld [vmem:[#allocation2 + $0x88] sm:$0xf]  ;;  %v5711_v34 = vrot.slane %v1593_v9, 9  ;;  %v1726_v37 = vrot.slane %v1594_v15, 5  ;;  %v5783_v56 = vcombine.low %v7389_v12, %v7393_v13 }
  0xb4   : > { %4581 = vmatprep.mubr.bf16.mxu0 %v5697_v3  ;;  %v1089_v17 = vld [vmem:[#allocation2 + $0x8c] sm:$0x1]  ;;  %v1370_v18 = vshrl.u32 %v1087_v10, 16  ;;  %v1373_v19 = vshll.u32 %v1087_v10, 16  ;;  %v1379_v20 = vshll.u32 %v1088_v11, 16  ;;  %v1383_v21 = vshrl.u32 %v1088_v11, 16 }
  0xb5   : > { %4582 = vmatmul.mubr.bf16.gmra.mrb[40].mxu0 %v6747_v0  ;;  %v1389_v22 = vshll.u32 %v1089_v17, 16  ;;  %v7397_v33 = vrot.slane %v2059_v23, 4  ;;  %v2069_v32 = vor.u32 %v2068_v14, %v7385_v8  ;;  %v1729_v38 = vrot.slane %v1595_v16, 5  ;;  %v6753_v51 = vld [vmem:[#allocation2 + $0x84] sm:$0xff]   ;;  %v2007_v61 = vld [vmem:[#allocation2 + $0x18] sm:$0xf] }
  0xb6   : > { %v1372_v25 = vrot.slane %v1370_v18, 4  ;;  %v1375_v27 = vrot.slane %v1373_v19, 5  ;;  %v1381_v29 = vrot.slane %v1379_v20, 5  ;;  %v1385_v30 = vrot.slane %v1383_v21, 4  ;;  %v2008_v2 = vld [vmem:[#allocation2 + $0x1c] sm:$0xf] }
  0xb7   : > { %v1391_v28 = vrot.slane %v1389_v22, 5  ;;  %v7400_v42 = vrot.slane %v2069_v32, 4  ;;  %v5768_v44 = vrot.slane %v2519_v40, 9  ;;  %v2621_v45 = vrot.slane %v2520_v41, 5  ;;  %v2009_v3 = vld [vmem:[#allocation2 + $0x20] sm:$0x1] }
  0xb8   : > { %v1376_v35 = vor.u32 %v1375_v27, %v1372_v25  ;;  %v1386_v36 = vor.u32 %v1385_v30, %v1381_v29  ;;  %v1727_v54 = vsel %vm7161_vm14, %v5711_v34, %v1726_v37  ;;  %v1728_v55 = vrot.slane %v1726_v37, 4  ;;  %v1596_v4 = vld [vmem:[#allocation2 + $0x6c] sm:$0xe]  ;;  %v1597_v9 = vld [vmem:[#allocation2 + $0x70] sm:$0xf]  ;;  %v6760_v37 = vld [vmem:[#allocation2 + $0x84] sm:$0xff]  }
  0xb9   : > { %v2065_v57 = vsel %vm6897_vm3, %v7397_v33, %v7385_v8  ;;  %v2623_v58 = vrot.slane %v2621_v45, 4  ;;  %v2624_v60 = vrot.slane %v2521_v43, 5  ;;  %v2075_v0 = vsel %vm6897_vm3, %v7400_v42, %v7395_v24  ;;  %v1598_v10 = vld [vmem:[#allocation2 + $0x74] sm:$0x1]  ;;  %v6763_v11 = vld [vmem:[%s8466_s3 + $0x1a8] sm:$0xff]  }
  0xba   : > { %v1377_v47 = vrot.slane %v1376_v35, 4  ;;  %v1387_v50 = vrot.slane %v1386_v36, 4  ;;  %v1730_v1 = vsel %vm7161_vm14, %v1728_v55, %v1729_v38  ;;  %v7425_v7 = vsel %vm7161_vm14, %v5768_v44, %v2621_v45  ;;  %v7432_v17 = vld [vmem:[#allocation2 + $0x24] sm:$0xe]  ;;  %v2523_v22 = vld [vmem:[#allocation2 + $0x28] sm:$0xf]  ;;  %6477 = vmatpush3.bf16.msra.mxu1 %v6763_v11 }
  0xbb   : > { %v5727_v6 = vcombine.low %v1727_v54, %v1730_v1  ;;  %v2077_v8 = vshrl.u32 %v2007_v61, 16  ;;  %v2625_v12 = vsel %vm7161_vm14, %v2623_v58, %v2624_v60  ;;  %v2080_v13 = vshll.u32 %v2007_v61, 16  ;;  %v2524_v27 = vld [vmem:[#allocation2 + $0x2c] sm:$0x1]  ;;  %v2010_v38 = vld [vmem:[#allocation2 + $0x24] sm:$0xf] }
  0xbc   : > { %v1382_v62 = vsel %vm6897_vm3, %v1377_v47, %v1381_v29  ;;  %v1392_v63 = vsel %vm6897_vm3, %v1387_v50, %v1391_v28  ;;  %v2086_v15 = vshll.u32 %v2008_v2, 16  ;;  %v2090_v16 = vshrl.u32 %v2008_v2, 16  ;;  %v2011_v42 = vld [vmem:[#allocation2 + $0x28] sm:$0xf]  ;;  %v2012_v43 = vld [vmem:[#allocation2 + $0x2c] sm:$0x1] }
  0xbd   : > { %v5698_v5 = vcombine.low %v1382_v62, %v1392_v63  ;;  %4727 = vmatmul.mubr.bf16.gmra.mrb[48].mxu1 %v5727_v6  ;;  %v2079_v18 = vrot.slane %v2077_v8, 4  ;;  %v2096_v19 = vshll.u32 %v2009_v3, 16  ;;  %v5712_v20 = vrot.slane %v1596_v4, 9  ;;  %v6762_v54 = vld [vmem:[%s8466_s3 + $0x208] sm:$0xff]   ;;  %v1599_v61 = vld [vmem:[#allocation2 + $0x78] sm:$0xe] }
  0xbe   : > { %v1733_v21 = vrot.slane %v1597_v9, 5  ;;  %4734 = vmatprep.mubr.bf16.mxu1 %v6759_v49  ;;  %v2082_v23 = vrot.slane %v2080_v13, 5  ;;  %v2088_v14 = vrot.slane %v2086_v15, 5  ;;  %v2092_v24 = vrot.slane %v2090_v16, 4  ;;  %v1601_v1 = vld [vmem:[#allocation2 + $0x80] sm:$0x1] }
  0xbf   : > { %4589 = vmatprep.mubr.bf16.mxu0 %v5698_v5  ;;  %v1736_v25 = vrot.slane %v1598_v10, 5  ;;  %v2098_v29 = vrot.slane %v2096_v19, 5  ;;  %v5769_v33 = vrot.slane %v7432_v17, 9  ;;  %v2628_v35 = vrot.slane %v2523_v22, 5  ;;  %v6766_v2 = vld [vmem:[%s8466_s3 + $0x1f0] sm:$0xff]  }
  0xc0   : > { %4590 = vmatmul.mubr.bf16.gmra.mrb[44].mxu0 %v6753_v51  ;;  %v1734_v30 = vsel %vm7161_vm14, %v5712_v20, %v1733_v21  ;;  %v1735_v28 = vrot.slane %v1733_v21, 4  ;;  %v2083_v32 = vor.u32 %v2082_v23, %v2079_v18  ;;  %v2093_v34 = vor.u32 %v2092_v24, %v2088_v14  ;;  %v6767_v9 = vld [vmem:[%s8466_s3 + $0x210] sm:$0xff]   ;;  %v2527_v16 = vld [vmem:[#allocation2 + $0x38] sm:$0x1]  ;;  %6478 = vmatprep.subr.bf16.mxu1 %v6766_v2 }
  0xc1   : > { %4823 = vmatprep.mubr.bf16.mxu0 %v5783_v56  ;;  %v2631_v36 = vrot.slane %v2524_v27, 5  ;;  %v5751_v40 = vcombine.low %v2065_v57, %v2075_v0  ;;  %v2101_v44 = vshrl.u32 %v2010_v38, 16  ;;  %v2104_v45 = vshll.u32 %v2010_v38, 16  ;;  %v1600_v0 = vld [vmem:[#allocation2 + $0x7c] sm:$0xf]  ;;  %v6768_v10 = vld [vmem:[%s8466_s3 + $0x1b0] sm:$0xff]  }
  0xc2   : > { %v1737_v41 = vsel %vm7161_vm14, %v1735_v28, %v1736_v25  ;;  %v5784_v46 = vcombine.low %v7425_v7, %v2625_v12  ;;  %v2084_v47 = vrot.slane %v2083_v32, 4  ;;  %v2094_v50 = vrot.slane %v2093_v34, 4  ;;  %v2526_v15 = vld [vmem:[#allocation2 + $0x34] sm:$0xf]  ;;  %6479 = vmatpush3.bf16.msra.mxu1 %v6768_v10  ;;  %v2013_v25 = vld [vmem:[#allocation2 + $0x30] sm:$0xf] }
  0xc3   : > { %v5728_v51 = vcombine.low %v1734_v30, %v1737_v41  ;;  %v2630_v55 = vrot.slane %v2628_v35, 4  ;;  %v2103_v49 = vrot.slane %v2101_v44, 4  ;;  %v2106_v56 = vrot.slane %v2104_v45, 5  ;;  %v6764_v21 = vld [vmem:[#allocation2 + $0x90] sm:$0xff]   ;;  %v2015_v28 = vld [vmem:[#allocation2 + $0x38] sm:$0x1] }
  0xc4   : > { %v2110_v57 = vshll.u32 %v2011_v42, 16  ;;  %v2114_v58 = vshrl.u32 %v2011_v42, 16  ;;  %v2120_v60 = vshll.u32 %v2012_v43, 16  ;;  %v2089_v62 = vsel %vm6897_vm3, %v2084_v47, %v2088_v14  ;;  %v2014_v30 = vld [vmem:[#allocation2 + $0x34] sm:$0xf]  ;;  %v6771_v44 = vld [vmem:[%s8466_s3 + $0x1f8] sm:$0xff]  }
  0xc5   : > { %4735 = vmatmul.mubr.bf16.gmra.mrb[52].mxu1 %v5728_v51  ;;  %v2099_v3 = vsel %vm6897_vm3, %v2094_v50, %v2098_v29  ;;  %v2107_v4 = vor.u32 %v2106_v56, %v2103_v49  ;;  %v5713_v6 = vrot.slane %v1599_v61, 9  ;;  %v1740_v7 = vrot.slane %v1600_v0, 5  ;;  %v1603_v38 = vld [vmem:[#allocation2 + $0x88] sm:$0xf]  ;;  %v1604_v43 = vld [vmem:[#allocation2 + $0x8c] sm:$0x1]  ;;  %6480 = vmatprep.subr.bf16.mxu1 %v6771_v44 }
  0xc6   : > { %v7445_v63 = vrot.slane %v2110_v57, 5  ;;  %4742 = vmatprep.mubr.bf16.mxu1 %v6760_v37  ;;  %v2116_v5 = vrot.slane %v2114_v58, 4  ;;  %v1743_v8 = vrot.slane %v1601_v1, 5  ;;  %v2629_v11 = vsel %vm7161_vm14, %v5769_v33, %v2628_v35  ;;  %v1602_v37 = vld [vmem:[#allocation2 + $0x84] sm:$0xe] }
  0xc7   : > { %v2632_v12 = vsel %vm7161_vm14, %v2630_v55, %v2631_v36  ;;  %v5752_v17 = vcombine.low %v2089_v62, %v2099_v3  ;;  %v2122_v18 = vrot.slane %v2120_v60, 5  ;;  %v1741_v19 = vsel %vm7161_vm14, %v5713_v6, %v1740_v7  ;;  %v2528_v51 = vld [vmem:[#allocation2 + $0x3c] sm:$0xe]  ;;  %v2529_v58 = vld [vmem:[#allocation2 + $0x40] sm:$0xf] }
  0xc8   : > { %4824 = vmatmul.mubr.bf16.vlgmr.msra.gmra.mrb[48].mxu0 %v5751_v40  ;;  %v2117_v13 = vor.u32 %v2116_v5, %v7445_v63  ;;  %v1742_v20 = vrot.slane %v1740_v7, 4  ;;  %v2108_v22 = vrot.slane %v2107_v4, 4  ;;  %v2635_v24 = vrot.slane %v2526_v15, 5  ;;  %v2530_v60 = vld [vmem:[#allocation2 + $0x44] sm:$0x1]  ;;  %v6765_v5 = vld [vmem:[#allocation2 + $0x9c] sm:$0xff]  }
  0xc9   : > { %6603 = vmatpush3.bf16.msra.mxu0 %v7373_v53  ;;  %4831 = vmatprep.mubr.bf16.mxu0 %v5784_v46  ;;  %v2525_v53 = vld [vmem:[#allocation2 + $0x30] sm:$0xe]  ;;  %v5785_v27 = vcombine.low %v2629_v11, %v2632_v12  ;;  %v2125_v33 = vshrl.u32 %v2013_v25, 16  ;;  %v2128_v32 = vshll.u32 %v2013_v25, 16  ;;  %v2638_v36 = vrot.slane %v2527_v16, 5  ;;  %v6773_v6 = vld [vmem:[%s8466_s3 + $0x1b8] sm:$0xff]  }
  0xca   : > { %6604 = vmatprep.subr.bf16.mxu0 %v6762_v54  ;;  %v2118_v23 = vrot.slane %v2117_v13, 4  ;;  %v5770_v14 = vrot.slane %v2525_v53, 9  ;;  %v1744_v29 = vsel %vm7161_vm14, %v1742_v20, %v1743_v8  ;;  %v2637_v35 = vrot.slane %v2635_v24, 4  ;;  %v2016_v12 = vld [vmem:[#allocation2 + $0x3c] sm:$0xf]  ;;  %6481 = vmatpush3.bf16.msra.mxu1 %v6773_v6 }
  0xcb   : > { %v5729_v34 = vcombine.low %v1741_v19, %v1744_v29  ;;  %v2127_v40 = vrot.slane %v2125_v33, 4  ;;  %v2130_v41 = vrot.slane %v2128_v32, 5  ;;  %v2134_v42 = vshll.u32 %v2014_v30, 16  ;;  %v1605_v33 = vld [vmem:[#allocation2 + $0x90] sm:$0xe] }
  0xcc   : > { %v2113_v45 = vsel %vm6897_vm3, %v2108_v22, %v7445_v63  ;;  %v2138_v46 = vshrl.u32 %v2014_v30, 16  ;;  %v2144_v47 = vshll.u32 %v2015_v28, 16  ;;  %v5714_v50 = vrot.slane %v1602_v37, 9  ;;  %v6775_v22 = vld [vmem:[%s8466_s3 + $0x220] sm:$0xff]   ;;  %v1606_v37 = vld [vmem:[#allocation2 + $0x94] sm:$0xf] }
  0xcd   : > { %6605 = vmatpush3.bf16.msra.mxu0 %v6762_v54  ;;  %4743 = vmatmul.mubr.bf16.gmra.mrb[56].mxu1 %v5729_v34  ;;  %v6772_v54 = vld [vmem:[%s8466_s3 + $0x218] sm:$0xff]   ;;  %v2123_v55 = vsel %vm6897_vm3, %v2118_v23, %v2122_v18  ;;  %v2131_v49 = vor.u32 %v2130_v41, %v2127_v40  ;;  %v7479_v56 = vrot.slane %v2134_v42, 5  ;;  %v1747_v57 = vrot.slane %v1603_v38, 5  ;;  %v2021_v6 = vld [vmem:[#allocation2 + $0x50] sm:$0x1] }
  0xce   : > { %6606 = vmatprep.subr.bf16.mxu0 %v6767_v9  ;;  %4750 = vmatprep.mubr.bf16.mxu1 %v6764_v21  ;;  %v2636_v61 = vsel %vm7161_vm14, %v5770_v14, %v2635_v24  ;;  %v2639_v62 = vsel %vm7161_vm14, %v2637_v35, %v2638_v36  ;;  %v2140_v63 = vrot.slane %v2138_v46, 4  ;;  %v1750_v0 = vrot.slane %v1604_v43, 5  ;;  %v1607_v40 = vld [vmem:[#allocation2 + $0x98] sm:$0x1]  ;;  %v2531_v46 = vld [vmem:[#allocation2 + $0x48] sm:$0xe] }
  0xcf   : > { %v2132_v1 = vrot.slane %v2131_v49, 4  ;;  %v1748_v2 = vsel %vm7161_vm14, %v5714_v50, %v1747_v57  ;;  %v1749_v3 = vrot.slane %v1747_v57, 4  ;;  %v2642_v4 = vrot.slane %v2529_v58, 5  ;;  %v2532_v49 = vld [vmem:[#allocation2 + $0x4c] sm:$0xf] }
  0xd0   : > { %4832 = vmatmul.mubr.bf16.gmra.mrb[52].mxu0 %v5752_v17  ;;  %v5753_v7 = vcombine.low %v2113_v45, %v2123_v55  ;;  %v2141_v8 = vor.u32 %v2140_v63, %v7479_v56  ;;  %v5771_v10 = vrot.slane %v2528_v51, 9  ;;  %v2645_v11 = vrot.slane %v2530_v60, 5  ;;  %v2018_v17 = vld [vmem:[#allocation2 + $0x44] sm:$0x1]  ;;  %v6769_v57 = vld [vmem:[#allocation2 + $0xa8] sm:$0xff]  }
  0xd1   : > { %4839 = vmatprep.mubr.bf16.mxu0 %v5785_v27  ;;  %6607 = vmatpush3.bf16.msra.mxu0 %v6767_v9  ;;  %v2017_v9 = vld [vmem:[#allocation2 + $0x40] sm:$0xf]  ;;  %v5786_v13 = vcombine.low %v2636_v61, %v2639_v62  ;;  %v2146_v53 = vrot.slane %v2144_v47, 5  ;;  %v1751_v15 = vsel %vm7161_vm14, %v1749_v3, %v1750_v0  ;;  %v2644_v16 = vrot.slane %v2642_v4, 4  ;;  %v6778_v47 = vld [vmem:[%s8466_s3 + $0x228] sm:$0xff]  }
  0xd2   : > { %6608 = vmatprep.subr.bf16.mxu0 %v6772_v54  ;;  %v2142_v18 = vrot.slane %v2141_v8, 4  ;;  %v5730_v19 = vcombine.low %v1748_v2, %v1751_v15  ;;  %v2149_v20 = vshrl.u32 %v2016_v12, 16  ;;  %v2152_v21 = vshll.u32 %v2016_v12, 16  ;;  %v2019_v0 = vld [vmem:[#allocation2 + $0x48] sm:$0xf] }
  0xd3   : > { %v2137_v23 = vsel %vm6897_vm3, %v2132_v1, %v7479_v56  ;;  %v2158_v14 = vshll.u32 %v2017_v9, 16  ;;  %v2162_v24 = vshrl.u32 %v2017_v9, 16  ;;  %v2168_v25 = vshll.u32 %v2018_v17, 16  ;;  %v2533_v56 = vld [vmem:[#allocation2 + $0x50] sm:$0x1] }
  0xd4   : > { %v2643_v27 = vsel %vm7161_vm14, %v5771_v10, %v2642_v4  ;;  %v2646_v29 = vsel %vm7161_vm14, %v2644_v16, %v2645_v11  ;;  %v2151_v30 = vrot.slane %v2149_v20, 4  ;;  %v2154_v28 = vrot.slane %v2152_v21, 5  ;;  %v2020_v1 = vld [vmem:[#allocation2 + $0x4c] sm:$0xf]  ;;  %v1609_v9 = vld [vmem:[#allocation2 + $0xa0] sm:$0xf] }
  0xd5   : > { %6609 = vmatpush3.bf16.msra.mxu0 %v6772_v54  ;;  %4751 = vmatmul.mubr.bf16.gmra.mrb[60].mxu1 %v5730_v19  ;;  %v2147_v32 = vsel %vm6897_vm3, %v2142_v18, %v2146_v53  ;;  %v2160_v34 = vrot.slane %v2158_v14, 5  ;;  %v2164_v35 = vrot.slane %v2162_v24, 4  ;;  %v2170_v36 = vrot.slane %v2168_v25, 5  ;;  %v1610_v16 = vld [vmem:[#allocation2 + $0xa4] sm:$0x1]  ;;  %v6781_v18 = vld [vmem:[%s8466_s3 + $0x230] sm:$0xff]  }
  0xd6   : > { %4758 = vmatprep.mubr.bf16.mxu1 %v6765_v5  ;;  %v2155_v38 = vor.u32 %v2154_v28, %v2151_v30  ;;  %v5715_v41 = vrot.slane %v1605_v33, 9  ;;  %v1754_v42 = vrot.slane %v1606_v37, 5  ;;  %6610 = vmatprep.subr.bf16.mxu0 %v6775_v22  ;;  %v5787_v43 = vcombine.low %v2643_v27, %v2646_v29  ;;  %v267_v14 = vld [vmem:[%s6885_s2 + $0xf0] sm:$0xff]  ;;  %v2535_v30 = vld [vmem:[#allocation2 + $0x58] sm:$0xf] }
  0xd7   : > { %v2165_v44 = vor.u32 %v2164_v35, %v2160_v34  ;;  %v1757_v45 = vrot.slane %v1607_v40, 5  ;;  %v5754_v50 = vcombine.low %v2137_v23, %v2147_v32  ;;  %v5772_v60 = vrot.slane %v2531_v46, 9  ;;  %v2534_v23 = vld [vmem:[#allocation2 + $0x54] sm:$0xe]  ;;  %v268_v28 = vld [vmem:[%s6885_s2 + $0xf8] sm:$0xff] }
  0xd8   : > { %4840 = vmatmul.mubr.bf16.gmra.mrb[56].mxu0 %v5753_v7  ;;  %v2156_v51 = vrot.slane %v2155_v38, 4  ;;  %v1755_v54 = vsel %vm7161_vm14, %v5715_v41, %v1754_v42  ;;  %v1756_v55 = vrot.slane %v1754_v42, 4  ;;  %v2649_v61 = vrot.slane %v2532_v49, 5  ;;  %v1608_v7 = vld [vmem:[#allocation2 + $0x9c] sm:$0xe] }
  0xd9   : > { %4847 = vmatprep.mubr.bf16.mxu0 %v5786_v13  ;;  %6611 = vmatpush3.bf16.msra.mxu0 %v6775_v22  ;;  %v2166_v58 = vrot.slane %v2165_v44, 4  ;;  %v2652_v62 = vrot.slane %v2533_v56, 5  ;;  %v2173_v10 = vshrl.u32 %v2019_v0, 16  ;;  %v2176_v11 = vshll.u32 %v2019_v0, 16  ;;  %v2022_v42 = vld [vmem:[#allocation2 + $0x54] sm:$0xf] }
  0xda   : > { %6612 = vmatprep.subr.bf16.mxu0 %v6778_v47  ;;  %v1758_v63 = vsel %vm7161_vm14, %v1756_v55, %v1757_v45  ;;  %v2161_v2 = vsel %vm6897_vm3, %v2156_v51, %v2160_v34  ;;  %v2651_v5 = vrot.slane %v2649_v61, 4  ;;  %v2650_v8 = vsel %vm7161_vm14, %v5772_v60, %v2649_v61  ;;  %v2536_v34 = vld [vmem:[#allocation2 + $0x5c] sm:$0x1]  ;;  %v2023_v45 = vld [vmem:[#allocation2 + $0x58] sm:$0xf] }
  0xdb   : > { %v2171_v3 = vsel %vm6897_vm3, %v2166_v58, %v2170_v36  ;;  %v5731_v4 = vcombine.low %v1755_v54, %v1758_v63  ;;  %v2182_v12 = vshll.u32 %v2020_v1, 16  ;;  %v2186_v53 = vshrl.u32 %v2020_v1, 16  ;;  %v2024_v46 = vld [vmem:[#allocation2 + $0x5c] sm:$0x1]  ;;  %v6770_v54 = vld [vmem:[#allocation2 + $0xb4] sm:$0xff]  }
  0xdc   : > { %v2653_v13 = vsel %vm7161_vm14, %v2651_v5, %v2652_v62  ;;  %v2192_v15 = vshll.u32 %v2021_v6, 16  ;;  %v5716_v17 = vrot.slane %v1608_v7, 9  ;;  %v5755_v19 = vcombine.low %v2161_v2, %v2171_v3  ;;  %v6784_v61 = vld [vmem:[%s8466_s3 + $0x238] sm:$0xff]   ;;  %v1611_v2 = vld [vmem:[#allocation2 + $0xa8] sm:$0xe] }
  0xdd   : > { %6613 = vmatpush3.bf16.msra.mxu0 %v6778_v47  ;;  %4759 = vmatmul.mubr.bf16.gmra.mrb[64].mxu1 %v5731_v4  ;;  %v2175_v20 = vrot.slane %v2173_v10, 4  ;;  %v2178_v21 = vrot.slane %v2176_v11, 5  ;;  %v2184_v22 = vrot.slane %v2182_v12, 5  ;;  %v2188_v24 = vrot.slane %v2186_v53, 4  ;;  %v1612_v7 = vld [vmem:[#allocation2 + $0xac] sm:$0xf] }
  0xde   : > { %4766 = vmatprep.mubr.bf16.mxu1 %v6769_v57  ;;  %v2194_v25 = vrot.slane %v2192_v15, 5  ;;  %v1761_v27 = vrot.slane %v1609_v9, 5  ;;  %v1764_v29 = vrot.slane %v1610_v16, 5  ;;  %6614 = vmatprep.subr.bf16.mxu0 %v6781_v18  ;;  %v5788_v33 = vcombine.low %v2650_v8, %v2653_v13  ;;  %v1613_v11 = vld [vmem:[#allocation2 + $0xb0] sm:$0x1] }
  0xdf   : > { %v2179_v32 = vor.u32 %v2178_v21, %v2175_v20  ;;  %v5773_v35 = vrot.slane %v2534_v23, 9  ;;  %v2656_v36 = vrot.slane %v2535_v30, 5  ;;  %v2189_v37 = vor.u32 %v2188_v24, %v2184_v22  ;;  %v2537_v21 = vld [vmem:[#allocation2 + $0x60] sm:$0xe] }
  0xe0   : > { %4848 = vmatmul.mubr.bf16.gmra.mrb[60].mxu0 %v5754_v50  ;;  %v1762_v38 = vsel %vm7161_vm14, %v5716_v17, %v1761_v27  ;;  %v1763_v40 = vrot.slane %v1761_v27, 4  ;;  %v2659_v41 = vrot.slane %v2536_v34, 5  ;;  %v7527_v47 = vpack.c.bf16 %v267_v14, %v267_v14  ;;  %v2539_v14 = vld [vmem:[#allocation2 + $0x68] sm:$0x1]  ;;  %v325_v27 = vld [vmem:[#allocation2 + $0xc0] sm:$0x1] }
  0xe1   : > { %4855 = vmatprep.mubr.bf16.mxu0 %v5787_v43  ;;  %6615 = vmatpush3.bf16.msra.mxu0 %v6781_v18  ;;  %v2180_v43 = vrot.slane %v2179_v32, 4  ;;  %v2658_v44 = vrot.slane %v2656_v36, 4  ;;  %v2190_v50 = vrot.slane %v2189_v37, 4  ;;  %v2197_v55 = vshrl.u32 %v2022_v42, 16  ;;  %v2025_v32 = vld [vmem:[#allocation2 + $0x60] sm:$0xf] }
  0xe2   : > { %v1765_v51 = vsel %vm7161_vm14, %v1763_v40, %v1764_v29  ;;  %v2200_v49 = vshll.u32 %v2022_v42, 16  ;;  %v2206_v58 = vshll.u32 %v2023_v45, 16  ;;  %v7533_v60 = vpack.c.bf16 %v268_v28, %v268_v28  ;;  %6616 = vmatprep.subr.bf16.mxu0 %v6784_v61 }
  0xe3   : > { %v2185_v56 = vsel %vm6897_vm3, %v2180_v43, %v2184_v22  ;;  %v5732_v57 = vcombine.low %v1762_v38, %v1765_v51  ;;  %v2195_v62 = vsel %vm6897_vm3, %v2190_v50, %v2194_v25  ;;  %v2657_v63 = vsel %vm7161_vm14, %v5773_v35, %v2656_v36  ;;  %v2538_v22 = vld [vmem:[#allocation2 + $0x64] sm:$0xf] }
  0xe4   : > { %v2199_v0 = vrot.slane %v2197_v55, 4  ;;  %v2202_v1 = vrot.slane %v2200_v49, 5  ;;  %v2660_v3 = vsel %vm7161_vm14, %v2658_v44, %v2659_v41  ;;  %v2208_v4 = vrot.slane %v2206_v58, 5  ;;  %v2026_v38 = vld [vmem:[#allocation2 + $0x64] sm:$0xf] }
  0xe5   : > { %4767 = vmatmul.mubr.bf16.gmra.mrb[68].mxu1 %v5732_v57  ;;  %v2210_v5 = vshrl.u32 %v2023_v45, 16  ;;  %v2216_v6 = vshll.u32 %v2024_v46, 16  ;;  %v5756_v8 = vcombine.low %v2185_v56, %v2195_v62  ;;  %v5717_v12 = vrot.slane %v1611_v2, 9  ;;  %6617 = vmatpush3.bf16.msra.mxu0 %v6784_v61  ;;  %v2027_v44 = vld [vmem:[#allocation2 + $0x68] sm:$0x1] }
  0xe6   : > { %4774 = vmatprep.mubr.bf16.mxu1 %v6770_v54  ;;  %v2203_v10 = vor.u32 %v2202_v1, %v2199_v0  ;;  %v1768_v9 = vrot.slane %v1612_v7, 5  ;;  %v1771_v15 = vrot.slane %v1613_v11, 5  ;;  %v732_v16 = vshrl.u32 %v7527_v47, 16  ;;  %v1614_v54 = vld [vmem:[#allocation2 + $0xb4] sm:$0xe] }
  0xe7   : > { %v2212_v13 = vrot.slane %v2210_v5, 4  ;;  %v2218_v53 = vrot.slane %v2216_v6, 5  ;;  %v5789_v17 = vcombine.low %v2657_v63, %v2660_v3  ;;  %v5774_v24 = vrot.slane %v2537_v21, 9  ;;  %v1615_v55 = vld [vmem:[#allocation2 + $0xb8] sm:$0xf] }
  0xe8   : > { %4856 = vmatmul.mubr.bf16.gmra.mrb[64].mxu0 %v5755_v19  ;;  %v2204_v18 = vrot.slane %v2203_v10, 4  ;;  %v1769_v19 = vsel %vm7161_vm14, %v5717_v12, %v1768_v9  ;;  %v1770_v20 = vrot.slane %v1768_v9, 4  ;;  %v2663_v25 = vrot.slane %v2538_v22, 5  ;;  %v1616_v58 = vld [vmem:[#allocation2 + $0xbc] sm:$0x1] }
  0xe9   : > { %4863 = vmatprep.mubr.bf16.mxu0 %v5788_v33  ;;  %v2213_v23 = vor.u32 %v2212_v13, %v2208_v4  ;;  %v2666_v28 = vrot.slane %v2539_v14, 5  ;;  %v326_v33 = vsel %vm6906_vm6, 0, %v325_v27  ;;  %v734_v40 = vrot.slane %v732_v16, 7  ;;  %v2540_v1 = vld [vmem:[#allocation2 + $0x6c] sm:$0xe] }
  0xea   : > { %v2209_v29 = vsel %vm6897_vm3, %v2204_v18, %v2208_v4  ;;  %v1772_v30 = vsel %vm7161_vm14, %v1770_v20, %v1771_v15  ;;  %v2664_v36 = vsel %vm7161_vm14, %v5774_v24, %v2663_v25  ;;  %v2665_v37 = vrot.slane %v2663_v25, 4  ;;  %327 = vst [vmem:[#allocation2 + $0xc0] sm:$0x1] %v326_v33  ;;  %v2541_v6 = vld [vmem:[#allocation2 + $0x70] sm:$0xf] }
  0xeb   : > { %v2214_v34 = vrot.slane %v2213_v23, 4  ;;  %v5733_v35 = vcombine.low %v1769_v19, %v1772_v30  ;;  %v735_v41 = vshll.u32 %v7527_v47, 16  ;;  %v740_v42 = vshrl.u32 %v7533_v60, 16  ;;  %v2542_v12 = vld [vmem:[#allocation2 + $0x74] sm:$0x1] }
  0xec   : > { %v743_v43 = vshll.u32 %v7533_v60, 16  ;;  %v2667_v46 = vsel %vm7161_vm14, %v2665_v37, %v2666_v28  ;;  %v2221_v50 = vshrl.u32 %v2025_v32, 16  ;;  %v2224_v51 = vshll.u32 %v2025_v32, 16  ;;  %v2028_v9 = vld [vmem:[#allocation2 + $0x6c] sm:$0xf] }
  0xed   : > { %v2219_v45 = vsel %vm6897_vm3, %v2214_v34, %v2218_v53  ;;  %4775 = vmatmul.mubr.bf16.gmra.mrb[72].mxu1 %v5733_v35  ;;  %v5790_v56 = vcombine.low %v2664_v36, %v2667_v46  ;;  %v737_v57 = vor.u32 %v735_v41, %v734_v40  ;;  %v738_v47 = vrot.slane %v734_v40, 4  ;;  %v2029_v18 = vld [vmem:[#allocation2 + $0x70] sm:$0xf]  ;;  %v2030_v14 = vld [vmem:[#allocation2 + $0x74] sm:$0x1] }
  0xee   : > { %v5757_v49 = vcombine.low %v2209_v29, %v2219_v45  ;;  %v7564_v60 = vrot.slane %v740_v42, 7  ;;  %v2223_v62 = vrot.slane %v2221_v50, 4  ;;  %v2226_v63 = vrot.slane %v2224_v51, 5  ;;  %v2949_v24 = vld [vmem:[#allocation2 + $0x18] sm:$0xf] }
  0xef   : > { %v2230_v0 = vshll.u32 %v2026_v38, 16  ;;  %v2234_v2 = vshrl.u32 %v2026_v38, 16  ;;  %v2240_v3 = vshll.u32 %v2027_v44, 16  ;;  %v5718_v4 = vrot.slane %v1614_v54, 9  ;;  %v2950_v46 = vld [vmem:[#allocation2 + $0x1c] sm:$0xf] }
  0xf0   : > { %4864 = vmatmul.mubr.bf16.gmra.mrb[68].mxu0 %v5756_v8  ;;  %v1775_v5 = vrot.slane %v1615_v55, 5  ;;  %v745_v7 = vor.u32 %v743_v43, %v7564_v60  ;;  %v2227_v10 = vor.u32 %v2226_v63, %v2223_v62  ;;  %v1778_v23 = vrot.slane %v1616_v58, 5  ;;  %v2951_v50 = vld [vmem:[#allocation2 + $0x20] sm:$0x1] }
  0xf1   : > { %4871 = vmatprep.mubr.bf16.mxu0 %v5789_v17  ;;  %v2232_v11 = vrot.slane %v2230_v0, 5  ;;  %v903_v13 = vld [vmem:[#allocation2 + $0xc0] sm:$0xf]  ;;  %v2236_v53 = vrot.slane %v2234_v2, 4  ;;  %v2242_v15 = vrot.slane %v2240_v3, 5  ;;  %v5775_v27 = vrot.slane %v2540_v1, 9 }
  0xf2   : > { %v7570_v16 = vsel %vm7161_vm14, %v5718_v4, %v1775_v5  ;;  %v1777_v17 = vrot.slane %v1775_v5, 4  ;;  %v746_v20 = vsel %vm6932_vm10, %v738_v47, %v745_v7  ;;  %v904_v21 = vsel %vm6944_vm11, %v737_v57, %v903_v13  ;;  %v2543_v57 = vld [vmem:[#allocation2 + $0x78] sm:$0xe]  ;;  %v2544_v47 = vld [vmem:[#allocation2 + $0x7c] sm:$0xf] }
  0xf3   : > { %v2228_v22 = vrot.slane %v2227_v10, 4  ;;  %905 = vst [vmem:[#allocation2 + $0xc0] sm:$0xf] %v904_v21  ;;  %906 = vst [vmem:[#allocation2 + $0xc4] sm:$0xf] %v746_v20  ;;  %v2237_v25 = vor.u32 %v2236_v53, %v2232_v11  ;;  %v2670_v29 = vrot.slane %v2541_v6, 5 }
  0xf4   : > { %v2673_v30 = vrot.slane %v2542_v12, 5  ;;  %v1779_v52 = vsel %vm7161_vm14, %v1777_v17, %v1778_v23  ;;  %v2245_v59 = vshrl.u32 %v2028_v9, 16  ;;  %v2248_v32 = vshll.u32 %v2028_v9, 16  ;;  %v2545_v2 = vld [vmem:[#allocation2 + $0x80] sm:$0x1] }
  0xf5   : > { %v2233_v33 = vsel %vm6897_vm3, %v2228_v22, %v2232_v11  ;;  %v2238_v34 = vrot.slane %v2237_v25, 4  ;;  %v5734_v35 = vcombine.low %v7570_v16, %v1779_v52  ;;  %v2671_v36 = vsel %vm7161_vm14, %v5775_v27, %v2670_v29  ;;  %v2031_v9 = vld [vmem:[#allocation2 + $0x78] sm:$0xf]  ;;  %v2033_v52 = vld [vmem:[#allocation2 + $0x80] sm:$0x1] }
  0xf6   : > { %v2672_v37 = vrot.slane %v2670_v29, 4  ;;  %v2247_v38 = vrot.slane %v2245_v59, 4  ;;  %v2250_v40 = vrot.slane %v2248_v32, 5  ;;  %v2254_v41 = vshll.u32 %v2029_v18, 16 }
  0xf7   : > { %v2258_v42 = vshrl.u32 %v2029_v18, 16  ;;  %v2243_v43 = vsel %vm6897_vm3, %v2238_v34, %v2242_v15  ;;  %v2264_v45 = vshll.u32 %v2030_v14, 16  ;;  %v2998_v51 = vshrl.u32 %v2949_v24, 16  ;;  %v2032_v18 = vld [vmem:[#allocation2 + $0x7c] sm:$0xf] }
  0xf8   : > { %4872 = vmatmul.mubr.bf16.gmra.mrb[72].mxu0 %v5757_v49  ;;  %v2674_v44 = vsel %vm7161_vm14, %v2672_v37, %v2673_v30  ;;  %v5758_v54 = vcombine.low %v2233_v33, %v2243_v43  ;;  %v2251_v49 = vor.u32 %v2250_v40, %v2247_v38  ;;  %v3001_v1 = vshll.u32 %v2949_v24, 16  ;;  %v2952_v37 = vld [vmem:[#allocation2 + $0x24] sm:$0xf]  ;;  %v2953_v38 = vld [vmem:[#allocation2 + $0x28] sm:$0xf] }
  0xf9   : > { %4879 = vmatprep.mubr.bf16.mxu0 %v5790_v56  ;;  %v5791_v55 = vcombine.low %v2671_v36, %v2674_v44  ;;  %v2256_v56 = vrot.slane %v2254_v41, 5  ;;  %v2260_v62 = vrot.slane %v2258_v42, 4  ;;  %v2266_v63 = vrot.slane %v2264_v45, 5  ;;  %v2954_v44 = vld [vmem:[#allocation2 + $0x2c] sm:$0x1] }
  0xfa   : > { %v3000_v0 = vrot.slane %v2998_v51, 4  ;;  %v6774_v3 = vld [vmem:[#allocation2 + $0xc0] sm:$0xff]   ;;  %v2252_v4 = vrot.slane %v2251_v49, 4  ;;  %v3003_v10 = vrot.slane %v3001_v1, 5  ;;  %v3007_v11 = vshll.u32 %v2950_v46, 16 }
  0xfb   : > { %v2261_v7 = vor.u32 %v2260_v62, %v2256_v56  ;;  %v3011_v12 = vshrl.u32 %v2950_v46, 16  ;;  %4782 = vmatprep.mubr.bf16.mxu1 %v6774_v3  ;;  %v3017_v15 = vshll.u32 %v2951_v50, 16  ;;  %v5776_v16 = vrot.slane %v2543_v57, 9  ;;  %v2546_v45 = vld [vmem:[#allocation2 + $0x84] sm:$0xe] }
  0xfc   : > { %v2257_v53 = vsel %vm6897_vm3, %v2252_v4, %v2256_v56  ;;  %v2677_v17 = vrot.slane %v2544_v47, 5  ;;  %4783 = vmatmul.mubr.bf16.gmra.mrb[76].mxu1 %v5734_v35  ;;  %v3004_v20 = vor.u32 %v3003_v10, %v3000_v0  ;;  %v3009_v21 = vrot.slane %v3007_v11, 5  ;;  %v6776_v56 = vld [vmem:[#allocation2 + $0x18] sm:$0xff]   ;;  %v2548_v62 = vld [vmem:[#allocation2 + $0x8c] sm:$0x1] }
  0xfd   : > { %v3013_v22 = vrot.slane %v3011_v12, 4  ;;  %v3019_v14 = vrot.slane %v3017_v15, 5  ;;  %v2680_v27 = vrot.slane %v2545_v2, 5  ;;  %v2269_v59 = vshrl.u32 %v2031_v9, 16  ;;  %v2034_v3 = vld [vmem:[#allocation2 + $0x84] sm:$0xf] }
  0xfe   : > { %v2678_v24 = vsel %vm7161_vm14, %v5776_v16, %v2677_v17  ;;  %v2679_v25 = vrot.slane %v2677_v17, 4  ;;  %v2272_v35 = vshll.u32 %v2031_v9, 16  ;;  %v2278_v36 = vshll.u32 %v2032_v18, 16  ;;  %v2035_v12 = vld [vmem:[#allocation2 + $0x88] sm:$0xf] }
  0xff   : > { %v3014_v33 = vor.u32 %v3013_v22, %v3009_v21  ;;  %v2271_v43 = vrot.slane %v2269_v59, 4  ;;  %v2282_v51 = vshrl.u32 %v2032_v18, 16  ;;  %v3022_v57 = vshrl.u32 %v2952_v37, 16 }
 0x100   : > { %4880 = vmatmul.mubr.bf16.gmra.mrb[76].mxu0 %v5758_v54  ;;  %v2681_v34 = vsel %vm7161_vm14, %v2679_v25, %v2680_v27  ;;  %v2274_v46 = vrot.slane %v2272_v35, 5  ;;  %v2280_v50 = vrot.slane %v2278_v36, 5  ;;  %v2288_v54 = vshll.u32 %v2033_v52, 16 }
 0x101   : > { %v7562_v61 = vpop.f32.mrb[0].mxu0  ;;  %4887 = vmatprep.mubr.bf16.mxu0 %v5791_v55  ;;  %v3015_v41 = vrot.slane %v3014_v33, 4  ;;  %v5792_v42 = vcombine.low %v2678_v24, %v2681_v34  ;;  %v2547_v55 = vld [vmem:[#allocation2 + $0x88] sm:$0xf]  ;;  %v3025_v47 = vshll.u32 %v2952_v37, 16  ;;  %v2284_v1 = vrot.slane %v2282_v51, 4 }
 0x102   : > { %v6147_v19 = vpop.f32.mrb[1].mxu0  ;;  %v2275_v0 = vor.u32 %v2274_v46, %v2271_v43  ;;  %v2290_v2 = vrot.slane %v2288_v54, 5  ;;  %v3024_v4 = vrot.slane %v3022_v57, 4  ;;  %v3035_v11 = vshrl.u32 %v2953_v38, 16  ;;  %v2956_v46 = vld [vmem:[#allocation2 + $0x34] sm:$0xf] }
 0x103   : > { %v6149_v28 = vpop.f32.mrb[2].mxu0  ;;  %v7588_v5 = vadd.f32 %v6147_v19, %v7562_v61  ;;  %v2262_v19 = vrot.slane %v2261_v7, 4  ;;  %v3020_v49 = vsel %vm6897_vm3, %v3015_v41, %v3019_v14  ;;  %v3027_v7 = vrot.slane %v3025_v47, 5  ;;  %v2549_v57 = vld [vmem:[#allocation2 + $0x90] sm:$0xe] }
 0x104   : > { %v6150_v58 = vpop.f32.mrb[3].mxu0  ;;  %v2276_v9 = vrot.slane %v2275_v0, 4  ;;  %v3041_v15 = vshll.u32 %v2954_v44, 16  ;;  %v5777_v16 = vrot.slane %v2546_v45, 9  ;;  %v2293_v27 = vshrl.u32 %v2034_v3, 16  ;;  %v6777_v44 = vld [vmem:[#allocation2 + $0x24] sm:$0xff]  }
 0x105   : > { %v7590_v6 = vadd.f32 %v6150_v58, %v6149_v28  ;;  %v2267_v30 = vsel %vm6897_vm3, %v2262_v19, %v2266_v63  ;;  %v3005_v28 = vrot.slane %v3004_v20, 4  ;;  %v3031_v58 = vshll.u32 %v2953_v38, 16  ;;  %v2955_v38 = vld [vmem:[#allocation2 + $0x30] sm:$0xf] }
 0x106   : > { %v5759_v32 = vcombine.low %v2257_v53, %v2267_v30  ;;  %v2285_v53 = vor.u32 %v2284_v1, %v2280_v50  ;;  %v3028_v18 = vor.u32 %v3027_v7, %v3024_v4  ;;  %v3037_v19 = vrot.slane %v3035_v11, 4  ;;  %v2550_v1 = vld [vmem:[#allocation2 + $0x94] sm:$0xf]  ;;  %v2551_v11 = vld [vmem:[#allocation2 + $0x98] sm:$0x1] }
 0x107   : > { %v3010_v40 = vsel %vm6897_vm3, %v3005_v28, %v3009_v21  ;;  %v3033_v10 = vrot.slane %v3031_v58, 5  ;;  %v2684_v20 = vrot.slane %v2547_v55, 5  ;;  %v2687_v21 = vrot.slane %v2548_v62, 5 }
 0x108   : > { %4888 = vmatmul.mubr.bf16.gmra.mrb[80].mxu0 %v5759_v32  ;;  %v5815_v63 = vcombine.low %v3010_v40, %v3020_v49  ;;  %v2281_v14 = vsel %vm6897_vm3, %v2276_v9, %v2280_v50  ;;  %v2286_v24 = vrot.slane %v2285_v53, 4  ;;  %v3043_v25 = vrot.slane %v3041_v15, 5  ;;  %v2036_v32 = vld [vmem:[#allocation2 + $0x8c] sm:$0x1]  ;;  %v2957_v50 = vld [vmem:[#allocation2 + $0x38] sm:$0x1] }
 0x109   : > { %v7592_v13 = vpop.f32.mrb[0].mxu1  ;;  %4895 = vmatprep.mubr.bf16.mxu0 %v5792_v42  ;;  %v3029_v28 = vrot.slane %v3028_v18, 4  ;;  %v3038_v33 = vor.u32 %v3037_v19, %v3033_v10  ;;  %v2685_v52 = vsel %vm7161_vm14, %v5777_v16, %v2684_v20  ;;  %v2686_v59 = vrot.slane %v2684_v20, 4 }
 0x10a   : > { %v7596_v61 = vpop.f32.mrb[1].mxu1  ;;  %4984 = vmatprep.mubr.bf16.mxu1 %v5815_v63  ;;  %v2291_v34 = vsel %vm6897_vm3, %v2286_v24, %v2290_v2  ;;  %v2295_v35 = vrot.slane %v2293_v27, 4  ;;  %v2296_v36 = vshll.u32 %v2034_v3, 16  ;;  %v2302_v37 = vshll.u32 %v2035_v12, 16 }
 0x10b   : > { %v7598_v23 = vpop.f32.mrb[2].mxu1  ;;  %4985 = vmatmul.mubr.bf16.vlgmr.msra.gmra.mrb[80].mxu1 %v6776_v56  ;;  %v5760_v41 = vcombine.low %v2281_v14, %v2291_v34  ;;  %v3034_v42 = vsel %vm6897_vm3, %v3029_v28, %v3033_v10  ;;  %v3039_v43 = vrot.slane %v3038_v33, 4  ;;  %v2688_v45 = vsel %vm7161_vm14, %v2686_v59, %v2687_v21  ;;  %v2037_v21 = vld [vmem:[#allocation2 + $0x90] sm:$0xf]  ;;  %v2038_v33 = vld [vmem:[#allocation2 + $0x94] sm:$0xf] }
 0x10c   : > { %v7602_v29 = vpop.f32.mrb[3].mxu1  ;;  %v5793_v54 = vcombine.low %v2685_v52, %v2688_v45  ;;  %v2298_v55 = vrot.slane %v2296_v36, 5  ;;  %v2304_v49 = vrot.slane %v2302_v37, 5  ;;  %v2306_v56 = vshrl.u32 %v2035_v12, 16 }
 0x10d   : > { %v3044_v58 = vsel %vm6897_vm3, %v3039_v43, %v3043_v25  ;;  %v2312_v62 = vshll.u32 %v2036_v32, 16  ;;  %v3046_v63 = vshrl.u32 %v2955_v38, 16  ;;  %v3049_v0 = vshll.u32 %v2955_v38, 16 }
 0x10e   : > { %v5816_v3 = vcombine.low %v3034_v42, %v3044_v58  ;;  %v2299_v4 = vor.u32 %v2298_v55, %v2295_v35  ;;  %v2308_v7 = vrot.slane %v2306_v56, 4  ;;  %v3055_v10 = vshll.u32 %v2956_v46, 16  ;;  %v2959_v56 = vld [vmem:[#allocation2 + $0x40] sm:$0xf] }
 0x10f   : > { %v2314_v12 = vrot.slane %v2312_v62, 5  ;;  %v3048_v9 = vrot.slane %v3046_v63, 4  ;;  %v3051_v53 = vrot.slane %v3049_v0, 5  ;;  %v3059_v15 = vshrl.u32 %v2956_v46, 16  ;;  %v2958_v46 = vld [vmem:[#allocation2 + $0x3c] sm:$0xf] }
 0x110   : > { %4896 = vmatmul.mubr.bf16.gmra.mrb[84].mxu0 %v5760_v41  ;;  %4992 = vmatprep.mubr.bf16.mxu1 %v5816_v3  ;;  %v2300_v16 = vrot.slane %v2299_v4, 4  ;;  %v2309_v18 = vor.u32 %v2308_v7, %v2304_v49  ;;  %v3057_v19 = vrot.slane %v3055_v10, 5  ;;  %v3065_v20 = vshll.u32 %v2957_v50, 16  ;;  %v2039_v41 = vld [vmem:[#allocation2 + $0x98] sm:$0x1]  ;;  %v6779_v7 = vld [vmem:[#allocation2 + $0x30] sm:$0xff]  }
 0x111   : > { %4903 = vmatprep.mubr.bf16.mxu0 %v5793_v54  ;;  %v3052_v24 = vor.u32 %v3051_v53, %v3048_v9  ;;  %v3061_v25 = vrot.slane %v3059_v15, 4  ;;  %v5778_v27 = vrot.slane %v2549_v57, 9  ;;  %v2691_v28 = vrot.slane %v2550_v1, 5  ;;  %v2960_v57 = vld [vmem:[#allocation2 + $0x44] sm:$0x1] }
 0x112   : > { %v2305_v52 = vsel %vm6897_vm3, %v2300_v16, %v2304_v49  ;;  %v2310_v59 = vrot.slane %v2309_v18, 4  ;;  %v3067_v32 = vrot.slane %v3065_v20, 5  ;;  %v2694_v34 = vrot.slane %v2551_v11, 5  ;;  %v2552_v1 = vld [vmem:[#allocation2 + $0x9c] sm:$0xe] }
 0x113   : > { %v7612_v17 = vpop.f32.mrb[4].mxu0  ;;  %4993 = vmatmul.mubr.bf16.gmra.mrb[84].mxu1 %v6777_v44  ;;  %v3053_v35 = vrot.slane %v3052_v24, 4  ;;  %v3062_v36 = vor.u32 %v3061_v25, %v3057_v19  ;;  %v2692_v37 = vsel %vm7161_vm14, %v5778_v27, %v2691_v28  ;;  %v2693_v38 = vrot.slane %v2691_v28, 4  ;;  %v2553_v3 = vld [vmem:[#allocation2 + $0xa0] sm:$0xf] }
 0x114   : > { %v7614_v22 = vpop.f32.mrb[5].mxu0  ;;  %v2315_v42 = vsel %vm6897_vm3, %v2310_v59, %v2314_v12  ;;  %v2317_v43 = vshrl.u32 %v2037_v21, 16  ;;  %v2320_v44 = vshll.u32 %v2037_v21, 16  ;;  %v2326_v45 = vshll.u32 %v2038_v33, 16  ;;  %v2554_v9 = vld [vmem:[#allocation2 + $0xa4] sm:$0x1] }
 0x115   : > { %v7624_v40 = vpop.f32.mrb[6].mxu0  ;;  %v5761_v50 = vcombine.low %v2305_v52, %v2315_v42  ;;  %v3058_v54 = vsel %vm6897_vm3, %v3053_v35, %v3057_v19  ;;  %v3063_v55 = vrot.slane %v3062_v36, 4  ;;  %v2695_v49 = vsel %vm7161_vm14, %v2693_v38, %v2694_v34  ;;  %v2040_v59 = vld [vmem:[#allocation2 + $0x9c] sm:$0xf]  ;;  %v2041_v36 = vld [vmem:[#allocation2 + $0xa0] sm:$0xf] }
 0x116   : > { %v7632_v47 = vpop.f32.mrb[7].mxu0  ;;  %v5794_v58 = vcombine.low %v2692_v37, %v2695_v49  ;;  %v2319_v62 = vrot.slane %v2317_v43, 4  ;;  %v2322_v63 = vrot.slane %v2320_v44, 5  ;;  %v2328_v0 = vrot.slane %v2326_v45, 5 }
 0x117   : > { %v7618_v30 = vpop.f32.mrb[4].mxu1  ;;  %v3068_v4 = vsel %vm6897_vm3, %v3063_v55, %v3067_v32  ;;  %v2330_v10 = vshrl.u32 %v2038_v33, 16  ;;  %v2336_v11 = vshll.u32 %v2039_v41, 16  ;;  %v3070_v12 = vshrl.u32 %v2958_v46, 16  ;;  %v2042_v55 = vld [vmem:[#allocation2 + $0xa4] sm:$0x1] }
 0x118   : > { %v7630_v51 = vpop.f32.mrb[5].mxu1  ;;  %4904 = vmatmul.mubr.bf16.gmra.mrb[88].mxu0 %v5761_v50  ;;  %v5817_v53 = vcombine.low %v3058_v54, %v3068_v4  ;;  %v2323_v15 = vor.u32 %v2322_v63, %v2319_v62  ;;  %v3073_v16 = vshll.u32 %v2958_v46, 16  ;;  %v3079_v18 = vshll.u32 %v2959_v56, 16  ;;  %v6780_v63 = vld [vmem:[#allocation2 + $0x3c] sm:$0xff]   ;;  %v2962_v4 = vld [vmem:[#allocation2 + $0x4c] sm:$0xf] }
 0x119   : > { %v7636_v2 = vpop.f32.mrb[6].mxu1  ;;  %4911 = vmatprep.mubr.bf16.mxu0 %v5794_v58  ;;  %v2332_v19 = vrot.slane %v2330_v10, 4  ;;  %v2338_v20 = vrot.slane %v2336_v11, 5  ;;  %v3072_v21 = vrot.slane %v3070_v12, 4  ;;  %v3083_v24 = vshrl.u32 %v2959_v56, 16 }
 0x11a   : > { %v7638_v14 = vpop.f32.mrb[7].mxu1  ;;  %5000 = vmatprep.mubr.bf16.mxu1 %v5817_v53  ;;  %v2324_v25 = vrot.slane %v2323_v15, 4  ;;  %v3075_v27 = vrot.slane %v3073_v16, 5  ;;  %v3081_v28 = vrot.slane %v3079_v18, 5  ;;  %v3089_v52 = vshll.u32 %v2960_v57, 16 }
 0x11b   : > { %5001 = vmatmul.mubr.bf16.gmra.mrb[88].mxu1 %v6779_v7  ;;  %v2333_v33 = vor.u32 %v2332_v19, %v2328_v0  ;;  %v3085_v32 = vrot.slane %v3083_v24, 4  ;;  %v5779_v34 = vrot.slane %v2552_v1, 9  ;;  %v2698_v35 = vrot.slane %v2553_v3, 5  ;;  %v2961_v3 = vld [vmem:[#allocation2 + $0x48] sm:$0xf] }
 0x11c   : > { %v2329_v38 = vsel %vm6897_vm3, %v2324_v25, %v2328_v0  ;;  %v3076_v41 = vor.u32 %v3075_v27, %v3072_v21  ;;  %v3091_v42 = vrot.slane %v3089_v52, 5  ;;  %v2701_v43 = vrot.slane %v2554_v9, 5  ;;  %v2963_v19 = vld [vmem:[#allocation2 + $0x50] sm:$0x1] }
 0x11d   : > { %v2334_v44 = vrot.slane %v2333_v33, 4  ;;  %v3086_v45 = vor.u32 %v3085_v32, %v3081_v28  ;;  %v2699_v46 = vsel %vm7161_vm14, %v5779_v34, %v2698_v35  ;;  %v2700_v50 = vrot.slane %v2698_v35, 4  ;;  %v2555_v34 = vld [vmem:[#allocation2 + $0xa8] sm:$0xe]  ;;  %v2556_v35 = vld [vmem:[#allocation2 + $0xac] sm:$0xf] }
 0x11e   : > { %v3077_v54 = vrot.slane %v3076_v41, 4  ;;  %v2341_v49 = vshrl.u32 %v2040_v59, 16  ;;  %v2344_v56 = vshll.u32 %v2040_v59, 16  ;;  %v2350_v57 = vshll.u32 %v2041_v36, 16 }
 0x11f   : > { %v2339_v58 = vsel %vm6897_vm3, %v2334_v44, %v2338_v20  ;;  %v3087_v62 = vrot.slane %v3086_v45, 4  ;;  %v2702_v0 = vsel %vm7161_vm14, %v2700_v50, %v2701_v43  ;;  %v2354_v1 = vshrl.u32 %v2041_v36, 16  ;;  %v2557_v43 = vld [vmem:[#allocation2 + $0xb0] sm:$0x1] }
 0x120   : > { %v5762_v7 = vcombine.low %v2329_v38, %v2339_v58  ;;  %v3082_v10 = vsel %vm6897_vm3, %v3077_v54, %v3081_v28  ;;  %v5795_v11 = vcombine.low %v2699_v46, %v2702_v0  ;;  %v2343_v12 = vrot.slane %v2341_v49, 4  ;;  %v2043_v54 = vld [vmem:[#allocation2 + $0xa8] sm:$0xf]  ;;  %v2044_v58 = vld [vmem:[#allocation2 + $0xac] sm:$0xf] }
 0x121   : > { %v3092_v53 = vsel %vm6897_vm3, %v3087_v62, %v3091_v42  ;;  %v2346_v15 = vrot.slane %v2344_v56, 5  ;;  %v2352_v16 = vrot.slane %v2350_v57, 5  ;;  %v2356_v18 = vrot.slane %v2354_v1, 4 }
 0x122   : > { %4912 = vmatmul.mubr.bf16.gmra.mrb[92].mxu0 %v5762_v7  ;;  %v5818_v21 = vcombine.low %v3082_v10, %v3092_v53  ;;  %v2360_v24 = vshll.u32 %v2042_v55, 16  ;;  %v3094_v25 = vshrl.u32 %v2961_v3, 16  ;;  %v3097_v27 = vshll.u32 %v2961_v3, 16 }
 0x123   : > { %4919 = vmatprep.mubr.bf16.mxu0 %v5795_v11  ;;  %v2347_v28 = vor.u32 %v2346_v15, %v2343_v12  ;;  %v2357_v59 = vor.u32 %v2356_v18, %v2352_v16  ;;  %v3103_v33 = vshll.u32 %v2962_v4, 16  ;;  %v3107_v32 = vshrl.u32 %v2962_v4, 16  ;;  %v2045_v4 = vld [vmem:[#allocation2 + $0xb0] sm:$0x1]  ;;  %v2964_v15 = vld [vmem:[#allocation2 + $0x54] sm:$0xf] }
 0x124   : > { %5008 = vmatprep.mubr.bf16.mxu1 %v5818_v21  ;;  %v2362_v36 = vrot.slane %v2360_v24, 5  ;;  %v3096_v38 = vrot.slane %v3094_v25, 4  ;;  %v3099_v41 = vrot.slane %v3097_v27, 5  ;;  %v3113_v42 = vshll.u32 %v2963_v19, 16  ;;  %v6782_v19 = vld [vmem:[#allocation2 + $0x48] sm:$0xff]  }
 0x125   : > { %5009 = vmatmul.mubr.bf16.gmra.mrb[92].mxu1 %v6780_v63  ;;  %v2348_v44 = vrot.slane %v2347_v28, 4  ;;  %v2358_v45 = vrot.slane %v2357_v59, 4  ;;  %v3105_v46 = vrot.slane %v3103_v33, 5  ;;  %v3109_v50 = vrot.slane %v3107_v32, 4  ;;  %v2965_v33 = vld [vmem:[#allocation2 + $0x58] sm:$0xf] }
 0x126   : > { %v3100_v55 = vor.u32 %v3099_v41, %v3096_v38  ;;  %v3115_v49 = vrot.slane %v3113_v42, 5  ;;  %v5780_v56 = vrot.slane %v2555_v34, 9  ;;  %v2705_v57 = vrot.slane %v2556_v35, 5  ;;  %v2966_v38 = vld [vmem:[#allocation2 + $0x5c] sm:$0x1] }
 0x127   : > { %v2353_v0 = vsel %vm6897_vm3, %v2348_v44, %v2352_v16  ;;  %v2363_v1 = vsel %vm6897_vm3, %v2358_v45, %v2362_v36  ;;  %v3110_v3 = vor.u32 %v3109_v50, %v3105_v46  ;;  %v2708_v63 = vrot.slane %v2557_v43, 5  ;;  %v2558_v41 = vld [vmem:[#allocation2 + $0xb4] sm:$0xe]  ;;  %v2559_v50 = vld [vmem:[#allocation2 + $0xb8] sm:$0xf] }
 0x128   : > { %v7652_v37 = vpop.f32.mrb[8].mxu0  ;;  %v5763_v10 = vcombine.low %v2353_v0, %v2363_v1  ;;  %v3101_v11 = vrot.slane %v3100_v55, 4  ;;  %v2706_v12 = vsel %vm7161_vm14, %v5780_v56, %v2705_v57  ;;  %v2707_v53 = vrot.slane %v2705_v57, 4 }
 0x129   : > { %v7664_v9 = vpop.f32.mrb[9].mxu0  ;;  %v3111_v18 = vrot.slane %v3110_v3, 4  ;;  %v2365_v21 = vshrl.u32 %v2043_v54, 16  ;;  %v2368_v24 = vshll.u32 %v2043_v54, 16  ;;  %v2374_v16 = vshll.u32 %v2044_v58, 16 }
 0x12a   : > { %v7670_v52 = vpop.f32.mrb[10].mxu0  ;;  %4920 = vmatmul.mubr.bf16.gmra.mrb[96].mxu0 %v5763_v10  ;;  %v3106_v25 = vsel %vm6897_vm3, %v3101_v11, %v3105_v46  ;;  %v2709_v27 = vsel %vm7161_vm14, %v2707_v53, %v2708_v63  ;;  %v2378_v28 = vshrl.u32 %v2044_v58, 16  ;;  %v2384_v59 = vshll.u32 %v2045_v4, 16  ;;  %v2560_v58 = vld [vmem:[#allocation2 + $0xbc] sm:$0x1] }
 0x12b   : > { %v7678_v7 = vpop.f32.mrb[11].mxu0  ;;  %v3116_v32 = vsel %vm6897_vm3, %v3111_v18, %v3115_v49  ;;  %v5796_v34 = vcombine.low %v2706_v12, %v2709_v27  ;;  %v2367_v35 = vrot.slane %v2365_v21, 4  ;;  %v2370_v36 = vrot.slane %v2368_v24, 5  ;;  %v2046_v4 = vld [vmem:[#allocation2 + $0xb4] sm:$0xf] }
 0x12c   : > { %v5819_v42 = vcombine.low %v3106_v25, %v3116_v32  ;;  %v2376_v43 = vrot.slane %v2374_v16, 5  ;;  %v2380_v44 = vrot.slane %v2378_v28, 4  ;;  %v2386_v45 = vrot.slane %v2384_v59, 5  ;;  %v2047_v25 = vld [vmem:[#allocation2 + $0xb8] sm:$0xf] }
 0x12d   : > { %v7668_v20 = vpop.f32.mrb[8].mxu1  ;;  %4927 = vmatprep.mubr.bf16.mxu0 %v5796_v34  ;;  %v2371_v54 = vor.u32 %v2370_v36, %v2367_v35  ;;  %v3118_v55 = vshrl.u32 %v2964_v15, 16  ;;  %v3121_v56 = vshll.u32 %v2964_v15, 16  ;;  %v3127_v57 = vshll.u32 %v2965_v33, 16  ;;  %v2048_v36 = vld [vmem:[#allocation2 + $0xbc] sm:$0x1] }
 0x12e   : > { %v7672_v62 = vpop.f32.mrb[9].mxu1  ;;  %5016 = vmatprep.mubr.bf16.mxu1 %v5819_v42  ;;  %v2381_v49 = vor.u32 %v2380_v44, %v2376_v43  ;;  %v3131_v1 = vshrl.u32 %v2965_v33, 16  ;;  %v3137_v3 = vshll.u32 %v2966_v38, 16  ;;  %v5781_v63 = vrot.slane %v2558_v41, 9 }
 0x12f   : > { %v7688_v46 = vpop.f32.mrb[10].mxu1  ;;  %5017 = vmatmul.mubr.bf16.gmra.mrb[96].mxu1 %v6782_v19  ;;  %v2372_v11 = vrot.slane %v2371_v54, 4  ;;  %v3120_v12 = vrot.slane %v3118_v55, 4  ;;  %v3123_v53 = vrot.slane %v3121_v56, 5  ;;  %v3129_v18 = vrot.slane %v3127_v57, 5  ;;  %v6783_v56 = vld [vmem:[#allocation2 + $0x54] sm:$0xff]  }
 0x130   : > { %v7690_v0 = vpop.f32.mrb[11].mxu1  ;;  %v2382_v21 = vrot.slane %v2381_v49, 4  ;;  %v3133_v24 = vrot.slane %v3131_v1, 4  ;;  %v3139_v15 = vrot.slane %v3137_v3, 5  ;;  %v2712_v16 = vrot.slane %v2559_v50, 5 }
 0x131   : > { %v2377_v27 = vsel %vm6897_vm3, %v2372_v11, %v2376_v43  ;;  %v3124_v28 = vor.u32 %v3123_v53, %v3120_v12  ;;  %v2715_v59 = vrot.slane %v2560_v58, 5  ;;  %v2389_v33 = vshrl.u32 %v2046_v4, 16  ;;  %v2967_v54 = vld [vmem:[#allocation2 + $0x60] sm:$0xf]  ;;  %v2969_v12 = vld [vmem:[#allocation2 + $0x68] sm:$0x1] }
 0x132   : > { %v2387_v32 = vsel %vm6897_vm3, %v2382_v21, %v2386_v45  ;;  %v3134_v34 = vor.u32 %v3133_v24, %v3129_v18  ;;  %v2713_v19 = vsel %vm7161_vm14, %v5781_v63, %v2712_v16  ;;  %v2714_v35 = vrot.slane %v2712_v16, 4 }
 0x133   : > { %v5764_v41 = vcombine.low %v2377_v27, %v2387_v32  ;;  %v3125_v42 = vrot.slane %v3124_v28, 4  ;;  %v2391_v44 = vrot.slane %v2389_v33, 4  ;;  %v2392_v50 = vshll.u32 %v2046_v4, 16  ;;  %v2968_v4 = vld [vmem:[#allocation2 + $0x64] sm:$0xf] }
 0x134   : > { %v3135_v55 = vrot.slane %v3134_v34, 4  ;;  %v2716_v45 = vsel %vm7161_vm14, %v2714_v35, %v2715_v59  ;;  %v2398_v57 = vshll.u32 %v2047_v25, 16  ;;  %v2402_v58 = vshrl.u32 %v2047_v25, 16  ;;  %v375_v27 = vld [vmem:[#allocation2 + $0xc8] sm:$0x1] }
 0x135   : > { %v7692_v10 = vpop.f32.mrb[12].mxu0  ;;  %4928 = vmatmul.mubr.bf16.gmra.mrb[100].mxu0 %v5764_v41  ;;  %v3130_v1 = vsel %vm6897_vm3, %v3125_v42, %v3129_v18  ;;  %v5797_v3 = vcombine.low %v2713_v19, %v2716_v45  ;;  %v2394_v63 = vrot.slane %v2392_v50, 5  ;;  %v2408_v11 = vshll.u32 %v2048_v36, 16  ;;  %v2561_v18 = vld [vmem:[#allocation2 + $0xc0] sm:$0xe] }
 0x136   : > { %v7700_v38 = vpop.f32.mrb[13].mxu0  ;;  %v3140_v53 = vsel %vm6897_vm3, %v3135_v55, %v3139_v15  ;;  %v2400_v21 = vrot.slane %v2398_v57, 5  ;;  %v2404_v24 = vrot.slane %v2402_v58, 4  ;;  %v3142_v16 = vshrl.u32 %v2967_v54, 16  ;;  %v2562_v34 = vld [vmem:[#allocation2 + $0xc4] sm:$0xf] }
 0x137   : > { %v7706_v49 = vpop.f32.mrb[14].mxu0  ;;  %v5820_v25 = vcombine.low %v3130_v1, %v3140_v53  ;;  %4935 = vmatprep.mubr.bf16.mxu0 %v5797_v3  ;;  %v2395_v59 = vor.u32 %v2394_v63, %v2391_v44  ;;  %v2410_v33 = vrot.slane %v2408_v11, 5  ;;  %v3145_v32 = vshll.u32 %v2967_v54, 16  ;;  %v2049_v3 = vld [vmem:[#allocation2 + $0xc0] sm:$0xf] }
 0x138   : > { %v2405_v19 = vor.u32 %v2404_v24, %v2400_v21  ;;  %v3144_v35 = vrot.slane %v3142_v16, 4  ;;  %v3151_v36 = vshll.u32 %v2968_v4, 16  ;;  %v3155_v41 = vshrl.u32 %v2968_v4, 16  ;;  %v7714_v42 = vpop.f32.mrb[15].mxu0 }
 0x139   : > { %5024 = vmatprep.mubr.bf16.mxu1 %v5820_v25  ;;  %v2396_v15 = vrot.slane %v2395_v59, 4  ;;  %v3147_v50 = vrot.slane %v3145_v32, 5  ;;  %v3161_v55 = vshll.u32 %v2969_v12, 16  ;;  %v7718_v45 = vadd.f32 %v7596_v61, %v7592_v13  ;;  %v2050_v61 = vld [vmem:[#allocation2 + $0xc4] sm:$0xf] }
 0x13a   : > { %5025 = vmatmul.mubr.bf16.gmra.mrb[100].mxu1 %v6783_v56  ;;  %v2406_v44 = vrot.slane %v2405_v19, 4  ;;  %v3153_v54 = vrot.slane %v3151_v36, 5  ;;  %v3157_v58 = vrot.slane %v3155_v41, 4  ;;  %v7724_v1 = vadd.f32 %v7602_v29, %v7598_v23  ;;  %v2970_v32 = vld [vmem:[#allocation2 + $0x6c] sm:$0xf] }
 0x13b   : > { %8481 = vst [vmem:[#allocation4_spill] sm:$0xff] %v7718_v45  ;;  %v2401_v11 = vsel %vm6897_vm3, %v2396_v15, %v2400_v21  ;;  %v3148_v4 = vor.u32 %v3147_v50, %v3144_v35  ;;  %v3163_v12 = vrot.slane %v3161_v55, 5  ;;  %v376_v13 = vsel %vm6914_vm8, 0, %v375_v27  ;;  %v2972_v50 = vld [vmem:[#allocation2 + $0x74] sm:$0x1] }
 0x13c   : > { %v7702_v43 = vpop.f32.mrb[12].mxu1  ;;  %8482 = vst [vmem:[#allocation5_spill] sm:$0xff] %v7724_v1  ;;  %v2411_v56 = vsel %vm6897_vm3, %v2406_v44, %v2410_v33  ;;  %v3158_v53 = vor.u32 %v3157_v58, %v3153_v54  ;;  %377 = vst [vmem:[#allocation2 + $0xc8] sm:$0x1] %v376_v13  ;;  %v5782_v24 = vrot.slane %v2561_v18, 9  ;;  %v2719_v23 = vrot.slane %v2562_v34, 5 }
 0x13d   : > { %v7712_v28 = vpop.f32.mrb[13].mxu1  ;;  %v5765_v29 = vcombine.low %v2401_v11, %v2411_v56  ;;  %v3149_v16 = vrot.slane %v3148_v4, 4  ;;  %v2413_v25 = vshrl.u32 %v2049_v3, 16  ;;  %v2416_v59 = vshll.u32 %v2049_v3, 16  ;;  %v2971_v33 = vld [vmem:[#allocation2 + $0x70] sm:$0xf] }
 0x13e   : > { %v7720_v57 = vpop.f32.mrb[14].mxu1  ;;  %v3159_v21 = vrot.slane %v3158_v53, 4  ;;  %v7738_v39 = vsel %vm7161_vm14, %v5782_v24, %v2719_v23  ;;  %v7740_v27 = vrot.slane %v2719_v23, 4  ;;  %v2422_v35 = vshll.u32 %v2050_v61, 16  ;;  %v6785_v58 = vld [vmem:[#allocation2 + $0x60] sm:$0xff]  }
 0x13f   : > { %v7726_v63 = vpop.f32.mrb[15].mxu1  ;;  %4936 = vmatmul.mubr.bf16.gmra.mrb[104].mxu0 %v5765_v29  ;;  %v3154_v18 = vsel %vm6897_vm3, %v3149_v16, %v3153_v54  ;;  %v2415_v34 = vrot.slane %v2413_v25, 4  ;;  %v2418_v41 = vrot.slane %v2416_v59, 5  ;;  %v2426_v15 = vshrl.u32 %v2050_v61, 16  ;;  %v3461_v25 = vld [vmem:[#allocation2 + $0x18] sm:$0xe] }
 0x140   : > { %v3164_v44 = vsel %vm6897_vm3, %v3159_v21, %v3163_v12  ;;  %v7750_v3 = vrot.slane %v2422_v35, 5  ;;  %v3166_v11 = vshrl.u32 %v2970_v32, 16  ;;  %v3169_v4 = vshll.u32 %v2970_v32, 16  ;;  %v3462_v35 = vld [vmem:[#allocation2 + $0x1c] sm:$0xf] }
 0x141   : > { %v5821_v56 = vcombine.low %v3154_v18, %v3164_v44  ;;  %v2419_v53 = vor.u32 %v2418_v41, %v2415_v34  ;;  %v2428_v24 = vrot.slane %v2426_v15, 4  ;;  %v3175_v54 = vshll.u32 %v2971_v33, 16  ;;  %v2973_v44 = vld [vmem:[#allocation2 + $0x78] sm:$0xf]  ;;  %v3467_v1 = vld [vmem:[#allocation2 + $0x30] sm:$0xe] }
 0x142   : > { %v3168_v23 = vrot.slane %v3166_v11, 4  ;;  %v3171_v29 = vrot.slane %v3169_v4, 5  ;;  %v3179_v61 = vshrl.u32 %v2971_v33, 16  ;;  %v3185_v16 = vshll.u32 %v2972_v50, 16  ;;  %v3463_v50 = vld [vmem:[#allocation2 + $0x20] sm:$0x1] }
 0x143   : > { %5032 = vmatprep.mubr.bf16.mxu1 %v5821_v56  ;;  %v907_v59 = vld [vmem:[#allocation2 + $0xc8] sm:$0x1]  ;;  %v7754_v8 = vrot.slane %v2419_v53, 4  ;;  %v2429_v12 = vor.u32 %v2428_v24, %v7750_v3  ;;  %v3177_v21 = vrot.slane %v3175_v54, 5  ;;  %v7759_v32 = vadd.f32 %v7614_v22, %v7612_v17  ;;  %v2975_v54 = vld [vmem:[#allocation2 + $0x80] sm:$0x1] }
 0x144   : > { %v7734_v19 = vpop.f32.mrb[16].mxu1  ;;  %5033 = vmatmul.mubr.bf16.gmra.mrb[104].mxu1 %v6785_v58  ;;  %v8483_v18 = vrot.slane %v7564_v60, 4  ;;  %v3172_v34 = vor.u32 %v3171_v29, %v3168_v23  ;;  %v3181_v41 = vrot.slane %v3179_v61, 4  ;;  %v3187_v15 = vrot.slane %v3185_v16, 5  ;;  %v2974_v60 = vld [vmem:[#allocation2 + $0x7c] sm:$0xf] }
 0x145   : > { %v7769_v17 = vrot.slane %v2429_v12, 4  ;;  %v7773_v22 = vadd.f32 %v7630_v51, %v7618_v30  ;;  %v7777_v31 = vadd.f32 %v7632_v47, %v7624_v40  ;;  %v7779_v58 = vpop.f32.mrb[17].mxu1  ;;  %v7783_v53 = vadd.f32 %v7638_v14, %v7636_v2  ;;  %v3464_v23 = vld [vmem:[#allocation2 + $0x24] sm:$0xe]  ;;  %v3465_v16 = vld [vmem:[#allocation2 + $0x28] sm:$0xf] }
 0x146   : > { %v908_v33 = vsel %vm6906_vm6, %v8483_v18, %v907_v59  ;;  %v3173_v4 = vrot.slane %v3172_v34, 4  ;;  %v3182_v56 = vor.u32 %v3181_v41, %v3177_v21  ;;  %v5831_v24 = vrot.slane %v3461_v25, 9  ;;  %v6786_v59 = vld [vmem:[#allocation2 + $0x6c] sm:$0xff]   ;;  %v7793_v34 = vpop.f32.mrb[18].mxu1  ;;  %v3485_v45 = vld [vmem:[#allocation2 + $0x78] sm:$0xe] }
 0x147   : > { %909 = vst [vmem:[#allocation2 + $0xc8] sm:$0x1] %v908_v33  ;;  %8484 = vst [vmem:[#allocation6_spill] sm:$0xff] %v7773_v22  ;;  %v3559_v29 = vrot.slane %v3462_v35, 5  ;;  %v3562_v61 = vrot.slane %v3463_v50, 5  ;;  %v3190_v30 = vshrl.u32 %v2973_v44, 16 }
 0x148   : > { %8485 = vst [vmem:[#allocation7_spill] sm:$0xff] %v7783_v53  ;;  %v3193_v51 = vshll.u32 %v2973_v44, 16  ;;  %v3178_v40 = vsel %vm6897_vm3, %v3173_v4, %v3177_v21  ;;  %v3183_v47 = vrot.slane %v3182_v56, 4  ;;  %v3199_v12 = vshll.u32 %v2974_v60, 16  ;;  %v3466_v4 = vld [vmem:[#allocation2 + $0x2c] sm:$0x1] }
 0x149   : > { %v7742_v36 = vpop.f32.mrb[16].mxu0  ;;  %v3203_v18 = vshrl.u32 %v2974_v60, 16  ;;  %v7791_v2 = vsel %vm7161_vm14, %v5831_v24, %v3559_v29  ;;  %v3561_v14 = vrot.slane %v3559_v29, 4  ;;  %v3192_v25 = vrot.slane %v3190_v30, 4  ;;  %v7797_v56 = vpop.f32.mrb[19].mxu1 }
 0x14a   : > { %v7746_v55 = vpop.f32.mrb[17].mxu0  ;;  %v3195_v35 = vrot.slane %v3193_v51, 5  ;;  %v3188_v41 = vsel %vm6897_vm3, %v3183_v47, %v3187_v15  ;;  %v3201_v50 = vrot.slane %v3199_v12, 5  ;;  %v3209_v44 = vshll.u32 %v2975_v54, 16 }
 0x14b   : > { %v7752_v13 = vpop.f32.mrb[18].mxu0  ;;  %v3205_v21 = vrot.slane %v3203_v18, 4  ;;  %v5822_v60 = vcombine.low %v3178_v40, %v3188_v41  ;;  %v7801_v11 = vsel %vm7161_vm14, %v3561_v14, %v3562_v61  ;;  %v5832_v29 = vrot.slane %v3464_v23, 9  ;;  %v3468_v61 = vld [vmem:[#allocation2 + $0x34] sm:$0xf] }
 0x14c   : > { %v7787_v33 = vpop.f32.mrb[19].mxu0  ;;  %v3196_v24 = vor.u32 %v3195_v35, %v3192_v25  ;;  %v5847_v15 = vcombine.low %v7791_v2, %v7801_v11  ;;  %v3211_v12 = vrot.slane %v3209_v44, 5  ;;  %v3566_v54 = vrot.slane %v3465_v16, 5  ;;  %v3469_v2 = vld [vmem:[#allocation2 + $0x38] sm:$0x1] }
 0x14d   : > { %v3206_v47 = vor.u32 %v3205_v21, %v3201_v50  ;;  %5040 = vmatprep.mubr.bf16.mxu1 %v5822_v60  ;;  %v3569_v41 = vrot.slane %v3466_v4, 5  ;;  %v7813_v11 = vadd.f32 %v7664_v9, %v7652_v37  ;;  %v2976_v16 = vld [vmem:[#allocation2 + $0x84] sm:$0xf]  ;;  %v7822_v21 = vadd.f32 %v7672_v62, %v7668_v20  ;;  %v2977_v44 = vld [vmem:[#allocation2 + $0x88] sm:$0xf] }
 0x14e   : > { %v2563_v51 = vld [vmem:[#allocation2 + $0xc8] sm:$0x1]  ;;  %v3197_v40 = vrot.slane %v3196_v24, 4  ;;  %5041 = vmatmul.mubr.bf16.gmra.mrb[108].mxu1 %v6786_v59  ;;  %v7809_v23 = vsel %vm7161_vm14, %v5832_v29, %v3566_v54  ;;  %v3568_v25 = vrot.slane %v3566_v54, 4  ;;  %v2978_v4 = vld [vmem:[#allocation2 + $0x8c] sm:$0x1]  ;;  %v7844_v24 = vadd.f32 %v7690_v0, %v7688_v46 }
 0x14f   : > { %v2051_v53 = vld [vmem:[#allocation2 + $0xc8] sm:$0x1]  ;;  %v2722_v18 = vrot.slane %v2563_v51, 5  ;;  %v3207_v14 = vrot.slane %v3206_v47, 4  ;;  %8486 = vst [vmem:[#allocation8_spill] sm:$0xff] %v7822_v21  ;;  %v7846_v47 = vpop.f32.mrb[20].mxu1 }
 0x150   : > { %v2432_v22 = vshll.u32 %v2051_v53, 16  ;;  %v3202_v59 = vsel %vm6897_vm3, %v3197_v40, %v3201_v50  ;;  %v3470_v50 = vld [vmem:[#allocation2 + $0x3c] sm:$0xe]  ;;  %8487 = vst [vmem:[#allocation9_spill] sm:$0xff] %v7844_v24  ;;  %v3471_v29 = vld [vmem:[#allocation2 + $0x40] sm:$0xf] }
 0x151   : > { %v2723_v53 = vsel %vm7161_vm14, %v7740_v27, %v2722_v18  ;;  %v3212_v9 = vsel %vm6897_vm3, %v3207_v14, %v3211_v12  ;;  %v7831_v27 = vsel %vm7161_vm14, %v3568_v25, %v3569_v41  ;;  %v3472_v51 = vld [vmem:[#allocation2 + $0x44] sm:$0x1]  ;;  %v5833_v54 = vrot.slane %v3467_v1, 9  ;;  %v7855_v41 = vpop.f32.mrb[21].mxu1 }
 0x152   : > { %v2434_v35 = vrot.slane %v2432_v22, 5  ;;  %v5798_v37 = vcombine.low %v7738_v39, %v2723_v53  ;;  %v7835_v22 = vadd.f32 %v7678_v7, %v7670_v52  ;;  %v5823_v62 = vcombine.low %v3202_v59, %v3212_v9  ;;  %v3473_v39 = vld [vmem:[#allocation2 + $0x48] sm:$0xe] }
 0x153   : > { %v7803_v30 = vpop.f32.mrb[20].mxu0  ;;  %v8488_v52 = vsel %vm6897_vm3, %v7754_v8, %v7750_v3  ;;  %v3573_v18 = vrot.slane %v3468_v61, 5  ;;  %v3576_v40 = vrot.slane %v3469_v2, 5  ;;  %v3214_v0 = vshrl.u32 %v2976_v16, 16 }
 0x154   : > { %v7824_v60 = vpop.f32.mrb[21].mxu0  ;;  %v2435_v20 = vsel %vm6897_vm3, %v7769_v17, %v2434_v35  ;;  %4943 = vmatprep.mubr.bf16.mxu0 %v5798_v37  ;;  %v6787_v17 = vld [vmem:[#allocation2 + $0x78] sm:$0xff]   ;;  %5048 = vmatprep.mubr.bf16.mxu1 %v5823_v62  ;;  %v3217_v14 = vshll.u32 %v2976_v16, 16  ;;  %v3223_v25 = vshll.u32 %v2977_v44, 16  ;;  %v3227_v53 = vshrl.u32 %v2977_v44, 16  ;;  %v7859_v35 = vpop.f32.mrb[22].mxu1 }
 0x155   : > { %v7848_v12 = vpop.f32.mrb[22].mxu0  ;;  %v5766_v7 = vcombine.low %v8488_v52, %v2435_v20  ;;  %v3574_v8 = vsel %vm7161_vm14, %v5833_v54, %v3573_v18  ;;  %v3575_v1 = vrot.slane %v3573_v18, 4  ;;  %v3233_v3 = vshll.u32 %v2978_v4, 16  ;;  %v7865_v2 = vpop.f32.mrb[23].mxu1  ;;  %v3474_v18 = vld [vmem:[#allocation2 + $0x4c] sm:$0xf] }
 0x156   : > { %v7857_v46 = vpop.f32.mrb[23].mxu0  ;;  %v5834_v61 = vrot.slane %v3470_v50, 9  ;;  %v3216_v37 = vrot.slane %v3214_v0, 4  ;;  %v3219_v9 = vrot.slane %v3217_v14, 5  ;;  %v3225_v20 = vrot.slane %v3223_v25, 5  ;;  %5049 = vmatmul.mubr.bf16.gmra.mrb[112].mxu1 %v6787_v17 }
 0x157   : > { %4944 = vmatmul.mubr.bf16.gmra.mrb[108].mxu0 %v5766_v7  ;;  %v3229_v16 = vrot.slane %v3227_v53, 4  ;;  %v3577_v44 = vsel %vm7161_vm14, %v3575_v1, %v3576_v40  ;;  %v3235_v62 = vrot.slane %v3233_v3, 5  ;;  %v3580_v52 = vrot.slane %v3471_v29, 5  ;;  %v3475_v0 = vld [vmem:[#allocation2 + $0x50] sm:$0x1] }
 0x158   : > { %6618 = vmatprep.mubr.bf16.mxu0 %v5847_v15  ;;  %v3583_v7 = vrot.slane %v3472_v51, 5  ;;  %v5849_v54 = vcombine.low %v3574_v8, %v3577_v44  ;;  %v3220_v4 = vor.u32 %v3219_v9, %v3216_v37  ;;  %v7873_v15 = vadd.f32 %v7700_v38, %v7692_v10  ;;  %v2979_v14 = vld [vmem:[#allocation2 + $0x90] sm:$0xf]  ;;  %v2980_v25 = vld [vmem:[#allocation2 + $0x94] sm:$0xf]  ;;  %v7887_v10 = vpop.f32.mrb[24].mxu1 }
 0x159   : > { %v3230_v50 = vor.u32 %v3229_v16, %v3225_v20  ;;  %v7877_v17 = vsel %vm7161_vm14, %v5834_v61, %v3580_v52  ;;  %v3582_v40 = vrot.slane %v3580_v52, 4  ;;  %v7881_v29 = vadd.f32 %v7712_v28, %v7702_v43  ;;  %v2981_v53 = vld [vmem:[#allocation2 + $0x98] sm:$0x1]  ;;  %v3476_v61 = vld [vmem:[#allocation2 + $0x54] sm:$0xe]  ;;  %v7899_v16 = vpop.f32.mrb[25].mxu1 }
 0x15a   : > { %v7885_v51 = vadd.f32 %v7714_v42, %v7706_v49  ;;  %v3221_v38 = vrot.slane %v3220_v4, 4  ;;  %v7891_v1 = vadd.f32 %v7726_v63, %v7720_v57  ;;  %v5835_v3 = vrot.slane %v3473_v39, 9  ;;  %v6788_v49 = vld [vmem:[#allocation2 + $0x84] sm:$0xff]   ;;  %v3478_v4 = vld [vmem:[#allocation2 + $0x5c] sm:$0x1] }
 0x15b   : > { %8489 = vst [vmem:[#allocation10_spill] sm:$0xff] %v7881_v29  ;;  %v3231_v8 = vrot.slane %v3230_v50, 4  ;;  %v7897_v43 = vsel %vm7161_vm14, %v3582_v40, %v3583_v7  ;;  %v3587_v28 = vrot.slane %v3474_v18, 5  ;;  %v3590_v42 = vrot.slane %v3475_v0, 5  ;;  %v3477_v7 = vld [vmem:[#allocation2 + $0x58] sm:$0xf] }
 0x15c   : > { %v7861_v59 = vpop.f32.mrb[24].mxu0  ;;  %8490 = vst [vmem:[#allocation11_spill] sm:$0xff] %v7891_v1  ;;  %v3238_v9 = vshrl.u32 %v2979_v14, 16  ;;  %v3226_v57 = vsel %vm6897_vm3, %v3221_v38, %v3225_v20  ;;  %v5850_v39 = vcombine.low %v7877_v17, %v7897_v43  ;;  %v3241_v52 = vshll.u32 %v2979_v14, 16  ;;  %v7909_v50 = vpop.f32.mrb[26].mxu1 }
 0x15d   : > { %v7869_v24 = vpop.f32.mrb[25].mxu0  ;;  %v3236_v63 = vsel %vm6897_vm3, %v3231_v8, %v3235_v62  ;;  %v8491_v18 = vcombine.low %v7809_v23, %v7831_v27  ;;  %v3588_v40 = vsel %vm7161_vm14, %v5835_v3, %v3587_v28  ;;  %v3589_v20 = vrot.slane %v3587_v28, 4  ;;  %v7916_v1 = vpop.f32.mrb[27].mxu1 }
 0x15e   : > { %v7893_v37 = vpop.f32.mrb[26].mxu0  ;;  %v5824_v0 = vcombine.low %v3226_v57, %v3236_v63  ;;  %v3240_v38 = vrot.slane %v3238_v9, 4  ;;  %v3243_v62 = vrot.slane %v3241_v52, 5  ;;  %v3247_v17 = vshll.u32 %v2980_v25, 16  ;;  %v7920_v57 = vpop.f32.mrb[28].mxu1 }
 0x15f   : > { %v7901_v44 = vpop.f32.mrb[27].mxu0  ;;  %6619 = vmatmul.mubr.bf16.vlgmr.msra.gmra.mrb[112].mxu0 %v8491_v18  ;;  %v3251_v14 = vshrl.u32 %v2980_v25, 16  ;;  %v3257_v8 = vshll.u32 %v2981_v53, 16  ;;  %v3591_v43 = vsel %vm7161_vm14, %v3589_v20, %v3590_v42  ;;  %v5836_v29 = vrot.slane %v3476_v61, 9  ;;  %v3479_v18 = vld [vmem:[#allocation2 + $0x60] sm:$0xe] }
 0x160   : > { %6622 = vmatprep.mubr.bf16.mxu0 %v5849_v54  ;;  %5056 = vmatprep.mubr.bf16.mxu1 %v5824_v0  ;;  %v3594_v23 = vrot.slane %v3477_v7, 5  ;;  %v3597_v27 = vrot.slane %v3478_v4, 5  ;;  %v5851_v3 = vcombine.low %v3588_v40, %v3591_v43  ;;  %v3244_v28 = vor.u32 %v3243_v62, %v3240_v38  ;;  %v3480_v54 = vld [vmem:[#allocation2 + $0x64] sm:$0xf]  ;;  %v3481_v42 = vld [vmem:[#allocation2 + $0x68] sm:$0x1] }
 0x161   : > { %5057 = vmatmul.mubr.bf16.gmra.mrb[116].mxu1 %v6788_v49  ;;  %v3249_v9 = vrot.slane %v3247_v17, 5  ;;  %v3253_v63 = vrot.slane %v3251_v14, 4  ;;  %v3259_v52 = vrot.slane %v3257_v8, 5  ;;  %v7928_v61 = vadd.f32 %v7746_v55, %v7742_v36  ;;  %v2982_v7 = vld [vmem:[#allocation2 + $0x9c] sm:$0xf]  ;;  %v7946_v14 = vpop.f32.mrb[29].mxu1 }
 0x162   : > { %v7924_v25 = vsel %vm7161_vm14, %v5836_v29, %v3594_v23  ;;  %v3596_v53 = vrot.slane %v3594_v23, 4  ;;  %v3245_v4 = vrot.slane %v3244_v28, 4  ;;  %v6260_v0 = vadd.f32 %v7779_v58, %v7734_v19  ;;  %v2983_v62 = vld [vmem:[#allocation2 + $0xa0] sm:$0xf]  ;;  %v2984_v43 = vld [vmem:[#allocation2 + $0xa4] sm:$0x1] }
 0x163   : > { %v3254_v49 = vor.u32 %v3253_v63, %v3249_v9  ;;  %v7934_v40 = vadd.f32 %v7787_v33, %v7752_v13  ;;  %v6263_v36 = vadd.f32 %v7797_v56, %v7793_v34  ;;  %v5837_v55 = vrot.slane %v3479_v18, 9  ;;  %v6789_v33 = vld [vmem:[#allocation2 + $0x90] sm:$0xff]   ;;  %v7957_v56 = vpop.f32.mrb[30].mxu1  ;;  %v3482_v63 = vld [vmem:[#allocation2 + $0x6c] sm:$0xe] }
 0x164   : > { %v7940_v29 = vsel %vm7161_vm14, %v3596_v53, %v3597_v27  ;;  %v3601_v38 = vrot.slane %v3480_v54, 5  ;;  %v3250_v19 = vsel %vm6897_vm3, %v3245_v4, %v3249_v9  ;;  %v7953_v8 = vadd.f32 %v6260_v0, %v7588_v5  ;;  %v7966_v54 = vpop.f32.mrb[31].mxu1  ;;  %v3483_v4 = vld [vmem:[#allocation2 + $0x70] sm:$0xf] }
 0x165   : > { %8492 = vst [vmem:[#allocation12_spill] sm:$0xff] %v7934_v40  ;;  %v3255_v13 = vrot.slane %v3254_v49, 4  ;;  %v5852_v58 = vcombine.low %v7924_v25, %v7940_v29  ;;  %v7960_v23 = vadd.f32 %v6263_v36, %v7590_v6  ;;  %v3604_v9 = vrot.slane %v3481_v42, 5  ;;  %v7970_v6 = vpop.f32.mrb[32].mxu1  ;;  %v3484_v36 = vld [vmem:[#allocation2 + $0x74] sm:$0x1] }
 0x166   : > { %8493 = vst [vmem:[#allocation13_spill] sm:$0xff] %v7953_v8  ;;  %v3602_v27 = vsel %vm7161_vm14, %v5837_v55, %v3601_v38  ;;  %v3603_v28 = vrot.slane %v3601_v38, 4  ;;  %v3262_v25 = vshrl.u32 %v2982_v7, 16  ;;  %v3265_v53 = vshll.u32 %v2982_v7, 16  ;;  %v3486_v40 = vld [vmem:[#allocation2 + $0x7c] sm:$0xf] }
 0x167   : > { %6623 = vmatmul.mubr.bf16.gmra.mrb[116].mxu0 %v5850_v39  ;;  %8494 = vst [vmem:[#allocation14_spill] sm:$0xff] %v7960_v23  ;;  %v3260_v5 = vsel %vm6897_vm3, %v3255_v13, %v3259_v52  ;;  %v3271_v39 = vshll.u32 %v2983_v62, 16  ;;  %v3275_v42 = vshrl.u32 %v2983_v62, 16  ;;  %v3281_v29 = vshll.u32 %v2984_v43, 16  ;;  %v7974_v23 = vpop.f32.mrb[33].mxu1 }
 0x168   : > { %6626 = vmatprep.mubr.bf16.mxu0 %v5851_v3  ;;  %v5825_v49 = vcombine.low %v3250_v19, %v3260_v5  ;;  %v3605_v0 = vsel %vm7161_vm14, %v3603_v28, %v3604_v9  ;;  %v3264_v38 = vrot.slane %v3262_v25, 4  ;;  %v3267_v21 = vrot.slane %v3265_v53, 5  ;;  %v7982_v28 = vpop.f32.mrb[34].mxu1 }
 0x169   : > { %v7936_v20 = vpop.f32.mrb[28].mxu0  ;;  %v5853_v55 = vcombine.low %v3602_v27, %v3605_v0  ;;  %v3273_v3 = vrot.slane %v3271_v39, 5  ;;  %v3277_v52 = vrot.slane %v3275_v42, 4  ;;  %v3283_v7 = vrot.slane %v3281_v29, 5  ;;  %v3487_v27 = vld [vmem:[#allocation2 + $0x80] sm:$0x1] }
 0x16a   : > { %v7944_v17 = vpop.f32.mrb[29].mxu0  ;;  %5064 = vmatprep.mubr.bf16.mxu1 %v5825_v49  ;;  %v5838_v13 = vrot.slane %v3482_v63, 9  ;;  %v3608_v8 = vrot.slane %v3483_v4, 5  ;;  %v3268_v19 = vor.u32 %v3267_v21, %v3264_v38  ;;  %v3611_v5 = vrot.slane %v3484_v36, 5  ;;  %v7992_v53 = vpop.f32.mrb[35].mxu1 }
 0x16b   : > { %v7955_v34 = vpop.f32.mrb[30].mxu0  ;;  %5065 = vmatmul.mubr.bf16.gmra.mrb[120].mxu1 %v6789_v33  ;;  %v7978_v62 = vadd.f32 %v7824_v60, %v7803_v30  ;;  %v6266_v43 = vadd.f32 %v7855_v41, %v7846_v47  ;;  %v3278_v9 = vor.u32 %v3277_v52, %v3273_v3  ;;  %v7990_v21 = vadd.f32 %v7857_v46, %v7848_v12  ;;  %v2985_v33 = vld [vmem:[#allocation2 + $0xa8] sm:$0xf]  ;;  %v6790_v46 = vld [vmem:[#allocation2 + $0x9c] sm:$0xff]   ;;  %v2986_v42 = vld [vmem:[#allocation2 + $0xac] sm:$0xf] }
 0x16c   : > { %v7964_v18 = vpop.f32.mrb[31].mxu0  ;;  %v7986_v25 = vsel %vm7161_vm14, %v5838_v13, %v3608_v8  ;;  %v3610_v63 = vrot.slane %v3608_v8, 4  ;;  %v3269_v30 = vrot.slane %v3268_v19, 4  ;;  %v6269_v47 = vadd.f32 %v7865_v2, %v7859_v35  ;;  %v8001_v4 = vpop.f32.mrb[36].mxu1  ;;  %v2987_v2 = vld [vmem:[#allocation2 + $0xb0] sm:$0x1] }
 0x16d   : > { %8495 = vst [vmem:[#allocation15_spill] sm:$0xff] %v7990_v21  ;;  %v7995_v60 = vadd.f32 %v6266_v43, %v7759_v32  ;;  %v5839_v41 = vrot.slane %v3485_v45, 9  ;;  %v3279_v8 = vrot.slane %v3278_v9, 4  ;;  %v3615_v49 = vrot.slane %v3486_v40, 5  ;;  %v3488_v36 = vld [vmem:[#allocation2 + $0x84] sm:$0xe] }
 0x16e   : > { %v3612_v12 = vsel %vm7161_vm14, %v3610_v63, %v3611_v5  ;;  %v3618_v0 = vrot.slane %v3487_v27, 5  ;;  %v3274_v32 = vsel %vm6897_vm3, %v3269_v30, %v3273_v3  ;;  %v8011_v35 = vadd.f32 %v6269_v47, %v7777_v31  ;;  %v3489_v19 = vld [vmem:[#allocation2 + $0x88] sm:$0xf]  ;;  %v8021_v5 = vpop.f32.mrb[37].mxu1 }
 0x16f   : > { %8496 = vst [vmem:[#allocation16_spill] sm:$0xff] %v7995_v60  ;;  %6627 = vmatmul.mubr.bf16.gmra.mrb[120].mxu0 %v5852_v58  ;;  %v5854_v45 = vcombine.low %v7986_v25, %v3612_v12  ;;  %v3286_v58 = vshrl.u32 %v2985_v33, 16  ;;  %v3284_v40 = vsel %vm6897_vm3, %v3279_v8, %v3283_v7  ;;  %v3616_v52 = vsel %vm7161_vm14, %v5839_v41, %v3615_v49  ;;  %v3490_v25 = vld [vmem:[#allocation2 + $0x8c] sm:$0x1]  ;;  %v8023_v63 = vpop.f32.mrb[38].mxu1 }
 0x170   : > { %6630 = vmatprep.mubr.bf16.mxu0 %v5853_v55  ;;  %8497 = vst [vmem:[#allocation17_spill] sm:$0xff] %v8011_v35  ;;  %v3617_v55 = vrot.slane %v3615_v49, 4  ;;  %v3289_v13 = vshll.u32 %v2985_v33, 16  ;;  %v5826_v31 = vcombine.low %v3274_v32, %v3284_v40  ;;  %v3295_v27 = vshll.u32 %v2986_v42, 16  ;;  %v3491_v8 = vld [vmem:[#allocation2 + $0x90] sm:$0xe] }
 0x171   : > { %v3288_v43 = vrot.slane %v3286_v58, 4  ;;  %v3299_v9 = vshrl.u32 %v2986_v42, 16  ;;  %v3305_v47 = vshll.u32 %v2987_v2, 16  ;;  %v5840_v41 = vrot.slane %v3488_v36, 9  ;;  %v8027_v33 = vpop.f32.mrb[39].mxu1 }
 0x172   : > { %v3619_v7 = vsel %vm7161_vm14, %v3617_v55, %v3618_v0  ;;  %v3291_v30 = vrot.slane %v3289_v13, 5  ;;  %5072 = vmatprep.mubr.bf16.mxu1 %v5826_v31  ;;  %v3297_v49 = vrot.slane %v3295_v27, 5  ;;  %v3622_v32 = vrot.slane %v3489_v19, 5  ;;  %v3492_v58 = vld [vmem:[#allocation2 + $0x94] sm:$0xf] }
 0x173   : > { %v7999_v39 = vpop.f32.mrb[32].mxu0  ;;  %v5855_v12 = vcombine.low %v3616_v52, %v3619_v7  ;;  %v3301_v35 = vrot.slane %v3299_v9, 4  ;;  %5073 = vmatmul.mubr.bf16.gmra.mrb[124].mxu1 %v6790_v46  ;;  %v3307_v40 = vrot.slane %v3305_v47, 5  ;;  %v3625_v60 = vrot.slane %v3490_v25, 5  ;;  %v3493_v55 = vld [vmem:[#allocation2 + $0x98] sm:$0x1] }
 0x174   : > { %v8005_v29 = vpop.f32.mrb[33].mxu0  ;;  %v3292_v42 = vor.u32 %v3291_v30, %v3288_v43  ;;  %v8031_v21 = vadd.f32 %v7869_v24, %v7861_v59  ;;  %v3623_v2 = vsel %vm7161_vm14, %v5840_v41, %v3622_v32  ;;  %v3624_v36 = vrot.slane %v3622_v32, 4  ;;  %v2988_v13 = vld [vmem:[#allocation2 + $0xb4] sm:$0xf]  ;;  %v2990_v9 = vld [vmem:[#allocation2 + $0xbc] sm:$0x1] }
 0x175   : > { %v8013_v38 = vpop.f32.mrb[34].mxu0  ;;  %v3302_v0 = vor.u32 %v3301_v35, %v3297_v49  ;;  %v6272_v52 = vadd.f32 %v7899_v16, %v7887_v10  ;;  %v8041_v31 = vadd.f32 %v7901_v44, %v7893_v37  ;;  %v6275_v24 = vadd.f32 %v7916_v1, %v7909_v50  ;;  %v2989_v35 = vld [vmem:[#allocation2 + $0xb8] sm:$0xf]  ;;  %v3494_v7 = vld [vmem:[#allocation2 + $0x9c] sm:$0xe] }
 0x176   : > { %v8019_v3 = vpop.f32.mrb[35].mxu0  ;;  %v3293_v46 = vrot.slane %v3292_v42, 4  ;;  %v5841_v59 = vrot.slane %v3491_v8, 9  ;;  %v3626_v10 = vsel %vm7161_vm14, %v3624_v36, %v3625_v60  ;;  %v3632_v50 = vrot.slane %v3493_v55, 5  ;;  %v6791_v60 = vld [vmem:[#allocation2 + $0xa8] sm:$0xff]  }
 0x177   : > { %6631 = vmatmul.mubr.bf16.gmra.mrb[124].mxu0 %v5854_v45  ;;  %v3303_v27 = vrot.slane %v3302_v0, 4  ;;  %v8050_v16 = vadd.f32 %v6272_v52, %v7813_v11  ;;  %v3629_v45 = vrot.slane %v3492_v58, 5  ;;  %v5856_v1 = vcombine.low %v3623_v2, %v3626_v10  ;;  %v3496_v2 = vld [vmem:[#allocation2 + $0xa4] sm:$0x1] }
 0x178   : > { %6634 = vmatprep.mubr.bf16.mxu0 %v5855_v12  ;;  %v3298_v37 = vsel %vm6897_vm3, %v3293_v46, %v3297_v49  ;;  %v8057_v44 = vadd.f32 %v6275_v24, %v7835_v22  ;;  %v3310_v12 = vshrl.u32 %v2988_v13, 16  ;;  %v3495_v49 = vld [vmem:[#allocation2 + $0xa0] sm:$0xf]  ;;  %v3313_v58 = vshll.u32 %v2988_v13, 16 }
 0x179   : > { %v3308_v11 = vsel %vm6897_vm3, %v3303_v27, %v3307_v40  ;;  %v3630_v41 = vsel %vm7161_vm14, %v5841_v59, %v3629_v45  ;;  %v3631_v8 = vrot.slane %v3629_v45, 4  ;;  %v3319_v42 = vshll.u32 %v2989_v35, 16 }
 0x17a   : > { %v8037_v19 = vpop.f32.mrb[40].mxu1  ;;  %8498 = vst [vmem:[#allocation18_spill] sm:$0xff] %v8057_v44  ;;  %v5827_v22 = vcombine.low %v3298_v37, %v3308_v11  ;;  %v3323_v0 = vshrl.u32 %v2989_v35, 16  ;;  %v3312_v40 = vrot.slane %v3310_v12, 4  ;;  %v3329_v55 = vshll.u32 %v2990_v9, 16 }
 0x17b   : > { %v8045_v43 = vpop.f32.mrb[41].mxu1  ;;  %v3633_v52 = vsel %vm7161_vm14, %v3631_v8, %v3632_v50  ;;  %v5842_v46 = vrot.slane %v3494_v7, 9  ;;  %v3315_v27 = vrot.slane %v3313_v58, 5  ;;  %v3321_v10 = vrot.slane %v3319_v42, 5  ;;  %v3497_v37 = vld [vmem:[#allocation2 + $0xa8] sm:$0xe] }
 0x17c   : > { %v8052_v25 = vpop.f32.mrb[42].mxu1  ;;  %5080 = vmatprep.mubr.bf16.mxu1 %v5827_v22  ;;  %v5857_v59 = vcombine.low %v3630_v41, %v3633_v52  ;;  %v3325_v45 = vrot.slane %v3323_v0, 4  ;;  %v3331_v13 = vrot.slane %v3329_v55, 5  ;;  %v3636_v35 = vrot.slane %v3495_v49, 5  ;;  %v3498_v50 = vld [vmem:[#allocation2 + $0xac] sm:$0xf] }
 0x17d   : > { %v8061_v47 = vpop.f32.mrb[43].mxu1  ;;  %5081 = vmatmul.mubr.bf16.gmra.mrb[128].mxu1 %v6791_v60  ;;  %v3639_v11 = vrot.slane %v3496_v2, 5  ;;  %v8077_v44 = vadd.f32 %v7944_v17, %v7936_v20  ;;  %v3316_v9 = vor.u32 %v3315_v27, %v3312_v40  ;;  %v6278_v8 = vadd.f32 %v7946_v14, %v7920_v57  ;;  %v3499_v12 = vld [vmem:[#allocation2 + $0xb0] sm:$0x1]  ;;  %v2991_v60 = vld [vmem:[#allocation2 + $0xc0] sm:$0xf] }
 0x17e   : > { %v8059_v30 = vpop.f32.mrb[36].mxu0  ;;  %v3326_v7 = vor.u32 %v3325_v45, %v3321_v10  ;;  %v8083_v41 = vadd.f32 %v7964_v18, %v7955_v34  ;;  %v3637_v49 = vsel %vm7161_vm14, %v5842_v46, %v3636_v35  ;;  %v3638_v22 = vrot.slane %v3636_v35, 4  ;;  %v2993_v34 = vld [vmem:[#allocation2 + $0xc8] sm:$0x1]  ;;  %v3501_v45 = vld [vmem:[#allocation2 + $0xb8] sm:$0xf] }
 0x17f   : > { %v8067_v32 = vpop.f32.mrb[37].mxu0  ;;  %6635 = vmatmul.mubr.bf16.gmra.mrb[128].mxu0 %v5856_v1  ;;  %v6281_v20 = vadd.f32 %v7966_v54, %v7957_v56  ;;  %v5843_v17 = vrot.slane %v3497_v37, 9  ;;  %v2992_v1 = vld [vmem:[#allocation2 + $0xc4] sm:$0xf]  ;;  %v3317_v58 = vrot.slane %v3316_v9, 4  ;;  %v8090_v57 = vadd.f32 %v6278_v8, %v7873_v15 }
 0x180   : > { %v8069_v36 = vpop.f32.mrb[38].mxu0  ;;  %6638 = vmatprep.mubr.bf16.mxu0 %v5857_v59  ;;  %v3327_v42 = vrot.slane %v3326_v7, 4  ;;  %v3643_v14 = vrot.slane %v3498_v50, 5  ;;  %v3640_v0 = vsel %vm7161_vm14, %v3638_v22, %v3639_v11  ;;  %v3646_v52 = vrot.slane %v3499_v12, 5  ;;  %v3500_v56 = vld [vmem:[#allocation2 + $0xb4] sm:$0xe] }
 0x181   : > { %v8073_v24 = vpop.f32.mrb[39].mxu0  ;;  %v8097_v2 = vadd.f32 %v6281_v20, %v7885_v51  ;;  %v3334_v40 = vshrl.u32 %v2991_v60, 16  ;;  %v3322_v55 = vsel %vm6897_vm3, %v3317_v58, %v3321_v10  ;;  %v5858_v46 = vcombine.low %v3637_v49, %v3640_v0  ;;  %v6792_v59 = vld [vmem:[#allocation2 + $0xb4] sm:$0xff]   ;;  %v3502_v37 = vld [vmem:[#allocation2 + $0xbc] sm:$0x1] }
 0x182   : > { %v3332_v15 = vsel %vm6897_vm3, %v3327_v42, %v3331_v13  ;;  %v3644_v27 = vsel %vm7161_vm14, %v5843_v17, %v3643_v14  ;;  %v3645_v11 = vrot.slane %v3643_v14, 4  ;;  %v3337_v9 = vshll.u32 %v2991_v60, 16  ;;  %v3503_v14 = vld [vmem:[#allocation2 + $0xc0] sm:$0xe] }
 0x183   : > { %v8092_v18 = vpop.f32.mrb[44].mxu1  ;;  %v5828_v35 = vcombine.low %v3322_v55, %v3332_v15  ;;  %v3336_v50 = vrot.slane %v3334_v40, 4  ;;  %v3343_v10 = vshll.u32 %v2992_v1, 16  ;;  %v3347_v12 = vshrl.u32 %v2992_v1, 16 }
 0x184   : > { %v8099_v54 = vpop.f32.mrb[45].mxu1  ;;  %v3353_v13 = vshll.u32 %v2993_v34, 16  ;;  %v5844_v49 = vrot.slane %v3500_v56, 9  ;;  %v3647_v20 = vsel %vm7161_vm14, %v3645_v11, %v3646_v52  ;;  %v3339_v17 = vrot.slane %v3337_v9, 5  ;;  %v3504_v34 = vld [vmem:[#allocation2 + $0xc4] sm:$0xf] }
 0x185   : > { %v8107_v51 = vpop.f32.mrb[46].mxu1  ;;  %5088 = vmatprep.mubr.bf16.mxu1 %v5828_v35  ;;  %v3650_v58 = vrot.slane %v3501_v45, 5  ;;  %v3653_v42 = vrot.slane %v3502_v37, 5  ;;  %v5859_v60 = vcombine.low %v3644_v27, %v3647_v20  ;;  %v3345_v40 = vrot.slane %v3343_v10, 5  ;;  %v3505_v11 = vld [vmem:[#allocation2 + $0xc8] sm:$0x1] }
 0x186   : > { %v8111_v8 = vpop.f32.mrb[47].mxu1  ;;  %5089 = vmatmul.mubr.bf16.gmra.mrb[132].mxu1 %v6792_v59  ;;  %v3349_v55 = vrot.slane %v3347_v12, 4  ;;  %v3355_v1 = vrot.slane %v3353_v13, 5  ;;  %v3340_v15 = vor.u32 %v3339_v17, %v3336_v50  ;;  %v8125_v45 = vadd.f32 %v8005_v29, %v7999_v39  ;;  %v2994_v50 = vld [vmem:[#allocation2 + $0xcc] sm:$0xf] }
 0x187   : > { %6639 = vmatmul.mubr.bf16.gmra.mrb[132].mxu0 %v5858_v46  ;;  %v3651_v35 = vsel %vm7161_vm14, %v5844_v49, %v3650_v58  ;;  %v3652_v52 = vrot.slane %v3650_v58, 4  ;;  %v6284_v46 = vadd.f32 %v7974_v23, %v7970_v6  ;;  %v8131_v59 = vadd.f32 %v8019_v3, %v8013_v38  ;;  %v2995_v12 = vld [vmem:[#allocation2 + $0xd0] sm:$0xf]  ;;  %v8499_v6 = vld [vmem:[#allocation12_spill] sm:$0xff]  ;;  %v2996_v3 = vld [vmem:[#allocation2 + $0xd4] sm:$0x1] }
 0x188   : > { %v8109_v7 = vpop.f32.mrb[40].mxu0  ;;  %6642 = vmatprep.mubr.bf16.mxu0 %v5859_v60  ;;  %v3350_v37 = vor.u32 %v3349_v55, %v3345_v40  ;;  %v6287_v27 = vadd.f32 %v7992_v53, %v7982_v28  ;;  %v3341_v9 = vrot.slane %v3340_v15, 4  ;;  %v5845_v39 = vrot.slane %v3503_v14, 9  ;;  %v3506_v58 = vld [vmem:[#allocation2 + $0xcc] sm:$0xe]  ;;  %v6793_v14 = vld [vmem:[#allocation2 + $0xc0] sm:$0xff]  }
 0x189   : > { %v8113_v22 = vpop.f32.mrb[41].mxu0  ;;  %v3654_v10 = vsel %vm7161_vm14, %v3652_v52, %v3653_v42  ;;  %v3657_v29 = vrot.slane %v3504_v34, 5  ;;  %v8138_v23 = vadd.f32 %v6284_v46, %v7928_v61  ;;  %v3660_v17 = vrot.slane %v3505_v11, 5  ;;  %v3507_v34 = vld [vmem:[#allocation2 + $0xd0] sm:$0xf] }
 0x18a   : > { %v8117_v0 = vpop.f32.mrb[42].mxu0  ;;  %v3351_v13 = vrot.slane %v3350_v37, 4  ;;  %v5860_v49 = vcombine.low %v3651_v35, %v3654_v10  ;;  %v8141_v38 = vadd.f32 %v6287_v27, %v8499_v6  ;;  %v3346_v28 = vsel %vm6897_vm3, %v3341_v9, %v3345_v40  ;;  %v3508_v37 = vld [vmem:[#allocation2 + $0xd4] sm:$0x1] }
 0x18b   : > { %v8119_v56 = vpop.f32.mrb[43].mxu0  ;;  %v3658_v53 = vsel %vm7161_vm14, %v5845_v39, %v3657_v29  ;;  %v3659_v20 = vrot.slane %v3657_v29, 4  ;;  %v3358_v60 = vshrl.u32 %v2994_v50, 16  ;;  %v3361_v61 = vshll.u32 %v2994_v50, 16 }
 0x18c   : > { %v3356_v42 = vsel %vm6897_vm3, %v3351_v13, %v3355_v1  ;;  %v3367_v55 = vshll.u32 %v2995_v12, 16  ;;  %v3371_v52 = vshrl.u32 %v2995_v12, 16  ;;  %v3377_v40 = vshll.u32 %v2996_v3, 16 }
 0x18d   : > { %v5829_v15 = vcombine.low %v3346_v28, %v3356_v42  ;;  %v3661_v35 = vsel %vm7161_vm14, %v3659_v20, %v3660_v17  ;;  %v3360_v27 = vrot.slane %v3358_v60, 4  ;;  %v3363_v11 = vrot.slane %v3361_v61, 5 }
 0x18e   : > { %v5861_v46 = vcombine.low %v3658_v53, %v3661_v35  ;;  %v3369_v9 = vrot.slane %v3367_v55, 5  ;;  %v3373_v1 = vrot.slane %v3371_v52, 4  ;;  %v3379_v39 = vrot.slane %v3377_v40, 5  ;;  %v8500_v52 = vld [vmem:[#allocation15_spill] sm:$0xff] }
 0x18f   : > { %6643 = vmatmul.mubr.bf16.gmra.mrb[136].mxu0 %v5860_v49  ;;  %5096 = vmatprep.mubr.bf16.mxu1 %v5829_v15  ;;  %v5846_v29 = vrot.slane %v3506_v58, 9  ;;  %v3664_v50 = vrot.slane %v3507_v34, 5  ;;  %v3364_v28 = vor.u32 %v3363_v11, %v3360_v27  ;;  %v3667_v20 = vrot.slane %v3508_v37, 5 }
 0x190   : > { %v6306_v10 = vpop.f32.mrb[48].mxu1  ;;  %5097 = vmatmul.mubr.bf16.gmra.mrb[136].mxu1 %v6793_v14  ;;  %6646 = vmatprep.mubr.bf16.mxu0 %v5861_v46  ;;  %v6202_v12 = vadd.f32 %v8067_v32, %v8059_v30  ;;  %v6290_v49 = vadd.f32 %v8021_v5, %v8001_v4  ;;  %v3374_v17 = vor.u32 %v3373_v1, %v3369_v9 }
 0x191   : > { %v6307_v6 = vpop.f32.mrb[49].mxu1  ;;  %v3665_v42 = vsel %vm7161_vm14, %v5846_v29, %v3664_v50  ;;  %v3666_v58 = vrot.slane %v3664_v50, 4  ;;  %v6205_v60 = vadd.f32 %v8073_v24, %v8069_v36  ;;  %v3365_v55 = vrot.slane %v3364_v28, 4  ;;  %v8501_v50 = vld [vmem:[#allocation13_spill] sm:$0xff]  ;;  %v8502_v28 = vld [vmem:[#allocation14_spill] sm:$0xff] }
 0x192   : > { %v6309_v53 = vpop.f32.mrb[50].mxu1  ;;  %v8160_v34 = vadd.f32 %v6290_v49, %v7978_v62  ;;  %v6293_v30 = vadd.f32 %v8027_v33, %v8023_v63  ;;  %v6208_v4 = vadd.f32 %v8113_v22, %v8109_v7  ;;  %v3375_v32 = vrot.slane %v3374_v17, 4  ;;  %v6794_v7 = vld [vmem:[#allocation2 + $0xcc] sm:$0xff]  }
 0x193   : > { %v6212_v13 = vpop.f32.mrb[44].mxu0  ;;  %v6310_v61 = vpop.f32.mrb[51].mxu1  ;;  %v3668_v15 = vsel %vm7161_vm14, %v3666_v58, %v3667_v20  ;;  %v6296_v36 = vadd.f32 %v8045_v43, %v8037_v19  ;;  %v6211_v24 = vadd.f32 %v8119_v56, %v8117_v0  ;;  %v3370_v62 = vsel %vm6897_vm3, %v3365_v55, %v3369_v9 }
 0x194   : > { %v6213_v3 = vpop.f32.mrb[45].mxu0  ;;  %v5862_v35 = vcombine.low %v3665_v42, %v3668_v15  ;;  %v8175_v63 = vadd.f32 %v6293_v30, %v8500_v52  ;;  %v6299_v33 = vadd.f32 %v8061_v47, %v8052_v25  ;;  %v3380_v48 = vsel %vm6897_vm3, %v3375_v32, %v3379_v39  ;;  %v8504_v32 = vld [vmem:[#allocation17_spill] sm:$0xff] }
 0x195   : > { %v6215_v14 = vpop.f32.mrb[46].mxu0  ;;  %v8182_v22 = vadd.f32 %v6296_v36, %v8031_v21  ;;  %v6214_v19 = vadd.f32 %v6213_v3, %v6212_v13  ;;  %v6302_v43 = vadd.f32 %v8099_v54, %v8092_v18  ;;  %v5830_v0 = vcombine.low %v3370_v62, %v3380_v48 }
 0x196   : > { %v6216_v5 = vpop.f32.mrb[47].mxu0  ;;  %v8187_v56 = vadd.f32 %v6299_v33, %v8041_v31  ;;  %v6305_v25 = vadd.f32 %v8111_v8, %v8107_v51  ;;  %v6308_v21 = vadd.f32 %v6307_v6, %v6306_v10  ;;  %v6311_v46 = vadd.f32 %v6310_v61, %v6309_v53  ;;  %v8503_v61 = vld [vmem:[#allocation16_spill] sm:$0xff] }
 0x197   : > { %6647 = vmatmul.mubr.bf16.gmra.mrb[140].mxu0 %v5862_v35  ;;  %v6217_v40 = vadd.f32 %v6216_v5, %v6215_v14  ;;  %v8192_v26 = vadd.f32 %v6302_v43, %v8077_v44  ;;  %5104 = vmatprep.mubr.bf16.mxu1 %v5830_v0 }
 0x198   : > { %v6312_v47 = vpop.f32.mrb[52].mxu1  ;;  %v8195_v18 = vadd.f32 %v6305_v25, %v8083_v41  ;;  %5105 = vmatmul.mubr.bf16.gmra.mrb[140].mxu1 %v6794_v7  ;;  %v8198_v1 = vadd.f32 %v6308_v21, %v8125_v45  ;;  %v8201_v44 = vadd.f32 %v6311_v46, %v8131_v59 }
 0x199   : > { %v6313_v27 = vpop.f32.mrb[53].mxu1 }
 0x19a   : > { %v6314_v11 = vadd.f32 %v6313_v27, %v6312_v47  ;;  %v6315_v31 = vpop.f32.mrb[54].mxu1  ;;  %v8505_v27 = vld [vmem:[#allocation18_spill] sm:$0xff] }
 0x19b   : > { %v6370_v37 = vpop.f32.mrb[48].mxu0  ;;  %v6316_v8 = vpop.f32.mrb[55].mxu1 }
 0x19c   : > { %v6371_v54 = vpop.f32.mrb[49].mxu0  ;;  %v8203_v39 = vadd.f32 %v6314_v11, %v6202_v12  ;;  %v6317_v29 = vadd.f32 %v6316_v8, %v6315_v31 }
 0x19d   : > { %v6372_v9 = vadd.f32 %v6371_v54, %v6370_v37  ;;  %v6373_v51 = vpop.f32.mrb[50].mxu0 }
 0x19e   : > { %v6374_v10 = vpop.f32.mrb[51].mxu0  ;;  %v8208_v6 = vadd.f32 %v6317_v29, %v6205_v60 }
 0x19f   : > { %v8206_v41 = vadd.f32 %v6372_v9, %v8501_v50  ;;  %v6375_v13 = vadd.f32 %v6374_v10, %v6373_v51 }
 0x1a0   : > { %v6318_v49 = vpop.f32.mrb[56].mxu1 }
 0x1a1   : > { %v8211_v20 = vadd.f32 %v6375_v13, %v8502_v28  ;;  %v6319_v53 = vpop.f32.mrb[57].mxu1 }
 0x1a2   : > { %v6320_v42 = vadd.f32 %v6319_v53, %v6318_v49  ;;  %v6321_v58 = vpop.f32.mrb[58].mxu1  ;;  %v8507_v53 = vld [vmem:[#allocation5_spill] sm:$0xff] }
 0x1a3   : > { %v6376_v45 = vpop.f32.mrb[52].mxu0  ;;  %v6322_v14 = vpop.f32.mrb[59].mxu1 }
 0x1a4   : > { %v6377_v3 = vpop.f32.mrb[53].mxu0  ;;  %v8216_v5 = vadd.f32 %v6320_v42, %v6208_v4  ;;  %v6323_v60 = vadd.f32 %v6322_v14, %v6321_v58 }
 0x1a5   : > { %v6378_v59 = vadd.f32 %v6377_v3, %v6376_v45  ;;  %v6379_v17 = vpop.f32.mrb[54].mxu0  ;;  %v8506_v45 = vld [vmem:[#allocation4_spill] sm:$0xff] }
 0x1a6   : > { %v6380_v12 = vpop.f32.mrb[55].mxu0  ;;  %v8221_v36 = vadd.f32 %v6323_v60, %v6211_v24 }
 0x1a7   : > { %v8214_v55 = vadd.f32 %v6378_v59, %v8503_v61  ;;  %v6381_v30 = vadd.f32 %v6380_v12, %v6379_v17 }
 0x1a8   : > { %v6324_v35 = vpop.f32.mrb[60].mxu1 }
 0x1a9   : > { %v8219_v15 = vadd.f32 %v6381_v30, %v8504_v32  ;;  %v6325_v33 = vpop.f32.mrb[61].mxu1 }
 0x1aa   : > { %v6326_v43 = vadd.f32 %v6325_v33, %v6324_v35  ;;  %v6327_v0 = vpop.f32.mrb[62].mxu1 }
 0x1ab   : > { %v6382_v62 = vpop.f32.mrb[56].mxu0  ;;  %v6328_v47 = vpop.f32.mrb[63].mxu1 }
 0x1ac   : > { %v6383_v52 = vpop.f32.mrb[57].mxu0  ;;  %v8226_v21 = vadd.f32 %v6326_v43, %v6214_v19  ;;  %v6329_v46 = vadd.f32 %v6328_v47, %v6327_v0  ;;  %v8509_v43 = vld [vmem:[#allocation7_spill] sm:$0xff] }
 0x1ad   : > { %v6384_v48 = vadd.f32 %v6383_v52, %v6382_v62  ;;  %v6385_v7 = vpop.f32.mrb[58].mxu0  ;;  %v8508_v52 = vld [vmem:[#allocation6_spill] sm:$0xff] }
 0x1ae   : > { %v6386_v25 = vpop.f32.mrb[59].mxu0  ;;  %v8231_v54 = vadd.f32 %v6329_v46, %v6217_v40 }
 0x1af   : > { %v8224_v37 = vadd.f32 %v6384_v48, %v8050_v16  ;;  %v6387_v4 = vadd.f32 %v6386_v25, %v6385_v7 }
 0x1b0   : > { %v6330_v9 = vpop.f32.mrb[64].mxu1 }
 0x1b1   : > { %v8229_v24 = vadd.f32 %v6387_v4, %v8505_v27  ;;  %v6331_v10 = vpop.f32.mrb[65].mxu1 }
 0x1b2   : > { %v6332_v50 = vadd.f32 %v6331_v10, %v6330_v9  ;;  %v6333_v13 = vpop.f32.mrb[66].mxu1  ;;  %v8510_v10 = vld [vmem:[#allocation8_spill] sm:$0xff] }
 0x1b3   : > { %v6388_v11 = vpop.f32.mrb[60].mxu0  ;;  %v6334_v28 = vpop.f32.mrb[67].mxu1 }
 0x1b4   : > { %v6389_v31 = vpop.f32.mrb[61].mxu0  ;;  %v8237_v49 = vadd.f32 %v6332_v50, %v8506_v45  ;;  %v6335_v3 = vadd.f32 %v6334_v28, %v6333_v13 }
 0x1b5   : > { %v6390_v51 = vadd.f32 %v6389_v31, %v6388_v11  ;;  %v6391_v8 = vpop.f32.mrb[62].mxu0 }
 0x1b6   : > { %v6392_v29 = vpop.f32.mrb[63].mxu0  ;;  %v8243_v59 = vadd.f32 %v6335_v3, %v8507_v53 }
 0x1b7   : > { %v8234_v16 = vadd.f32 %v6390_v51, %v8090_v57  ;;  %v6393_v19 = vadd.f32 %v6392_v29, %v6391_v8 }
 0x1b8   : > { %v6336_v14 = vpop.f32.mrb[68].mxu1 }
 0x1b9   : > { %v8240_v40 = vadd.f32 %v6393_v19, %v8097_v2  ;;  %v6337_v57 = vpop.f32.mrb[69].mxu1  ;;  %v8511_v19 = vld [vmem:[#allocation9_spill] sm:$0xff] }
 0x1ba   : > { %v6338_v32 = vadd.f32 %v6337_v57, %v6336_v14  ;;  %v6339_v62 = vpop.f32.mrb[70].mxu1 }
 0x1bb   : > { %v6394_v17 = vpop.f32.mrb[64].mxu0  ;;  %v6340_v35 = vpop.f32.mrb[71].mxu1 }
 0x1bc   : > { %v6395_v42 = vpop.f32.mrb[65].mxu0  ;;  %v8252_v33 = vadd.f32 %v6338_v32, %v8508_v52  ;;  %v6341_v48 = vadd.f32 %v6340_v35, %v6339_v62 }
 0x1bd   : > { %v6396_v58 = vadd.f32 %v6395_v42, %v6394_v17  ;;  %v6397_v12 = vpop.f32.mrb[66].mxu0 }
 0x1be   : > { %v6398_v61 = vpop.f32.mrb[67].mxu0  ;;  %v8255_v0 = vadd.f32 %v6341_v48, %v8509_v43  ;;  %v8512_v43 = vld [vmem:[#allocation10_spill] sm:$0xff] }
 0x1bf   : > { %v8246_v30 = vadd.f32 %v6396_v58, %v8138_v23  ;;  %v6399_v60 = vadd.f32 %v6398_v61, %v6397_v12 }
 0x1c0   : > { %v6342_v23 = vpop.f32.mrb[72].mxu1 }
 0x1c1   : > { %v8249_v2 = vadd.f32 %v6399_v60, %v8141_v38  ;;  %v6343_v27 = vpop.f32.mrb[73].mxu1 }
 0x1c2   : > { %v6344_v38 = vadd.f32 %v6343_v27, %v6342_v23  ;;  %v6345_v9 = vpop.f32.mrb[74].mxu1 }
 0x1c3   : > { %v6400_v7 = vpop.f32.mrb[68].mxu0  ;;  %v6346_v51 = vpop.f32.mrb[75].mxu1 }
 0x1c4   : > { %v6401_v25 = vpop.f32.mrb[69].mxu0  ;;  %v8264_v29 = vadd.f32 %v6344_v38, %v8510_v10  ;;  %v6347_v50 = vadd.f32 %v6346_v51, %v6345_v9 }
 0x1c5   : > { %v6402_v47 = vadd.f32 %v6401_v25, %v6400_v7  ;;  %v6403_v4 = vpop.f32.mrb[70].mxu0 }
 0x1c6   : > { %v6404_v46 = vpop.f32.mrb[71].mxu0  ;;  %v8267_v28 = vadd.f32 %v6347_v50, %v8511_v19 }
 0x1c7   : > { %v8258_v11 = vadd.f32 %v6402_v47, %v8160_v34  ;;  %v6405_v31 = vadd.f32 %v6404_v46, %v6403_v4  ;;  %v8513_v4 = vld [vmem:[#allocation11_spill] sm:$0xff] }
 0x1c9   : > { %v8261_v8 = vadd.f32 %v6405_v31, %v8175_v63 }
 0x1cb   : > { %v6406_v13 = vpop.f32.mrb[72].mxu0 }
 0x1cc   : > { %v6407_v45 = vpop.f32.mrb[73].mxu0 }
 0x1cd   : > { %v6408_v3 = vadd.f32 %v6407_v45, %v6406_v13  ;;  %v6409_v53 = vpop.f32.mrb[74].mxu0 }
 0x1ce   : > { %v6410_v34 = vpop.f32.mrb[75].mxu0 }
 0x1cf   : > { %v8270_v17 = vadd.f32 %v6408_v3, %v8182_v22  ;;  %v6411_v42 = vadd.f32 %v6410_v34, %v6409_v53  ;;  %v6348_v57 = vpop.f32.mrb[76].mxu1 }
 0x1d0   : > { %v6349_v62 = vpop.f32.mrb[77].mxu1 }
 0x1d1   : > { %v8273_v58 = vadd.f32 %v6411_v42, %v8187_v56  ;;  %v6350_v52 = vadd.f32 %v6349_v62, %v6348_v57  ;;  %v6351_v48 = vpop.f32.mrb[78].mxu1 }
 0x1d2   : > { %v6352_v7 = vpop.f32.mrb[79].mxu1 }
 0x1d3   : > { %v6412_v63 = vpop.f32.mrb[76].mxu0  ;;  %v8282_v56 = vadd.f32 %v6350_v52, %v8512_v43  ;;  %v6353_v25 = vadd.f32 %v6352_v7, %v6351_v48 }
 0x1d4   : > { %v6413_v12 = vpop.f32.mrb[77].mxu0 }
 0x1d5   : > { %v6414_v14 = vadd.f32 %v6413_v12, %v6412_v63  ;;  %v6415_v61 = vpop.f32.mrb[78].mxu0  ;;  %v8285_v23 = vadd.f32 %v6353_v25, %v8513_v4 }
 0x1d6   : > { %v6416_v60 = vpop.f32.mrb[79].mxu0 }
 0x1d7   : > { %v8276_v32 = vadd.f32 %v6414_v14, %v8192_v26  ;;  %v6417_v35 = vadd.f32 %v6416_v60, %v6415_v61 }
 0x1d9   : > { %v8279_v22 = vadd.f32 %v6417_v35, %v8195_v18 }
 0x1db   : > { %v6418_v47 = vpop.f32.mrb[80].mxu0 }
 0x1dc   : > { %v6419_v46 = vpop.f32.mrb[81].mxu0 }
 0x1dd   : > { %v6420_v27 = vadd.f32 %v6419_v46, %v6418_v47  ;;  %v6421_v26 = vpop.f32.mrb[82].mxu0 }
 0x1de   : > { %v6422_v31 = vpop.f32.mrb[83].mxu0  ;;  %v6482_v51 = vpop.f32.mrb[80].mxu1 }
 0x1df   : > { %v8288_v38 = vadd.f32 %v6420_v27, %v8198_v1  ;;  %v6423_v9 = vadd.f32 %v6422_v31, %v6421_v26  ;;  %v6483_v18 = vpop.f32.mrb[81].mxu1 }
 0x1e0   : > { %v6484_v50 = vadd.f32 %v6483_v18, %v6482_v51  ;;  %v6485_v13 = vpop.f32.mrb[82].mxu1 }
 0x1e1   : > { %v8291_v10 = vadd.f32 %v6423_v9, %v8201_v44  ;;  %v6486_v19 = vpop.f32.mrb[83].mxu1 }
 0x1e2   : > { %v6487_v45 = vadd.f32 %v6486_v19, %v6485_v13  ;;  %v8294_v3 = vadd.f32 %v6484_v50, %v8206_v41 }
 0x1e3   : > { %v6424_v53 = vpop.f32.mrb[84].mxu0 }
 0x1e4   : > { %v8297_v34 = vadd.f32 %v6487_v45, %v8211_v20  ;;  %v6425_v42 = vpop.f32.mrb[85].mxu0 }
 0x1e5   : > { %v6426_v1 = vadd.f32 %v6425_v42, %v6424_v53  ;;  %v6427_v63 = vpop.f32.mrb[86].mxu0 }
 0x1e6   : > { %v6428_v12 = vpop.f32.mrb[87].mxu0  ;;  %v6488_v44 = vpop.f32.mrb[84].mxu1 }
 0x1e7   : > { %v8300_v14 = vadd.f32 %v6426_v1, %v8203_v39  ;;  %v6429_v61 = vadd.f32 %v6428_v12, %v6427_v63  ;;  %v6489_v57 = vpop.f32.mrb[85].mxu1 }
 0x1e8   : > { %v6490_v60 = vadd.f32 %v6489_v57, %v6488_v44  ;;  %v6491_v41 = vpop.f32.mrb[86].mxu1 }
 0x1e9   : > { %v8303_v62 = vadd.f32 %v6429_v61, %v8208_v6  ;;  %v6492_v35 = vpop.f32.mrb[87].mxu1 }
 0x1ea   : > { %v6493_v52 = vadd.f32 %v6492_v35, %v6491_v41  ;;  %v8306_v20 = vadd.f32 %v6490_v60, %v8214_v55 }
 0x1eb   : > { %v6430_v48 = vpop.f32.mrb[88].mxu0 }
 0x1ec   : > { %v8309_v7 = vadd.f32 %v6493_v52, %v8219_v15  ;;  %v6431_v43 = vpop.f32.mrb[89].mxu0 }
 0x1ed   : > { %v6432_v39 = vadd.f32 %v6431_v43, %v6430_v48  ;;  %v6433_v25 = vpop.f32.mrb[90].mxu0 }
 0x1ee   : > { %v6434_v47 = vpop.f32.mrb[91].mxu0  ;;  %v6494_v46 = vpop.f32.mrb[88].mxu1 }
 0x1ef   : > { %v8312_v4 = vadd.f32 %v6432_v39, %v8216_v5  ;;  %v6435_v6 = vadd.f32 %v6434_v47, %v6433_v25  ;;  %v6495_v27 = vpop.f32.mrb[89].mxu1 }
 0x1f0   : > { %v6496_v26 = vadd.f32 %v6495_v27, %v6494_v46  ;;  %v6497_v55 = vpop.f32.mrb[90].mxu1 }
 0x1f1   : > { %v8315_v31 = vadd.f32 %v6435_v6, %v8221_v36  ;;  %v6498_v9 = vpop.f32.mrb[91].mxu1 }
 0x1f2   : > { %v6499_v51 = vadd.f32 %v6498_v9, %v6497_v55  ;;  %v8318_v15 = vadd.f32 %v6496_v26, %v8224_v37 }
 0x1f4   : > { %v8321_v18 = vadd.f32 %v6499_v51, %v8229_v24 }
 0x1f5   : > { %v6436_v50 = vpop.f32.mrb[92].mxu0 }
 0x1f6   : > { %v6437_v13 = vpop.f32.mrb[93].mxu0 }
 0x1f7   : > { %v6438_v5 = vadd.f32 %v6437_v13, %v6436_v50  ;;  %v6439_v19 = vpop.f32.mrb[94].mxu0 }
 0x1f8   : > { %v6500_v45 = vpop.f32.mrb[92].mxu1  ;;  %v6440_v53 = vpop.f32.mrb[95].mxu0 }
 0x1f9   : > { %v8324_v42 = vadd.f32 %v6438_v5, %v8226_v21  ;;  %v6501_v36 = vpop.f32.mrb[93].mxu1  ;;  %v6441_v1 = vadd.f32 %v6440_v53, %v6439_v19 }
 0x1fa   : > { %v6502_v63 = vadd.f32 %v6501_v36, %v6500_v45  ;;  %v6503_v12 = vpop.f32.mrb[94].mxu1 }
 0x1fb   : > { %v8327_v44 = vadd.f32 %v6441_v1, %v8231_v54  ;;  %v6504_v37 = vpop.f32.mrb[95].mxu1 }
 0x1fc   : > { %v6505_v61 = vadd.f32 %v6504_v37, %v6503_v12  ;;  %v8330_v24 = vadd.f32 %v6502_v63, %v8234_v16 }
 0x1fd   : > { %v6442_v57 = vpop.f32.mrb[96].mxu0 }
 0x1fe   : > { %v6443_v60 = vpop.f32.mrb[97].mxu0  ;;  %v8333_v41 = vadd.f32 %v6505_v61, %v8240_v40 }
 0x1ff   : > { %v6444_v35 = vadd.f32 %v6443_v60, %v6442_v57  ;;  %v6445_v21 = vpop.f32.mrb[98].mxu0 }
 0x200   : > { %v6446_v52 = vpop.f32.mrb[99].mxu0 }
 0x201   : > { %v8336_v48 = vadd.f32 %v6444_v35, %v8237_v49  ;;  %v6447_v43 = vadd.f32 %v6446_v52, %v6445_v21 }
 0x202   : > { %v6506_v39 = vpop.f32.mrb[96].mxu1 }
 0x203   : > { %v6507_v54 = vpop.f32.mrb[97].mxu1  ;;  %v8339_v25 = vadd.f32 %v6447_v43, %v8243_v59 }
 0x204   : > { %v6508_v47 = vadd.f32 %v6507_v54, %v6506_v39  ;;  %v6509_v16 = vpop.f32.mrb[98].mxu1 }
 0x205   : > { %v6510_v46 = vpop.f32.mrb[99].mxu1 }
 0x206   : > { %v6511_v6 = vadd.f32 %v6510_v46, %v6509_v16  ;;  %v8342_v27 = vadd.f32 %v6508_v47, %v8246_v30 }
 0x208   : > { %v6448_v40 = vpop.f32.mrb[100].mxu0  ;;  %v8345_v26 = vadd.f32 %v6511_v6, %v8249_v2 }
 0x209   : > { %v6449_v55 = vpop.f32.mrb[101].mxu0 }
 0x20a   : > { %v6450_v49 = vadd.f32 %v6449_v55, %v6448_v40  ;;  %v6451_v9 = vpop.f32.mrb[102].mxu0 }
 0x20b   : > { %v6452_v51 = vpop.f32.mrb[103].mxu0 }
 0x20c   : > { %v8348_v50 = vadd.f32 %v6450_v49, %v8252_v33  ;;  %v6453_v59 = vadd.f32 %v6452_v51, %v6451_v9 }
 0x20d   : > { %v6512_v13 = vpop.f32.mrb[100].mxu1 }
 0x20e   : > { %v6513_v5 = vpop.f32.mrb[101].mxu1  ;;  %v8351_v19 = vadd.f32 %v6453_v59, %v8255_v0 }
 0x20f   : > { %v6514_v45 = vadd.f32 %v6513_v5, %v6512_v13  ;;  %v6515_v30 = vpop.f32.mrb[102].mxu1 }
 0x210   : > { %v6516_v53 = vpop.f32.mrb[103].mxu1 }
 0x211   : > { %v6517_v36 = vadd.f32 %v6516_v53, %v6515_v30  ;;  %v8354_v2 = vadd.f32 %v6514_v45, %v8258_v11 }
 0x212   : > { %v6454_v1 = vpop.f32.mrb[104].mxu0 }
 0x213   : > { %v6455_v63 = vpop.f32.mrb[105].mxu0  ;;  %v8357_v12 = vadd.f32 %v6517_v36, %v8261_v8 }
 0x214   : > { %v6456_v33 = vadd.f32 %v6455_v63, %v6454_v1  ;;  %v6457_v37 = vpop.f32.mrb[106].mxu0 }
 0x215   : > { %v6458_v61 = vpop.f32.mrb[107].mxu0 }
 0x216   : > { %v8360_v57 = vadd.f32 %v6456_v33, %v8264_v29  ;;  %v6459_v0 = vadd.f32 %v6458_v61, %v6457_v37 }
 0x217   : > { %v6518_v60 = vpop.f32.mrb[104].mxu1 }
 0x218   : > { %v6519_v35 = vpop.f32.mrb[105].mxu1  ;;  %v8363_v21 = vadd.f32 %v6459_v0, %v8267_v28 }
 0x219   : > { %v6520_v52 = vadd.f32 %v6519_v35, %v6518_v60  ;;  %v6521_v11 = vpop.f32.mrb[106].mxu1 }
 0x21a   : > { %v6522_v43 = vpop.f32.mrb[107].mxu1 }
 0x21b   : > { %v6523_v39 = vadd.f32 %v6522_v43, %v6521_v11  ;;  %v8366_v54 = vadd.f32 %v6520_v52, %v8270_v17 }
 0x21d   : > { %v8369_v8 = vadd.f32 %v6523_v39, %v8273_v58 }
 0x221   : > { %v6524_v47 = vpop.f32.mrb[108].mxu1 }
 0x222   : > { %v6525_v16 = vpop.f32.mrb[109].mxu1 }
 0x223   : > { %v6526_v29 = vadd.f32 %v6525_v16, %v6524_v47  ;;  %v6527_v46 = vpop.f32.mrb[110].mxu1 }
 0x224   : > { %v6528_v6 = vpop.f32.mrb[111].mxu1 }
 0x225   : > { %v6529_v40 = vadd.f32 %v6528_v6, %v6527_v46  ;;  %v8372_v55 = vadd.f32 %v6526_v29, %v8276_v32 }
 0x227   : > { %v8375_v49 = vadd.f32 %v6529_v40, %v8279_v22 }
 0x229   : > { %v6530_v59 = vpop.f32.mrb[112].mxu1 }
 0x22a   : > { %v6460_v28 = vpop.f32.mrb[108].mxu0  ;;  %v6531_v13 = vpop.f32.mrb[113].mxu1 }
 0x22b   : > { %v6461_v9 = vpop.f32.mrb[109].mxu0  ;;  %v6532_v30 = vadd.f32 %v6531_v13, %v6530_v59  ;;  %v6533_v53 = vpop.f32.mrb[114].mxu1 }
 0x22c   : > { %v6462_v51 = vadd.f32 %v6461_v9, %v6460_v28  ;;  %v6463_v17 = vpop.f32.mrb[110].mxu0  ;;  %v6534_v36 = vpop.f32.mrb[115].mxu1 }
 0x22d   : > { %v6464_v58 = vpop.f32.mrb[111].mxu0  ;;  %v6535_v1 = vadd.f32 %v6534_v36, %v6533_v53  ;;  %v8384_v22 = vadd.f32 %v6532_v30, %v8288_v38 }
 0x22e   : > { %v8378_v5 = vadd.f32 %v6462_v51, %v8282_v56  ;;  %v6465_v45 = vadd.f32 %v6464_v58, %v6463_v17 }
 0x22f   : > { %v8387_v33 = vadd.f32 %v6535_v1, %v8291_v10 }
 0x230   : > { %v8381_v32 = vadd.f32 %v6465_v45, %v8285_v23 }
 0x232   : > { %v6620_v63 = vpop.f32.mrb[112].mxu0 }
 0x233   : > { %v5156_v37 = vadd.f32 %v6620_v63, %v8306_v20  ;;  %v5147_v61 = vpop.f32.mrb[113].mxu0 }
 0x234   : > { %v5148_v56 = vadd.f32 %v5147_v61, %v8294_v3  ;;  %v6621_v0 = vpop.f32.mrb[114].mxu0  ;;  %v6536_v23 = vpop.f32.mrb[116].mxu1 }
 0x235   : > { %v5159_v60 = vadd.f32 %v6621_v0, %v8309_v7  ;;  %v5150_v35 = vpop.f32.mrb[115].mxu0  ;;  %v6537_v10 = vpop.f32.mrb[117].mxu1  ;;  %v5313_v46 = vmul.f32 %v5156_v37, %v5156_v37 }
 0x236   : > { %v5151_v38 = vadd.f32 %v5150_v35, %v8297_v34  ;;  %v6538_v52 = vadd.f32 %v6537_v10, %v6536_v23  ;;  %v6539_v11 = vpop.f32.mrb[118].mxu1  ;;  %v5311_v43 = vmul.f32 %v5148_v56, %v5148_v56 }
 0x237   : > { %v6043_v20 = vpack.c.bf16 %v5159_v60, %v5156_v37  ;;  %v6540_v7 = vpop.f32.mrb[119].mxu1  ;;  %v5314_v17 = vmul.f32 %v5159_v60, %v5159_v60 }
 0x238   : > { %v5274_v3 = vadd.f32 %v5151_v38, %v5148_v56  ;;  %v5312_v39 = vmul.f32 %v5151_v38, %v5151_v38  ;;  %v6038_v47 = vpack.c.bf16 %v5151_v38, %v5148_v56  ;;  %v6541_v16 = vadd.f32 %v6540_v7, %v6539_v11 }
 0x239   : > { %6115 = vst [vmem:[%s8396_s23 + $0x8] sm:$0xff] %v6043_v20   ;;  %v8401_v29 = vadd.f32 %v6538_v52, %v8300_v14 }
 0x23a   : > { %v5275_v6 = vadd.f32 %v5274_v3, %v5156_v37  ;;  %v5343_v40 = vadd.f32 %v5312_v39, %v5311_v43  ;;  %6039 = vst [vmem:[%s8396_s23] sm:$0xff] %v6038_v47   ;;  %v6624_v34 = vpop.f32.mrb[116].mxu0  ;;  %v8406_v51 = vadd.f32 %v6541_v16, %v8303_v62 }
 0x23b   : > { %v5172_v28 = vadd.f32 %v6624_v34, %v8330_v24  ;;  %v5163_v9 = vpop.f32.mrb[117].mxu0 }
 0x23c   : > { %v5344_v59 = vadd.f32 %v5343_v40, %v5313_v46  ;;  %v5164_v58 = vadd.f32 %v5163_v9, %v8318_v15  ;;  %v5276_v13 = vadd.f32 %v5275_v6, %v5159_v60  ;;  %v6625_v45 = vpop.f32.mrb[118].mxu0 }
 0x23d   : > { %v5175_v14 = vadd.f32 %v6625_v45, %v8333_v41  ;;  %v5166_v30 = vpop.f32.mrb[119].mxu0  ;;  %v5317_v23 = vmul.f32 %v5172_v28, %v5172_v28 }
 0x23e   : > { %v5277_v53 = vadd.f32 %v5276_v13, %v5164_v58  ;;  %v5315_v36 = vmul.f32 %v5164_v58, %v5164_v58  ;;  %v5345_v1 = vadd.f32 %v5344_v59, %v5314_v17  ;;  %v5167_v24 = vadd.f32 %v5166_v30, %v8321_v18  ;;  %v6542_v37 = vpop.f32.mrb[120].mxu1 }
 0x23f   : > { %v6053_v63 = vpack.c.bf16 %v5175_v14, %v5172_v28  ;;  %v6543_v35 = vpop.f32.mrb[121].mxu1  ;;  %v5318_v3 = vmul.f32 %v5175_v14, %v5175_v14 }
 0x240   : > { %v5346_v62 = vadd.f32 %v5345_v1, %v5315_v36  ;;  %v5278_v61 = vadd.f32 %v5277_v53, %v5167_v24  ;;  %v5316_v56 = vmul.f32 %v5167_v24, %v5167_v24  ;;  %v6048_v0 = vpack.c.bf16 %v5167_v24, %v5164_v58  ;;  %v6545_v60 = vpop.f32.mrb[122].mxu1 }
 0x241   : > { %6117 = vst [vmem:[%s8396_s23 + $0x18] sm:$0xff] %v6053_v63   ;;  %v6544_v15 = vadd.f32 %v6543_v35, %v6542_v37  ;;  %v6546_v20 = vpop.f32.mrb[123].mxu1 }
 0x242   : > { %v5279_v38 = vadd.f32 %v5278_v61, %v5172_v28  ;;  %v5347_v41 = vadd.f32 %v5346_v62, %v5316_v56  ;;  %6116 = vst [vmem:[%s8396_s23 + $0x10] sm:$0xff] %v6048_v0   ;;  %v6628_v10 = vpop.f32.mrb[120].mxu0  ;;  %v6547_v18 = vadd.f32 %v6546_v20, %v6545_v60 }
 0x243   : > { %v5188_v52 = vadd.f32 %v6628_v10, %v8354_v2  ;;  %v5179_v11 = vpop.f32.mrb[121].mxu0  ;;  %v8415_v43 = vadd.f32 %v6544_v15, %v8312_v4 }
 0x244   : > { %v5348_v39 = vadd.f32 %v5347_v41, %v5317_v23  ;;  %v5180_v47 = vadd.f32 %v5179_v11, %v8342_v27  ;;  %v5280_v7 = vadd.f32 %v5279_v38, %v5175_v14  ;;  %v6629_v16 = vpop.f32.mrb[122].mxu0  ;;  %v8420_v40 = vadd.f32 %v6547_v18, %v8315_v31 }
 0x245   : > { %v5191_v46 = vadd.f32 %v6629_v16, %v8357_v12  ;;  %v5182_v6 = vpop.f32.mrb[123].mxu0  ;;  %v5321_v14 = vmul.f32 %v5188_v52, %v5188_v52 }
 0x246   : > { %v5281_v2 = vadd.f32 %v5280_v7, %v5180_v47  ;;  %v5319_v34 = vmul.f32 %v5180_v47, %v5180_v47  ;;  %v5349_v28 = vadd.f32 %v5348_v39, %v5318_v3  ;;  %v5183_v4 = vadd.f32 %v5182_v6, %v8345_v26  ;;  %v6548_v13 = vpop.f32.mrb[124].mxu1 }
 0x247   : > { %v6063_v9 = vpack.c.bf16 %v5191_v46, %v5188_v52  ;;  %v6549_v45 = vpop.f32.mrb[125].mxu1  ;;  %v5322_v1 = vmul.f32 %v5191_v46, %v5191_v46 }
 0x248   : > { %v5350_v17 = vadd.f32 %v5349_v28, %v5319_v34  ;;  %v5282_v59 = vadd.f32 %v5281_v2, %v5183_v4  ;;  %v5320_v58 = vmul.f32 %v5183_v4, %v5183_v4  ;;  %v6058_v27 = vpack.c.bf16 %v5183_v4, %v5180_v47  ;;  %v6551_v36 = vpop.f32.mrb[126].mxu1 }
 0x249   : > { %6119 = vst [vmem:[%s8396_s23 + $0x28] sm:$0xff] %v6063_v9   ;;  %v6550_v53 = vadd.f32 %v6549_v45, %v6548_v13  ;;  %v6552_v26 = vpop.f32.mrb[127].mxu1 }
 0x24a   : > { %v5283_v12 = vadd.f32 %v5282_v59, %v5188_v52  ;;  %v5351_v30 = vadd.f32 %v5350_v17, %v5320_v58  ;;  %6118 = vst [vmem:[%s8396_s23 + $0x20] sm:$0xff] %v6058_v27   ;;  %v6632_v31 = vpop.f32.mrb[124].mxu0  ;;  %v6553_v0 = vadd.f32 %v6552_v26, %v6551_v36 }
 0x24b   : > { %v5204_v24 = vadd.f32 %v6632_v31, %v8372_v55  ;;  %v5195_v63 = vpop.f32.mrb[125].mxu0  ;;  %v5075_v60 = vadd.f32 %v6550_v53, %v8324_v42 }
 0x24c   : > { %v5352_v37 = vadd.f32 %v5351_v30, %v5321_v14  ;;  %v5196_v62 = vadd.f32 %v5195_v63, %v8366_v54  ;;  %v5284_v61 = vadd.f32 %v5283_v12, %v5191_v46  ;;  %v6633_v56 = vpop.f32.mrb[126].mxu0  ;;  %v5078_v20 = vadd.f32 %v6553_v0, %v8327_v44 }
 0x24d   : > { %v5207_v35 = vadd.f32 %v6633_v56, %v8375_v49  ;;  %v5198_v15 = vpop.f32.mrb[127].mxu0  ;;  %v5325_v39 = vmul.f32 %v5204_v24, %v5204_v24 }
 0x24e   : > { %v5285_v23 = vadd.f32 %v5284_v61, %v5196_v62  ;;  %v5323_v38 = vmul.f32 %v5196_v62, %v5196_v62  ;;  %v5353_v41 = vadd.f32 %v5352_v37, %v5322_v1  ;;  %v5199_v55 = vadd.f32 %v5198_v15, %v8369_v8 }
 0x24f   : > { %v6073_v10 = vpack.c.bf16 %v5207_v35, %v5204_v24  ;;  %v5326_v2 = vmul.f32 %v5207_v35, %v5207_v35 }
 0x250   : > { %v5354_v52 = vadd.f32 %v5353_v41, %v5323_v38  ;;  %v5286_v54 = vadd.f32 %v5285_v23, %v5199_v55  ;;  %v5324_v11 = vmul.f32 %v5199_v55, %v5199_v55  ;;  %v6068_v18 = vpack.c.bf16 %v5199_v55, %v5196_v62  ;;  %v6554_v3 = vpop.f32.mrb[128].mxu1 }
 0x251   : > { %6121 = vst [vmem:[%s8396_s23 + $0x38] sm:$0xff] %v6073_v10   ;;  %v6555_v7 = vpop.f32.mrb[129].mxu1 }
 0x252   : > { %v5287_v49 = vadd.f32 %v5286_v54, %v5204_v24  ;;  %v5355_v47 = vadd.f32 %v5354_v52, %v5324_v11  ;;  %6120 = vst [vmem:[%s8396_s23 + $0x30] sm:$0xff] %v6068_v18   ;;  %v6636_v42 = vpop.f32.mrb[128].mxu0  ;;  %v6556_v6 = vadd.f32 %v6555_v7, %v6554_v3  ;;  %v6557_v8 = vpop.f32.mrb[130].mxu1 }
 0x253   : > { %v5220_v16 = vadd.f32 %v6636_v42, %v8401_v29  ;;  %v5211_v46 = vpop.f32.mrb[129].mxu0  ;;  %v6558_v9 = vpop.f32.mrb[131].mxu1 }
 0x254   : > { %v5356_v34 = vadd.f32 %v5355_v47, %v5325_v39  ;;  %v5212_v44 = vadd.f32 %v5211_v46, %v8384_v22  ;;  %v5288_v28 = vadd.f32 %v5287_v49, %v5207_v35  ;;  %v6637_v4 = vpop.f32.mrb[130].mxu0  ;;  %v6559_v58 = vadd.f32 %v6558_v9, %v6557_v8 }
 0x255   : > { %v5223_v17 = vadd.f32 %v6637_v4, %v8406_v51  ;;  %v5214_v59 = vpop.f32.mrb[131].mxu0  ;;  %v5083_v27 = vadd.f32 %v6556_v6, %v8336_v48  ;;  %v5329_v1 = vmul.f32 %v5220_v16, %v5220_v16 }
 0x256   : > { %v5289_v13 = vadd.f32 %v5288_v28, %v5212_v44  ;;  %v5327_v29 = vmul.f32 %v5212_v44, %v5212_v44  ;;  %v5357_v45 = vadd.f32 %v5356_v34, %v5326_v2  ;;  %v5215_v14 = vadd.f32 %v5214_v59, %v8387_v33 }
 0x257   : > { %v6083_v12 = vpack.c.bf16 %v5223_v17, %v5220_v16  ;;  %v5086_v30 = vadd.f32 %v6559_v58, %v8339_v25  ;;  %v5330_v48 = vmul.f32 %v5223_v17, %v5223_v17 }
 0x258   : > { %v5358_v22 = vadd.f32 %v5357_v45, %v5327_v29  ;;  %v5290_v31 = vadd.f32 %v5289_v13, %v5215_v14  ;;  %v5328_v53 = vmul.f32 %v5215_v14, %v5215_v14  ;;  %v6078_v36 = vpack.c.bf16 %v5215_v14, %v5212_v44 }
 0x259   : > { %6123 = vst [vmem:[%s8396_s23 + $0x48] sm:$0xff] %v6083_v12   ;;  %v6560_v26 = vpop.f32.mrb[132].mxu1 }
 0x25a   : > { %v5291_v51 = vadd.f32 %v5290_v31, %v5220_v16  ;;  %v5359_v24 = vadd.f32 %v5358_v22, %v5328_v53  ;;  %6122 = vst [vmem:[%s8396_s23 + $0x40] sm:$0xff] %v6078_v36   ;;  %v6640_v63 = vpop.f32.mrb[132].mxu0  ;;  %v6561_v61 = vpop.f32.mrb[133].mxu1 }
 0x25b   : > { %v5236_v37 = vadd.f32 %v6640_v63, %v5075_v60  ;;  %v5227_v62 = vpop.f32.mrb[133].mxu0  ;;  %v6562_v25 = vadd.f32 %v6561_v61, %v6560_v26  ;;  %v6563_v15 = vpop.f32.mrb[134].mxu1 }
 0x25c   : > { %v5360_v56 = vadd.f32 %v5359_v24, %v5329_v1  ;;  %v5228_v33 = vadd.f32 %v5227_v62, %v8415_v43  ;;  %v5292_v0 = vadd.f32 %v5291_v51, %v5223_v17  ;;  %v6641_v35 = vpop.f32.mrb[134].mxu0  ;;  %v6564_v41 = vpop.f32.mrb[135].mxu1 }
 0x25d   : > { %v5239_v23 = vadd.f32 %v6641_v35, %v5078_v20  ;;  %v5230_v38 = vpop.f32.mrb[135].mxu0  ;;  %v6565_v11 = vadd.f32 %v6564_v41, %v6563_v15  ;;  %v5091_v18 = vadd.f32 %v6562_v25, %v8348_v50  ;;  %v5333_v20 = vmul.f32 %v5236_v37, %v5236_v37 }
 0x25e   : > { %v5293_v55 = vadd.f32 %v5292_v0, %v5228_v33  ;;  %v5331_v10 = vmul.f32 %v5228_v33, %v5228_v33  ;;  %v5361_v52 = vadd.f32 %v5360_v56, %v5330_v48  ;;  %v5231_v54 = vadd.f32 %v5230_v38, %v8420_v40 }
 0x25f   : > { %v6093_v60 = vpack.c.bf16 %v5239_v23, %v5236_v37  ;;  %v5094_v47 = vadd.f32 %v6565_v11, %v8351_v19  ;;  %v5334_v8 = vmul.f32 %v5239_v23, %v5239_v23 }
 0x260   : > { %v5362_v3 = vadd.f32 %v5361_v52, %v5331_v10  ;;  %v5294_v43 = vadd.f32 %v5293_v55, %v5231_v54  ;;  %v5332_v39 = vmul.f32 %v5231_v54, %v5231_v54  ;;  %v6088_v49 = vpack.c.bf16 %v5231_v54, %v5228_v33 }
 0x261   : > { %6125 = vst [vmem:[%s8396_s23 + $0x58] sm:$0xff] %v6093_v60  }
 0x262   : > { %v5295_v42 = vadd.f32 %v5294_v43, %v5236_v37  ;;  %v5363_v7 = vadd.f32 %v5362_v3, %v5332_v39  ;;  %6124 = vst [vmem:[%s8396_s23 + $0x50] sm:$0xff] %v6088_v49   ;;  %v6644_v16 = vpop.f32.mrb[136].mxu0 }
 0x263   : > { %v5252_v46 = vadd.f32 %v6644_v16, %v5091_v18  ;;  %v5243_v6 = vpop.f32.mrb[137].mxu0  ;;  %v6566_v2 = vpop.f32.mrb[136].mxu1 }
 0x264   : > { %v5364_v40 = vadd.f32 %v5363_v7, %v5333_v20  ;;  %v5244_v34 = vadd.f32 %v5243_v6, %v5083_v27  ;;  %v5296_v44 = vadd.f32 %v5295_v42, %v5239_v23  ;;  %v6645_v50 = vpop.f32.mrb[138].mxu0  ;;  %v6567_v28 = vpop.f32.mrb[137].mxu1 }
 0x265   : > { %v5255_v4 = vadd.f32 %v6645_v50, %v5094_v47  ;;  %v5246_v9 = vpop.f32.mrb[139].mxu0  ;;  %v6568_v58 = vadd.f32 %v6567_v28, %v6566_v2  ;;  %v6569_v13 = vpop.f32.mrb[138].mxu1  ;;  %v5337_v24 = vmul.f32 %v5252_v46, %v5252_v46 }
 0x266   : > { %v5297_v17 = vadd.f32 %v5296_v44, %v5244_v34  ;;  %v5335_v59 = vmul.f32 %v5244_v34, %v5244_v34  ;;  %v5365_v19 = vadd.f32 %v5364_v40, %v5334_v8  ;;  %v5247_v45 = vadd.f32 %v5246_v9, %v5086_v30  ;;  %v6570_v14 = vpop.f32.mrb[139].mxu1 }
 0x267   : > { %v6103_v29 = vpack.c.bf16 %v5255_v4, %v5252_v46  ;;  %v6571_v22 = vadd.f32 %v6570_v14, %v6569_v13  ;;  %v5099_v31 = vadd.f32 %v6568_v58, %v8360_v57  ;;  %v5338_v30 = vmul.f32 %v5255_v4, %v5255_v4 }
 0x268   : > { %v5366_v12 = vadd.f32 %v5365_v19, %v5335_v59  ;;  %v5298_v27 = vadd.f32 %v5297_v17, %v5247_v45  ;;  %v5336_v53 = vmul.f32 %v5247_v45, %v5247_v45  ;;  %v6098_v36 = vpack.c.bf16 %v5247_v45, %v5244_v34 }
 0x269   : > { %6127 = vst [vmem:[%s8396_s23 + $0x68] sm:$0xff] %v6103_v29   ;;  %v5102_v51 = vadd.f32 %v6571_v22, %v8363_v21 }
 0x26a   : > { %v6648_v1 = vpop.f32.mrb[140].mxu0  ;;  %v5299_v63 = vadd.f32 %v5298_v27, %v5252_v46  ;;  %v5367_v26 = vadd.f32 %v5366_v12, %v5336_v53  ;;  %6126 = vst [vmem:[%s8396_s23 + $0x60] sm:$0xff] %v6098_v36  }
 0x26b   : > { %v5259_v48 = vpop.f32.mrb[141].mxu0  ;;  %v6572_v56 = vpop.f32.mrb[140].mxu1 }
 0x26c   : > { %v5260_v37 = vadd.f32 %v5259_v48, %v5099_v31  ;;  %v6649_v62 = vpop.f32.mrb[142].mxu0  ;;  %v5368_v61 = vadd.f32 %v5367_v26, %v5337_v24  ;;  %v5300_v33 = vadd.f32 %v5299_v63, %v5255_v4  ;;  %v6573_v25 = vpop.f32.mrb[141].mxu1 }
 0x26d   : > { %v5262_v57 = vpop.f32.mrb[143].mxu0  ;;  %v6574_v38 = vadd.f32 %v6573_v25, %v6572_v56  ;;  %v6575_v21 = vpop.f32.mrb[142].mxu1 }
 0x26e   : > { %v5339_v0 = vmul.f32 %v5260_v37, %v5260_v37  ;;  %v5263_v35 = vadd.f32 %v5262_v57, %v5102_v51  ;;  %v5301_v15 = vadd.f32 %v5300_v33, %v5260_v37  ;;  %v5369_v23 = vadd.f32 %v5368_v61, %v5338_v30  ;;  %v6576_v10 = vpop.f32.mrb[143].mxu1 }
 0x26f   : > { %v5107_v54 = vadd.f32 %v6574_v38, %v8378_v5  ;;  %v6577_v11 = vadd.f32 %v6576_v10, %v6575_v21 }
 0x270   : > { %v5340_v41 = vmul.f32 %v5263_v35, %v5263_v35  ;;  %v6108_v55 = vpack.c.bf16 %v5263_v35, %v5260_v37  ;;  %v5370_v52 = vadd.f32 %v5369_v23, %v5339_v0  ;;  %v5302_v60 = vadd.f32 %v5301_v15, %v5263_v35 }
 0x271   : > { %v5268_v18 = vadd.f32 %v6648_v1, %v5107_v54  ;;  %v5110_v43 = vadd.f32 %v6577_v11, %v8381_v32 }
 0x272   : > { %6128 = vst [vmem:[%s8396_s23 + $0x70] sm:$0xff] %v6108_v55   ;;  %v5371_v3 = vadd.f32 %v5370_v52, %v5340_v41 }
 0x273   : > { %v5341_v39 = vmul.f32 %v5268_v18, %v5268_v18  ;;  %v5303_v49 = vadd.f32 %v5302_v60, %v5268_v18  ;;  %v5271_v47 = vadd.f32 %v6649_v62, %v5110_v43 }
 0x275   : > { %v5372_v20 = vadd.f32 %v5371_v3, %v5341_v39  ;;  %v5304_v42 = vadd.f32 %v5303_v49, %v5271_v47  ;;  %v5342_v7 = vmul.f32 %v5271_v47, %v5271_v47  ;;  %v6113_v16 = vpack.c.bf16 %v5271_v47, %v5268_v18 }
 0x277   : > { %v5305_v46 = vrot.slane %v5304_v42, 4  ;;  %v5373_v6 = vadd.f32 %v5372_v20, %v5342_v7  ;;  %6129 = vst [vmem:[%s8396_s23 + $0x78] sm:$0xff] %v6113_v16  }
 0x279   : > { %v5306_v5 = vadd.f32 %v5305_v46, %v5304_v42  ;;  %v5374_v8 = vrot.slane %v5373_v6, 4 }
 0x27b   : > { %v5307_v40 = vrot.slane %v5306_v5, 2  ;;  %v5375_v2 = vadd.f32 %v5374_v8, %v5373_v6 }
 0x27d   : > { %v5308_v34 = vadd.f32 %v5307_v40, %v5306_v5  ;;  %v5376_v44 = vrot.slane %v5375_v2, 2 }
 0x27f   : > { %v5309_v50 = vrot.slane %v5308_v34, 1  ;;  %v5377_v28 = vadd.f32 %v5376_v44, %v5375_v2 }
 0x281   : > { %v5378_v32 = vrot.slane %v5377_v28, 1  ;;  %v5310_v4 = vadd.f32 %v5309_v50, %v5308_v34 }
 0x283   : > { %v5379_v9 = vadd.f32 %v5378_v32, %v5377_v28 }
 0x285   : > { %v5381_v17 = vsel %vm277_vm0, %v5310_v4, %v5379_v9 }
 0x286   : > { %5382 = vst [vmem:[%s235_s27] sm:$0x3] %v5381_v17 }
 0x287 PF: > { %s16_s18 = sadd.s32 1, %s6801_s18  }
 0x288   : > { %p13_p4 = scmp.ge.s32.totalorder %s16_s18, 4  }
 0x28a   :  { %15 = sbr.rel (!%p13_p4) target bundleno = 1 (0x1), region = 81 }

// kernel: basic_block_forward.4
= control target key start
LH: loop header
LB: loop body
LE: loop exit
PB: predicated region body
PF: predicated region fallthrough
CT: control target
= control target key end

     0   :  { %s7063_s18 = smov 0   ;;  %s8896_s0 = inlined_call_operand.vmem [shape: bf16[2,16,16,128], index: 0, kind: input, shape index: {}]   ;;  %s8897_s1 = inlined_call_operand.vmem [shape: f32[1,128], index: 1, kind: input, shape index: {}]   ;;  %s8898_s2 = inlined_call_operand.vmem [shape: f32[1,128], index: 2, kind: input, shape index: {}]   ;;  %s8899_s3 = inlined_call_operand.vmem [shape: bf16[1152,128], index: 3, kind: input, shape index: {}]   ;;  %s8900_s4 = inlined_call_operand.vmem [shape: bf16[2,16,16,128], index: 4, kind: output, shape index: {0}]   ;;  %s8901_s5 = inlined_call_operand.vmem [shape: f32[2,2,128], index: 5, kind: output, shape index: {1}]  }
   0x1 LB: > { %s5771_s19 = sadd.s32 4294967295, %s7030_s18   ;;  %p5775_p0 = scmp.ge.s32.totalorder %s7030_s18, 1  ;;  %s7030_s18 = sphi %s7063_s18, %s16_s18  }
   0x2   : > { %p190_p1 = scmp.lt.s32.totalorder %s7030_s18, 3 }
   0x4   : > { %p191_p2 = pnand %p5775_p0, %p190_p1 }
   0x6   : > { %194 = sbr.rel (%p191_p2) target bundleno = 672 (0x2a0), region = 36 }
   0xd   : > { %v6898_v0 = vld [vmem:[%s8899_s3 + $0x40] sm:$0xff]   ;;  %v7032_v2 = vmov 0   ;;  %v6900_v3 = vld [vmem:[%s8899_s3 + $0x48] sm:$0xff]   ;;  %v6902_v5 = vld [vmem:[%s8899_s3 + $0x50] sm:$0xff]   ;;  %p222_p3 = scmp.lt.s32.totalorder %s5771_s19, 1  ;;  %vm419_vm0 = vcmask 1040384  }
   0xe   : > { %v6899_v1 = vld [vmem:[%s8899_s3] sm:$0xff]   ;;  %411 = vst [vmem:[#allocation2] sm:$0xf] %v7032_v2  ;;  %412 = vst [vmem:[#allocation2 + $0x4] sm:$0xf] %v7032_v2  ;;  %6353 = vmatprep.subr.bf16.mxu0 %v6898_v0  ;;  %6873 = vmatprep.subr.bf16.mxu1 %v6898_v0  ;;  %v6901_v4 = vld [vmem:[%s8899_s3 + $0x8] sm:$0xff]  }
   0xf   : > { %413 = vst [vmem:[#allocation2 + $0x8] sm:$0x1] %v7032_v2  ;;  %415 = vst [vmem:[#allocation2 + $0xcc] sm:$0xf] %v7032_v2  ;;  %6354 = vmatpush3.bf16.msra.mxu0 %v6899_v1  ;;  %6881 = vmatpush3.bf16.msra.mxu1 %v6899_v1  ;;  %v6903_v6 = vld [vmem:[%s8899_s3 + $0x10] sm:$0xff]   ;;  %v6904_v7 = vld [vmem:[%s8899_s3 + $0x58] sm:$0xff]  }
  0x10   : > { %416 = vst [vmem:[#allocation2 + $0xd0] sm:$0xf] %v7032_v2  ;;  %417 = vst [vmem:[#allocation2 + $0xd4] sm:$0x1] %v7032_v2  ;;  %6355 = vmatprep.subr.bf16.mxu0 %v6900_v3  ;;  %6874 = vmatprep.subr.bf16.mxu1 %v6900_v3  ;;  %s8943_s19 = smov (!%p222_p3, %s5771_s19), 1  ;;  %v6905_v8 = vld [vmem:[%s8899_s3 + $0x18] sm:$0xff]  }
  0x11   : > { %v6906_v9 = vld [vmem:[%s8899_s3 + $0x60] sm:$0xff]   ;;  %s6113_s13 = sshll.u32 %s8943_s19, 7  ;;  %v6908_v11 = vld [vmem:[%s8899_s3 + $0x68] sm:$0xff]   ;;  %vm1244_vm1 = vsmask.f32 3328  ;;  %v6910_v25 = vld [vmem:[%s8899_s3 + $0x70] sm:$0xff]  }
  0x12   : > { %v6907_v10 = vld [vmem:[%s8899_s3 + $0x20] sm:$0xff]   ;;  %s7116_s22 = scalar_lea.vmem %s8896_s0, %s6113_s13  ;;  %vm1245_vm2 = vsmask.f32 7440  ;;  %v6909_v17 = vld [vmem:[%s8899_s3 + $0x28] sm:$0xff]   ;;  %v6911_v30 = vld [vmem:[%s8899_s3 + $0x30] sm:$0xff]   ;;  %vm938_vm9 = vcmask 1043456   ;;  %s8832_s11 = scalar_lea.vmem %s8900_s4, %s6113_s13 }
  0x13   : > { %6356 = vmatpush3.bf16.msra.mxu0 %v6901_v4  ;;  %6882 = vmatpush3.bf16.msra.mxu1 %v6901_v4  ;;  %v6180_v23 = vld [vmem:[%s7116_s22] sm:$0xff]   ;;  %v6333_v24 = vld [vmem:[%s7116_s22 + $0x58] sm:$0xff]   ;;  %vm7136_vm3 = vmor %vm1244_vm1, %vm1245_vm2  ;;  %vm420_vm4 = vsmask.f32 256  ;;  %vm470_vm6 = vsmask.f32 7938 }
  0x14   : > { %6357 = vmatprep.subr.bf16.mxu0 %v6902_v5  ;;  %6875 = vmatprep.subr.bf16.mxu1 %v6902_v5  ;;  %v6181_v28 = vunpack.c.l.bf16 %v6180_v23  ;;  %v7129_v29 = vld [vmem:[%s8897_s1] ss:$0 sm:$0xff]  ;;  %v6182_v33 = vunpack.c.h.bf16 %v6180_v23  ;;  %v422_v35 = vld [vmem:[#allocation2 + $0xc] sm:$0x1]  ;;  %v6225_v36 = vunpack.c.l.bf16 %v6333_v24  ;;  %v6912_v37 = vld [vmem:[%s8899_s3 + $0x78] sm:$0xff]   ;;  %v6226_v47 = vunpack.c.h.bf16 %v6333_v24  ;;  %s5780_s13 = sshll.u32 %s8943_s19, 1 }
  0x15   : > { %v1196_v12 = vld [vmem:[#allocation2] sm:$0xf]  ;;  %v1197_v13 = vld [vmem:[#allocation2 + $0x4] sm:$0xf]  ;;  %vm7151_vm5 = vmand %vm419_vm0, %vm420_vm4  ;;  %vm616_vm8 = vsmask.f32 4368  ;;  %s235_s15 = scalar_lea.vmem %s8901_s5, %s5780_s13 }
  0x16   : > { %v1198_v14 = vld [vmem:[#allocation2 + $0x8] sm:$0x1]  ;;  %v1248_v15 = vshrl.u32 %v1196_v12, 16  ;;  %v1251_v16 = vshll.u32 %v1196_v12, 16  ;;  %v1257_v18 = vshll.u32 %v1197_v13, 16  ;;  %v1261_v19 = vshrl.u32 %v1197_v13, 16  ;;  %vm7160_vm7 = vmand %vm419_vm0, %vm470_vm6 }
  0x17   : > { %6358 = vmatpush3.bf16.msra.mxu0 %v6903_v6  ;;  %6883 = vmatpush3.bf16.msra.mxu1 %v6903_v6  ;;  %v1267_v20 = vshll.u32 %v1198_v14, 16  ;;  %v7143_v34 = vld [vmem:[%s8898_s2] ss:$0 sm:$0xff]  ;;  %v308_v40 = vmul.f32 %v6181_v28, %v7129_v29  ;;  %v472_v42 = vld [vmem:[#allocation2 + $0x14] sm:$0x1]  ;;  %v309_v44 = vmul.f32 %v6182_v33, %v7129_v29  ;;  %v423_v45 = vsel %vm7151_vm5, 0, %v422_v35  ;;  %vm7195_vm10 = vmand %vm938_vm9, %vm470_vm6 }
  0x18   : > { %6359 = vmatprep.subr.bf16.mxu0 %v6904_v7  ;;  %6876 = vmatprep.subr.bf16.mxu1 %v6904_v7  ;;  %v1250_v21 = vrot.slane %v1248_v15, 4  ;;  %v1253_v22 = vrot.slane %v1251_v16, 5  ;;  %v1259_v26 = vrot.slane %v1257_v18, 5  ;;  %v1263_v27 = vrot.slane %v1261_v19, 4  ;;  %v455_v48 = vld [vmem:[#allocation2 + $0x90] sm:$0x1]  ;;  %vm7202_vm11 = vmor %vm420_vm4, %vm616_vm8 }
  0x19   : > { %v1269_v39 = vrot.slane %v1267_v20, 5  ;;  %v505_v49 = vld [vmem:[#allocation2 + $0x98] sm:$0x1]  ;;  %v347_v51 = vadd.f32 %v7143_v34, %v308_v40  ;;  %424 = vst [vmem:[#allocation2 + $0xc] sm:$0x1] %v423_v45  ;;  %v473_v52 = vsel %vm7160_vm7, 0, %v472_v42  ;;  %v330_v53 = vmul.f32 %v6225_v36, %v7129_v29 }
  0x1a   : > { %v1254_v32 = vor.u32 %v1253_v22, %v1250_v21  ;;  %v1264_v38 = vor.u32 %v1263_v27, %v1259_v26  ;;  %v348_v55 = vadd.f32 %v7143_v34, %v309_v44  ;;  %474 = vst [vmem:[#allocation2 + $0x14] sm:$0x1] %v473_v52  ;;  %v331_v56 = vmul.f32 %v6226_v47, %v7129_v29  ;;  %v6913_v58 = vld [vmem:[%s8899_s3 + $0x38] sm:$0xff]   ;;  %v6915_v2 = vld [vmem:[%s8899_s3 + $0xc0] sm:$0xff]   ;;  %v6323_v12 = vld [vmem:[%s7116_s22 + $0x8] sm:$0xff]  }
  0x1b   : > { %6360 = vmatpush3.bf16.msra.mxu0 %v6905_v8  ;;  %6884 = vmatpush3.bf16.msra.mxu1 %v6905_v8  ;;  %v456_v57 = vsel %vm7151_vm5, 0, %v455_v48  ;;  %v379_v60 = vmax.f32 %v347_v51, 0.0  ;;  %v369_v61 = vadd.f32 %v7143_v34, %v330_v53  ;;  %v506_v62 = vsel %vm7160_vm7, 0, %v505_v49  ;;  %v6916_v5 = vld [vmem:[%s8899_s3 + $0x140] sm:$0xff]   ;;  %v458_v47 = vld [vmem:[#allocation2 + $0x9c] sm:$0x1] }
  0x1c   : > { %6361 = vmatprep.subr.bf16.mxu0 %v6906_v9  ;;  %6877 = vmatprep.subr.bf16.mxu1 %v6906_v9  ;;  %v1255_v43 = vrot.slane %v1254_v32, 4  ;;  %v1265_v50 = vrot.slane %v1264_v38, 4  ;;  %457 = vst [vmem:[#allocation2 + $0x90] sm:$0x1] %v456_v57  ;;  %v380_v0 = vmax.f32 %v348_v55, 0.0  ;;  %v370_v1 = vadd.f32 %v7143_v34, %v331_v56  ;;  %v6914_v8 = vld [vmem:[#allocation2] sm:$0xff]  }
  0x1d   : > { %507 = vst [vmem:[#allocation2 + $0x98] sm:$0x1] %v506_v62  ;;  %v6115_v3 = vpack.c.bf16 %v379_v60, %v379_v60  ;;  %v401_v4 = vmax.f32 %v369_v61, 0.0  ;;  %v6920_v16 = vld [vmem:[%s8899_s3 + $0x100] sm:$0xff]   ;;  %v6186_v22 = vunpack.c.h.bf16 %v6323_v12  ;;  %vm1807_vm12 = vcmask 1042432  }
  0x1e   : > { %v1260_v54 = vsel %vm7136_vm3, %v1255_v43, %v1259_v26  ;;  %v1270_v59 = vsel %vm7136_vm3, %v1265_v50, %v1269_v39  ;;  %v6116_v6 = vpack.c.bf16 %v380_v0, %v380_v0  ;;  %v402_v7 = vmax.f32 %v370_v1, 0.0  ;;  %v475_v45 = vld [vmem:[#allocation2 + $0x20] sm:$0x1]  ;;  %v508_v53 = vld [vmem:[#allocation2 + $0xa4] sm:$0x1] }
  0x1f   : > { %6362 = vmatpush3.bf16.msra.mxu0 %v6907_v10  ;;  %6885 = vmatpush3.bf16.msra.mxu1 %v6907_v10  ;;  %v5831_v63 = vcombine.low %v1260_v54, %v1270_v59  ;;  %v619_v9 = vshrl.u32 %v6115_v3, 16  ;;  %v622_v10 = vshll.u32 %v6115_v3, 16  ;;  %v311_v39 = vmul.f32 %v6186_v22, %v7129_v29  ;;  %v6334_v52 = vld [vmem:[%s7116_s22 + $0x60] sm:$0xff]   ;;  %v6930_v3 = vld [vmem:[%s8899_s3 + $0x108] sm:$0xff]  }
  0x20   : > { %6363 = vmatprep.subr.bf16.mxu0 %v6908_v11  ;;  %6878 = vmatprep.subr.bf16.mxu1 %v6908_v11  ;;  %v6137_v11 = vpack.c.bf16 %v401_v4, %v401_v4  ;;  %v627_v13 = vshrl.u32 %v6116_v6, 16  ;;  %v630_v14 = vshll.u32 %v6116_v6, 16  ;;  %v6138_v15 = vpack.c.bf16 %v402_v7, %v402_v7  ;;  %v940_v19 = vld [vmem:[#allocation2 + $0xc] sm:$0xf] }
  0x21   : > { %4643 = vmatprep.mubr.bf16.mxu0 %v5831_v63  ;;  %v621_v18 = vrot.slane %v619_v9, 7  ;;  %v350_v51 = vadd.f32 %v7143_v34, %v311_v39  ;;  %v476_v1 = vsel %vm7160_vm7, 0, %v475_v45  ;;  %v6230_v6 = vunpack.c.h.bf16 %v6334_v52 }
  0x22   : > { %v806_v20 = vshrl.u32 %v6137_v11, 16  ;;  %v809_v21 = vshll.u32 %v6137_v11, 16  ;;  %v629_v23 = vrot.slane %v627_v13, 7  ;;  %v814_v26 = vshrl.u32 %v6138_v15, 16  ;;  %477 = vst [vmem:[#allocation2 + $0x20] sm:$0x1] %v476_v1 }
  0x23   : > { %6364 = vmatpush3.bf16.msra.mxu0 %v6909_v17  ;;  %6886 = vmatpush3.bf16.msra.mxu1 %v6909_v17  ;;  %v6185_v17 = vunpack.c.l.bf16 %v6323_v12  ;;  %v817_v27 = vshll.u32 %v6138_v15, 16  ;;  %v624_v33 = vor.u32 %v622_v10, %v621_v18  ;;  %v625_v35 = vrot.slane %v621_v18, 4  ;;  %v7239_v13 = vld [vmem:[%s7116_s22 + $0x68] sm:$0xff]  }
  0x24   : > { %6365 = vmatprep.subr.bf16.mxu0 %v6910_v25  ;;  %6879 = vmatprep.subr.bf16.mxu1 %v6910_v25  ;;  %v944_v25 = vld [vmem:[#allocation2 + $0x14] sm:$0x1]  ;;  %v808_v36 = vrot.slane %v806_v20, 7  ;;  %v1021_v38 = vld [vmem:[#allocation2 + $0x98] sm:$0x1]  ;;  %v632_v40 = vor.u32 %v630_v14, %v629_v23  ;;  %v634_v42 = vrot.slane %v629_v23, 4  ;;  %v333_v18 = vmul.f32 %v6230_v6, %v7129_v29 }
  0x25   : > { %v310_v28 = vmul.f32 %v6185_v17, %v7129_v29  ;;  %v816_v43 = vrot.slane %v814_v26, 7  ;;  %v941_v48 = vsel %vm7195_vm10, %v624_v33, %v940_v19  ;;  %v382_v61 = vmax.f32 %v350_v51, 0.0 }
  0x26   : > { %v811_v49 = vor.u32 %v809_v21, %v808_v36  ;;  %v812_v50 = vrot.slane %v808_v36, 4  ;;  %v633_v54 = vsel %vm7202_vm11, %v625_v35, %v632_v40  ;;  %942 = vst [vmem:[#allocation2 + $0xc] sm:$0xf] %v941_v48  ;;  %v945_v55 = vsel %vm7151_vm5, %v634_v42, %v944_v25 }
  0x27   : > { %6366 = vmatpush3.bf16.msra.mxu0 %v6911_v30  ;;  %6887 = vmatpush3.bf16.msra.mxu1 %v6911_v30  ;;  %v425_v30 = vld [vmem:[#allocation2 + $0x18] sm:$0x1]  ;;  %v349_v44 = vadd.f32 %v7143_v34, %v310_v28  ;;  %v819_v56 = vor.u32 %v817_v27, %v816_v43  ;;  %v821_v57 = vrot.slane %v816_v43, 4  ;;  %943 = vst [vmem:[#allocation2 + $0x10] sm:$0xf] %v633_v54  ;;  %v459_v7 = vsel %vm7151_vm5, 0, %v458_v47 }
  0x28   : > { %6367 = vmatprep.subr.bf16.mxu0 %v6912_v37  ;;  %6880 = vmatprep.subr.bf16.mxu1 %v6912_v37  ;;  %v1017_v37 = vld [vmem:[#allocation2 + $0x90] sm:$0xf]  ;;  %946 = vst [vmem:[#allocation2 + $0x14] sm:$0x1] %v945_v55  ;;  %v426_v62 = vsel %vm7151_vm5, 0, %v425_v30  ;;  %v509_v10 = vsel %vm7160_vm7, 0, %v508_v53  ;;  %v6233_v26 = vunpack.c.l.bf16 %v7239_v13  ;;  %v6234_v27 = vunpack.c.h.bf16 %v7239_v13 }
  0x29   : > { %v1018_v59 = vsel %vm7195_vm10, %v811_v49, %v1017_v37  ;;  %v381_v60 = vmax.f32 %v349_v44, 0.0  ;;  %v820_v63 = vsel %vm7202_vm11, %v812_v50, %v819_v56  ;;  %v1022_v0 = vsel %vm7151_vm5, %v821_v57, %v1021_v38  ;;  %427 = vst [vmem:[#allocation2 + $0x18] sm:$0x1] %v426_v62  ;;  %460 = vst [vmem:[#allocation2 + $0x9c] sm:$0x1] %v459_v7 }
  0x2a   : > { %1019 = vst [vmem:[#allocation2 + $0x90] sm:$0xf] %v1018_v59  ;;  %1020 = vst [vmem:[#allocation2 + $0x94] sm:$0xf] %v820_v63  ;;  %v372_v36 = vadd.f32 %v7143_v34, %v333_v18  ;;  %vm1808_vm13 = vcmask 1046532  }
  0x2b   : > { %6368 = vmatpush3.bf16.msra.mxu0 %v6913_v58  ;;  %6888 = vmatpush3.bf16.msra.mxu1 %v6913_v58  ;;  %v6928_v58 = vld [vmem:[%s8899_s3 + $0x148] sm:$0xff]   ;;  %1023 = vst [vmem:[#allocation2 + $0x98] sm:$0x1] %v1022_v0  ;;  %v6117_v4 = vpack.c.bf16 %v381_v60, %v381_v60  ;;  %510 = vst [vmem:[#allocation2 + $0xa4] sm:$0x1] %v509_v10 }
  0x2c   : > { %6465 = vmatprep.subr.bf16.mxu1 %v6915_v2  ;;  %6577 = vmatprep.subr.bf16.mxu0 %v6916_v5  ;;  %v6229_v2 = vunpack.c.l.bf16 %v6334_v52  ;;  %v6118_v5 = vpack.c.bf16 %v382_v61, %v382_v61  ;;  %vm7471_vm14 = vmor %vm1807_vm12, %vm1808_vm13 }
  0x2d   : > { %v636_v14 = vshrl.u32 %v6117_v4, 16  ;;  %v639_v15 = vshll.u32 %v6117_v4, 16  ;;  %v1199_v22 = vld [vmem:[#allocation2 + $0xc] sm:$0xf] }
  0x2e   : > { %4644 = vmatmul.mubr.bf16.vlgmr.msra.gmra.mrb[0].mxu0 %v6914_v8  ;;  %v6324_v8 = vld [vmem:[%s7116_s22 + $0x10] sm:$0xff]   ;;  %v332_v9 = vmul.f32 %v6229_v2, %v7129_v29  ;;  %v647_v17 = vshll.u32 %v6118_v5, 16  ;;  %v1272_v33 = vshrl.u32 %v1199_v22, 16  ;;  %v1275_v35 = vshll.u32 %v1199_v22, 16 }
  0x2f   : > { %6578 = vmatpush3.bf16.msra.mxu0 %v6920_v16  ;;  %v6189_v11 = vunpack.c.l.bf16 %v6324_v8  ;;  %v6190_v12 = vunpack.c.h.bf16 %v6324_v8  ;;  %v644_v16 = vshrl.u32 %v6118_v5, 16  ;;  %v638_v23 = vrot.slane %v636_v14, 7  ;;  %v1200_v28 = vld [vmem:[#allocation2 + $0x10] sm:$0xf]  ;;  %v1201_v30 = vld [vmem:[#allocation2 + $0x14] sm:$0x1] }
  0x30   : > { %6579 = vmatprep.subr.bf16.mxu0 %v6928_v58  ;;  %v7243_v19 = vadd.f32 %v7143_v34, %v332_v9  ;;  %v1281_v38 = vshll.u32 %v1200_v28, 16  ;;  %v1285_v39 = vshrl.u32 %v1200_v28, 16  ;;  %v1291_v40 = vshll.u32 %v1201_v30, 16  ;;  %v951_v8 = vld [vmem:[#allocation2 + $0x20] sm:$0x1] }
  0x31   : > { %v312_v20 = vmul.f32 %v6189_v11, %v7129_v29  ;;  %v313_v21 = vmul.f32 %v6190_v12, %v7129_v29  ;;  %v646_v25 = vrot.slane %v644_v16, 7  ;;  %v1232_v42 = vld [vmem:[#allocation2 + $0x90] sm:$0xf]  ;;  %v641_v43 = vor.u32 %v639_v15, %v638_v23  ;;  %v1233_v47 = vld [vmem:[#allocation2 + $0x94] sm:$0xf]  ;;  %v6919_v30 = vld [vmem:[%s8899_s3 + $0x80] sm:$0xff]  }
  0x32   : > { %v1274_v44 = vrot.slane %v1272_v33, 4  ;;  %v1277_v45 = vrot.slane %v1275_v35, 5  ;;  %v1234_v48 = vld [vmem:[#allocation2 + $0x98] sm:$0x1]  ;;  %v1283_v51 = vrot.slane %v1281_v38, 5  ;;  %v1287_v52 = vrot.slane %v1285_v39, 4 }
  0x33   : > { %6580 = vmatpush3.bf16.msra.mxu0 %v6930_v3  ;;  %v7251_v37 = vadd.f32 %v7143_v34, %v312_v20  ;;  %v649_v49 = vor.u32 %v647_v17, %v646_v25  ;;  %v7254_v50 = vadd.f32 %v7143_v34, %v313_v21  ;;  %v1293_v53 = vrot.slane %v1291_v40, 5  ;;  %v947_v3 = vld [vmem:[#allocation2 + $0x18] sm:$0xf]  ;;  %v6917_v12 = vld [vmem:[#allocation2 + $0xc] sm:$0xff]   ;;  %v428_v15 = vld [vmem:[#allocation2 + $0x24] sm:$0x1] }
  0x34   : > { %v1536_v54 = vshrl.u32 %v1232_v42, 16  ;;  %v1278_v55 = vor.u32 %v1277_v45, %v1274_v44  ;;  %v1539_v56 = vshll.u32 %v1232_v42, 16  ;;  %v1545_v57 = vshll.u32 %v1233_v47, 16  ;;  %v478_v16 = vld [vmem:[#allocation2 + $0x2c] sm:$0x1] }
  0x35   : > { %v1549_v58 = vshrl.u32 %v1233_v47, 16  ;;  %v1288_v59 = vor.u32 %v1287_v52, %v1283_v51  ;;  %v1555_v61 = vshll.u32 %v1234_v48, 16  ;;  %v642_v62 = vrot.slane %v638_v23, 4  ;;  %v7283_v48 = vld [vmem:[%s7116_s22 + $0x18] sm:$0xff]  }
  0x36   : > { %v1538_v60 = vrot.slane %v1536_v54, 4  ;;  %v1279_v63 = vrot.slane %v1278_v55, 4  ;;  %v1541_v0 = vrot.slane %v1539_v56, 5  ;;  %v1547_v1 = vrot.slane %v1545_v57, 5 }
  0x37   : > { %v1551_v2 = vrot.slane %v1549_v58, 4  ;;  %v1289_v4 = vrot.slane %v1288_v59, 4  ;;  %v1557_v5 = vrot.slane %v1555_v61, 5  ;;  %v650_v6 = vsel %vm7202_vm11, %v642_v62, %v649_v49  ;;  %v6921_v49 = vld [vmem:[%s8899_s3 + $0xc8] sm:$0xff]  }
  0x38   : > { %v651_v7 = vrot.slane %v646_v25, 4  ;;  %v1284_v9 = vsel %vm7136_vm3, %v1279_v63, %v1283_v51  ;;  %v1542_v10 = vor.u32 %v1541_v0, %v1538_v60  ;;  %v948_v14 = vsel %vm7195_vm10, %v641_v43, %v947_v3  ;;  %950 = vst [vmem:[#allocation2 + $0x1c] sm:$0xf] %v650_v6  ;;  %v1024_v51 = vld [vmem:[#allocation2 + $0x9c] sm:$0xf] }
  0x39   : > { %v1552_v11 = vor.u32 %v1551_v2, %v1547_v1  ;;  %v1294_v17 = vsel %vm7136_vm3, %v1289_v4, %v1293_v53  ;;  %949 = vst [vmem:[#allocation2 + $0x18] sm:$0xf] %v948_v14  ;;  %v403_v20 = vmax.f32 %v7243_v19, 0.0  ;;  %v404_v21 = vmax.f32 %v372_v36, 0.0 }
  0x3a   : > { %v952_v18 = vsel %vm7151_vm5, %v651_v7, %v951_v8  ;;  %v5832_v22 = vcombine.low %v1284_v9, %v1294_v17  ;;  %v1543_v23 = vrot.slane %v1542_v10, 4  ;;  %v383_v28 = vmax.f32 %v7251_v37, 0.0  ;;  %v6918_v37 = vld [vmem:[#allocation2 + $0x90] sm:$0xff]   ;;  %v1028_v8 = vld [vmem:[#allocation2 + $0xa4] sm:$0x1] }
  0x3b   : > { %v1553_v25 = vrot.slane %v1552_v11, 4  ;;  %953 = vst [vmem:[#allocation2 + $0x20] sm:$0x1] %v952_v18  ;;  %v6139_v33 = vpack.c.bf16 %v403_v20, %v403_v20  ;;  %v6140_v35 = vpack.c.bf16 %v404_v21, %v404_v21  ;;  %v384_v38 = vmax.f32 %v7254_v50, 0.0  ;;  %v6923_v9 = vld [vmem:[%s8899_s3 + $0xd0] sm:$0xff]   ;;  %v6927_v21 = vld [vmem:[%s8899_s3 + $0xd8] sm:$0xff]  }
  0x3c   : > { %v429_v39 = vsel %vm7151_vm5, 0, %v428_v15  ;;  %4651 = vmatprep.mubr.bf16.mxu0 %v5832_v22  ;;  %v1548_v19 = vsel %vm7136_vm3, %v1543_v23, %v1547_v1  ;;  %v479_v40 = vsel %vm7160_vm7, 0, %v478_v16  ;;  %v7280_v42 = vpack.c.bf16 %v383_v28, %v383_v28  ;;  %v6922_v1 = vld [vmem:[%s8899_s3 + $0x88] sm:$0xff]   ;;  %v6926_v15 = vld [vmem:[%s8899_s3 + $0x90] sm:$0xff]  }
  0x3d   : > { %v1558_v36 = vsel %vm7136_vm3, %v1553_v25, %v1557_v5  ;;  %430 = vst [vmem:[#allocation2 + $0x24] sm:$0x1] %v429_v39  ;;  %4652 = vmatmul.mubr.bf16.gmra.mrb[4].mxu0 %v6917_v12  ;;  %v823_v44 = vshrl.u32 %v6139_v33, 16  ;;  %v826_v45 = vshll.u32 %v6139_v33, 16  ;;  %v831_v47 = vshrl.u32 %v6140_v35, 16  ;;  %v6938_v16 = vld [vmem:[%s8899_s3 + $0x150] sm:$0xff]  }
  0x3e   : > { %v5843_v43 = vcombine.low %v1548_v19, %v1558_v36  ;;  %480 = vst [vmem:[#allocation2 + $0x2c] sm:$0x1] %v479_v40  ;;  %v834_v50 = vshll.u32 %v6140_v35, 16  ;;  %v7288_v52 = vpack.c.bf16 %v384_v38, %v384_v38  ;;  %v653_v53 = vshrl.u32 %v7280_v42, 16  ;;  %v461_v23 = vld [vmem:[#allocation2 + $0xa8] sm:$0x1]  ;;  %6581 = vmatprep.subr.bf16.mxu0 %v6938_v16 }
  0x3f   : > { %v656_v54 = vshll.u32 %v7280_v42, 16  ;;  %v1203_v55 = vld [vmem:[#allocation2 + $0x1c] sm:$0xf]  ;;  %v825_v56 = vrot.slane %v823_v44, 7  ;;  %v833_v57 = vrot.slane %v831_v47, 7  ;;  %v334_v58 = vmul.f32 %v6233_v26, %v7129_v29 }
  0x40   : > { %4739 = vmatprep.mubr.bf16.mxu1 %v5843_v43  ;;  %v335_v59 = vmul.f32 %v6234_v27, %v7129_v29  ;;  %v1202_v60 = vld [vmem:[#allocation2 + $0x18] sm:$0xf]  ;;  %v1305_v61 = vshll.u32 %v1203_v55, 16  ;;  %v1309_v62 = vshrl.u32 %v1203_v55, 16  ;;  %v6193_v63 = vunpack.c.l.bf16 %v7283_v48  ;;  %v511_v25 = vld [vmem:[#allocation2 + $0xb0] sm:$0x1] }
  0x41   : > { %4740 = vmatmul.mubr.bf16.vlgmr.msra.gmra.mrb[0].mxu1 %v6918_v37  ;;  %v6194_v0 = vunpack.c.h.bf16 %v7283_v48  ;;  %v1296_v3 = vshrl.u32 %v1202_v60, 16  ;;  %v1299_v26 = vshll.u32 %v1202_v60, 16  ;;  %v828_v4 = vor.u32 %v826_v45, %v825_v56  ;;  %v431_v42 = vld [vmem:[#allocation2 + $0x30] sm:$0x1]  ;;  %v6924_v44 = vld [vmem:[#allocation2 + $0x18] sm:$0xff]   ;;  %v6931_v55 = vld [vmem:[%s8899_s3 + $0xe0] sm:$0xff]  }
  0x42   : > { %6466 = vmatpush3.bf16.msra.mxu1 %v6919_v30  ;;  %v1204_v2 = vld [vmem:[#allocation2 + $0x20] sm:$0x1]  ;;  %v829_v5 = vrot.slane %v825_v56, 4  ;;  %v1307_v13 = vrot.slane %v1305_v61, 5  ;;  %v1311_v27 = vrot.slane %v1309_v62, 4  ;;  %v836_v7 = vor.u32 %v834_v50, %v833_v57  ;;  %v6929_v45 = vld [vmem:[%s8899_s3 + $0x98] sm:$0xff]  }
  0x43   : > { %6467 = vmatprep.subr.bf16.mxu1 %v6921_v49  ;;  %v1315_v6 = vshll.u32 %v1204_v2, 16  ;;  %v1298_v10 = vrot.slane %v1296_v3, 4  ;;  %v1301_v11 = vrot.slane %v1299_v26, 5  ;;  %v838_v12 = vrot.slane %v833_v57, 4  ;;  %v7340_v56 = vld [vmem:[%s7116_s22 + $0x70] sm:$0xff]  }
  0x44   : > { %v1025_v14 = vsel %vm7195_vm10, %v828_v4, %v1024_v51  ;;  %v1312_v17 = vor.u32 %v1311_v27, %v1307_v13  ;;  %v837_v20 = vsel %vm7202_vm11, %v829_v5, %v836_v7  ;;  %v655_v22 = vrot.slane %v653_v53, 7  ;;  %v954_v38 = vld [vmem:[#allocation2 + $0x24] sm:$0xf]  ;;  %v6942_v3 = vld [vmem:[%s8899_s3 + $0x110] sm:$0xff]  }
  0x45   : > { %v1317_v18 = vrot.slane %v1315_v6, 5  ;;  %1026 = vst [vmem:[#allocation2 + $0x9c] sm:$0xf] %v1025_v14  ;;  %v1302_v28 = vor.u32 %v1301_v11, %v1298_v10  ;;  %1027 = vst [vmem:[#allocation2 + $0xa0] sm:$0xf] %v837_v20  ;;  %v1029_v30 = vsel %vm7151_vm5, %v838_v12, %v1028_v8  ;;  %v661_v33 = vshrl.u32 %v7288_v52, 16  ;;  %6582 = vmatpush3.bf16.msra.mxu0 %v6942_v3 }
  0x46   : > { %6468 = vmatpush3.bf16.msra.mxu1 %v6922_v1  ;;  %v664_v35 = vshll.u32 %v7288_v52, 16  ;;  %v1313_v39 = vrot.slane %v1312_v17, 4  ;;  %1030 = vst [vmem:[#allocation2 + $0xa4] sm:$0x1] %v1029_v30  ;;  %v658_v19 = vor.u32 %v656_v54, %v655_v22  ;;  %v659_v36 = vrot.slane %v655_v22, 4  ;;  %v6935_v14 = vld [vmem:[%s8899_s3 + $0xe8] sm:$0xff]  }
  0x47   : > { %6469 = vmatprep.subr.bf16.mxu1 %v6923_v9  ;;  %v958_v37 = vld [vmem:[#allocation2 + $0x2c] sm:$0x1]  ;;  %v373_v40 = vadd.f32 %v7143_v34, %v334_v58  ;;  %v1303_v43 = vrot.slane %v1302_v28, 4  ;;  %v663_v47 = vrot.slane %v661_v33, 7  ;;  %v374_v49 = vadd.f32 %v7143_v34, %v335_v59 }
  0x48   : > { %v462_v50 = vsel %vm7151_vm5, 0, %v461_v23  ;;  %v1318_v51 = vsel %vm7136_vm3, %v1313_v39, %v1317_v18  ;;  %v955_v52 = vsel %vm7195_vm10, %v658_v19, %v954_v38  ;;  %v512_v54 = vsel %vm7160_vm7, 0, %v511_v25  ;;  %v6936_v28 = vld [vmem:[%s8899_s3 + $0xa8] sm:$0xff]  }
  0x49   : > { %v405_v53 = vmax.f32 %v373_v40, 0.0  ;;  %463 = vst [vmem:[#allocation2 + $0xa8] sm:$0x1] %v462_v50  ;;  %v1308_v57 = vsel %vm7136_vm3, %v1303_v43, %v1307_v13  ;;  %v666_v58 = vor.u32 %v664_v35, %v663_v47  ;;  %v668_v59 = vrot.slane %v663_v47, 4  ;;  %956 = vst [vmem:[#allocation2 + $0x24] sm:$0xf] %v955_v52 }
  0x4a   : > { %6470 = vmatpush3.bf16.msra.mxu1 %v6926_v15  ;;  %v406_v60 = vmax.f32 %v374_v49, 0.0  ;;  %513 = vst [vmem:[#allocation2 + $0xb0] sm:$0x1] %v512_v54  ;;  %v5833_v61 = vcombine.low %v1308_v57, %v1318_v51  ;;  %v314_v1 = vmul.f32 %v6193_v63, %v7129_v29  ;;  %v315_v2 = vmul.f32 %v6194_v0, %v7129_v29  ;;  %v6934_v63 = vld [vmem:[%s8899_s3 + $0xa0] sm:$0xff]  }
  0x4b   : > { %6471 = vmatprep.subr.bf16.mxu1 %v6927_v21  ;;  %v6141_v62 = vpack.c.bf16 %v405_v53, %v405_v53  ;;  %v667_v4 = vsel %vm7202_vm11, %v659_v36, %v666_v58  ;;  %v959_v5 = vsel %vm7151_vm5, %v668_v59, %v958_v37  ;;  %v432_v48 = vsel %vm7151_vm5, 0, %v431_v42  ;;  %v6937_v36 = vld [vmem:[%s8899_s3 + $0xf0] sm:$0xff]  }
  0x4c   : > { %v1235_v26 = vld [vmem:[#allocation2 + $0x9c] sm:$0xf]  ;;  %v7357_v13 = vpack.c.bf16 %v406_v60, %v406_v60  ;;  %4659 = vmatprep.mubr.bf16.mxu0 %v5833_v61  ;;  %v1236_v0 = vld [vmem:[#allocation2 + $0xa0] sm:$0xf]  ;;  %957 = vst [vmem:[#allocation2 + $0x28] sm:$0xf] %v667_v4  ;;  %v7365_v7 = vadd.f32 %v7143_v34, %v314_v1  ;;  %v7368_v8 = vadd.f32 %v7143_v34, %v315_v2  ;;  %v6237_v15 = vunpack.c.l.bf16 %v7340_v56 }
  0x4d   : > { %v1560_v27 = vshrl.u32 %v1235_v26, 16  ;;  %v1563_v6 = vshll.u32 %v1235_v26, 16  ;;  %960 = vst [vmem:[#allocation2 + $0x2c] sm:$0x1] %v959_v5  ;;  %433 = vst [vmem:[#allocation2 + $0x30] sm:$0x1] %v432_v48  ;;  %4660 = vmatmul.mubr.bf16.gmra.mrb[8].mxu0 %v6924_v44  ;;  %v6238_v19 = vunpack.c.h.bf16 %v7340_v56 }
  0x4e   : > { %v1237_v9 = vld [vmem:[#allocation2 + $0xa4] sm:$0x1]  ;;  %v1569_v10 = vshll.u32 %v1236_v0, 16  ;;  %v1573_v11 = vshrl.u32 %v1236_v0, 16  ;;  %6472 = vmatpush3.bf16.msra.mxu1 %v6929_v45  ;;  %v840_v12 = vshrl.u32 %v6141_v62, 16  ;;  %v843_v20 = vshll.u32 %v6141_v62, 16 }
  0x4f   : > { %v1562_v16 = vrot.slane %v1560_v27, 4  ;;  %v1565_v17 = vrot.slane %v1563_v6, 5  ;;  %v1579_v18 = vshll.u32 %v1237_v9, 16  ;;  %6473 = vmatprep.subr.bf16.mxu1 %v6931_v55  ;;  %v848_v25 = vshrl.u32 %v7357_v13, 16  ;;  %v481_v56 = vld [vmem:[#allocation2 + $0x38] sm:$0x1] }
  0x50   : > { %v1571_v21 = vrot.slane %v1569_v10, 5  ;;  %v1575_v22 = vrot.slane %v1573_v11, 4  ;;  %v842_v23 = vrot.slane %v840_v12, 7  ;;  %v1205_v35 = vld [vmem:[#allocation2 + $0x24] sm:$0xf]  ;;  %v851_v38 = vshll.u32 %v7357_v13, 16 }
  0x51   : > { %v1566_v30 = vor.u32 %v1565_v17, %v1562_v16  ;;  %v1581_v33 = vrot.slane %v1579_v18, 5  ;;  %v1031_v39 = vld [vmem:[#allocation2 + $0xa8] sm:$0xf]  ;;  %v1320_v40 = vshrl.u32 %v1205_v35, 16  ;;  %v1323_v42 = vshll.u32 %v1205_v35, 16  ;;  %v6925_v1 = vld [vmem:[#allocation2 + $0x9c] sm:$0xff]  }
  0x52   : > { %v1576_v37 = vor.u32 %v1575_v22, %v1571_v21  ;;  %v845_v43 = vor.u32 %v843_v20, %v842_v23  ;;  %6474 = vmatpush3.bf16.msra.mxu1 %v6934_v63  ;;  %v846_v45 = vrot.slane %v842_v23, 4  ;;  %v850_v47 = vrot.slane %v848_v25, 7  ;;  %v1035_v49 = vld [vmem:[#allocation2 + $0xb0] sm:$0x1]  ;;  %v464_v4 = vld [vmem:[#allocation2 + $0xb4] sm:$0x1] }
  0x53   : > { %v1567_v44 = vrot.slane %v1566_v30, 4  ;;  %6475 = vmatprep.subr.bf16.mxu1 %v6935_v14  ;;  %v385_v50 = vmax.f32 %v7365_v7, 0.0  ;;  %v1206_v52 = vld [vmem:[#allocation2 + $0x28] sm:$0xf]  ;;  %v1322_v54 = vrot.slane %v1320_v40, 4  ;;  %v336_v57 = vmul.f32 %v6237_v15, %v7129_v29  ;;  %v6941_v0 = vld [vmem:[%s8899_s3 + $0xb0] sm:$0xff]  }
  0x54   : > { %v1577_v51 = vrot.slane %v1576_v37, 4  ;;  %v1207_v53 = vld [vmem:[#allocation2 + $0x2c] sm:$0x1]  ;;  %v1032_v55 = vsel %vm7195_vm10, %v845_v43, %v1031_v39  ;;  %v1325_v59 = vrot.slane %v1323_v42, 5  ;;  %v1329_v60 = vshll.u32 %v1206_v52, 16  ;;  %v6943_v10 = vld [vmem:[%s8899_s3 + $0xf8] sm:$0xff]  }
  0x55   : > { %v1572_v58 = vsel %vm7136_vm3, %v1567_v44, %v1571_v21  ;;  %v1333_v61 = vshrl.u32 %v1206_v52, 16  ;;  %1033 = vst [vmem:[#allocation2 + $0xa8] sm:$0xf] %v1032_v55  ;;  %v1339_v2 = vshll.u32 %v1207_v53, 16  ;;  %v853_v3 = vor.u32 %v851_v38, %v850_v47  ;;  %v7403_v11 = vld [vmem:[%s7116_s22 + $0x20] sm:$0xff]   ;;  %v6944_v21 = vld [vmem:[%s8899_s3 + $0xb8] sm:$0xff]  }
  0x56   : > { %v1582_v62 = vsel %vm7136_vm3, %v1577_v51, %v1581_v33  ;;  %v855_v26 = vrot.slane %v850_v47, 4  ;;  %6476 = vmatpush3.bf16.msra.mxu1 %v6936_v28  ;;  %v1326_v13 = vor.u32 %v1325_v59, %v1322_v54  ;;  %v1331_v63 = vrot.slane %v1329_v60, 5  ;;  %v6932_v25 = vld [vmem:[#allocation2 + $0x24] sm:$0xff]   ;;  %v6949_v33 = vld [vmem:[%s8899_s3 + $0x158] sm:$0xff]   ;;  %v961_v44 = vld [vmem:[#allocation2 + $0x30] sm:$0xf] }
  0x57   : > { %v5844_v5 = vcombine.low %v1572_v58, %v1582_v62  ;;  %v1335_v48 = vrot.slane %v1333_v61, 4  ;;  %6477 = vmatprep.subr.bf16.mxu1 %v6937_v36  ;;  %v1341_v27 = vrot.slane %v1339_v2, 5  ;;  %v854_v6 = vsel %vm7202_vm11, %v846_v45, %v853_v3  ;;  %v514_v45 = vld [vmem:[#allocation2 + $0xbc] sm:$0x1]  ;;  %6583 = vmatprep.subr.bf16.mxu0 %v6949_v33 }
  0x58   : > { %v1036_v7 = vsel %vm7151_vm5, %v855_v26, %v1035_v49  ;;  %v386_v9 = vmax.f32 %v7368_v8, 0.0  ;;  %v1327_v12 = vrot.slane %v1326_v13, 4  ;;  %1034 = vst [vmem:[#allocation2 + $0xac] sm:$0xf] %v854_v6  ;;  %v482_v15 = vsel %vm7160_vm7, 0, %v481_v56  ;;  %v6950_v47 = vld [vmem:[%s8899_s3 + $0x118] sm:$0xff]  }
  0x59   : > { %4747 = vmatprep.mubr.bf16.mxu1 %v5844_v5  ;;  %v1336_v14 = vor.u32 %v1335_v48, %v1331_v63  ;;  %1037 = vst [vmem:[#allocation2 + $0xb0] sm:$0x1] %v1036_v7  ;;  %v6121_v16 = vpack.c.bf16 %v385_v50, %v385_v50  ;;  %483 = vst [vmem:[#allocation2 + $0x38] sm:$0x1] %v482_v15  ;;  %v337_v8 = vmul.f32 %v6238_v19, %v7129_v29  ;;  %v6946_v29 = vld [vmem:[%s8899_s3 + $0x1c0] sm:$0xff]  }
  0x5a   : > { %4748 = vmatmul.mubr.bf16.gmra.mrb[4].mxu1 %v6925_v1  ;;  %v6122_v17 = vpack.c.bf16 %v386_v9, %v386_v9  ;;  %v375_v18 = vadd.f32 %v7143_v34, %v336_v57  ;;  %v465_v20 = vsel %vm7151_vm5, 0, %v464_v4  ;;  %v1332_v22 = vsel %vm7136_vm3, %v1327_v12, %v1331_v63  ;;  %6584 = vmatpush3.bf16.msra.mxu0 %v6950_v47  ;;  %v434_v4 = vld [vmem:[#allocation2 + $0x3c] sm:$0x1] }
  0x5b   : > { %v1337_v23 = vrot.slane %v1336_v14, 4  ;;  %v670_v28 = vshrl.u32 %v6121_v16, 16  ;;  %v673_v30 = vshll.u32 %v6121_v16, 16  ;;  %466 = vst [vmem:[#allocation2 + $0xb4] sm:$0x1] %v465_v20  ;;  %6478 = vmatpush3.bf16.msra.mxu1 %v6941_v0  ;;  %v376_v19 = vadd.f32 %v7143_v34, %v337_v8 }
  0x5c   : > { %v1238_v35 = vld [vmem:[#allocation2 + $0xa8] sm:$0xf]  ;;  %v678_v38 = vshrl.u32 %v6122_v17, 16  ;;  %v681_v39 = vshll.u32 %v6122_v17, 16  ;;  %6479 = vmatprep.subr.bf16.mxu1 %v6943_v10  ;;  %v6197_v36 = vunpack.c.l.bf16 %v7403_v11  ;;  %v407_v51 = vmax.f32 %v375_v18, 0.0 }
  0x5d   : > { %v1342_v37 = vsel %vm7136_vm3, %v1337_v23, %v1341_v27  ;;  %v1584_v40 = vshrl.u32 %v1238_v35, 16  ;;  %v1587_v42 = vshll.u32 %v1238_v35, 16  ;;  %v672_v43 = vrot.slane %v670_v28, 7  ;;  %v484_v0 = vld [vmem:[#allocation2 + $0x44] sm:$0x1] }
  0x5e   : > { %v5834_v49 = vcombine.low %v1332_v22, %v1342_v37  ;;  %v680_v50 = vrot.slane %v678_v38, 7  ;;  %v408_v34 = vmax.f32 %v376_v19, 0.0  ;;  %v6143_v59 = vpack.c.bf16 %v407_v51, %v407_v51  ;;  %v7436_v27 = vld [vmem:[#allocation2] sm:$0xe]  ;;  %v7445_v20 = vld [vmem:[%s8897_s1] ss:$0 sm:$0xff] }
  0x5f   : > { %v1586_v52 = vrot.slane %v1584_v40, 4  ;;  %v1589_v53 = vrot.slane %v1587_v42, 5  ;;  %v675_v54 = vor.u32 %v673_v30, %v672_v43  ;;  %v676_v55 = vrot.slane %v672_v43, 4  ;;  %6480 = vmatpush3.bf16.msra.mxu1 %v6944_v21  ;;  %v1239_v56 = vld [vmem:[#allocation2 + $0xac] sm:$0xf] }
  0x60   : > { %4667 = vmatprep.mubr.bf16.mxu0 %v5834_v49  ;;  %v1240_v57 = vld [vmem:[#allocation2 + $0xb0] sm:$0x1]  ;;  %v683_v58 = vor.u32 %v681_v39, %v680_v50  ;;  %v6144_v60 = vpack.c.bf16 %v408_v34, %v408_v34  ;;  %v6198_v61 = vunpack.c.h.bf16 %v7403_v11  ;;  %6689 = vmatprep.subr.bf16.mxu1 %v6946_v29  ;;  %v1593_v1 = vshll.u32 %v1239_v56, 16  ;;  %v965_v26 = vld [vmem:[#allocation2 + $0x38] sm:$0x1]  ;;  %v6954_v29 = vld [vmem:[%s8899_s3 + $0x160] sm:$0xff]  }
  0x61   : > { %v1590_v62 = vor.u32 %v1589_v53, %v1586_v52  ;;  %v1597_v2 = vshrl.u32 %v1239_v56, 16  ;;  %v1603_v3 = vshll.u32 %v1240_v57, 16  ;;  %4668 = vmatmul.mubr.bf16.gmra.mrb[12].mxu0 %v6932_v25  ;;  %v685_v13 = vrot.slane %v680_v50, 4  ;;  %v1712_v22 = vld [vmem:[#allocation2 + $0x4] sm:$0xf]  ;;  %6585 = vmatprep.subr.bf16.mxu0 %v6954_v29 }
  0x62   : > { %v684_v5 = vsel %vm7202_vm11, %v676_v55, %v683_v58  ;;  %v962_v63 = vsel %vm7195_vm10, %v675_v54, %v961_v44  ;;  %v515_v48 = vsel %vm7160_vm7, 0, %v514_v45  ;;  %v1595_v7 = vrot.slane %v1593_v1, 5  ;;  %v1038_v18 = vld [vmem:[#allocation2 + $0xb4] sm:$0xf]  ;;  %v7457_v35 = vld [vmem:[%s8898_s2] ss:$0 sm:$0xff] }
  0x63   : > { %v1591_v6 = vrot.slane %v1590_v62, 4  ;;  %v1599_v9 = vrot.slane %v1597_v2, 4  ;;  %v1605_v10 = vrot.slane %v1603_v3, 5  ;;  %963 = vst [vmem:[#allocation2 + $0x30] sm:$0xf] %v962_v63  ;;  %v966_v11 = vsel %vm7151_vm5, %v685_v13, %v965_v26  ;;  %v6933_v45 = vld [vmem:[#allocation2 + $0xa8] sm:$0xff]  }
  0x64   : > { %964 = vst [vmem:[#allocation2 + $0x34] sm:$0xf] %v684_v5  ;;  %516 = vst [vmem:[#allocation2 + $0xbc] sm:$0x1] %v515_v48  ;;  %v857_v12 = vshrl.u32 %v6143_v59, 16  ;;  %v860_v14 = vshll.u32 %v6143_v59, 16  ;;  %v316_v21 = vmul.f32 %v7445_v20, %v6197_v36  ;;  %v317_v28 = vmul.f32 %v7445_v20, %v6198_v61 }
  0x65   : > { %v865_v15 = vshrl.u32 %v6144_v60, 16  ;;  %v1596_v16 = vsel %vm7136_vm3, %v1591_v6, %v1595_v7  ;;  %v1600_v17 = vor.u32 %v1599_v9, %v1595_v7  ;;  %967 = vst [vmem:[#allocation2 + $0x38] sm:$0x1] %v966_v11  ;;  %v868_v8 = vshll.u32 %v6144_v60, 16  ;;  %v7464_v36 = vld [vmem:[%s7116_s22 + $0x28] sm:$0xff]   ;;  %v6957_v9 = vld [vmem:[%s8899_s3 + $0x120] sm:$0xff]  }
  0x66   : > { %v859_v23 = vrot.slane %v857_v12, 7  ;;  %v435_v30 = vsel %vm7151_vm5, 0, %v434_v4  ;;  %v355_v38 = vadd.f32 %v7457_v35, %v316_v21  ;;  %v485_v39 = vsel %vm7160_vm7, 0, %v484_v0  ;;  %v1713_v57 = vld [vmem:[#allocation2 + $0x8] sm:$0x1]  ;;  %6586 = vmatpush3.bf16.msra.mxu0 %v6957_v9 }
  0x67   : > { %v867_v25 = vrot.slane %v865_v15, 7  ;;  %v1601_v33 = vrot.slane %v1600_v17, 4  ;;  %436 = vst [vmem:[#allocation2 + $0x3c] sm:$0x1] %v435_v30  ;;  %v5847_v19 = vrot.slane %v7436_v27, 9  ;;  %v356_v47 = vadd.f32 %v7457_v35, %v317_v28  ;;  %v7490_v15 = vld [vmem:[%s7116_s22 + $0x30] sm:$0xff]  }
  0x68   : > { %v862_v37 = vor.u32 %v860_v14, %v859_v23  ;;  %v863_v40 = vrot.slane %v859_v23, 4  ;;  %486 = vst [vmem:[#allocation2 + $0x44] sm:$0x1] %v485_v39  ;;  %v387_v49 = vmax.f32 %v355_v38, 0.0  ;;  %v1812_v51 = vrot.slane %v1712_v22, 5 }
  0x69   : > { %v870_v42 = vor.u32 %v868_v8, %v867_v25  ;;  %v872_v43 = vrot.slane %v867_v25, 4  ;;  %v1606_v44 = vsel %vm7136_vm3, %v1601_v33, %v1605_v10  ;;  %v6201_v58 = vunpack.c.l.bf16 %v7464_v36 }
  0x6a   : > { %v5845_v34 = vcombine.low %v1596_v16, %v1606_v44  ;;  %v1208_v52 = vld [vmem:[#allocation2 + $0x30] sm:$0xf]  ;;  %v1039_v55 = vsel %vm7195_vm10, %v862_v37, %v1038_v18  ;;  %v388_v3 = vmax.f32 %v356_v47, 0.0  ;;  %v6123_v26 = vpack.c.bf16 %v387_v49, %v387_v49 }
  0x6b   : > { %v1209_v53 = vld [vmem:[#allocation2 + $0x34] sm:$0xf]  ;;  %v871_v54 = vsel %vm7202_vm11, %v863_v40, %v870_v42  ;;  %v1042_v56 = vld [vmem:[#allocation2 + $0xbc] sm:$0x1]  ;;  %v1344_v59 = vshrl.u32 %v1208_v52, 16  ;;  %v1347_v60 = vshll.u32 %v1208_v52, 16  ;;  %v7484_v4 = vsel %vm7471_vm14, %v5847_v19, %v1812_v51 }
  0x6c   : > { %v1353_v61 = vshll.u32 %v1209_v53, 16  ;;  %v1357_v62 = vshrl.u32 %v1209_v53, 16  ;;  %1040 = vst [vmem:[#allocation2 + $0xb4] sm:$0xf] %v1039_v55  ;;  %1041 = vst [vmem:[#allocation2 + $0xb8] sm:$0xf] %v871_v54  ;;  %4755 = vmatprep.mubr.bf16.mxu1 %v5845_v34  ;;  %v1043_v2 = vsel %vm7151_vm5, %v872_v43, %v1042_v56  ;;  %v6124_v27 = vpack.c.bf16 %v388_v3, %v388_v3 }
  0x6d   : > { %v1210_v1 = vld [vmem:[#allocation2 + $0x38] sm:$0x1]  ;;  %4756 = vmatmul.mubr.bf16.gmra.mrb[8].mxu1 %v6933_v45  ;;  %v1346_v5 = vrot.slane %v1344_v59, 4  ;;  %v1349_v13 = vrot.slane %v1347_v60, 5  ;;  %1044 = vst [vmem:[#allocation2 + $0xbc] sm:$0x1] %v1043_v2  ;;  %v6202_v28 = vunpack.c.h.bf16 %v7464_v36  ;;  %v318_v39 = vmul.f32 %v7445_v20, %v6201_v58 }
  0x6e   : > { %v1355_v63 = vrot.slane %v1353_v61, 5  ;;  %v1359_v48 = vrot.slane %v1357_v62, 4  ;;  %v1363_v0 = vshll.u32 %v1210_v1, 16  ;;  %v687_v6 = vshrl.u32 %v6123_v26, 16  ;;  %v6939_v23 = vld [vmem:[#allocation2 + $0x30] sm:$0xff]  }
  0x6f   : > { %v690_v7 = vshll.u32 %v6123_v26, 16  ;;  %v1350_v10 = vor.u32 %v1349_v13, %v1346_v5  ;;  %v1814_v12 = vrot.slane %v1812_v51, 4  ;;  %v1815_v14 = vrot.slane %v1713_v57, 5  ;;  %v968_v44 = vld [vmem:[#allocation2 + $0x3c] sm:$0xf] }
  0x70   : > { %v1360_v11 = vor.u32 %v1359_v48, %v1355_v63  ;;  %v1365_v16 = vrot.slane %v1363_v0, 5  ;;  %v689_v17 = vrot.slane %v687_v6, 7  ;;  %v695_v8 = vshrl.u32 %v6124_v27, 16  ;;  %v437_v36 = vld [vmem:[#allocation2 + $0x48] sm:$0x1] }
  0x71   : > { %v698_v18 = vshll.u32 %v6124_v27, 16  ;;  %v1351_v21 = vrot.slane %v1350_v10, 4  ;;  %v7494_v25 = vsel %vm7471_vm14, %v1814_v12, %v1815_v14  ;;  %v6205_v19 = vunpack.c.l.bf16 %v7490_v15  ;;  %v487_v52 = vld [vmem:[#allocation2 + $0x50] sm:$0x1]  ;;  %v1714_v57 = vld [vmem:[#allocation2 + $0xc] sm:$0xe] }
  0x72   : > { %v1361_v22 = vrot.slane %v1360_v11, 4  ;;  %v692_v33 = vor.u32 %v690_v7, %v689_v17  ;;  %v5863_v38 = vcombine.low %v7484_v4, %v7494_v25  ;;  %v693_v34 = vrot.slane %v689_v17, 4  ;;  %v972_v61 = vld [vmem:[#allocation2 + $0x44] sm:$0x1]  ;;  %v1715_v5 = vld [vmem:[#allocation2 + $0x10] sm:$0xf] }
  0x73   : > { %v1241_v30 = vld [vmem:[#allocation2 + $0xb4] sm:$0xf]  ;;  %v1242_v29 = vld [vmem:[#allocation2 + $0xb8] sm:$0xf]  ;;  %v1356_v37 = vsel %vm7136_vm3, %v1351_v21, %v1355_v63  ;;  %v697_v56 = vrot.slane %v695_v8, 7  ;;  %v319_v62 = vmul.f32 %v7445_v20, %v6202_v28  ;;  %v357_v48 = vadd.f32 %v7457_v35, %v318_v39 }
  0x74   : > { %v1366_v40 = vsel %vm7136_vm3, %v1361_v22, %v1365_v16  ;;  %v1608_v42 = vshrl.u32 %v1241_v30, 16  ;;  %v1611_v43 = vshll.u32 %v1241_v30, 16  ;;  %v1243_v47 = vld [vmem:[#allocation2 + $0xbc] sm:$0x1]  ;;  %v1617_v49 = vshll.u32 %v1242_v29, 16  ;;  %v6940_v28 = vld [vmem:[#allocation2 + $0xb4] sm:$0xff]  }
  0x75   : > { %v5835_v45 = vcombine.low %v1356_v37, %v1366_v40  ;;  %v1621_v51 = vshrl.u32 %v1242_v29, 16  ;;  %v1627_v55 = vshll.u32 %v1243_v47, 16  ;;  %v969_v60 = vsel %vm7195_vm10, %v692_v33, %v968_v44  ;;  %v1716_v13 = vld [vmem:[#allocation2 + $0x14] sm:$0x1]  ;;  %v7522_v22 = vld [vmem:[%s7116_s22 + $0x38] sm:$0xff]   ;;  %v6945_v37 = vld [vmem:[#allocation2 + $0xc] sm:$0xff]  }
  0x76   : > { %v1610_v53 = vrot.slane %v1608_v42, 4  ;;  %v1613_v54 = vrot.slane %v1611_v43, 5  ;;  %v1619_v58 = vrot.slane %v1617_v49, 5  ;;  %v700_v3 = vor.u32 %v698_v18, %v697_v56  ;;  %970 = vst [vmem:[#allocation2 + $0x3c] sm:$0xf] %v969_v60 }
  0x77   : > { %4675 = vmatprep.mubr.bf16.mxu0 %v5835_v45  ;;  %v1623_v59 = vrot.slane %v1621_v51, 4  ;;  %v1629_v2 = vrot.slane %v1627_v55, 5  ;;  %v702_v26 = vrot.slane %v697_v56, 4  ;;  %v358_v0 = vadd.f32 %v7457_v35, %v319_v62 }
  0x78   : > { %v1614_v1 = vor.u32 %v1613_v54, %v1610_v53  ;;  %4676 = vmatmul.mubr.bf16.gmra.mrb[16].mxu0 %v6939_v23  ;;  %v438_v27 = vsel %vm7151_vm5, 0, %v437_v36  ;;  %v701_v7 = vsel %vm7202_vm11, %v693_v34, %v700_v3  ;;  %v488_v10 = vsel %vm7160_vm7, 0, %v487_v52 }
  0x79   : > { %v1624_v63 = vor.u32 %v1623_v59, %v1619_v58  ;;  %v973_v9 = vsel %vm7151_vm5, %v702_v26, %v972_v61  ;;  %439 = vst [vmem:[#allocation2 + $0x48] sm:$0x1] %v438_v27  ;;  %971 = vst [vmem:[#allocation2 + $0x40] sm:$0xf] %v701_v7  ;;  %v389_v12 = vmax.f32 %v357_v48, 0.0  ;;  %v390_v14 = vmax.f32 %v358_v0, 0.0 }
  0x7a   : > { %v1615_v6 = vrot.slane %v1614_v1, 4  ;;  %974 = vst [vmem:[#allocation2 + $0x44] sm:$0x1] %v973_v9  ;;  %489 = vst [vmem:[#allocation2 + $0x50] sm:$0x1] %v488_v10  ;;  %v5848_v16 = vrot.slane %v1714_v57, 9  ;;  %v6206_v21 = vunpack.c.h.bf16 %v7490_v15  ;;  %v320_v33 = vmul.f32 %v7445_v20, %v6205_v19 }
  0x7b   : > { %v1625_v11 = vrot.slane %v1624_v63, 4  ;;  %v1819_v8 = vrot.slane %v1715_v5, 5  ;;  %v1822_v18 = vrot.slane %v1716_v13, 5  ;;  %v6125_v30 = vpack.c.bf16 %v389_v12, %v389_v12  ;;  %v6961_v15 = vld [vmem:[%s8899_s3 + $0x168] sm:$0xff]   ;;  %v1717_v48 = vld [vmem:[#allocation2 + $0x18] sm:$0xe] }
  0x7c   : > { %v1620_v17 = vsel %vm7136_vm3, %v1615_v6, %v1619_v58  ;;  %v6126_v29 = vpack.c.bf16 %v390_v14, %v390_v14  ;;  %v321_v43 = vmul.f32 %v7445_v20, %v6206_v21  ;;  %v359_v47 = vadd.f32 %v7457_v35, %v320_v33  ;;  %6587 = vmatprep.subr.bf16.mxu0 %v6961_v15  ;;  %v440_v58 = vld [vmem:[#allocation2 + $0x54] sm:$0x1]  ;;  %v6962_v10 = vld [vmem:[%s8899_s3 + $0x128] sm:$0xff]  }
  0x7d   : > { %v1630_v23 = vsel %vm7136_vm3, %v1625_v11, %v1629_v2  ;;  %v7529_v40 = vsel %vm7471_vm14, %v5848_v16, %v1819_v8  ;;  %v1821_v42 = vrot.slane %v1819_v8, 4  ;;  %v1211_v44 = vld [vmem:[#allocation2 + $0x3c] sm:$0xf]  ;;  %v704_v36 = vshrl.u32 %v6125_v30, 16  ;;  %v6948_v16 = vld [vmem:[%s8899_s3 + $0x180] sm:$0xff]   ;;  %6588 = vmatpush3.bf16.msra.mxu0 %v6962_v10 }
  0x7e   : > { %v5846_v39 = vcombine.low %v1620_v17, %v1630_v23  ;;  %v707_v45 = vshll.u32 %v6125_v30, 16  ;;  %v6209_v19 = vunpack.c.l.bf16 %v7522_v22  ;;  %v1368_v49 = vshrl.u32 %v1211_v44, 16  ;;  %v490_v2 = vld [vmem:[#allocation2 + $0x5c] sm:$0x1]  ;;  %v6953_v10 = vld [vmem:[#allocation2 + $0x24] sm:$0xff]  }
  0x7f   : > { %v1371_v51 = vshll.u32 %v1211_v44, 16  ;;  %v712_v34 = vshrl.u32 %v6126_v29, 16  ;;  %v715_v52 = vshll.u32 %v6126_v29, 16  ;;  %v706_v53 = vrot.slane %v704_v36, 7  ;;  %v6951_v23 = vld [vmem:[#allocation2 + $0x18] sm:$0xff]  }
  0x80   : > { %4763 = vmatprep.mubr.bf16.mxu1 %v5846_v39  ;;  %v975_v54 = vld [vmem:[#allocation2 + $0x48] sm:$0xf]  ;;  %v7539_v55 = vsel %vm7471_vm14, %v1821_v42, %v1822_v18  ;;  %v360_v56 = vadd.f32 %v7457_v35, %v321_v43  ;;  %v391_v57 = vmax.f32 %v359_v47, 0.0  ;;  %v1212_v59 = vld [vmem:[#allocation2 + $0x40] sm:$0xf]  ;;  %v1370_v61 = vrot.slane %v1368_v49, 4 }
  0x81   : > { %4764 = vmatmul.mubr.bf16.gmra.mrb[12].mxu1 %v6940_v28  ;;  %v1213_v60 = vld [vmem:[#allocation2 + $0x44] sm:$0x1]  ;;  %v1373_v62 = vrot.slane %v1371_v51, 5  ;;  %v5864_v1 = vcombine.low %v7529_v40, %v7539_v55  ;;  %v6210_v3 = vunpack.c.h.bf16 %v7522_v22  ;;  %v1377_v26 = vshll.u32 %v1212_v59, 16  ;;  %v979_v7 = vld [vmem:[#allocation2 + $0x50] sm:$0x1] }
  0x82   : > { %4804 = vmatprep.mubr.bf16.mxu1 %v6945_v37  ;;  %v1381_v5 = vshrl.u32 %v1212_v59, 16  ;;  %v1387_v13 = vshll.u32 %v1213_v60, 16  ;;  %v709_v63 = vor.u32 %v707_v45, %v706_v53  ;;  %v710_v27 = vrot.slane %v706_v53, 4  ;;  %v1718_v30 = vld [vmem:[#allocation2 + $0x1c] sm:$0xf]  ;;  %v6955_v42 = vld [vmem:[%s8899_s3 + $0x1c8] sm:$0xff]  }
  0x83   : > { %v1374_v0 = vor.u32 %v1373_v62, %v1370_v61  ;;  %v714_v6 = vrot.slane %v712_v34, 7  ;;  %v392_v9 = vmax.f32 %v360_v56, 0.0  ;;  %v1379_v11 = vrot.slane %v1377_v26, 5  ;;  %v1719_v43 = vld [vmem:[#allocation2 + $0x20] sm:$0x1]  ;;  %v6958_v56 = vld [vmem:[%s8899_s3 + $0x188] sm:$0xff]  }
  0x84   : > { %v1383_v12 = vrot.slane %v1381_v5, 4  ;;  %v1389_v14 = vrot.slane %v1387_v13, 5  ;;  %v976_v17 = vsel %vm7195_vm10, %v709_v63, %v975_v54  ;;  %v441_v28 = vsel %vm7151_vm5, 0, %v440_v58  ;;  %v7579_v60 = vld [vmem:[%s7116_s22 + $0x40] sm:$0xff]   ;;  %v6964_v61 = vld [vmem:[%s8899_s3 + $0x1d0] sm:$0xff]  }
  0x85   : > { %v1375_v8 = vrot.slane %v1374_v0, 4  ;;  %v717_v18 = vor.u32 %v715_v52, %v714_v6  ;;  %v719_v21 = vrot.slane %v714_v6, 4  ;;  %977 = vst [vmem:[#allocation2 + $0x48] sm:$0xf] %v976_v17  ;;  %442 = vst [vmem:[#allocation2 + $0x54] sm:$0x1] %v441_v28  ;;  %v6127_v39 = vpack.c.bf16 %v391_v57, %v391_v57 }
  0x86   : > { %v1384_v29 = vor.u32 %v1383_v12, %v1379_v11  ;;  %v491_v33 = vsel %vm7160_vm7, 0, %v490_v2  ;;  %v6128_v37 = vpack.c.bf16 %v392_v9, %v392_v9  ;;  %v5849_v45 = vrot.slane %v1717_v48, 9  ;;  %v6968_v26 = vld [vmem:[%s8899_s3 + $0x170] sm:$0xff]   ;;  %v443_v0 = vld [vmem:[#allocation2 + $0x60] sm:$0x1] }
  0x87   : > { %v1380_v15 = vsel %vm7136_vm3, %v1375_v8, %v1379_v11  ;;  %v718_v44 = vsel %vm7202_vm11, %v710_v27, %v717_v18  ;;  %v980_v36 = vsel %vm7151_vm5, %v719_v21, %v979_v7  ;;  %492 = vst [vmem:[#allocation2 + $0x5c] sm:$0x1] %v491_v33  ;;  %v721_v49 = vshrl.u32 %v6127_v39, 16  ;;  %v493_v27 = vld [vmem:[#allocation2 + $0x68] sm:$0x1]  ;;  %v6970_v28 = vld [vmem:[%s8899_s3 + $0x130] sm:$0xff]   ;;  %6589 = vmatprep.subr.bf16.mxu0 %v6968_v26 }
  0x88   : > { %v1385_v47 = vrot.slane %v1384_v29, 4  ;;  %978 = vst [vmem:[#allocation2 + $0x4c] sm:$0xf] %v718_v44  ;;  %981 = vst [vmem:[#allocation2 + $0x50] sm:$0x1] %v980_v36  ;;  %v724_v51 = vshll.u32 %v6127_v39, 16  ;;  %v322_v4 = vmul.f32 %v7445_v20, %v6209_v19  ;;  %v323_v59 = vmul.f32 %v7445_v20, %v6210_v3  ;;  %6590 = vmatpush3.bf16.msra.mxu0 %v6970_v28 }
  0x89   : > { %4805 = vmatmul.mubr.bf16.vlgmr.msra.gmra.mrb[16].mxu1 %v5863_v38  ;;  %v729_v34 = vshrl.u32 %v6128_v37, 16  ;;  %v732_v52 = vshll.u32 %v6128_v37, 16  ;;  %v1826_v53 = vrot.slane %v1718_v30, 5  ;;  %v1829_v54 = vrot.slane %v1719_v43, 5  ;;  %v6947_v38 = vld [vmem:[#allocation2 + $0x3c] sm:$0xff]   ;;  %v6959_v26 = vld [vmem:[#allocation2 + $0x30] sm:$0xff]  }
  0x8a   : > { %6690 = vmatpush3.bf16.msra.mxu1 %v6948_v16  ;;  %4812 = vmatprep.mubr.bf16.mxu1 %v6951_v23  ;;  %v1390_v25 = vsel %vm7136_vm3, %v1385_v47, %v1389_v14  ;;  %v723_v57 = vrot.slane %v721_v49, 7  ;;  %v361_v2 = vadd.f32 %v7457_v35, %v322_v4  ;;  %v362_v12 = vadd.f32 %v7457_v35, %v323_v59  ;;  %v6966_v14 = vld [vmem:[%s8899_s3 + $0x190] sm:$0xff]   ;;  %v1720_v23 = vld [vmem:[#allocation2 + $0x24] sm:$0xe]  ;;  %v7613_v43 = vld [vmem:[#allocation2 + $0x2c] sm:$0x1] }
  0x8b   : > { %v731_v58 = vrot.slane %v729_v34, 7  ;;  %6691 = vmatprep.subr.bf16.mxu1 %v6955_v42  ;;  %v5836_v62 = vcombine.low %v1380_v15, %v1390_v25  ;;  %v7586_v22 = vsel %vm7471_vm14, %v5849_v45, %v1826_v53  ;;  %v1828_v19 = vrot.slane %v1826_v53, 4  ;;  %v7611_v42 = vld [vmem:[#allocation2 + $0x28] sm:$0xf] }
  0x8c   : > { %v1214_v5 = vld [vmem:[#allocation2 + $0x48] sm:$0xf]  ;;  %v726_v3 = vor.u32 %v724_v51, %v723_v57  ;;  %v727_v13 = vrot.slane %v723_v57, 4  ;;  %v982_v9 = vld [vmem:[#allocation2 + $0x54] sm:$0xf]  ;;  %v393_v21 = vmax.f32 %v361_v2, 0.0  ;;  %v6213_v15 = vunpack.c.l.bf16 %v7579_v60 }
  0x8d   : > { %v734_v63 = vor.u32 %v732_v52, %v731_v58  ;;  %v736_v48 = vrot.slane %v731_v58, 4  ;;  %4683 = vmatprep.mubr.bf16.mxu0 %v5836_v62  ;;  %v1392_v6 = vshrl.u32 %v1214_v5, 16  ;;  %v1395_v7 = vshll.u32 %v1214_v5, 16 }
  0x8e   : > { %v7594_v11 = vsel %vm7471_vm14, %v1828_v19, %v1829_v54  ;;  %6692 = vmatpush3.bf16.msra.mxu1 %v6958_v56  ;;  %4684 = vmatmul.mubr.bf16.gmra.mrb[20].mxu0 %v6947_v38  ;;  %v983_v17 = vsel %vm7195_vm10, %v726_v3, %v982_v9  ;;  %v986_v8 = vld [vmem:[#allocation2 + $0x5c] sm:$0x1]  ;;  %v6129_v47 = vpack.c.bf16 %v393_v21, %v393_v21  ;;  %v394_v51 = vmax.f32 %v362_v12, 0.0 }
  0x8f   : > { %v735_v16 = vsel %vm7202_vm11, %v727_v13, %v734_v63  ;;  %v5865_v18 = vcombine.low %v7586_v22, %v7594_v11  ;;  %6693 = vmatprep.subr.bf16.mxu1 %v6964_v61  ;;  %v1215_v30 = vld [vmem:[#allocation2 + $0x4c] sm:$0xf]  ;;  %v1216_v29 = vld [vmem:[#allocation2 + $0x50] sm:$0x1]  ;;  %v1394_v33 = vrot.slane %v1392_v6, 4  ;;  %v1397_v39 = vrot.slane %v1395_v7, 5 }
  0x90   : > { %984 = vst [vmem:[#allocation2 + $0x54] sm:$0xf] %v983_v17  ;;  %985 = vst [vmem:[#allocation2 + $0x58] sm:$0xf] %v735_v16  ;;  %v987_v37 = vsel %vm7151_vm5, %v736_v48, %v986_v8  ;;  %v1401_v44 = vshll.u32 %v1215_v30, 16  ;;  %v1405_v36 = vshrl.u32 %v1215_v30, 16  ;;  %v6214_v5 = vunpack.c.h.bf16 %v7579_v60 }
  0x91   : > { %v1411_v45 = vshll.u32 %v1216_v29, 16  ;;  %4813 = vmatmul.mubr.bf16.gmra.mrb[20].mxu1 %v5864_v1  ;;  %988 = vst [vmem:[#allocation2 + $0x5c] sm:$0x1] %v987_v37  ;;  %v1398_v49 = vor.u32 %v1397_v39, %v1394_v33  ;;  %v444_v34 = vsel %vm7151_vm5, 0, %v443_v0  ;;  %v494_v52 = vsel %vm7160_vm7, 0, %v493_v27  ;;  %v6972_v61 = vld [vmem:[%s8899_s3 + $0x1d8] sm:$0xff]  }
  0x92   : > { %4820 = vmatprep.mubr.bf16.mxu1 %v6953_v10  ;;  %6694 = vmatpush3.bf16.msra.mxu1 %v6966_v14  ;;  %v1403_v53 = vrot.slane %v1401_v44, 5  ;;  %v1407_v54 = vrot.slane %v1405_v36, 4  ;;  %445 = vst [vmem:[#allocation2 + $0x60] sm:$0x1] %v444_v34  ;;  %495 = vst [vmem:[#allocation2 + $0x68] sm:$0x1] %v494_v52  ;;  %v6130_v1 = vpack.c.bf16 %v394_v51, %v394_v51 }
  0x93   : > { %v1413_v56 = vrot.slane %v1411_v45, 5  ;;  %v738_v40 = vshrl.u32 %v6129_v47, 16  ;;  %v1399_v55 = vrot.slane %v1398_v49, 4  ;;  %v741_v4 = vshll.u32 %v6129_v47, 16  ;;  %v6952_v13 = vld [vmem:[#allocation2 + $0x48] sm:$0xff]   ;;  %6695 = vmatprep.subr.bf16.mxu1 %v6972_v61  ;;  %v6974_v22 = vld [vmem:[%s8899_s3 + $0x198] sm:$0xff]  }
  0x94   : > { %v5850_v25 = vrot.slane %v1720_v23, 9  ;;  %v1408_v38 = vor.u32 %v1407_v54, %v1403_v53  ;;  %v1833_v58 = vrot.slane %v7611_v42, 5  ;;  %v1836_v59 = vrot.slane %v7613_v43, 5  ;;  %v446_v16 = vld [vmem:[#allocation2 + $0x6c] sm:$0x1]  ;;  %v6963_v47 = vld [vmem:[#allocation2 + $0x3c] sm:$0xff]  }
  0x95   : > { %v7623_v57 = vrot.slane %v738_v40, 7  ;;  %v1404_v62 = vsel %vm7136_vm3, %v1399_v55, %v1403_v53  ;;  %v746_v19 = vshrl.u32 %v6130_v1, 16  ;;  %v749_v2 = vshll.u32 %v6130_v1, 16  ;;  %v1723_v49 = vld [vmem:[#allocation2 + $0x30] sm:$0xe]  ;;  %v6975_v51 = vld [vmem:[%s8899_s3 + $0x178] sm:$0xff]  }
  0x96   : > { %v1409_v3 = vrot.slane %v1408_v38, 4  ;;  %v7636_v27 = vsel %vm7471_vm14, %v5850_v25, %v1833_v58  ;;  %v324_v6 = vmul.f32 %v7445_v20, %v6213_v15  ;;  %v325_v21 = vmul.f32 %v7445_v20, %v6214_v5  ;;  %v496_v15 = vld [vmem:[#allocation2 + $0x74] sm:$0x1]  ;;  %6696 = vmatpush3.bf16.msra.mxu1 %v6974_v22  ;;  %v1725_v25 = vld [vmem:[#allocation2 + $0x38] sm:$0x1]  ;;  %v7661_v38 = vld [vmem:[%s7116_s22 + $0x48] sm:$0xff]   ;;  %6591 = vmatprep.subr.bf16.mxu0 %v6975_v51 }
  0x97   : > { %v1217_v63 = vld [vmem:[#allocation2 + $0x54] sm:$0xf]  ;;  %v1218_v48 = vld [vmem:[#allocation2 + $0x58] sm:$0xf]  ;;  %v743_v0 = vor.u32 %v741_v4, %v7623_v57  ;;  %v744_v8 = vrot.slane %v7623_v57, 4  ;;  %v748_v42 = vrot.slane %v746_v19, 7 }
  0x98   : > { %v1219_v7 = vld [vmem:[#allocation2 + $0x5c] sm:$0x1]  ;;  %v1416_v9 = vshrl.u32 %v1217_v63, 16  ;;  %v1419_v10 = vshll.u32 %v1217_v63, 16  ;;  %v1425_v12 = vshll.u32 %v1218_v48, 16  ;;  %v1429_v14 = vshrl.u32 %v1218_v48, 16 }
  0x99   : > { %v1414_v60 = vsel %vm7136_vm3, %v1409_v3, %v1413_v56  ;;  %v1435_v17 = vshll.u32 %v1219_v7, 16  ;;  %4821 = vmatmul.mubr.bf16.gmra.mrb[24].mxu1 %v5865_v18  ;;  %v989_v33 = vld [vmem:[#allocation2 + $0x60] sm:$0xf]  ;;  %v993_v18 = vld [vmem:[#allocation2 + $0x68] sm:$0x1]  ;;  %v1835_v44 = vrot.slane %v1833_v58, 4  ;;  %v363_v36 = vadd.f32 %v7457_v35, %v324_v6 }
  0x9a   : > { %v5837_v23 = vcombine.low %v1404_v62, %v1414_v60  ;;  %v1418_v28 = vrot.slane %v1416_v9, 4  ;;  %v1421_v30 = vrot.slane %v1419_v10, 5  ;;  %v1427_v29 = vrot.slane %v1425_v12, 5  ;;  %4828 = vmatprep.mubr.bf16.mxu1 %v6959_v26  ;;  %v1724_v56 = vld [vmem:[#allocation2 + $0x34] sm:$0xf]  ;;  %v6976_v57 = vld [vmem:[%s8899_s3 + $0x138] sm:$0xff]  }
  0x9b   : > { %v1431_v39 = vrot.slane %v1429_v14, 4  ;;  %v1437_v37 = vrot.slane %v1435_v17, 5  ;;  %v990_v43 = vsel %vm7195_vm10, %v743_v0, %v989_v33  ;;  %v364_v45 = vadd.f32 %v7457_v35, %v325_v21  ;;  %v6979_v19 = vld [vmem:[%s8899_s3 + $0x1e0] sm:$0xff]   ;;  %6592 = vmatpush3.bf16.msra.mxu0 %v6976_v57  ;;  %v6956_v48 = vld [vmem:[#allocation2 + $0x54] sm:$0xff]   ;;  %v6984_v60 = vld [vmem:[%s8899_s3 + $0x1e8] sm:$0xff]  }
  0x9c   : > { %4691 = vmatprep.mubr.bf16.mxu0 %v5837_v23  ;;  %v1422_v11 = vor.u32 %v1421_v30, %v1418_v28  ;;  %991 = vst [vmem:[#allocation2 + $0x60] sm:$0xf] %v990_v43  ;;  %v751_v52 = vor.u32 %v749_v2, %v748_v42  ;;  %v753_v53 = vrot.slane %v748_v42, 4  ;;  %v447_v54 = vsel %vm7151_vm5, 0, %v446_v16  ;;  %6697 = vmatprep.subr.bf16.mxu1 %v6979_v19  ;;  %v6981_v7 = vld [vmem:[%s8899_s3 + $0x1a0] sm:$0xff]   ;;  %v6332_v19 = vld [vmem:[%s7116_s22 + $0x50] sm:$0xff]  }
  0x9d   : > { %4692 = vmatmul.mubr.bf16.gmra.mrb[24].mxu0 %v6952_v13  ;;  %v1432_v34 = vor.u32 %v1431_v39, %v1427_v29  ;;  %v1837_v55 = vsel %vm7471_vm14, %v1835_v44, %v1836_v59  ;;  %v395_v1 = vmax.f32 %v363_v36, 0.0  ;;  %v396_v4 = vmax.f32 %v364_v45, 0.0  ;;  %448 = vst [vmem:[#allocation2 + $0x6c] sm:$0x1] %v447_v54  ;;  %v7681_v13 = vld [vmem:[%s8899_s3 + $0x200] sm:$0xff]   ;;  %6698 = vmatpush3.bf16.msra.mxu1 %v6981_v7 }
  0x9e   : > { %v1423_v40 = vrot.slane %v1422_v11, 4  ;;  %v752_v61 = vsel %vm7202_vm11, %v744_v8, %v751_v52  ;;  %v994_v62 = vsel %vm7151_vm5, %v753_v53, %v993_v18  ;;  %v5866_v59 = vcombine.low %v7636_v27, %v1837_v55  ;;  %v449_v16 = vld [vmem:[#allocation2 + $0x78] sm:$0x1]  ;;  %6825 = vmatprep.subr.bf16.mxu0 %v7681_v13  ;;  %6699 = vmatprep.subr.bf16.mxu1 %v6984_v60  ;;  %v6967_v11 = vld [vmem:[#allocation2 + $0x48] sm:$0xff]   ;;  %v1727_v55 = vld [vmem:[#allocation2 + $0x40] sm:$0xf] }
  0x9f   : > { %v1433_v58 = vrot.slane %v1432_v34, 4  ;;  %992 = vst [vmem:[#allocation2 + $0x64] sm:$0xf] %v752_v61  ;;  %995 = vst [vmem:[#allocation2 + $0x68] sm:$0x1] %v994_v62  ;;  %v497_v26 = vsel %vm7160_vm7, 0, %v496_v15  ;;  %v6131_v5 = vpack.c.bf16 %v395_v1, %v395_v1  ;;  %v6132_v3 = vpack.c.bf16 %v396_v4, %v396_v4 }
  0xa0   : > { %v1428_v2 = vsel %vm7136_vm3, %v1423_v40, %v1427_v29  ;;  %498 = vst [vmem:[#allocation2 + $0x74] sm:$0x1] %v497_v26  ;;  %v5851_v0 = vrot.slane %v1723_v49, 9  ;;  %v1840_v27 = vrot.slane %v1724_v56, 5  ;;  %v1843_v6 = vrot.slane %v1725_v25, 5  ;;  %v6986_v49 = vld [vmem:[%s8899_s3 + $0x1a8] sm:$0xff]  }
  0xa1   : > { %v1438_v63 = vsel %vm7136_vm3, %v1433_v58, %v1437_v37  ;;  %4829 = vmatmul.mubr.bf16.gmra.mrb[28].mxu1 %v5866_v59  ;;  %v755_v10 = vshrl.u32 %v6131_v5, 16  ;;  %v758_v12 = vshll.u32 %v6131_v5, 16  ;;  %v763_v14 = vshrl.u32 %v6132_v3, 16  ;;  %v1726_v40 = vld [vmem:[#allocation2 + $0x3c] sm:$0xe] }
  0xa2   : > { %v5838_v9 = vcombine.low %v1428_v2, %v1438_v63  ;;  %4836 = vmatprep.mubr.bf16.mxu1 %v6963_v47  ;;  %v766_v8 = vshll.u32 %v6132_v3, 16  ;;  %v1841_v21 = vsel %vm7471_vm14, %v5851_v0, %v1840_v27  ;;  %v1842_v23 = vrot.slane %v1840_v27, 4  ;;  %v499_v47 = vld [vmem:[#allocation2 + $0x80] sm:$0x1]  ;;  %v1728_v58 = vld [vmem:[#allocation2 + $0x44] sm:$0x1]  ;;  %6700 = vmatpush3.bf16.msra.mxu1 %v6986_v49 }
  0xa3   : > { %v1220_v17 = vld [vmem:[#allocation2 + $0x60] sm:$0xf]  ;;  %v6217_v28 = vunpack.c.l.bf16 %v7661_v38  ;;  %v757_v33 = vrot.slane %v755_v10, 7  ;;  %v765_v39 = vrot.slane %v763_v14, 7  ;;  %v6218_v43 = vunpack.c.h.bf16 %v7661_v38 }
  0xa4   : > { %4699 = vmatprep.mubr.bf16.mxu0 %v5838_v9  ;;  %v1440_v30 = vshrl.u32 %v1220_v17, 16  ;;  %v1443_v29 = vshll.u32 %v1220_v17, 16  ;;  %v996_v37 = vld [vmem:[#allocation2 + $0x6c] sm:$0xf]  ;;  %v1844_v42 = vsel %vm7471_vm14, %v1842_v23, %v1843_v6  ;;  %v450_v22 = vsel %vm7151_vm5, 0, %v449_v16 }
  0xa5   : > { %4700 = vmatmul.mubr.bf16.gmra.mrb[28].mxu0 %v6956_v48  ;;  %v326_v15 = vmul.f32 %v7445_v20, %v6217_v28  ;;  %v760_v36 = vor.u32 %v758_v12, %v757_v33  ;;  %v761_v45 = vrot.slane %v757_v33, 4  ;;  %451 = vst [vmem:[#allocation2 + $0x78] sm:$0x1] %v450_v22  ;;  %v768_v52 = vor.u32 %v766_v8, %v765_v39  ;;  %v6971_v22 = vld [vmem:[#allocation2 + $0x54] sm:$0xff]  }
  0xa6   : > { %v1442_v18 = vrot.slane %v1440_v30, 4  ;;  %v1445_v44 = vrot.slane %v1443_v29, 5  ;;  %v1221_v51 = vld [vmem:[#allocation2 + $0x64] sm:$0xf]  ;;  %v1222_v34 = vld [vmem:[#allocation2 + $0x68] sm:$0x1]  ;;  %v5867_v53 = vcombine.low %v1841_v21, %v1844_v42  ;;  %v327_v54 = vmul.f32 %v7445_v20, %v6218_v43 }
  0xa7   : > { %v365_v56 = vadd.f32 %v7457_v35, %v326_v15  ;;  %v1449_v4 = vshll.u32 %v1221_v51, 16  ;;  %v1453_v25 = vshrl.u32 %v1221_v51, 16  ;;  %v1459_v38 = vshll.u32 %v1222_v34, 16  ;;  %v1000_v57 = vld [vmem:[#allocation2 + $0x74] sm:$0x1] }
  0xa8   : > { %v1446_v1 = vor.u32 %v1445_v44, %v1442_v18  ;;  %v769_v61 = vsel %vm7202_vm11, %v761_v45, %v768_v52  ;;  %v770_v62 = vrot.slane %v765_v39, 4  ;;  %v997_v59 = vsel %vm7195_vm10, %v760_v36, %v996_v37  ;;  %v6960_v39 = vld [vmem:[#allocation2 + $0x60] sm:$0xff]  }
  0xa9   : > { %4837 = vmatmul.mubr.bf16.gmra.mrb[32].mxu1 %v5867_v53  ;;  %v366_v20 = vadd.f32 %v7457_v35, %v327_v54  ;;  %v1451_v26 = vrot.slane %v1449_v4, 5  ;;  %v1455_v5 = vrot.slane %v1453_v25, 4  ;;  %v1461_v3 = vrot.slane %v1459_v38, 5  ;;  %998 = vst [vmem:[#allocation2 + $0x6c] sm:$0xf] %v997_v59 }
  0xaa   : > { %v1447_v2 = vrot.slane %v1446_v1, 4  ;;  %999 = vst [vmem:[#allocation2 + $0x70] sm:$0xf] %v769_v61  ;;  %4844 = vmatprep.mubr.bf16.mxu1 %v6967_v11  ;;  %v1001_v63 = vsel %vm7151_vm5, %v770_v62, %v1000_v57  ;;  %v397_v48 = vmax.f32 %v365_v56, 0.0  ;;  %v500_v27 = vsel %vm7160_vm7, 0, %v499_v47 }
  0xab   : > { %v398_v0 = vmax.f32 %v366_v20, 0.0  ;;  %v1456_v35 = vor.u32 %v1455_v5, %v1451_v26  ;;  %1002 = vst [vmem:[#allocation2 + $0x74] sm:$0x1] %v1001_v63  ;;  %501 = vst [vmem:[#allocation2 + $0x80] sm:$0x1] %v500_v27  ;;  %v5852_v7 = vrot.slane %v1726_v40, 9  ;;  %v6221_v16 = vunpack.c.l.bf16 %v6332_v19 }
  0xac   : > { %v1452_v6 = vsel %vm7136_vm3, %v1447_v2, %v1451_v26  ;;  %v1847_v9 = vrot.slane %v1727_v55, 5  ;;  %v6133_v10 = vpack.c.bf16 %v397_v48, %v397_v48  ;;  %v1850_v14 = vrot.slane %v1728_v58, 5  ;;  %v7020_v42 = vld [vmem:[%s8897_s1] ss:$0 sm:$0xff]  ;;  %v452_v55 = vld [vmem:[#allocation2 + $0x84] sm:$0x1] }
  0xad   : > { %v6134_v12 = vpack.c.bf16 %v398_v0, %v398_v0  ;;  %v1457_v60 = vrot.slane %v1456_v35, 4  ;;  %v6222_v21 = vunpack.c.h.bf16 %v6332_v19  ;;  %v328_v43 = vmul.f32 %v7020_v42, %v6221_v16  ;;  %v7021_v54 = vld [vmem:[%s8898_s2] ss:$0 sm:$0xff]  ;;  %v1003_v57 = vld [vmem:[#allocation2 + $0x78] sm:$0xf] }
  0xae   : > { %v1848_v17 = vsel %vm7471_vm14, %v5852_v7, %v1847_v9  ;;  %v1849_v8 = vrot.slane %v1847_v9, 4  ;;  %v772_v23 = vshrl.u32 %v6133_v10, 16  ;;  %v775_v28 = vshll.u32 %v6133_v10, 16  ;;  %v502_v58 = vld [vmem:[#allocation2 + $0x8c] sm:$0x1] }
  0xaf   : > { %v780_v30 = vshrl.u32 %v6134_v12, 16  ;;  %v783_v29 = vshll.u32 %v6134_v12, 16  ;;  %v1462_v33 = vsel %vm7136_vm3, %v1457_v60, %v1461_v3  ;;  %v329_v15 = vmul.f32 %v7020_v42, %v6222_v21  ;;  %v1729_v61 = vld [vmem:[#allocation2 + $0x48] sm:$0xe]  ;;  %v1730_v26 = vld [vmem:[#allocation2 + $0x4c] sm:$0xf] }
  0xb0   : > { %v1851_v37 = vsel %vm7471_vm14, %v1849_v8, %v1850_v14  ;;  %v5839_v11 = vcombine.low %v1452_v6, %v1462_v33  ;;  %v1223_v18 = vld [vmem:[#allocation2 + $0x6c] sm:$0xf]  ;;  %v774_v52 = vrot.slane %v772_v23, 7  ;;  %v367_v56 = vadd.f32 %v7021_v54, %v328_v43  ;;  %v1731_v7 = vld [vmem:[#allocation2 + $0x50] sm:$0x1] }
  0xb1   : > { %v1224_v44 = vld [vmem:[#allocation2 + $0x70] sm:$0xf]  ;;  %v5868_v36 = vcombine.low %v1848_v17, %v1851_v37  ;;  %v1464_v45 = vshrl.u32 %v1223_v18, 16  ;;  %v1467_v47 = vshll.u32 %v1223_v18, 16  ;;  %v782_v53 = vrot.slane %v780_v30, 7 }
  0xb2   : > { %v1473_v49 = vshll.u32 %v1224_v44, 16  ;;  %v1477_v51 = vshrl.u32 %v1224_v44, 16  ;;  %4707 = vmatprep.mubr.bf16.mxu0 %v5839_v11  ;;  %v1225_v34 = vld [vmem:[#allocation2 + $0x74] sm:$0x1]  ;;  %v368_v40 = vadd.f32 %v7021_v54, %v329_v15  ;;  %v777_v59 = vor.u32 %v775_v28, %v774_v52  ;;  %v1007_v2 = vld [vmem:[#allocation2 + $0x80] sm:$0x1] }
  0xb3   : > { %4845 = vmatmul.mubr.bf16.gmra.mrb[36].mxu1 %v5868_v36  ;;  %4708 = vmatmul.mubr.bf16.gmra.mrb[32].mxu0 %v6960_v39  ;;  %v1466_v1 = vrot.slane %v1464_v45, 4  ;;  %v1469_v4 = vrot.slane %v1467_v47, 5  ;;  %v1483_v62 = vshll.u32 %v1225_v34, 16  ;;  %v778_v20 = vrot.slane %v774_v52, 4  ;;  %v7734_v9 = vld [vmem:[#allocation2 + $0xc] sm:$0xe] }
  0xb4   : > { %v1475_v25 = vrot.slane %v1473_v49, 5  ;;  %v1479_v38 = vrot.slane %v1477_v51, 4  ;;  %4852 = vmatprep.mubr.bf16.mxu1 %v6971_v22  ;;  %v785_v19 = vor.u32 %v783_v29, %v782_v53  ;;  %v787_v63 = vrot.slane %v782_v53, 4  ;;  %v6965_v14 = vld [vmem:[#allocation2 + $0x6c] sm:$0xff]   ;;  %v7742_v8 = vld [vmem:[#allocation2 + $0x14] sm:$0x1] }
  0xb5   : > { %v1470_v5 = vor.u32 %v1469_v4, %v1466_v1  ;;  %v399_v48 = vmax.f32 %v367_v56, 0.0  ;;  %v1485_v0 = vrot.slane %v1483_v62, 5  ;;  %v1004_v6 = vsel %vm7195_vm10, %v777_v59, %v1003_v57  ;;  %v7740_v17 = vld [vmem:[#allocation2 + $0x10] sm:$0xf]  ;;  %v1732_v33 = vld [vmem:[#allocation2 + $0x54] sm:$0xe] }
  0xb6   : > { %v1480_v3 = vor.u32 %v1479_v38, %v1475_v25  ;;  %v786_v27 = vsel %vm7202_vm11, %v778_v20, %v785_v19  ;;  %v400_v35 = vmax.f32 %v368_v40, 0.0  ;;  %1005 = vst [vmem:[#allocation2 + $0x78] sm:$0xf] %v1004_v6  ;;  %v1008_v16 = vsel %vm7151_vm5, %v787_v63, %v1007_v2  ;;  %v6989_v21 = vld [vmem:[%s8899_s3 + $0x1f0] sm:$0xff]   ;;  %v7749_v39 = vld [vmem:[#allocation2 + $0x58] sm:$0xf] }
  0xb7   : > { %v1471_v10 = vrot.slane %v1470_v5, 4  ;;  %1006 = vst [vmem:[#allocation2 + $0x7c] sm:$0xf] %v786_v27  ;;  %v453_v60 = vsel %vm7151_vm5, 0, %v452_v55  ;;  %1009 = vst [vmem:[#allocation2 + $0x80] sm:$0x1] %v1008_v16  ;;  %v6135_v28 = vpack.c.bf16 %v399_v48, %v399_v48  ;;  %6701 = vmatprep.subr.bf16.mxu1 %v6989_v21 }
  0xb8   : > { %v1481_v12 = vrot.slane %v1480_v3, 4  ;;  %454 = vst [vmem:[#allocation2 + $0x84] sm:$0x1] %v453_v60  ;;  %v503_v23 = vsel %vm7160_vm7, 0, %v502_v58  ;;  %v6136_v30 = vpack.c.bf16 %v400_v35, %v400_v35  ;;  %v5853_v29 = vrot.slane %v1729_v61, 9  ;;  %v6991_v34 = vld [vmem:[%s8899_s3 + $0x1b0] sm:$0xff]  }
  0xb9   : > { %v1476_v37 = vsel %vm7136_vm3, %v1471_v10, %v1475_v25  ;;  %504 = vst [vmem:[#allocation2 + $0x8c] sm:$0x1] %v503_v23  ;;  %v1854_v43 = vrot.slane %v1730_v26, 5  ;;  %v1857_v15 = vrot.slane %v1731_v7, 5  ;;  %v789_v11 = vshrl.u32 %v6135_v28, 16  ;;  %v6977_v55 = vld [vmem:[#allocation2 + $0x60] sm:$0xff]   ;;  %6702 = vmatpush3.bf16.msra.mxu1 %v6991_v34 }
  0xba   : > { %v1486_v42 = vsel %vm7136_vm3, %v1481_v12, %v1485_v0  ;;  %v792_v18 = vshll.u32 %v6135_v28, 16  ;;  %v797_v44 = vshrl.u32 %v6136_v30, 16  ;;  %v7755_v36 = vld [vmem:[#allocation2 + $0x5c] sm:$0x1]  ;;  %v800_v45 = vshll.u32 %v6136_v30, 16 }
  0xbb   : > { %v5840_v22 = vcombine.low %v1476_v37, %v1486_v42  ;;  %v1855_v47 = vsel %vm7471_vm14, %v5853_v29, %v1854_v43  ;;  %v1856_v49 = vrot.slane %v1854_v43, 4  ;;  %v5911_v51 = vrot.slane %v7734_v9, 9  ;;  %v2146_v5 = vld [vmem:[#allocation2 + $0xc] sm:$0xf]  ;;  %v2147_v3 = vld [vmem:[#allocation2 + $0x10] sm:$0xf] }
  0xbc   : > { %v791_v52 = vrot.slane %v789_v11, 7  ;;  %v799_v53 = vrot.slane %v797_v44, 7  ;;  %v2756_v54 = vrot.slane %v7740_v17, 5  ;;  %v2759_v56 = vrot.slane %v7742_v8, 5  ;;  %v2148_v8 = vld [vmem:[#allocation2 + $0x14] sm:$0x1] }
  0xbd   : > { %4715 = vmatprep.mubr.bf16.mxu0 %v5840_v22  ;;  %v1858_v40 = vsel %vm7471_vm14, %v1856_v49, %v1857_v15  ;;  %v5854_v1 = vrot.slane %v1732_v33, 9  ;;  %v1861_v4 = vrot.slane %v7749_v39, 5  ;;  %v1864_v25 = vrot.slane %v7755_v36, 5  ;;  %v1226_v38 = vld [vmem:[#allocation2 + $0x78] sm:$0xf]  ;;  %v6978_v15 = vld [vmem:[#allocation2 + $0x6c] sm:$0xff]  }
  0xbe   : > { %4716 = vmatmul.mubr.bf16.gmra.mrb[36].mxu0 %v6965_v14  ;;  %v1227_v57 = vld [vmem:[#allocation2 + $0x7c] sm:$0xf]  ;;  %v794_v58 = vor.u32 %v792_v18, %v791_v52  ;;  %v802_v61 = vor.u32 %v800_v45, %v799_v53  ;;  %v5869_v62 = vcombine.low %v1855_v47, %v1858_v40  ;;  %v1228_v59 = vld [vmem:[#allocation2 + $0x80] sm:$0x1]  ;;  %v1488_v20 = vshrl.u32 %v1226_v38, 16 }
  0xbf   : > { %v1491_v19 = vshll.u32 %v1226_v38, 16  ;;  %v1497_v2 = vshll.u32 %v1227_v57, 16  ;;  %v1501_v26 = vshrl.u32 %v1227_v57, 16  ;;  %v1507_v63 = vshll.u32 %v1228_v59, 16  ;;  %v1010_v10 = vld [vmem:[#allocation2 + $0x84] sm:$0xf] }
  0xc0   : > { %v795_v48 = vrot.slane %v791_v52, 4  ;;  %v804_v0 = vrot.slane %v799_v53, 4  ;;  %4853 = vmatmul.mubr.bf16.gmra.mrb[40].mxu1 %v5869_v62  ;;  %v1862_v27 = vsel %vm7471_vm14, %v5854_v1, %v1861_v4  ;;  %v1490_v6 = vrot.slane %v1488_v20, 4  ;;  %v1014_v60 = vld [vmem:[#allocation2 + $0x8c] sm:$0x1]  ;;  %v6994_v52 = vld [vmem:[%s8899_s3 + $0x1f8] sm:$0xff]  }
  0xc1   : > { %v1493_v35 = vrot.slane %v1491_v19, 5  ;;  %v1499_v7 = vrot.slane %v1497_v2, 5  ;;  %v1503_v9 = vrot.slane %v1501_v26, 4  ;;  %4860 = vmatprep.mubr.bf16.mxu1 %v6977_v55  ;;  %v1509_v12 = vrot.slane %v1507_v63, 5  ;;  %v2661_v29 = vld [vmem:[#allocation2 + $0x18] sm:$0xe]  ;;  %6703 = vmatprep.subr.bf16.mxu1 %v6994_v52 }
  0xc2   : > { %v803_v14 = vsel %vm7202_vm11, %v795_v48, %v802_v61  ;;  %v1011_v16 = vsel %vm7195_vm10, %v794_v58, %v1010_v10  ;;  %v2758_v17 = vrot.slane %v2756_v54, 4  ;;  %v1015_v28 = vsel %vm7151_vm5, %v804_v0, %v1014_v60  ;;  %v2662_v33 = vld [vmem:[#allocation2 + $0x1c] sm:$0xf]  ;;  %v2663_v22 = vld [vmem:[#allocation2 + $0x20] sm:$0x1] }
  0xc3   : > { %v1494_v21 = vor.u32 %v1493_v35, %v1490_v6  ;;  %v1504_v23 = vor.u32 %v1503_v9, %v1499_v7  ;;  %1012 = vst [vmem:[#allocation2 + $0x84] sm:$0xf] %v1011_v16  ;;  %1013 = vst [vmem:[#allocation2 + $0x88] sm:$0xf] %v803_v14  ;;  %v1863_v30 = vrot.slane %v1861_v4, 4  ;;  %v7779_v39 = vsel %vm7471_vm14, %v5911_v51, %v2756_v54 }
  0xc4   : > { %1016 = vst [vmem:[#allocation2 + $0x8c] sm:$0x1] %v1015_v28  ;;  %v2195_v37 = vshrl.u32 %v2146_v5, 16  ;;  %v2198_v42 = vshll.u32 %v2146_v5, 16  ;;  %v2204_v43 = vshll.u32 %v2147_v3, 16  ;;  %v7783_v44 = vsel %vm7471_vm14, %v2758_v17, %v2759_v56  ;;  %v6969_v56 = vld [vmem:[#allocation2 + $0x78] sm:$0xff]  }
  0xc5   : > { %v1495_v11 = vrot.slane %v1494_v21, 4  ;;  %v1505_v18 = vrot.slane %v1504_v23, 4  ;;  %v1865_v36 = vsel %vm7471_vm14, %v1863_v30, %v1864_v25  ;;  %v1735_v51 = vld [vmem:[#allocation2 + $0x60] sm:$0xe]  ;;  %v2208_v40 = vshrl.u32 %v2147_v3, 16 }
  0xc6   : > { %v5870_v45 = vcombine.low %v1862_v27, %v1865_v36  ;;  %v2197_v47 = vrot.slane %v2195_v37, 4  ;;  %v2200_v49 = vrot.slane %v2198_v42, 5  ;;  %v2206_v34 = vrot.slane %v2204_v43, 5  ;;  %v1736_v26 = vld [vmem:[#allocation2 + $0x64] sm:$0xf] }
  0xc7   : > { %v1500_v53 = vsel %vm7136_vm3, %v1495_v11, %v1499_v7  ;;  %v1510_v54 = vsel %vm7136_vm3, %v1505_v18, %v1509_v12  ;;  %v2214_v55 = vshll.u32 %v2148_v8, 16  ;;  %v5912_v25 = vrot.slane %v2661_v29, 9  ;;  %v1737_v27 = vld [vmem:[#allocation2 + $0x68] sm:$0x1]  ;;  %v2149_v60 = vld [vmem:[#allocation2 + $0x18] sm:$0xf] }
  0xc8   : > { %v5841_v1 = vcombine.low %v1500_v53, %v1510_v54  ;;  %4861 = vmatmul.mubr.bf16.gmra.mrb[44].mxu1 %v5870_v45  ;;  %v2201_v4 = vor.u32 %v2200_v49, %v2197_v47  ;;  %v2763_v38 = vrot.slane %v2662_v33, 5  ;;  %v2210_v57 = vrot.slane %v2208_v40, 4  ;;  %v2150_v28 = vld [vmem:[#allocation2 + $0x1c] sm:$0xf]  ;;  %v2151_v30 = vld [vmem:[#allocation2 + $0x20] sm:$0x1] }
  0xc9   : > { %v2216_v58 = vrot.slane %v2214_v55, 5  ;;  %4868 = vmatprep.mubr.bf16.mxu1 %v6978_v15  ;;  %v2766_v61 = vrot.slane %v2663_v22, 5  ;;  %v5855_v62 = vrot.slane %v1735_v51, 9  ;;  %v5927_v19 = vcombine.low %v7779_v39, %v7783_v44  ;;  %v2664_v18 = vld [vmem:[#allocation2 + $0x24] sm:$0xe] }
  0xca   : > { %4723 = vmatprep.mubr.bf16.mxu0 %v5841_v1  ;;  %v1229_v59 = vld [vmem:[#allocation2 + $0x84] sm:$0xf]  ;;  %v1230_v20 = vld [vmem:[#allocation2 + $0x88] sm:$0xf]  ;;  %v7798_v2 = vsel %vm7471_vm14, %v5912_v25, %v2763_v38  ;;  %v2202_v35 = vrot.slane %v2201_v4, 4  ;;  %v2211_v7 = vor.u32 %v2210_v57, %v2206_v34  ;;  %v2765_v9 = vrot.slane %v2763_v38, 4 }
  0xcb   : > { %4724 = vmatmul.mubr.bf16.gmra.mrb[40].mxu0 %v6969_v56  ;;  %v1231_v5 = vld [vmem:[#allocation2 + $0x8c] sm:$0x1]  ;;  %v1512_v3 = vshrl.u32 %v1229_v59, 16  ;;  %v1515_v63 = vshll.u32 %v1229_v59, 16  ;;  %v1521_v48 = vshll.u32 %v1230_v20, 16  ;;  %v1525_v0 = vshrl.u32 %v1230_v20, 16 }
  0xcc   : > { %v1531_v6 = vshll.u32 %v1231_v5, 16  ;;  %v2207_v8 = vsel %vm7136_vm3, %v2202_v35, %v2206_v34  ;;  %v2212_v21 = vrot.slane %v2211_v7, 4  ;;  %v7804_v23 = vsel %vm7471_vm14, %v2765_v9, %v2766_v61  ;;  %v6973_v47 = vld [vmem:[#allocation2 + $0x84] sm:$0xff]   ;;  %v2666_v52 = vld [vmem:[#allocation2 + $0x2c] sm:$0x1]  ;;  %v6982_v1 = vld [vmem:[#allocation2 + $0x78] sm:$0xff]  }
  0xcd   : > { %v1514_v10 = vrot.slane %v1512_v3, 4  ;;  %v1517_v12 = vrot.slane %v1515_v63, 5  ;;  %v1523_v14 = vrot.slane %v1521_v48, 5  ;;  %v1527_v16 = vrot.slane %v1525_v0, 4  ;;  %v2665_v51 = vld [vmem:[#allocation2 + $0x28] sm:$0xf] }
  0xce   : > { %v1533_v17 = vrot.slane %v1531_v6, 5  ;;  %v5928_v37 = vcombine.low %v7798_v2, %v7804_v23  ;;  %v1868_v42 = vrot.slane %v1736_v26, 5  ;;  %v2217_v43 = vsel %vm7136_vm3, %v2212_v21, %v2216_v58  ;;  %v1738_v53 = vld [vmem:[#allocation2 + $0x6c] sm:$0xe]  ;;  %v1739_v4 = vld [vmem:[#allocation2 + $0x70] sm:$0xf] }
  0xcf   : > { %v1518_v29 = vor.u32 %v1517_v12, %v1514_v10  ;;  %v1528_v33 = vor.u32 %v1527_v16, %v1523_v14  ;;  %v1871_v15 = vrot.slane %v1737_v27, 5  ;;  %v2219_v22 = vshrl.u32 %v2149_v60, 16  ;;  %v1740_v25 = vld [vmem:[#allocation2 + $0x74] sm:$0x1]  ;;  %v2152_v5 = vld [vmem:[#allocation2 + $0x24] sm:$0xf] }
  0xd0   : > { %v2222_v11 = vshll.u32 %v2149_v60, 16  ;;  %v7810_v49 = vcombine.low %v2207_v8, %v2217_v43  ;;  %v1869_v34 = vsel %vm7471_vm14, %v5855_v62, %v1868_v42  ;;  %v1870_v54 = vrot.slane %v1868_v42, 4  ;;  %v6996_v3 = vld [vmem:[%s8899_s3 + $0x1b8] sm:$0xff]   ;;  %v2153_v10 = vld [vmem:[#allocation2 + $0x28] sm:$0xf] }
  0xd1   : > { %v1519_v36 = vrot.slane %v1518_v29, 4  ;;  %v1529_v45 = vrot.slane %v1528_v33, 4  ;;  %v2221_v56 = vrot.slane %v2219_v22, 4  ;;  %v2228_v55 = vshll.u32 %v2150_v28, 16  ;;  %6704 = vmatpush3.bf16.msra.mxu1 %v6996_v3  ;;  %v2154_v60 = vld [vmem:[#allocation2 + $0x2c] sm:$0x1] }
  0xd2   : > { %v2224_v40 = vrot.slane %v2222_v11, 5  ;;  %v2232_v58 = vshrl.u32 %v2150_v28, 16  ;;  %v2238_v61 = vshll.u32 %v2151_v30, 16  ;;  %v1872_v62 = vsel %vm7471_vm14, %v1870_v54, %v1871_v15  ;;  %v2667_v29 = vld [vmem:[#allocation2 + $0x30] sm:$0xe] }
  0xd3   : > { %v1524_v38 = vsel %vm7136_vm3, %v1519_v36, %v1523_v14  ;;  %v1534_v57 = vsel %vm7136_vm3, %v1529_v45, %v1533_v17  ;;  %v2230_v26 = vrot.slane %v2228_v55, 5  ;;  %v5871_v63 = vcombine.low %v1869_v34, %v1872_v62  ;;  %v2668_v33 = vld [vmem:[#allocation2 + $0x34] sm:$0xf]  ;;  %v2669_v39 = vld [vmem:[#allocation2 + $0x38] sm:$0x1]  ;;  %v6983_v55 = vld [vmem:[#allocation2 + $0x84] sm:$0xff]  }
  0xd4   : > { %v5842_v59 = vcombine.low %v1524_v38, %v1534_v57  ;;  %v2225_v20 = vor.u32 %v2224_v40, %v2221_v56  ;;  %v2234_v48 = vrot.slane %v2232_v58, 4  ;;  %v2240_v0 = vrot.slane %v2238_v61, 5  ;;  %v1741_v44 = vld [vmem:[#allocation2 + $0x78] sm:$0xe]  ;;  %v2155_v61 = vld [vmem:[#allocation2 + $0x30] sm:$0xf] }
  0xd5   : > { %v5913_v27 = vrot.slane %v2664_v18, 9  ;;  %v2770_v35 = vrot.slane %v2665_v51, 5  ;;  %v2773_v7 = vrot.slane %v2666_v52, 5  ;;  %v5856_v9 = vrot.slane %v1738_v53, 9  ;;  %4869 = vmatmul.mubr.bf16.gmra.mrb[48].mxu1 %v5871_v63  ;;  %v1745_v23 = vld [vmem:[#allocation2 + $0x88] sm:$0xf] }
  0xd6   : > { %4731 = vmatprep.mubr.bf16.mxu0 %v5842_v59  ;;  %v2226_v6 = vrot.slane %v2225_v20, 4  ;;  %v2235_v12 = vor.u32 %v2234_v48, %v2230_v26  ;;  %v1875_v14 = vrot.slane %v1739_v4, 5  ;;  %v1878_v16 = vrot.slane %v1740_v25, 5  ;;  %4876 = vmatprep.mubr.bf16.mxu1 %v6982_v1  ;;  %v6985_v1 = vld [vmem:[%s8899_s3 + $0x208] sm:$0xff]   ;;  %v1743_v4 = vld [vmem:[#allocation2 + $0x80] sm:$0x1] }
  0xd7   : > { %4732 = vmatmul.mubr.bf16.gmra.mrb[44].mxu0 %v6973_v47  ;;  %v2243_v17 = vshrl.u32 %v2152_v5, 16  ;;  %v7830_v21 = vsel %vm7471_vm14, %v5913_v27, %v2770_v35  ;;  %v2772_v28 = vrot.slane %v2770_v35, 4  ;;  %v2246_v30 = vshll.u32 %v2152_v5, 16  ;;  %v2156_v5 = vld [vmem:[#allocation2 + $0x34] sm:$0xf] }
  0xd8   : > { %4965 = vmatprep.mubr.bf16.mxu0 %v5927_v19  ;;  %v2231_v8 = vsel %vm7136_vm3, %v2226_v6, %v2230_v26  ;;  %v2236_v42 = vrot.slane %v2235_v12, 4  ;;  %v1876_v43 = vsel %vm7471_vm14, %v5856_v9, %v1875_v14  ;;  %v1877_v15 = vrot.slane %v1875_v14, 4  ;;  %v1742_v19 = vld [vmem:[#allocation2 + $0x7c] sm:$0xf]  ;;  %v2157_v27 = vld [vmem:[#allocation2 + $0x38] sm:$0x1] }
  0xd9   : > { %v2245_v22 = vrot.slane %v2243_v17, 4  ;;  %v7836_v11 = vsel %vm7471_vm14, %v2772_v28, %v2773_v7  ;;  %v2248_v18 = vrot.slane %v2246_v30, 5  ;;  %v2252_v36 = vshll.u32 %v2153_v10, 16  ;;  %v2670_v6 = vld [vmem:[#allocation2 + $0x3c] sm:$0xe] }
  0xda   : > { %v2256_v45 = vshrl.u32 %v2153_v10, 16  ;;  %v2241_v47 = vsel %vm7136_vm3, %v2236_v42, %v2240_v0  ;;  %v5929_v34 = vcombine.low %v7830_v21, %v7836_v11  ;;  %v1879_v51 = vsel %vm7471_vm14, %v1877_v15, %v1878_v16  ;;  %v2671_v10 = vld [vmem:[#allocation2 + $0x40] sm:$0xf]  ;;  %v2672_v12 = vld [vmem:[#allocation2 + $0x44] sm:$0x1] }
  0xdb   : > { %v2262_v52 = vshll.u32 %v2154_v60, 16  ;;  %v7844_v53 = vcombine.low %v2231_v8, %v2241_v47  ;;  %v5872_v54 = vcombine.low %v1876_v43, %v1879_v51  ;;  %v2249_v56 = vor.u32 %v2248_v18, %v2245_v22  ;;  %v1744_v14 = vld [vmem:[#allocation2 + $0x84] sm:$0xe]  ;;  %v1746_v15 = vld [vmem:[#allocation2 + $0x8c] sm:$0x1]  ;;  %v6987_v18 = vld [vmem:[#allocation2 + $0x90] sm:$0xff]  }
  0xdc   : > { %v2254_v40 = vrot.slane %v2252_v36, 5  ;;  %v2258_v25 = vrot.slane %v2256_v45, 4  ;;  %v5914_v57 = vrot.slane %v2667_v29, 9  ;;  %v2777_v58 = vrot.slane %v2668_v33, 5  ;;  %v2158_v22 = vld [vmem:[#allocation2 + $0x3c] sm:$0xf] }
  0xdd   : > { %v2264_v38 = vrot.slane %v2262_v52, 5  ;;  %v2250_v59 = vrot.slane %v2249_v56, 4  ;;  %v2780_v62 = vrot.slane %v2669_v39, 5  ;;  %v5857_v20 = vrot.slane %v1741_v44, 9  ;;  %4877 = vmatmul.mubr.bf16.gmra.mrb[52].mxu1 %v5872_v54  ;;  %v2159_v45 = vld [vmem:[#allocation2 + $0x40] sm:$0xf] }
  0xde   : > { %v1882_v26 = vrot.slane %v1742_v19, 5  ;;  %v2259_v3 = vor.u32 %v2258_v25, %v2254_v40  ;;  %v7852_v63 = vsel %vm7471_vm14, %v5914_v57, %v2777_v58  ;;  %v2779_v48 = vrot.slane %v2777_v58, 4  ;;  %4884 = vmatprep.mubr.bf16.mxu1 %v6983_v55  ;;  %v6995_v25 = vld [vmem:[%s8899_s3 + $0x218] sm:$0xff]   ;;  %v2160_v58 = vld [vmem:[#allocation2 + $0x44] sm:$0x1] }
  0xdf   : > { %4966 = vmatmul.mubr.bf16.vlgmr.msra.gmra.mrb[48].mxu0 %v7810_v49  ;;  %v1885_v0 = vrot.slane %v1743_v4, 5  ;;  %v2255_v35 = vsel %vm7136_vm3, %v2250_v59, %v2254_v40  ;;  %v2267_v9 = vshrl.u32 %v2155_v61, 16  ;;  %v2270_v2 = vshll.u32 %v2155_v61, 16  ;;  %v2673_v59 = vld [vmem:[#allocation2 + $0x48] sm:$0xe] }
  0xe0   : > { %4973 = vmatprep.mubr.bf16.mxu0 %v5928_v37  ;;  %6826 = vmatpush3.bf16.msra.mxu0 %v7681_v13  ;;  %v1883_v49 = vsel %vm7471_vm14, %v5857_v20, %v1882_v26  ;;  %v1884_v7 = vrot.slane %v1882_v26, 4  ;;  %v2260_v16 = vrot.slane %v2259_v3, 4  ;;  %v7864_v60 = vsel %vm7471_vm14, %v2779_v48, %v2780_v62  ;;  %v6990_v37 = vld [vmem:[%s8899_s3 + $0x210] sm:$0xff]   ;;  %v2688_v32 = vld [vmem:[#allocation2 + $0x84] sm:$0xe] }
  0xe1   : > { %6827 = vmatprep.subr.bf16.mxu0 %v6985_v1  ;;  %v2276_v13 = vshll.u32 %v2156_v5, 16  ;;  %v5930_v17 = vcombine.low %v7852_v63, %v7864_v60  ;;  %v2269_v28 = vrot.slane %v2267_v9, 4  ;;  %v2280_v30 = vshrl.u32 %v2156_v5, 16  ;;  %v6998_v9 = vld [vmem:[%s8899_s3 + $0x220] sm:$0xff]  }
  0xe2   : > { %v1886_v8 = vsel %vm7471_vm14, %v1884_v7, %v1885_v0  ;;  %v2265_v29 = vsel %vm7136_vm3, %v2260_v16, %v2264_v38  ;;  %v2272_v42 = vrot.slane %v2270_v2, 5  ;;  %v2286_v19 = vshll.u32 %v2157_v27, 16  ;;  %v2674_v27 = vld [vmem:[#allocation2 + $0x4c] sm:$0xf]  ;;  %v1748_v7 = vld [vmem:[#allocation2 + $0x94] sm:$0xf] }
  0xe3   : > { %v5873_v33 = vcombine.low %v1883_v49, %v1886_v8  ;;  %v2278_v43 = vrot.slane %v2276_v13, 5  ;;  %v7875_v39 = vcombine.low %v2255_v35, %v2265_v29  ;;  %v2282_v44 = vrot.slane %v2280_v30, 4  ;;  %v1747_v49 = vld [vmem:[#allocation2 + $0x90] sm:$0xe]  ;;  %v1749_v2 = vld [vmem:[#allocation2 + $0x98] sm:$0x1] }
  0xe4   : > { %6828 = vmatpush3.bf16.msra.mxu0 %v6985_v1  ;;  %v5915_v36 = vrot.slane %v2670_v6, 9  ;;  %v2273_v47 = vor.u32 %v2272_v42, %v2269_v28  ;;  %v2784_v51 = vrot.slane %v2671_v10, 5  ;;  %v2787_v52 = vrot.slane %v2672_v12, 5  ;;  %v2675_v6 = vld [vmem:[#allocation2 + $0x50] sm:$0x1]  ;;  %v6988_v8 = vld [vmem:[#allocation2 + $0x9c] sm:$0xff]  }
  0xe5   : > { %v5858_v54 = vrot.slane %v1744_v14, 9  ;;  %6829 = vmatprep.subr.bf16.mxu0 %v6990_v37  ;;  %v2283_v56 = vor.u32 %v2282_v44, %v2278_v43  ;;  %v2288_v40 = vrot.slane %v2286_v19, 5  ;;  %v1889_v55 = vrot.slane %v1745_v23, 5  ;;  %4885 = vmatmul.mubr.bf16.gmra.mrb[56].mxu1 %v5873_v33  ;;  %v2161_v13 = vld [vmem:[#allocation2 + $0x48] sm:$0xf] }
  0xe6   : > { %v1892_v4 = vrot.slane %v1746_v15, 5  ;;  %v2274_v1 = vrot.slane %v2273_v47, 4  ;;  %v7883_v38 = vsel %vm7471_vm14, %v5915_v36, %v2784_v51  ;;  %v2786_v57 = vrot.slane %v2784_v51, 4  ;;  %4892 = vmatprep.mubr.bf16.mxu1 %v6987_v18  ;;  %v2162_v29 = vld [vmem:[#allocation2 + $0x4c] sm:$0xf] }
  0xe7   : > { %4974 = vmatmul.mubr.bf16.gmra.mrb[52].mxu0 %v7844_v53  ;;  %v2291_v61 = vshrl.u32 %v2158_v22, 16  ;;  %v2284_v62 = vrot.slane %v2283_v56, 4  ;;  %v1890_v20 = vsel %vm7471_vm14, %v5858_v54, %v1889_v55  ;;  %v1891_v53 = vrot.slane %v1889_v55, 4  ;;  %v7001_v36 = vld [vmem:[%s8899_s3 + $0x228] sm:$0xff]   ;;  %v2163_v54 = vld [vmem:[#allocation2 + $0x50] sm:$0x1] }
  0xe8   : > { %4981 = vmatprep.mubr.bf16.mxu0 %v5929_v34  ;;  %v2294_v26 = vshll.u32 %v2158_v22, 16  ;;  %v2279_v5 = vsel %vm7136_vm3, %v2274_v1, %v2278_v43  ;;  %v7894_v3 = vsel %vm7471_vm14, %v2786_v57, %v2787_v52  ;;  %v2300_v0 = vshll.u32 %v2159_v45, 16  ;;  %6830 = vmatpush3.bf16.msra.mxu0 %v6990_v37  ;;  %v3110_v46 = vld [vmem:[#allocation2 + $0x64] sm:$0xf] }
  0xe9   : > { %v2293_v48 = vrot.slane %v2291_v61, 4  ;;  %v2289_v21 = vsel %vm7136_vm3, %v2284_v62, %v2288_v40  ;;  %v5931_v11 = vcombine.low %v7883_v38, %v7894_v3  ;;  %v1893_v34 = vsel %vm7471_vm14, %v1891_v53, %v1892_v4  ;;  %6831 = vmatprep.subr.bf16.mxu0 %v6995_v25  ;;  %v2676_v4 = vld [vmem:[#allocation2 + $0x54] sm:$0xe]  ;;  %v1751_v53 = vld [vmem:[#allocation2 + $0xa0] sm:$0xf] }
  0xea   : > { %v2296_v35 = vrot.slane %v2294_v26, 5  ;;  %v7905_v10 = vcombine.low %v2279_v5, %v2289_v21  ;;  %v5874_v12 = vcombine.low %v1890_v20, %v1893_v34  ;;  %v2302_v14 = vrot.slane %v2300_v0, 5  ;;  %v7004_v26 = vld [vmem:[%s8899_s3 + $0x230] sm:$0xff]   ;;  %v1752_v21 = vld [vmem:[#allocation2 + $0xa4] sm:$0x1] }
  0xeb   : > { %v2304_v16 = vshrl.u32 %v2159_v45, 16  ;;  %v2310_v37 = vshll.u32 %v2160_v58, 16  ;;  %v5916_v28 = vrot.slane %v2673_v59, 9  ;;  %v2791_v30 = vrot.slane %v2674_v27, 5  ;;  %v1750_v58 = vld [vmem:[#allocation2 + $0x9c] sm:$0xe] }
  0xec   : > { %v2297_v23 = vor.u32 %v2296_v35, %v2293_v48  ;;  %v2794_v42 = vrot.slane %v2675_v6, 5  ;;  %v5859_v43 = vrot.slane %v1747_v49, 9  ;;  %v1896_v15 = vrot.slane %v1748_v7, 5  ;;  %6832 = vmatpush3.bf16.msra.mxu0 %v6995_v25  ;;  %v2677_v25 = vld [vmem:[#allocation2 + $0x58] sm:$0xf]  ;;  %v6992_v27 = vld [vmem:[#allocation2 + $0xa8] sm:$0xff]  }
  0xed   : > { %v2306_v33 = vrot.slane %v2304_v16, 4  ;;  %v2312_v44 = vrot.slane %v2310_v37, 5  ;;  %v7909_v19 = vsel %vm7471_vm14, %v5916_v28, %v2791_v30  ;;  %v2793_v18 = vrot.slane %v2791_v30, 4  ;;  %6833 = vmatprep.subr.bf16.mxu0 %v6998_v9  ;;  %4893 = vmatmul.mubr.bf16.gmra.mrb[60].mxu1 %v5874_v12  ;;  %v2165_v12 = vld [vmem:[#allocation2 + $0x58] sm:$0xf] }
  0xee   : > { %v2298_v22 = vrot.slane %v2297_v23, 4  ;;  %v1897_v47 = vsel %vm7471_vm14, %v5859_v43, %v1896_v15  ;;  %v1898_v51 = vrot.slane %v1896_v15, 4  ;;  %v1899_v52 = vrot.slane %v1749_v2, 5  ;;  %4900 = vmatprep.mubr.bf16.mxu1 %v6988_v8 }
  0xef   : > { %4982 = vmatmul.mubr.bf16.gmra.mrb[56].mxu0 %v7875_v39  ;;  %v2307_v45 = vor.u32 %v2306_v33, %v2302_v14  ;;  %v7924_v40 = vsel %vm7471_vm14, %v2793_v18, %v2794_v42  ;;  %v2315_v39 = vshrl.u32 %v2161_v13, 16  ;;  %v2318_v55 = vshll.u32 %v2161_v13, 16  ;;  %v2679_v33 = vld [vmem:[#allocation2 + $0x60] sm:$0xe] }
  0xf0   : > { %4989 = vmatprep.mubr.bf16.mxu0 %v5930_v17  ;;  %v2303_v56 = vsel %vm7136_vm3, %v2298_v22, %v2302_v14  ;;  %v5932_v57 = vcombine.low %v7909_v19, %v7924_v40  ;;  %v1900_v63 = vsel %vm7471_vm14, %v1898_v51, %v1899_v52  ;;  %v2324_v60 = vshll.u32 %v2162_v29, 16  ;;  %v2678_v17 = vld [vmem:[#allocation2 + $0x5c] sm:$0x1]  ;;  %6834 = vmatpush3.bf16.msra.mxu0 %v6998_v9  ;;  %v2164_v9 = vld [vmem:[#allocation2 + $0x54] sm:$0xf] }
  0xf1   : > { %v2308_v1 = vrot.slane %v2307_v45, 4  ;;  %v5875_v61 = vcombine.low %v1897_v47, %v1900_v63  ;;  %v2317_v59 = vrot.slane %v2315_v39, 4  ;;  %v2320_v62 = vrot.slane %v2318_v55, 5  ;;  %6835 = vmatprep.subr.bf16.mxu0 %v7001_v36  ;;  %v7007_v14 = vld [vmem:[%s8899_s3 + $0x238] sm:$0xff]   ;;  %v2681_v47 = vld [vmem:[#allocation2 + $0x68] sm:$0x1] }
  0xf2   : > { %v2328_v20 = vshrl.u32 %v2162_v29, 16  ;;  %v2326_v48 = vrot.slane %v2324_v60, 5  ;;  %v2334_v0 = vshll.u32 %v2163_v54, 16  ;;  %v5917_v6 = vrot.slane %v2676_v4, 9  ;;  %v2166_v29 = vld [vmem:[#allocation2 + $0x5c] sm:$0x1] }
  0xf3   : > { %v2313_v5 = vsel %vm7136_vm3, %v2308_v1, %v2312_v44  ;;  %v2321_v35 = vor.u32 %v2320_v62, %v2317_v59  ;;  %v2798_v7 = vrot.slane %v2677_v25, 5  ;;  %v2801_v2 = vrot.slane %v2678_v17, 5  ;;  %v2680_v44 = vld [vmem:[#allocation2 + $0x64] sm:$0xf]  ;;  %v6993_v55 = vld [vmem:[#allocation2 + $0xb4] sm:$0xff]  }
  0xf4   : > { %v7935_v34 = vcombine.low %v2303_v56, %v2313_v5  ;;  %v2330_v49 = vrot.slane %v2328_v20, 4  ;;  %v2336_v16 = vrot.slane %v2334_v0, 5  ;;  %v5860_v13 = vrot.slane %v1750_v58, 9  ;;  %6836 = vmatpush3.bf16.msra.mxu0 %v7001_v36  ;;  %v1753_v4 = vld [vmem:[#allocation2 + $0xa8] sm:$0xe] }
  0xf5   : > { %v1903_v23 = vrot.slane %v1751_v53, 5  ;;  %v2322_v37 = vrot.slane %v2321_v35, 4  ;;  %v7942_v28 = vsel %vm7471_vm14, %v5917_v6, %v2798_v7  ;;  %v2800_v30 = vrot.slane %v2798_v7, 4  ;;  %6837 = vmatprep.subr.bf16.mxu0 %v7004_v26  ;;  %4901 = vmatmul.mubr.bf16.gmra.mrb[64].mxu1 %v5875_v61  ;;  %v1754_v17 = vld [vmem:[#allocation2 + $0xac] sm:$0xf] }
  0xf6   : > { %v2331_v8 = vor.u32 %v2330_v49, %v2326_v48  ;;  %v1906_v15 = vrot.slane %v1752_v21, 5  ;;  %v2339_v22 = vshrl.u32 %v2164_v9, 16  ;;  %4908 = vmatprep.mubr.bf16.mxu1 %v6992_v27  ;;  %v2342_v45 = vshll.u32 %v2164_v9, 16  ;;  %v1755_v53 = vld [vmem:[#allocation2 + $0xb0] sm:$0x1] }
  0xf7   : > { %4990 = vmatmul.mubr.bf16.gmra.mrb[60].mxu0 %v7905_v10  ;;  %v1904_v42 = vsel %vm7471_vm14, %v5860_v13, %v1903_v23  ;;  %v1905_v43 = vrot.slane %v1903_v23, 4  ;;  %v2327_v18 = vsel %vm7136_vm3, %v2322_v37, %v2326_v48  ;;  %v7954_v10 = vsel %vm7471_vm14, %v2800_v30, %v2801_v2  ;;  %v2167_v6 = vld [vmem:[#allocation2 + $0x60] sm:$0xf]  ;;  %v2168_v9 = vld [vmem:[#allocation2 + $0x64] sm:$0xf] }
  0xf8   : > { %4997 = vmatprep.mubr.bf16.mxu0 %v5931_v11  ;;  %v2332_v36 = vrot.slane %v2331_v8, 4  ;;  %v5933_v51 = vcombine.low %v7942_v28, %v7954_v10  ;;  %v2341_v54 = vrot.slane %v2339_v22, 4  ;;  %v2348_v38 = vshll.u32 %v2165_v12, 16  ;;  %6838 = vmatpush3.bf16.msra.mxu0 %v7004_v26  ;;  %v2169_v30 = vld [vmem:[#allocation2 + $0x68] sm:$0x1] }
  0xf9   : > { %v1907_v52 = vsel %vm7471_vm14, %v1905_v43, %v1906_v15  ;;  %v2344_v56 = vrot.slane %v2342_v45, 5  ;;  %v2352_v39 = vshrl.u32 %v2165_v12, 16  ;;  %6839 = vmatprep.subr.bf16.mxu0 %v7007_v14  ;;  %v2358_v63 = vshll.u32 %v2166_v29, 16  ;;  %v6337_v12 = vld [vmem:[%s7116_s22 + $0x78] sm:$0xff]   ;;  %v467_v40 = vld [vmem:[#allocation2 + $0xc0] sm:$0x1] }
  0xfa   : > { %v2337_v3 = vsel %vm7136_vm3, %v2332_v36, %v2336_v16  ;;  %v5876_v11 = vcombine.low %v1904_v42, %v1907_v52  ;;  %v2350_v1 = vrot.slane %v2348_v38, 5  ;;  %v5918_v60 = vrot.slane %v2679_v33, 9  ;;  %v2683_v36 = vld [vmem:[#allocation2 + $0x70] sm:$0xf]  ;;  %v2684_v38 = vld [vmem:[#allocation2 + $0x74] sm:$0x1] }
  0xfb   : > { %v7962_v25 = vcombine.low %v2327_v18, %v2337_v3  ;;  %v2345_v61 = vor.u32 %v2344_v56, %v2341_v54  ;;  %v2354_v59 = vrot.slane %v2352_v39, 4  ;;  %v2805_v62 = vrot.slane %v2680_v44, 5  ;;  %v1756_v3 = vld [vmem:[#allocation2 + $0xb4] sm:$0xe] }
  0xfc   : > { %v2808_v20 = vrot.slane %v2681_v47, 5  ;;  %v2360_v5 = vrot.slane %v2358_v63, 5  ;;  %v5861_v48 = vrot.slane %v1753_v4, 9  ;;  %v1910_v0 = vrot.slane %v1754_v17, 5  ;;  %6840 = vmatpush3.bf16.msra.mxu0 %v7007_v14  ;;  %v7022_v17 = vld [vmem:[%s8897_s1] ss:$0 sm:$0xff] }
  0xfd   : > { %v1913_v27 = vrot.slane %v1755_v53, 5  ;;  %v2346_v21 = vrot.slane %v2345_v61, 4  ;;  %v2355_v35 = vor.u32 %v2354_v59, %v2350_v1  ;;  %v7970_v49 = vsel %vm7471_vm14, %v5918_v60, %v2805_v62  ;;  %4909 = vmatmul.mubr.bf16.gmra.mrb[68].mxu1 %v5876_v11 }
  0xfe   : > { %v2807_v7 = vrot.slane %v2805_v62, 4  ;;  %v1911_v16 = vsel %vm7471_vm14, %v5861_v48, %v1910_v0  ;;  %v1912_v2 = vrot.slane %v1910_v0, 4  ;;  %v2363_v13 = vshrl.u32 %v2167_v6, 16  ;;  %4916 = vmatprep.mubr.bf16.mxu1 %v6993_v55  ;;  %v1758_v62 = vld [vmem:[#allocation2 + $0xbc] sm:$0x1] }
  0xff   : > { %4998 = vmatmul.mubr.bf16.gmra.mrb[64].mxu0 %v7935_v34  ;;  %v2366_v23 = vshll.u32 %v2167_v6, 16  ;;  %v2351_v14 = vsel %vm7136_vm3, %v2346_v21, %v2350_v1  ;;  %v2356_v8 = vrot.slane %v2355_v35, 4  ;;  %v2372_v29 = vshll.u32 %v2168_v9, 16  ;;  %v1757_v1 = vld [vmem:[#allocation2 + $0xb8] sm:$0xf] }
 0x100   : > { %5005 = vmatprep.mubr.bf16.mxu0 %v5932_v57  ;;  %v7985_v34 = vsel %vm7471_vm14, %v2807_v7, %v2808_v20  ;;  %v1914_v42 = vsel %vm7471_vm14, %v1912_v2, %v1913_v27  ;;  %v2365_v43 = vrot.slane %v2363_v13, 4  ;;  %v2682_v57 = vld [vmem:[#allocation2 + $0x6c] sm:$0xe]  ;;  %v2376_v18 = vshrl.u32 %v2168_v9, 16  ;;  %v7023_v6 = vld [vmem:[%s8898_s2] ss:$0 sm:$0xff] }
 0x101   : > { %v7964_v58 = vpop.f32.mrb[0].mxu0  ;;  %v5934_v33 = vcombine.low %v7970_v49, %v7985_v34  ;;  %v2368_v19 = vrot.slane %v2366_v23, 5  ;;  %v2361_v15 = vsel %vm7136_vm3, %v2356_v8, %v2360_v5  ;;  %v5877_v22 = vcombine.low %v1911_v16, %v1914_v42  ;;  %v2170_v0 = vld [vmem:[#allocation2 + $0x6c] sm:$0xf]  ;;  %v2171_v23 = vld [vmem:[#allocation2 + $0x70] sm:$0xf] }
 0x102   : > { %v7966_v26 = vpop.f32.mrb[1].mxu0  ;;  %v2374_v44 = vrot.slane %v2372_v29, 5  ;;  %v7993_v45 = vcombine.low %v2351_v14, %v2361_v15  ;;  %v2382_v52 = vshll.u32 %v2169_v30, 16  ;;  %v6241_v54 = vunpack.c.l.bf16 %v6337_v12  ;;  %v3093_v34 = vld [vmem:[#allocation2 + $0x20] sm:$0x1] }
 0x103   : > { %v7976_v37 = vpop.f32.mrb[2].mxu0  ;;  %v2369_v47 = vor.u32 %v2368_v19, %v2365_v43  ;;  %v2378_v56 = vrot.slane %v2376_v18, 4  ;;  %v6242_v39 = vunpack.c.h.bf16 %v6337_v12  ;;  %v468_v55 = vsel %vm7151_vm5, 0, %v467_v40 }
 0x104   : > { %v7995_v11 = vpop.f32.mrb[3].mxu0  ;;  %v5919_v4 = vrot.slane %v2682_v57, 9  ;;  %v2384_v60 = vrot.slane %v2382_v52, 5  ;;  %v338_v61 = vmul.f32 %v7022_v17, %v6241_v54  ;;  %469 = vst [vmem:[#allocation2 + $0xc0] sm:$0x1] %v468_v55  ;;  %v2812_v59 = vrot.slane %v2683_v36, 5 }
 0x105   : > { %v2370_v63 = vrot.slane %v2369_v47, 4  ;;  %v2379_v20 = vor.u32 %v2378_v56, %v2374_v44  ;;  %v339_v53 = vmul.f32 %v7022_v17, %v6242_v39  ;;  %v2815_v5 = vrot.slane %v2684_v38, 5  ;;  %4917 = vmatmul.mubr.bf16.gmra.mrb[72].mxu1 %v5877_v22  ;;  %v2685_v57 = vld [vmem:[#allocation2 + $0x78] sm:$0xe]  ;;  %v2686_v36 = vld [vmem:[#allocation2 + $0x7c] sm:$0xf] }
 0x106   : > { %v5862_v48 = vrot.slane %v1756_v3, 9  ;;  %v377_v21 = vadd.f32 %v7023_v6, %v338_v61  ;;  %v8010_v35 = vsel %vm7471_vm14, %v5919_v4, %v2812_v59  ;;  %v2814_v7 = vrot.slane %v2812_v59, 4  ;;  %v2687_v3 = vld [vmem:[#allocation2 + $0x80] sm:$0x1] }
 0x107   : > { %5006 = vmatmul.mubr.bf16.gmra.mrb[68].mxu0 %v7962_v25  ;;  %v2375_v27 = vsel %vm7136_vm3, %v2370_v63, %v2374_v44  ;;  %v2380_v9 = vrot.slane %v2379_v20, 4  ;;  %v378_v25 = vadd.f32 %v7023_v6, %v339_v53  ;;  %v1917_v12 = vrot.slane %v1757_v1, 5  ;;  %v3091_v1 = vld [vmem:[#allocation2 + $0x18] sm:$0xf] }
 0x108   : > { %5013 = vmatprep.mubr.bf16.mxu0 %v5933_v51  ;;  %v1920_v16 = vrot.slane %v1758_v62, 5  ;;  %v409_v2 = vmax.f32 %v377_v21, 0.0  ;;  %v8017_v13 = vsel %vm7471_vm14, %v2814_v7, %v2815_v5  ;;  %v2387_v14 = vshrl.u32 %v2170_v0, 16  ;;  %v2172_v51 = vld [vmem:[#allocation2 + $0x74] sm:$0x1] }
 0x109   : > { %v2390_v8 = vshll.u32 %v2170_v0, 16  ;;  %v2385_v30 = vsel %vm7136_vm3, %v2380_v9, %v2384_v60  ;;  %v410_v29 = vmax.f32 %v378_v25, 0.0  ;;  %v5935_v28 = vcombine.low %v8010_v35, %v8017_v13  ;;  %v3092_v21 = vld [vmem:[#allocation2 + $0x1c] sm:$0xf]  ;;  %v3095_v35 = vld [vmem:[#allocation2 + $0x28] sm:$0xf] }
 0x10a   : > { %v8025_v10 = vsel %vm7471_vm14, %v5862_v48, %v1917_v12  ;;  %v8027_v42 = vcombine.low %v2375_v27, %v2385_v30  ;;  %v6145_v43 = vpack.c.bf16 %v409_v2, %v409_v2  ;;  %v1919_v19 = vrot.slane %v1917_v12, 4 }
 0x10b   : > { %v2389_v40 = vrot.slane %v2387_v14, 4  ;;  %v6146_v15 = vpack.c.bf16 %v410_v29, %v410_v29  ;;  %v2392_v22 = vrot.slane %v2390_v8, 5  ;;  %v2396_v44 = vshll.u32 %v2171_v23, 16  ;;  %v1045_v62 = vld [vmem:[#allocation2 + $0xc0] sm:$0xf] }
 0x10c   : > { %v2400_v18 = vshrl.u32 %v2171_v23, 16  ;;  %v874_v47 = vshrl.u32 %v6145_v43, 16  ;;  %v877_v52 = vshll.u32 %v6145_v43, 16  ;;  %v8031_v54 = vsel %vm7471_vm14, %v1919_v19, %v1920_v16  ;;  %v2173_v23 = vld [vmem:[#allocation2 + $0x78] sm:$0xf] }
 0x10d   : > { %v2406_v38 = vshll.u32 %v2172_v51, 16  ;;  %v882_v56 = vshrl.u32 %v6146_v15, 16  ;;  %v885_v39 = vshll.u32 %v6146_v15, 16  ;;  %v5878_v55 = vcombine.low %v8025_v10, %v8031_v54  ;;  %v2174_v43 = vld [vmem:[#allocation2 + $0x7c] sm:$0xf] }
 0x10e   : > { %v2393_v4 = vor.u32 %v2392_v22, %v2389_v40  ;;  %v876_v63 = vrot.slane %v874_v47, 7  ;;  %v2398_v60 = vrot.slane %v2396_v44, 5  ;;  %v2402_v17 = vrot.slane %v2400_v18, 4  ;;  %v2175_v22 = vld [vmem:[#allocation2 + $0x80] sm:$0x1] }
 0x10f   : > { %5014 = vmatmul.mubr.bf16.gmra.mrb[72].mxu0 %v7993_v45  ;;  %v2408_v61 = vrot.slane %v2406_v38, 5  ;;  %v8039_v59 = vrot.slane %v882_v56, 7  ;;  %v5920_v53 = vrot.slane %v2685_v57, 9  ;;  %v2819_v5 = vrot.slane %v2686_v36, 5  ;;  %v2691_v54 = vld [vmem:[#allocation2 + $0x90] sm:$0xe] }
 0x110   : > { %5021 = vmatprep.mubr.bf16.mxu0 %v5934_v33  ;;  %v2394_v20 = vrot.slane %v2393_v4, 4  ;;  %v879_v48 = vor.u32 %v877_v52, %v876_v63  ;;  %v880_v0 = vrot.slane %v876_v63, 4  ;;  %v2403_v27 = vor.u32 %v2402_v17, %v2398_v60  ;;  %v8049_v33 = vpop.f32.mrb[4].mxu0  ;;  %v2690_v17 = vld [vmem:[#allocation2 + $0x8c] sm:$0x1] }
 0x111   : > { %v2822_v6 = vrot.slane %v2687_v3, 5  ;;  %v887_v45 = vor.u32 %v885_v39, %v8039_v59  ;;  %v889_v7 = vrot.slane %v8039_v59, 4  ;;  %v8047_v49 = vsel %vm7471_vm14, %v5920_v53, %v2819_v5  ;;  %v8053_v14 = vpop.f32.mrb[5].mxu0  ;;  %v2689_v39 = vld [vmem:[#allocation2 + $0x88] sm:$0xf] }
 0x112   : > { %v2399_v9 = vsel %vm7136_vm3, %v2394_v20, %v2398_v60  ;;  %v1046_v25 = vsel %vm7195_vm10, %v879_v48, %v1045_v62  ;;  %v2404_v12 = vrot.slane %v2403_v27, 4  ;;  %v2821_v16 = vrot.slane %v2819_v5, 4  ;;  %v3094_v5 = vld [vmem:[#allocation2 + $0x24] sm:$0xf] }
 0x113   : > { %v3140_v2 = vshrl.u32 %v3091_v1, 16  ;;  %v888_v8 = vsel %vm7202_vm11, %v880_v0, %v887_v45  ;;  %1047 = vst [vmem:[#allocation2 + $0xc0] sm:$0xf] %v1046_v25  ;;  %v3143_v30 = vshll.u32 %v3091_v1, 16  ;;  %v3149_v29 = vshll.u32 %v3092_v21, 16 }
 0x114   : > { %v3153_v51 = vshrl.u32 %v3092_v21, 16  ;;  %v8057_v19 = vpop.f32.mrb[0].mxu1  ;;  %1048 = vst [vmem:[#allocation2 + $0xc4] sm:$0xf] %v888_v8  ;;  %v2409_v24 = vsel %vm7136_vm3, %v2404_v12, %v2408_v61  ;;  %v8063_v40 = vsel %vm7471_vm14, %v2821_v16, %v2822_v6  ;;  %v3159_v15 = vshll.u32 %v3093_v34, 16  ;;  %v8079_v8 = vpop.f32.mrb[6].mxu0 }
 0x115   : > { %v3142_v57 = vrot.slane %v3140_v2, 4  ;;  %v5903_v44 = vcombine.low %v2399_v9, %v2409_v24  ;;  %v5936_v18 = vcombine.low %v8047_v49, %v8063_v40  ;;  %v3145_v36 = vrot.slane %v3143_v30, 5  ;;  %v8071_v61 = vpop.f32.mrb[1].mxu1  ;;  %v3096_v49 = vld [vmem:[#allocation2 + $0x2c] sm:$0x1] }
 0x116   : > { %v3151_v47 = vrot.slane %v3149_v29, 5  ;;  %v3155_v52 = vrot.slane %v3153_v51, 4  ;;  %v3161_v38 = vrot.slane %v3159_v15, 5  ;;  %v2411_v3 = vshrl.u32 %v2173_v23, 16  ;;  %v8073_v48 = vpop.f32.mrb[2].mxu1 }
 0x117   : > { %5022 = vmatmul.mubr.bf16.gmra.mrb[76].mxu0 %v8027_v42  ;;  %v2414_v56 = vshll.u32 %v2173_v23, 16  ;;  %v3146_v4 = vor.u32 %v3145_v36, %v3142_v57  ;;  %v2420_v1 = vshll.u32 %v2174_v43, 16  ;;  %v2424_v63 = vshrl.u32 %v2174_v43, 16  ;;  %v8075_v34 = vpop.f32.mrb[3].mxu1  ;;  %v2176_v24 = vld [vmem:[#allocation2 + $0x84] sm:$0xf] }
 0x118   : > { %5029 = vmatprep.mubr.bf16.mxu0 %v5935_v28  ;;  %v2430_v60 = vshll.u32 %v2175_v22, 16  ;;  %v3156_v62 = vor.u32 %v3155_v52, %v3151_v47  ;;  %v2413_v20 = vrot.slane %v2411_v3, 4  ;;  %v5921_v42 = vrot.slane %v2688_v32, 9  ;;  %v2177_v40 = vld [vmem:[#allocation2 + $0x88] sm:$0xf]  ;;  %v8087_v36 = vpop.f32.mrb[7].mxu0 }
 0x119   : > { %v2416_v53 = vrot.slane %v2414_v56, 5  ;;  %v3147_v0 = vrot.slane %v3146_v4, 4  ;;  %v2422_v27 = vrot.slane %v2420_v1, 5  ;;  %v2426_v6 = vrot.slane %v2424_v63, 4  ;;  %v2178_v56 = vld [vmem:[#allocation2 + $0x8c] sm:$0x1] }
 0x11a   : > { %v2432_v21 = vrot.slane %v2430_v60, 5  ;;  %v3157_v13 = vrot.slane %v3156_v62, 4  ;;  %v2826_v45 = vrot.slane %v2689_v39, 5  ;;  %v2829_v9 = vrot.slane %v2690_v17, 5  ;;  %v6999_v63 = vld [vmem:[#allocation2 + $0x18] sm:$0xff]  }
 0x11b   : > { %v2417_v28 = vor.u32 %v2416_v53, %v2413_v20  ;;  %v6997_v25 = vld [vmem:[#allocation2 + $0xc0] sm:$0xff]   ;;  %v3152_v12 = vsel %vm7136_vm3, %v3147_v0, %v3151_v47  ;;  %v2427_v16 = vor.u32 %v2426_v6, %v2422_v27  ;;  %v3164_v2 = vshrl.u32 %v3094_v5, 16  ;;  %v2693_v20 = vld [vmem:[#allocation2 + $0x98] sm:$0x1] }
 0x11c   : > { %v3167_v23 = vshll.u32 %v3094_v5, 16  ;;  %v3162_v30 = vsel %vm7136_vm3, %v3157_v13, %v3161_v38  ;;  %v8085_v51 = vsel %vm7471_vm14, %v5921_v42, %v2826_v45  ;;  %v2828_v43 = vrot.slane %v2826_v45, 4  ;;  %4924 = vmatprep.mubr.bf16.mxu1 %v6997_v25  ;;  %v3097_v13 = vld [vmem:[#allocation2 + $0x30] sm:$0xf] }
 0x11d   : > { %v2418_v29 = vrot.slane %v2417_v28, 4  ;;  %v5959_v57 = vcombine.low %v3152_v12, %v3162_v30  ;;  %v2428_v15 = vrot.slane %v2427_v16, 4  ;;  %v3166_v22 = vrot.slane %v3164_v2, 4  ;;  %4925 = vmatmul.mubr.bf16.gmra.mrb[76].mxu1 %v5878_v55  ;;  %v2692_v55 = vld [vmem:[#allocation2 + $0x94] sm:$0xf] }
 0x11e   : > { %v3169_v32 = vrot.slane %v3167_v23, 5  ;;  %v2830_v52 = vsel %vm7471_vm14, %v2828_v43, %v2829_v9  ;;  %v3173_v38 = vshll.u32 %v3095_v35, 16  ;;  %v3177_v3 = vshrl.u32 %v3095_v35, 16  ;;  %v3098_v43 = vld [vmem:[#allocation2 + $0x34] sm:$0xf] }
 0x11f   : > { %5030 = vmatmul.mubr.bf16.gmra.mrb[80].mxu0 %v5903_v44  ;;  %v2423_v47 = vsel %vm7136_vm3, %v2418_v29, %v2422_v27  ;;  %5126 = vmatprep.mubr.bf16.mxu1 %v5959_v57  ;;  %v2433_v39 = vsel %vm7136_vm3, %v2428_v15, %v2432_v21  ;;  %v5937_v4 = vcombine.low %v8085_v51, %v2830_v52  ;;  %v3183_v10 = vshll.u32 %v3096_v49, 16  ;;  %v3099_v52 = vld [vmem:[#allocation2 + $0x38] sm:$0x1] }
 0x120   : > { %5037 = vmatprep.mubr.bf16.mxu0 %v5936_v18  ;;  %v3170_v1 = vor.u32 %v3169_v32, %v3166_v22  ;;  %v5904_v44 = vcombine.low %v2423_v47, %v2433_v39  ;;  %v3175_v60 = vrot.slane %v3173_v38, 5  ;;  %v3179_v17 = vrot.slane %v3177_v3, 4  ;;  %v8099_v53 = vpop.f32.mrb[8].mxu0  ;;  %v2179_v38 = vld [vmem:[#allocation2 + $0x90] sm:$0xf] }
 0x121   : > { %v2435_v62 = vshrl.u32 %v2176_v24, 16  ;;  %v3185_v18 = vrot.slane %v3183_v10, 5  ;;  %v2438_v5 = vshll.u32 %v2176_v24, 16  ;;  %v2444_v0 = vshll.u32 %v2177_v40, 16  ;;  %v8101_v28 = vpop.f32.mrb[9].mxu0 }
 0x122   : > { %v3171_v42 = vrot.slane %v3170_v1, 4  ;;  %v3180_v27 = vor.u32 %v3179_v17, %v3175_v60  ;;  %v2448_v21 = vshrl.u32 %v2177_v40, 16  ;;  %v2454_v35 = vshll.u32 %v2178_v56, 16  ;;  %v8105_v12 = vpop.f32.mrb[10].mxu0  ;;  %v2180_v10 = vld [vmem:[#allocation2 + $0x94] sm:$0xf] }
 0x123   : > { %v2437_v6 = vrot.slane %v2435_v62, 4  ;;  %v2440_v9 = vrot.slane %v2438_v5, 5  ;;  %v2446_v49 = vrot.slane %v2444_v0, 5  ;;  %v5922_v25 = vrot.slane %v2691_v54, 9  ;;  %v8107_v57 = vpop.f32.mrb[11].mxu0  ;;  %v7000_v0 = vld [vmem:[#allocation2 + $0x24] sm:$0xff]  }
 0x124   : > { %v3176_v45 = vsel %vm7136_vm3, %v3171_v42, %v3175_v60  ;;  %v3181_v16 = vrot.slane %v3180_v27, 4  ;;  %v2450_v2 = vrot.slane %v2448_v21, 4  ;;  %v2456_v23 = vrot.slane %v2454_v35, 5  ;;  %v2181_v60 = vld [vmem:[#allocation2 + $0x98] sm:$0x1] }
 0x125   : > { %v2833_v30 = vrot.slane %v2692_v55, 5  ;;  %v2441_v29 = vor.u32 %v2440_v9, %v2437_v6  ;;  %v2836_v51 = vrot.slane %v2693_v20, 5  ;;  %v3188_v24 = vshrl.u32 %v3097_v13, 16  ;;  %5127 = vmatmul.mubr.bf16.vlgmr.msra.gmra.mrb[80].mxu1 %v6999_v63  ;;  %v2694_v17 = vld [vmem:[#allocation2 + $0x9c] sm:$0xe] }
 0x126   : > { %v3191_v40 = vshll.u32 %v3097_v13, 16  ;;  %v3186_v15 = vsel %vm7136_vm3, %v3181_v16, %v3185_v18  ;;  %v2451_v22 = vor.u32 %v2450_v2, %v2446_v49  ;;  %v3201_v63 = vshrl.u32 %v3098_v43, 16  ;;  %v2695_v18 = vld [vmem:[#allocation2 + $0xa0] sm:$0xf] }
 0x127   : > { %5038 = vmatmul.mubr.bf16.gmra.mrb[84].mxu0 %v5904_v44  ;;  %v2834_v32 = vsel %vm7471_vm14, %v5922_v25, %v2833_v30  ;;  %v2835_v47 = vrot.slane %v2833_v30, 4  ;;  %v5960_v3 = vcombine.low %v3176_v45, %v3186_v15  ;;  %v2442_v56 = vrot.slane %v2441_v29, 4  ;;  %v2696_v25 = vld [vmem:[#allocation2 + $0xa4] sm:$0x1]  ;;  %v3100_v29 = vld [vmem:[#allocation2 + $0x3c] sm:$0xf] }
 0x128   : > { %5045 = vmatprep.mubr.bf16.mxu0 %v5937_v4  ;;  %v3190_v39 = vrot.slane %v3188_v24, 4  ;;  %v3193_v1 = vrot.slane %v3191_v40, 5  ;;  %v2452_v54 = vrot.slane %v2451_v22, 4  ;;  %v3197_v44 = vshll.u32 %v3098_v43, 16 }
 0x129   : > { %v2837_v55 = vsel %vm7471_vm14, %v2835_v47, %v2836_v51  ;;  %5134 = vmatprep.mubr.bf16.mxu1 %v5960_v3  ;;  %v2447_v62 = vsel %vm7136_vm3, %v2442_v56, %v2446_v49  ;;  %v3207_v4 = vshll.u32 %v3099_v52, 16  ;;  %v3203_v6 = vrot.slane %v3201_v63, 4 }
 0x12a   : > { %v5938_v20 = vcombine.low %v2834_v32, %v2837_v55  ;;  %v3194_v42 = vor.u32 %v3193_v1, %v3190_v39  ;;  %v2457_v5 = vsel %vm7136_vm3, %v2452_v54, %v2456_v23  ;;  %v3199_v27 = vrot.slane %v3197_v44, 5  ;;  %v3102_v1 = vld [vmem:[#allocation2 + $0x44] sm:$0x1] }
 0x12b   : > { %v2459_v21 = vshrl.u32 %v2179_v38, 16  ;;  %v5905_v35 = vcombine.low %v2447_v62, %v2457_v5  ;;  %v3209_v45 = vrot.slane %v3207_v4, 5  ;;  %v2462_v9 = vshll.u32 %v2179_v38, 16  ;;  %v3101_v38 = vld [vmem:[#allocation2 + $0x40] sm:$0xf] }
 0x12c   : > { %v3195_v13 = vrot.slane %v3194_v42, 4  ;;  %v3204_v16 = vor.u32 %v3203_v6, %v3199_v27  ;;  %v2468_v30 = vshll.u32 %v2180_v10, 16  ;;  %v2472_v49 = vshrl.u32 %v2180_v10, 16 }
 0x12d   : > { %v2461_v2 = vrot.slane %v2459_v21, 4  ;;  %v8119_v51 = vpop.f32.mrb[4].mxu1  ;;  %v2464_v23 = vrot.slane %v2462_v9, 5  ;;  %v2478_v24 = vshll.u32 %v2181_v60, 16  ;;  %v5923_v40 = vrot.slane %v2694_v17, 9  ;;  %5135 = vmatmul.mubr.bf16.gmra.mrb[84].mxu1 %v7000_v0  ;;  %v7002_v0 = vld [vmem:[#allocation2 + $0x30] sm:$0xff]  }
 0x12e   : > { %v3200_v43 = vsel %vm7136_vm3, %v3195_v13, %v3199_v27  ;;  %v8123_v15 = vpop.f32.mrb[5].mxu1  ;;  %v3205_v22 = vrot.slane %v3204_v16, 4  ;;  %v2470_v32 = vrot.slane %v2468_v30, 5  ;;  %v2474_v47 = vrot.slane %v2472_v49, 4  ;;  %v2182_v17 = vld [vmem:[#allocation2 + $0x9c] sm:$0xf] }
 0x12f   : > { %5046 = vmatmul.mubr.bf16.gmra.mrb[88].mxu0 %v5905_v35  ;;  %v2840_v52 = vrot.slane %v2695_v18, 5  ;;  %v2465_v3 = vor.u32 %v2464_v23, %v2461_v2  ;;  %v2480_v56 = vrot.slane %v2478_v24, 5  ;;  %v2843_v39 = vrot.slane %v2696_v25, 5  ;;  %v8125_v54 = vpop.f32.mrb[6].mxu1  ;;  %v2183_v35 = vld [vmem:[#allocation2 + $0xa0] sm:$0xf] }
 0x130   : > { %5053 = vmatprep.mubr.bf16.mxu0 %v5938_v20  ;;  %v3212_v10 = vshrl.u32 %v3100_v29, 16  ;;  %v3210_v55 = vsel %vm7136_vm3, %v3205_v22, %v3209_v45  ;;  %v2475_v44 = vor.u32 %v2474_v47, %v2470_v32  ;;  %v8131_v62 = vpop.f32.mrb[7].mxu1  ;;  %v3215_v18 = vshll.u32 %v3100_v29, 16  ;;  %v2184_v16 = vld [vmem:[#allocation2 + $0xa4] sm:$0x1] }
 0x131   : > { %v2841_v63 = vsel %vm7471_vm14, %v5923_v40, %v2840_v52  ;;  %v2842_v60 = vrot.slane %v2840_v52, 4  ;;  %v5961_v42 = vcombine.low %v3200_v43, %v3210_v55  ;;  %v2466_v20 = vrot.slane %v2465_v3, 4  ;;  %v2697_v2 = vld [vmem:[#allocation2 + $0xa8] sm:$0xe]  ;;  %v2698_v52 = vld [vmem:[#allocation2 + $0xac] sm:$0xf] }
 0x132   : > { %v3214_v4 = vrot.slane %v3212_v10, 4  ;;  %v2476_v5 = vrot.slane %v2475_v44, 4  ;;  %v3221_v6 = vshll.u32 %v3101_v38, 16  ;;  %v3225_v21 = vshrl.u32 %v3101_v38, 16 }
 0x133   : > { %v2844_v27 = vsel %vm7471_vm14, %v2842_v60, %v2843_v39  ;;  %5142 = vmatprep.mubr.bf16.mxu1 %v5961_v42  ;;  %v2471_v13 = vsel %vm7136_vm3, %v2466_v20, %v2470_v32  ;;  %v3217_v9 = vrot.slane %v3215_v18, 5  ;;  %v3231_v25 = vshll.u32 %v3102_v1, 16  ;;  %v2699_v1 = vld [vmem:[#allocation2 + $0xb0] sm:$0x1] }
 0x134   : > { %v5939_v45 = vcombine.low %v2841_v63, %v2844_v27  ;;  %v2481_v30 = vsel %vm7136_vm3, %v2476_v5, %v2480_v56  ;;  %v3223_v49 = vrot.slane %v3221_v6, 5  ;;  %v3227_v29 = vrot.slane %v3225_v21, 4  ;;  %v8139_v23 = vpop.f32.mrb[12].mxu0  ;;  %v3104_v6 = vld [vmem:[#allocation2 + $0x4c] sm:$0xf] }
 0x135   : > { %v2483_v43 = vshrl.u32 %v2182_v17, 16  ;;  %v5906_v24 = vcombine.low %v2471_v13, %v2481_v30  ;;  %v3218_v40 = vor.u32 %v3217_v9, %v3214_v4  ;;  %v3233_v22 = vrot.slane %v3231_v25, 5  ;;  %5143 = vmatmul.mubr.bf16.gmra.mrb[88].mxu1 %v7002_v0  ;;  %v8141_v10 = vpop.f32.mrb[13].mxu0  ;;  %v7003_v13 = vld [vmem:[#allocation2 + $0x3c] sm:$0xff]   ;;  %v3105_v25 = vld [vmem:[#allocation2 + $0x50] sm:$0x1] }
 0x136   : > { %v2486_v47 = vshll.u32 %v2182_v17, 16  ;;  %v3228_v32 = vor.u32 %v3227_v29, %v3223_v49  ;;  %v2492_v3 = vshll.u32 %v2183_v35, 16  ;;  %v2496_v39 = vshrl.u32 %v2183_v35, 16  ;;  %v3103_v17 = vld [vmem:[#allocation2 + $0x48] sm:$0xf] }
 0x137   : > { %v2485_v38 = vrot.slane %v2483_v43, 4  ;;  %5054 = vmatmul.mubr.bf16.gmra.mrb[92].mxu0 %v5906_v24  ;;  %v3219_v56 = vrot.slane %v3218_v40, 4  ;;  %v2502_v44 = vshll.u32 %v2184_v16, 16  ;;  %v5924_v63 = vrot.slane %v2697_v2, 9  ;;  %v8149_v16 = vpop.f32.mrb[14].mxu0 }
 0x138   : > { %v2488_v55 = vrot.slane %v2486_v47, 5  ;;  %5061 = vmatprep.mubr.bf16.mxu0 %v5939_v45  ;;  %v3229_v60 = vrot.slane %v3228_v32, 4  ;;  %v2494_v42 = vrot.slane %v2492_v3, 5  ;;  %v2498_v20 = vrot.slane %v2496_v39, 4  ;;  %v2185_v43 = vld [vmem:[#allocation2 + $0xa8] sm:$0xf] }
 0x139   : > { %v2847_v4 = vrot.slane %v2698_v52, 5  ;;  %v3224_v18 = vsel %vm7136_vm3, %v3219_v56, %v3223_v49  ;;  %v2504_v0 = vrot.slane %v2502_v44, 5  ;;  %v2850_v27 = vrot.slane %v2699_v1, 5  ;;  %v8151_v24 = vpop.f32.mrb[15].mxu0  ;;  %v2186_v1 = vld [vmem:[#allocation2 + $0xac] sm:$0xf] }
 0x13a   : > { %v2489_v5 = vor.u32 %v2488_v55, %v2485_v38  ;;  %v3234_v21 = vsel %vm7136_vm3, %v3229_v60, %v3233_v22  ;;  %v2499_v35 = vor.u32 %v2498_v20, %v2494_v42  ;;  %v3236_v29 = vshrl.u32 %v3103_v17, 16  ;;  %v2187_v60 = vld [vmem:[#allocation2 + $0xb0] sm:$0x1] }
 0x13b   : > { %v2848_v45 = vsel %vm7471_vm14, %v5924_v63, %v2847_v4  ;;  %v2849_v9 = vrot.slane %v2847_v4, 4  ;;  %v5962_v2 = vcombine.low %v3224_v18, %v3234_v21  ;;  %v3239_v49 = vshll.u32 %v3103_v17, 16 }
 0x13c   : > { %v2490_v30 = vrot.slane %v2489_v5, 4  ;;  %v2500_v40 = vrot.slane %v2499_v35, 4  ;;  %v3245_v47 = vshll.u32 %v3104_v6, 16  ;;  %v3249_v52 = vshrl.u32 %v3104_v6, 16  ;;  %v2700_v5 = vld [vmem:[#allocation2 + $0xb4] sm:$0xe] }
 0x13d   : > { %v2851_v22 = vsel %vm7471_vm14, %v2849_v9, %v2850_v27  ;;  %5150 = vmatprep.mubr.bf16.mxu1 %v5962_v2  ;;  %v3238_v3 = vrot.slane %v3236_v29, 4  ;;  %v3241_v39 = vrot.slane %v3239_v49, 5  ;;  %v3255_v63 = vshll.u32 %v3105_v25, 16  ;;  %v2701_v27 = vld [vmem:[#allocation2 + $0xb8] sm:$0xf] }
 0x13e   : > { %v2495_v32 = vsel %vm7136_vm3, %v2490_v30, %v2494_v42  ;;  %v5940_v38 = vcombine.low %v2848_v45, %v2851_v22  ;;  %v2505_v56 = vsel %vm7136_vm3, %v2500_v40, %v2504_v0  ;;  %5151 = vmatmul.mubr.bf16.gmra.mrb[92].mxu1 %v7003_v13  ;;  %v3247_v55 = vrot.slane %v3245_v47, 5  ;;  %v2702_v45 = vld [vmem:[#allocation2 + $0xbc] sm:$0x1]  ;;  %v3106_v25 = vld [vmem:[#allocation2 + $0x54] sm:$0xf] }
 0x13f   : > { %v3251_v44 = vrot.slane %v3249_v52, 4  ;;  %v5907_v20 = vcombine.low %v2495_v32, %v2505_v56  ;;  %v3242_v4 = vor.u32 %v3241_v39, %v3238_v3  ;;  %v2507_v17 = vshrl.u32 %v2185_v43, 16  ;;  %v3107_v39 = vld [vmem:[#allocation2 + $0x58] sm:$0xf] }
 0x140   : > { %v2510_v18 = vshll.u32 %v2185_v43, 16  ;;  %v3257_v42 = vrot.slane %v3255_v63, 5  ;;  %v2516_v21 = vshll.u32 %v2186_v1, 16  ;;  %v2520_v35 = vshrl.u32 %v2186_v1, 16  ;;  %v8159_v9 = vpop.f32.mrb[8].mxu1  ;;  %v7005_v43 = vld [vmem:[#allocation2 + $0x48] sm:$0xff]  }
 0x141   : > { %v3252_v6 = vor.u32 %v3251_v44, %v3247_v55  ;;  %5062 = vmatmul.mubr.bf16.gmra.mrb[96].mxu0 %v5907_v20  ;;  %v3243_v0 = vrot.slane %v3242_v4, 4  ;;  %v2509_v13 = vrot.slane %v2507_v17, 4  ;;  %v2526_v30 = vshll.u32 %v2187_v60, 16  ;;  %v3108_v63 = vld [vmem:[#allocation2 + $0x5c] sm:$0x1] }
 0x142   : > { %v2512_v2 = vrot.slane %v2510_v18, 5  ;;  %5069 = vmatprep.mubr.bf16.mxu0 %v5940_v38  ;;  %v2518_v49 = vrot.slane %v2516_v21, 5  ;;  %v2522_v40 = vrot.slane %v2520_v35, 4  ;;  %v5925_v22 = vrot.slane %v2700_v5, 9  ;;  %v2188_v18 = vld [vmem:[#allocation2 + $0xb4] sm:$0xf] }
 0x143   : > { %v3253_v29 = vrot.slane %v3252_v6, 4  ;;  %v3248_v47 = vsel %vm7136_vm3, %v3243_v0, %v3247_v55  ;;  %v2528_v32 = vrot.slane %v2526_v30, 5  ;;  %v2854_v3 = vrot.slane %v2701_v27, 5  ;;  %v2189_v27 = vld [vmem:[#allocation2 + $0xb8] sm:$0xf] }
 0x144   : > { %v2513_v52 = vor.u32 %v2512_v2, %v2509_v13  ;;  %v2523_v56 = vor.u32 %v2522_v40, %v2518_v49  ;;  %v2857_v44 = vrot.slane %v2702_v45, 5  ;;  %v3260_v60 = vshrl.u32 %v3106_v25, 16  ;;  %v2190_v13 = vld [vmem:[#allocation2 + $0xbc] sm:$0x1]  ;;  %v517_v2 = vld [vmem:[#allocation2 + $0xc8] sm:$0x1] }
 0x145   : > { %v3258_v1 = vsel %vm7136_vm3, %v3253_v29, %v3257_v42  ;;  %v2855_v4 = vsel %vm7471_vm14, %v5925_v22, %v2854_v3  ;;  %v2856_v17 = vrot.slane %v2854_v3, 4  ;;  %v3263_v6 = vshll.u32 %v3106_v25, 16  ;;  %v2703_v22 = vld [vmem:[#allocation2 + $0xc0] sm:$0xe] }
 0x146   : > { %v5963_v38 = vcombine.low %v3248_v47, %v3258_v1  ;;  %v2514_v20 = vrot.slane %v2513_v52, 4  ;;  %v2524_v5 = vrot.slane %v2523_v56, 4  ;;  %v3262_v55 = vrot.slane %v3260_v60, 4  ;;  %v2704_v47 = vld [vmem:[#allocation2 + $0xc4] sm:$0xf]  ;;  %v8173_v56 = vpop.f32.mrb[9].mxu1 }
 0x147   : > { %v3269_v21 = vshll.u32 %v3107_v39, 16  ;;  %v2858_v35 = vsel %vm7471_vm14, %v2856_v17, %v2857_v44  ;;  %v3273_v45 = vshrl.u32 %v3107_v39, 16  ;;  %v3279_v0 = vshll.u32 %v3108_v63, 16  ;;  %v3109_v17 = vld [vmem:[#allocation2 + $0x60] sm:$0xf] }
 0x148   : > { %5158 = vmatprep.mubr.bf16.mxu1 %v5963_v38  ;;  %v2519_v42 = vsel %vm7136_vm3, %v2514_v20, %v2518_v49  ;;  %v2529_v30 = vsel %vm7136_vm3, %v2524_v5, %v2528_v32  ;;  %v5941_v29 = vcombine.low %v2855_v4, %v2858_v35  ;;  %v3265_v40 = vrot.slane %v3263_v6, 5  ;;  %v8175_v38 = vpop.f32.mrb[10].mxu1 }
 0x149   : > { %5159 = vmatmul.mubr.bf16.gmra.mrb[96].mxu1 %v7005_v43  ;;  %v3271_v25 = vrot.slane %v3269_v21, 5  ;;  %v5908_v52 = vcombine.low %v2519_v42, %v2529_v30  ;;  %v3275_v3 = vrot.slane %v3273_v45, 4  ;;  %v3281_v1 = vrot.slane %v3279_v0, 5  ;;  %v8179_v5 = vpop.f32.mrb[11].mxu1 }
 0x14a   : > { %v2531_v49 = vshrl.u32 %v2188_v18, 16  ;;  %v3266_v44 = vor.u32 %v3265_v40, %v3262_v55  ;;  %v2534_v39 = vshll.u32 %v2188_v18, 16  ;;  %v2540_v63 = vshll.u32 %v2189_v27, 16 }
 0x14b   : > { %v2544_v60 = vshrl.u32 %v2189_v27, 16  ;;  %5070 = vmatmul.mubr.bf16.gmra.mrb[100].mxu0 %v5908_v52  ;;  %v3276_v32 = vor.u32 %v3275_v3, %v3271_v25  ;;  %v2550_v20 = vshll.u32 %v2190_v13, 16  ;;  %v518_v4 = vsel %vm7160_vm7, 0, %v517_v2  ;;  %v3111_v2 = vld [vmem:[#allocation2 + $0x68] sm:$0x1]  ;;  %v8183_v52 = vpop.f32.mrb[16].mxu0 }
 0x14c   : > { %v2533_v43 = vrot.slane %v2531_v49, 4  ;;  %5077 = vmatprep.mubr.bf16.mxu0 %v5941_v29  ;;  %v3267_v6 = vrot.slane %v3266_v44, 4  ;;  %v2536_v21 = vrot.slane %v2534_v39, 5  ;;  %v2542_v42 = vrot.slane %v2540_v63, 5  ;;  %519 = vst [vmem:[#allocation2 + $0xc8] sm:$0x1] %v518_v4 }
 0x14d   : > { %v2546_v55 = vrot.slane %v2544_v60, 4  ;;  %v3277_v18 = vrot.slane %v3276_v32, 4  ;;  %v2552_v27 = vrot.slane %v2550_v20, 5  ;;  %v5926_v35 = vrot.slane %v2703_v22, 9  ;;  %v7006_v3 = vld [vmem:[#allocation2 + $0x54] sm:$0xff]   ;;  %v8193_v32 = vpop.f32.mrb[17].mxu0 }
 0x14e   : > { %v2861_v45 = vrot.slane %v2704_v47, 5  ;;  %v3272_v0 = vsel %vm7136_vm3, %v3267_v6, %v3271_v25  ;;  %v2537_v13 = vor.u32 %v2536_v21, %v2533_v43  ;;  %v3284_v40 = vshrl.u32 %v3109_v17, 16  ;;  %v2191_v44 = vld [vmem:[#allocation2 + $0xc0] sm:$0xf] }
 0x14f   : > { %v2547_v30 = vor.u32 %v2546_v55, %v2542_v42  ;;  %v3282_v29 = vsel %vm7136_vm3, %v3277_v18, %v3281_v1  ;;  %v3287_v47 = vshll.u32 %v3109_v17, 16  ;;  %v3293_v20 = vshll.u32 %v3110_v46, 16  ;;  %v2192_v1 = vld [vmem:[#allocation2 + $0xc4] sm:$0xf] }
 0x150   : > { %v8189_v49 = vsel %vm7471_vm14, %v5926_v35, %v2861_v45  ;;  %v8191_v22 = vrot.slane %v2861_v45, 4  ;;  %v5964_v25 = vcombine.low %v3272_v0, %v3282_v29  ;;  %v2538_v39 = vrot.slane %v2537_v13, 4 }
 0x151   : > { %v2548_v63 = vrot.slane %v2547_v30, 4  ;;  %v3286_v60 = vrot.slane %v3284_v40, 4  ;;  %v3289_v43 = vrot.slane %v3287_v47, 5  ;;  %v3297_v4 = vshrl.u32 %v3110_v46, 16 }
 0x152   : > { %v3303_v6 = vshll.u32 %v3111_v2, 16  ;;  %5166 = vmatprep.mubr.bf16.mxu1 %v5964_v25  ;;  %v2543_v21 = vsel %vm7136_vm3, %v2538_v39, %v2542_v42  ;;  %v2555_v17 = vshrl.u32 %v2191_v44, 16  ;;  %v2558_v18 = vshll.u32 %v2191_v44, 16  ;;  %v3112_v25 = vld [vmem:[#allocation2 + $0x6c] sm:$0xf] }
 0x153   : > { %v2553_v55 = vsel %vm7136_vm3, %v2548_v63, %v2552_v27  ;;  %5167 = vmatmul.mubr.bf16.gmra.mrb[100].mxu1 %v7006_v3  ;;  %v1049_v45 = vld [vmem:[#allocation2 + $0xc8] sm:$0x1]  ;;  %v3290_v0 = vor.u32 %v3289_v43, %v3286_v60  ;;  %v3295_v13 = vrot.slane %v3293_v20, 5  ;;  %v3299_v30 = vrot.slane %v3297_v4, 4  ;;  %v3113_v60 = vld [vmem:[#allocation2 + $0x70] sm:$0xf] }
 0x154   : > { %v5909_v35 = vcombine.low %v2543_v21, %v2553_v55  ;;  %v1050_v46 = vsel %vm7151_vm5, %v889_v7, %v1049_v45  ;;  %v3305_v2 = vrot.slane %v3303_v6, 5  ;;  %v2557_v40 = vrot.slane %v2555_v17, 4  ;;  %v8203_v42 = vpop.f32.mrb[12].mxu1  ;;  %v3114_v21 = vld [vmem:[#allocation2 + $0x74] sm:$0x1] }
 0x155   : > { %v2560_v29 = vrot.slane %v2558_v18, 5  ;;  %1051 = vst [vmem:[#allocation2 + $0xc8] sm:$0x1] %v1050_v46  ;;  %v3291_v27 = vrot.slane %v3290_v0, 4  ;;  %v3300_v47 = vor.u32 %v3299_v30, %v3295_v13  ;;  %v2564_v44 = vshll.u32 %v2192_v1, 16  ;;  %v8205_v39 = vpop.f32.mrb[13].mxu1 }
 0x156   : > { %5078 = vmatmul.mubr.bf16.gmra.mrb[104].mxu0 %v5909_v35  ;;  %v2568_v3 = vshrl.u32 %v2192_v1, 16  ;;  %v8209_v59 = vadd.f32 %v7966_v26, %v7964_v58  ;;  %v8213_v41 = vadd.f32 %v7995_v11, %v7976_v37  ;;  %v8217_v7 = vadd.f32 %v8071_v61, %v8057_v19  ;;  %v7008_v1 = vld [vmem:[#allocation2 + $0x60] sm:$0xff]   ;;  %v8223_v58 = vpop.f32.mrb[14].mxu1  ;;  %v3603_v61 = vld [vmem:[#allocation2 + $0x18] sm:$0xe] }
 0x157   : > { %v2561_v63 = vor.u32 %v2560_v29, %v2557_v40  ;;  %v3296_v43 = vsel %vm7136_vm3, %v3291_v27, %v3295_v13  ;;  %v3301_v20 = vrot.slane %v3300_v47, 4  ;;  %v8221_v4 = vrot.slane %v2564_v44, 5  ;;  %v8231_v55 = vpop.f32.mrb[15].mxu1  ;;  %v3604_v0 = vld [vmem:[#allocation2 + $0x1c] sm:$0xf] }
 0x158   : > { %8914 = vst [vmem:[#allocation4_spill] sm:$0xff] %v8217_v7  ;;  %v2570_v6 = vrot.slane %v2568_v3, 4  ;;  %v8229_v37 = vadd.f32 %v8075_v34, %v8073_v48  ;;  %v3308_v11 = vshrl.u32 %v3112_v25, 16  ;;  %v3311_v19 = vshll.u32 %v3112_v25, 16  ;;  %v3605_v46 = vld [vmem:[#allocation2 + $0x20] sm:$0x1] }
 0x159   : > { %v8225_v26 = vrot.slane %v2561_v63, 4  ;;  %v3306_v17 = vsel %vm7136_vm3, %v3301_v20, %v3305_v2  ;;  %v3317_v35 = vshll.u32 %v3113_v60, 16  ;;  %v3321_v45 = vshrl.u32 %v3113_v60, 16  ;;  %v3606_v44 = vld [vmem:[#allocation2 + $0x24] sm:$0xe] }
 0x15a   : > { %8915 = vst [vmem:[#allocation5_spill] sm:$0xff] %v8229_v37  ;;  %v2571_v18 = vor.u32 %v2570_v6, %v8221_v4  ;;  %v5965_v13 = vcombine.low %v3296_v43, %v3306_v17  ;;  %v3310_v34 = vrot.slane %v3308_v11, 4  ;;  %v3313_v30 = vrot.slane %v3311_v19, 5  ;;  %v3607_v11 = vld [vmem:[#allocation2 + $0x28] sm:$0xf]  ;;  %v8244_v19 = vpop.f32.mrb[18].mxu0 }
 0x15b   : > { %v2567_v48 = vsel %vm7136_vm3, %v8225_v26, %v8221_v4  ;;  %v3319_v29 = vrot.slane %v3317_v35, 5  ;;  %v3323_v27 = vrot.slane %v3321_v45, 4  ;;  %v3327_v47 = vshll.u32 %v3114_v21, 16  ;;  %v8248_v45 = vpop.f32.mrb[19].mxu0 }
 0x15c   : > { %v2572_v40 = vrot.slane %v2571_v18, 4  ;;  %v2705_v2 = vld [vmem:[#allocation2 + $0xc8] sm:$0x1]  ;;  %5174 = vmatprep.mubr.bf16.mxu1 %v5965_v13  ;;  %v3314_v25 = vor.u32 %v3313_v30, %v3310_v34  ;;  %v5975_v63 = vrot.slane %v3603_v61, 9  ;;  %v3701_v60 = vrot.slane %v3604_v0, 5  ;;  %v7009_v0 = vld [vmem:[#allocation2 + $0x6c] sm:$0xff]  }
 0x15d   : > { %v2193_v3 = vld [vmem:[#allocation2 + $0xc8] sm:$0x1]  ;;  %v8242_v43 = vadd.f32 %v8053_v14, %v8049_v33  ;;  %v2864_v20 = vrot.slane %v2705_v2, 5  ;;  %5175 = vmatmul.mubr.bf16.gmra.mrb[104].mxu1 %v7008_v1  ;;  %v3324_v6 = vor.u32 %v3323_v27, %v3319_v29  ;;  %v3329_v26 = vrot.slane %v3327_v47, 5  ;;  %v3608_v61 = vld [vmem:[#allocation2 + $0x2c] sm:$0x1] }
 0x15e   : > { %v2574_v4 = vshll.u32 %v2193_v3, 16  ;;  %v3315_v21 = vrot.slane %v3314_v25, 4  ;;  %v3702_v17 = vsel %vm7471_vm14, %v5975_v63, %v3701_v60  ;;  %v3703_v18 = vrot.slane %v3701_v60, 4  ;;  %v3115_v34 = vld [vmem:[#allocation2 + $0x78] sm:$0xf]  ;;  %v8253_v30 = vpop.f32.mrb[16].mxu1 }
 0x15f   : > { %v3704_v35 = vrot.slane %v3605_v46, 5  ;;  %v2865_v33 = vsel %vm7471_vm14, %v8191_v22, %v2864_v20  ;;  %v3325_v1 = vrot.slane %v3324_v6, 4  ;;  %v5976_v13 = vrot.slane %v3606_v44, 9  ;;  %v3116_v3 = vld [vmem:[#allocation2 + $0x7c] sm:$0xf]  ;;  %v8260_v63 = vpop.f32.mrb[17].mxu1 }
 0x160   : > { %v2576_v14 = vrot.slane %v2574_v4, 5  ;;  %v5942_v27 = vcombine.low %v8189_v49, %v2865_v33  ;;  %v3320_v47 = vsel %vm7136_vm3, %v3315_v21, %v3319_v29  ;;  %v3708_v2 = vrot.slane %v3607_v11, 5  ;;  %v3117_v25 = vld [vmem:[#allocation2 + $0x80] sm:$0x1]  ;;  %v3609_v49 = vld [vmem:[#allocation2 + $0x30] sm:$0xe] }
 0x161   : > { %v3705_v46 = vsel %vm7471_vm14, %v3703_v18, %v3704_v35  ;;  %v3330_v44 = vsel %vm7136_vm3, %v3325_v1, %v3329_v26  ;;  %v3711_v20 = vrot.slane %v3608_v61, 5  ;;  %v3610_v4 = vld [vmem:[#allocation2 + $0x34] sm:$0xf]  ;;  %v8266_v6 = vpop.f32.mrb[18].mxu1  ;;  %v8278_v26 = vadd.f32 %v8123_v15, %v8119_v51  ;;  %v3611_v61 = vld [vmem:[#allocation2 + $0x38] sm:$0x1] }
 0x162   : > { %v2577_v22 = vsel %vm7136_vm3, %v2572_v40, %v2576_v14  ;;  %v5991_v60 = vcombine.low %v3702_v17, %v3705_v46  ;;  %5085 = vmatprep.mubr.bf16.mxu0 %v5942_v27  ;;  %v5966_v21 = vcombine.low %v3320_v47, %v3330_v44  ;;  %v3709_v11 = vsel %vm7471_vm14, %v5976_v13, %v3708_v2  ;;  %v8270_v35 = vpop.f32.mrb[19].mxu1  ;;  %v3612_v33 = vld [vmem:[#allocation2 + $0x3c] sm:$0xe]  ;;  %v8284_v14 = vpop.f32.mrb[20].mxu0  ;;  %v3613_v27 = vld [vmem:[#allocation2 + $0x40] sm:$0xf] }
 0x163   : > { %v5910_v29 = vcombine.low %v2567_v48, %v2577_v22  ;;  %v3710_v18 = vrot.slane %v3708_v2, 4  ;;  %v8274_v40 = vadd.f32 %v8087_v36, %v8079_v8  ;;  %8916 = vst [vmem:[#allocation6_spill] sm:$0xff] %v8278_v26  ;;  %v8282_v17 = vadd.f32 %v8131_v62, %v8125_v54  ;;  %v8288_v51 = vpop.f32.mrb[21].mxu0 }
 0x164   : > { %v3332_v48 = vshrl.u32 %v3115_v34, 16  ;;  %5182 = vmatprep.mubr.bf16.mxu1 %v5966_v21  ;;  %v3335_v8 = vshll.u32 %v3115_v34, 16  ;;  %v3341_v36 = vshll.u32 %v3116_v3, 16  ;;  %v3345_v13 = vshrl.u32 %v3116_v3, 16  ;;  %v8290_v46 = vpop.f32.mrb[22].mxu0 }
 0x165   : > { %8917 = vst [vmem:[#allocation7_spill] sm:$0xff] %v8282_v17  ;;  %5086 = vmatmul.mubr.bf16.gmra.mrb[108].mxu0 %v5910_v29  ;;  %v3712_v1 = vsel %vm7471_vm14, %v3710_v18, %v3711_v20  ;;  %5183 = vmatmul.mubr.bf16.gmra.mrb[108].mxu1 %v7009_v0  ;;  %v3351_v62 = vshll.u32 %v3117_v25, 16  ;;  %v5977_v47 = vrot.slane %v3609_v49, 9  ;;  %v3715_v29 = vrot.slane %v3610_v4, 5  ;;  %v3614_v21 = vld [vmem:[#allocation2 + $0x44] sm:$0x1] }
 0x166   : > { %6841 = vmatprep.mubr.bf16.mxu0 %v5991_v60  ;;  %v5992_v15 = vcombine.low %v3709_v11, %v3712_v1  ;;  %v3334_v54 = vrot.slane %v3332_v48, 4  ;;  %v3337_v2 = vrot.slane %v3335_v8, 5  ;;  %v3343_v22 = vrot.slane %v3341_v36, 5  ;;  %v3118_v11 = vld [vmem:[#allocation2 + $0x84] sm:$0xf]  ;;  %v8294_v49 = vpop.f32.mrb[23].mxu0 }
 0x167   : > { %v3347_v44 = vrot.slane %v3345_v13, 4  ;;  %v3353_v20 = vrot.slane %v3351_v62, 5  ;;  %v3718_v34 = vrot.slane %v3611_v61, 5  ;;  %v5978_v18 = vrot.slane %v3612_v33, 9  ;;  %v3119_v25 = vld [vmem:[#allocation2 + $0x88] sm:$0xf] }
 0x168   : > { %v3722_v3 = vrot.slane %v3613_v27, 5  ;;  %v3338_v17 = vor.u32 %v3337_v2, %v3334_v54  ;;  %v3716_v0 = vsel %vm7471_vm14, %v5977_v47, %v3715_v29  ;;  %v3717_v60 = vrot.slane %v3715_v29, 4  ;;  %v3120_v33 = vld [vmem:[#allocation2 + $0x8c] sm:$0x1]  ;;  %v3615_v54 = vld [vmem:[#allocation2 + $0x48] sm:$0xe] }
 0x169   : > { %v3348_v26 = vor.u32 %v3347_v44, %v3343_v22  ;;  %v3725_v1 = vrot.slane %v3614_v21, 5  ;;  %v8302_v61 = vadd.f32 %v8101_v28, %v8099_v53  ;;  %v8308_v27 = vadd.f32 %v8107_v57, %v8105_v12  ;;  %v7010_v47 = vld [vmem:[#allocation2 + $0x78] sm:$0xff]   ;;  %v8320_v44 = vpop.f32.mrb[20].mxu1 }
 0x16a   : > { %v8298_v48 = vsel %vm7471_vm14, %v5978_v18, %v3722_v3  ;;  %v3724_v4 = vrot.slane %v3722_v3, 4  ;;  %v3339_v8 = vrot.slane %v3338_v17, 4  ;;  %v3719_v13 = vsel %vm7471_vm14, %v3717_v60, %v3718_v34  ;;  %v3617_v17 = vld [vmem:[#allocation2 + $0x50] sm:$0x1]  ;;  %v8327_v34 = vpop.f32.mrb[21].mxu1 }
 0x16b   : > { %v3349_v36 = vrot.slane %v3348_v26, 4  ;;  %v5993_v62 = vcombine.low %v3716_v0, %v3719_v13  ;;  %v8314_v53 = vadd.f32 %v8173_v56, %v8159_v9  ;;  %v8318_v28 = vadd.f32 %v8179_v5, %v8175_v38  ;;  %v3616_v26 = vld [vmem:[#allocation2 + $0x4c] sm:$0xf]  ;;  %v3618_v9 = vld [vmem:[#allocation2 + $0x54] sm:$0xe] }
 0x16c   : > { %v3726_v2 = vsel %vm7471_vm14, %v3724_v4, %v3725_v1  ;;  %v3344_v12 = vsel %vm7136_vm3, %v3339_v8, %v3343_v22  ;;  %v3356_v21 = vshrl.u32 %v3118_v11, 16  ;;  %v3619_v56 = vld [vmem:[#allocation2 + $0x58] sm:$0xf]  ;;  %v3359_v5 = vshll.u32 %v3118_v11, 16  ;;  %v3620_v0 = vld [vmem:[#allocation2 + $0x5c] sm:$0x1] }
 0x16d   : > { %8918 = vst [vmem:[#allocation8_spill] sm:$0xff] %v8314_v53  ;;  %8919 = vst [vmem:[#allocation9_spill] sm:$0xff] %v8318_v28  ;;  %6842 = vmatmul.mubr.bf16.vlgmr.msra.gmra.mrb[112].mxu0 %v5992_v15  ;;  %v3354_v57 = vsel %vm7136_vm3, %v3349_v36, %v3353_v20  ;;  %v5994_v29 = vcombine.low %v8298_v48, %v3726_v2  ;;  %v3365_v18 = vshll.u32 %v3119_v25, 16  ;;  %v3369_v3 = vshrl.u32 %v3119_v25, 16  ;;  %v8329_v15 = vpop.f32.mrb[22].mxu1 }
 0x16e   : > { %v5967_v38 = vcombine.low %v3344_v12, %v3354_v57  ;;  %6845 = vmatprep.mubr.bf16.mxu0 %v5993_v62  ;;  %v3358_v60 = vrot.slane %v3356_v21, 4  ;;  %v3375_v22 = vshll.u32 %v3120_v33, 16  ;;  %v5979_v4 = vrot.slane %v3615_v54, 9  ;;  %v8331_v20 = vpop.f32.mrb[23].mxu1  ;;  %v3121_v28 = vld [vmem:[#allocation2 + $0x90] sm:$0xf] }
 0x16f   : > { %v3729_v1 = vrot.slane %v3616_v26, 5  ;;  %v3361_v8 = vrot.slane %v3359_v5, 5  ;;  %v3367_v36 = vrot.slane %v3365_v18, 5  ;;  %v3371_v13 = vrot.slane %v3369_v3, 4  ;;  %v3122_v5 = vld [vmem:[#allocation2 + $0x94] sm:$0xf] }
 0x170   : > { %v8333_v48 = vpop.f32.mrb[24].mxu0  ;;  %5190 = vmatprep.mubr.bf16.mxu1 %v5967_v38  ;;  %v3732_v2 = vrot.slane %v3617_v17, 5  ;;  %v3377_v11 = vrot.slane %v3375_v22, 5  ;;  %v5980_v12 = vrot.slane %v3618_v9, 9  ;;  %v3736_v26 = vrot.slane %v3619_v56, 5 }
 0x171   : > { %5191 = vmatmul.mubr.bf16.gmra.mrb[112].mxu1 %v7010_v47  ;;  %v3730_v25 = vsel %vm7471_vm14, %v5979_v4, %v3729_v1  ;;  %v3731_v62 = vrot.slane %v3729_v1, 4  ;;  %v8337_v57 = vpop.f32.mrb[25].mxu0  ;;  %v3362_v33 = vor.u32 %v3361_v8, %v3358_v60  ;;  %v3372_v54 = vor.u32 %v3371_v13, %v3367_v36  ;;  %v3123_v18 = vld [vmem:[#allocation2 + $0x98] sm:$0x1]  ;;  %v3621_v22 = vld [vmem:[#allocation2 + $0x60] sm:$0xe] }
 0x172   : > { %v3739_v21 = vrot.slane %v3620_v0, 5  ;;  %v8343_v17 = vadd.f32 %v8141_v10, %v8139_v23  ;;  %v8347_v47 = vadd.f32 %v8151_v24, %v8149_v16  ;;  %v8351_v9 = vadd.f32 %v8205_v39, %v8203_v42  ;;  %v3622_v4 = vld [vmem:[#allocation2 + $0x64] sm:$0xf]  ;;  %v3623_v23 = vld [vmem:[#allocation2 + $0x68] sm:$0x1]  ;;  %v8355_v10 = vpop.f32.mrb[26].mxu0 }
 0x173   : > { %v3733_v38 = vsel %vm7471_vm14, %v3731_v62, %v3732_v2  ;;  %v3363_v56 = vrot.slane %v3362_v33, 4  ;;  %v3373_v3 = vrot.slane %v3372_v54, 4  ;;  %v3737_v60 = vsel %vm7471_vm14, %v5980_v12, %v3736_v26  ;;  %v8357_v1 = vpop.f32.mrb[24].mxu1  ;;  %v8363_v8 = vpop.f32.mrb[27].mxu0  ;;  %v7011_v62 = vld [vmem:[#allocation2 + $0x84] sm:$0xff]  }
 0x174   : > { %8920 = vst [vmem:[#allocation10_spill] sm:$0xff] %v8347_v47  ;;  %8921 = vst [vmem:[#allocation11_spill] sm:$0xff] %v8351_v9  ;;  %v5995_v0 = vcombine.low %v3730_v25, %v3733_v38  ;;  %v3738_v16 = vrot.slane %v3736_v26, 4  ;;  %v8361_v24 = vadd.f32 %v8231_v55, %v8223_v58  ;;  %v3380_v42 = vshrl.u32 %v3121_v28, 16  ;;  %v8365_v13 = vpop.f32.mrb[25].mxu1 }
 0x175   : > { %6846 = vmatmul.mubr.bf16.gmra.mrb[116].mxu0 %v5994_v29  ;;  %v3383_v39 = vshll.u32 %v3121_v28, 16  ;;  %v3368_v2 = vsel %vm7136_vm3, %v3363_v56, %v3367_v36  ;;  %v3378_v25 = vsel %vm7136_vm3, %v3373_v3, %v3377_v11  ;;  %v3389_v29 = vshll.u32 %v3122_v5, 16  ;;  %v3624_v33 = vld [vmem:[#allocation2 + $0x6c] sm:$0xe]  ;;  %v8371_v54 = vpop.f32.mrb[26].mxu1 }
 0x176   : > { %8922 = vst [vmem:[#allocation12_spill] sm:$0xff] %v8361_v24  ;;  %6849 = vmatprep.mubr.bf16.mxu0 %v5995_v0  ;;  %v3393_v12 = vshrl.u32 %v3122_v5, 16  ;;  %v5968_v58 = vcombine.low %v3368_v2, %v3378_v25  ;;  %v3740_v55 = vsel %vm7471_vm14, %v3738_v16, %v3739_v21  ;;  %v3382_v28 = vrot.slane %v3380_v42, 4  ;;  %v3625_v38 = vld [vmem:[#allocation2 + $0x70] sm:$0xf]  ;;  %v8375_v24 = vpop.f32.mrb[27].mxu1 }
 0x177   : > { %v3385_v26 = vrot.slane %v3383_v39, 5  ;;  %v5996_v56 = vcombine.low %v3737_v60, %v3740_v55  ;;  %v3391_v11 = vrot.slane %v3389_v29, 5  ;;  %v3399_v0 = vshll.u32 %v3123_v18, 16  ;;  %v3626_v9 = vld [vmem:[#allocation2 + $0x74] sm:$0x1] }
 0x178   : > { %v8377_v36 = vpop.f32.mrb[28].mxu0  ;;  %v3395_v3 = vrot.slane %v3393_v12, 4  ;;  %5198 = vmatprep.mubr.bf16.mxu1 %v5968_v58  ;;  %v5981_v2 = vrot.slane %v3621_v22, 9  ;;  %v3743_v25 = vrot.slane %v3622_v4, 5  ;;  %v3746_v37 = vrot.slane %v3623_v23, 5  ;;  %v8387_v22 = vpop.f32.mrb[28].mxu1 }
 0x179   : > { %v8379_v5 = vpop.f32.mrb[29].mxu0  ;;  %v3386_v53 = vor.u32 %v3385_v26, %v3382_v28  ;;  %5199 = vmatmul.mubr.bf16.gmra.mrb[116].mxu1 %v7011_v62  ;;  %v3401_v42 = vrot.slane %v3399_v0, 5  ;;  %v5982_v39 = vrot.slane %v3624_v33, 9  ;;  %v3750_v7 = vrot.slane %v3625_v38, 5  ;;  %v3124_v47 = vld [vmem:[#allocation2 + $0x9c] sm:$0xf] }
 0x17a   : > { %v8381_v21 = vpop.f32.mrb[30].mxu0  ;;  %v3396_v16 = vor.u32 %v3395_v3, %v3391_v11  ;;  %v3744_v18 = vsel %vm7471_vm14, %v5981_v2, %v3743_v25  ;;  %v3745_v12 = vrot.slane %v3743_v25, 4  ;;  %v3753_v58 = vrot.slane %v3626_v9, 5  ;;  %v3125_v55 = vld [vmem:[#allocation2 + $0xa0] sm:$0xf] }
 0x17b   : > { %v8383_v60 = vpop.f32.mrb[31].mxu0  ;;  %v3387_v29 = vrot.slane %v3386_v53, 4  ;;  %v3751_v23 = vsel %vm7471_vm14, %v5982_v39, %v3750_v7  ;;  %v3752_v62 = vrot.slane %v3750_v7, 4  ;;  %v8393_v33 = vadd.f32 %v8193_v32, %v8183_v52  ;;  %v3126_v38 = vld [vmem:[#allocation2 + $0xa4] sm:$0x1] }
 0x17c   : > { %v3397_v4 = vrot.slane %v3396_v16, 4  ;;  %v3747_v28 = vsel %vm7471_vm14, %v3745_v12, %v3746_v37  ;;  %v8401_v9 = vadd.f32 %v8248_v45, %v8244_v19  ;;  %v6483_v26 = vadd.f32 %v8260_v63, %v8253_v30  ;;  %v3627_v7 = vld [vmem:[#allocation2 + $0x78] sm:$0xe]  ;;  %v3628_v3 = vld [vmem:[#allocation2 + $0x7c] sm:$0xf]  ;;  %v8411_v45 = vpop.f32.mrb[29].mxu1 }
 0x17d   : > { %6850 = vmatmul.mubr.bf16.gmra.mrb[120].mxu0 %v5996_v56  ;;  %v3392_v53 = vsel %vm7136_vm3, %v3387_v29, %v3391_v11  ;;  %v5997_v32 = vcombine.low %v3744_v18, %v3747_v28  ;;  %v7012_v56 = vld [vmem:[#allocation2 + $0x90] sm:$0xff]   ;;  %v3754_v11 = vsel %vm7471_vm14, %v3752_v62, %v3753_v58  ;;  %v6486_v37 = vadd.f32 %v8270_v35, %v8266_v6  ;;  %v3629_v0 = vld [vmem:[#allocation2 + $0x80] sm:$0x1]  ;;  %v3630_v19 = vld [vmem:[#allocation2 + $0x84] sm:$0xe]  ;;  %v8418_v39 = vpop.f32.mrb[30].mxu1 }
 0x17e   : > { %v3402_v52 = vsel %vm7136_vm3, %v3397_v4, %v3401_v42  ;;  %v5998_v30 = vcombine.low %v3751_v23, %v3754_v11  ;;  %v8414_v63 = vadd.f32 %v6483_v26, %v8209_v59  ;;  %v3404_v25 = vshrl.u32 %v3124_v47, 16  ;;  %v3631_v16 = vld [vmem:[#allocation2 + $0x88] sm:$0xf]  ;;  %v8416_v42 = vld [vmem:[#allocation2 + $0x8c] sm:$0x1]  ;;  %v8423_v12 = vpop.f32.mrb[31].mxu1 }
 0x17f   : > { %v5969_v2 = vcombine.low %v3392_v53, %v3402_v52  ;;  %6853 = vmatprep.mubr.bf16.mxu0 %v5997_v32  ;;  %v8421_v29 = vadd.f32 %v6486_v37, %v8213_v41  ;;  %v3407_v6 = vshll.u32 %v3124_v47, 16  ;;  %v3413_v35 = vshll.u32 %v3125_v55, 16  ;;  %v8425_v62 = vpop.f32.mrb[32].mxu1 }
 0x180   : > { %8923 = vst [vmem:[#allocation13_spill] sm:$0xff] %v8414_v63  ;;  %v3417_v18 = vshrl.u32 %v3125_v55, 16  ;;  %v3406_v58 = vrot.slane %v3404_v25, 4  ;;  %v3423_v4 = vshll.u32 %v3126_v38, 16  ;;  %v5983_v59 = vrot.slane %v3627_v7, 9  ;;  %v8429_v11 = vpop.f32.mrb[33].mxu1 }
 0x181   : > { %8924 = vst [vmem:[#allocation14_spill] sm:$0xff] %v8421_v29  ;;  %5206 = vmatprep.mubr.bf16.mxu1 %v5969_v2  ;;  %v3757_v23 = vrot.slane %v3628_v3, 5  ;;  %v3409_v53 = vrot.slane %v3407_v6, 5  ;;  %v3415_v28 = vrot.slane %v3413_v35, 5  ;;  %v3760_v52 = vrot.slane %v3629_v0, 5 }
 0x182   : > { %5207 = vmatmul.mubr.bf16.gmra.mrb[120].mxu1 %v7012_v56  ;;  %v3419_v26 = vrot.slane %v3417_v18, 4  ;;  %v3425_v32 = vrot.slane %v3423_v4, 5  ;;  %v5984_v55 = vrot.slane %v3630_v19, 9  ;;  %v3764_v38 = vrot.slane %v3631_v16, 5  ;;  %v3127_v3 = vld [vmem:[#allocation2 + $0xa8] sm:$0xf] }
 0x183   : > { %v3758_v41 = vsel %vm7471_vm14, %v5983_v59, %v3757_v23  ;;  %v3759_v47 = vrot.slane %v3757_v23, 4  ;;  %v3410_v37 = vor.u32 %v3409_v53, %v3406_v58  ;;  %v3767_v7 = vrot.slane %v8416_v42, 5  ;;  %v3128_v6 = vld [vmem:[#allocation2 + $0xac] sm:$0xf]  ;;  %v8444_v16 = vpop.f32.mrb[34].mxu1  ;;  %v7013_v18 = vld [vmem:[#allocation2 + $0x9c] sm:$0xff]  }
 0x184   : > { %v3420_v2 = vor.u32 %v3419_v26, %v3415_v28  ;;  %v8436_v0 = vadd.f32 %v8288_v51, %v8284_v14  ;;  %v8440_v25 = vadd.f32 %v8294_v49, %v8290_v46  ;;  %v6489_v19 = vadd.f32 %v8327_v34, %v8320_v44  ;;  %v3129_v4 = vld [vmem:[#allocation2 + $0xb0] sm:$0x1]  ;;  %v3633_v14 = vld [vmem:[#allocation2 + $0x90] sm:$0xe]  ;;  %v3634_v51 = vld [vmem:[#allocation2 + $0x94] sm:$0xf] }
 0x185   : > { %6854 = vmatmul.mubr.bf16.gmra.mrb[124].mxu0 %v5998_v30  ;;  %v3761_v56 = vsel %vm7471_vm14, %v3759_v47, %v3760_v52  ;;  %v3411_v42 = vrot.slane %v3410_v37, 4  ;;  %v3765_v58 = vsel %vm7471_vm14, %v5984_v55, %v3764_v38  ;;  %v3635_v59 = vld [vmem:[#allocation2 + $0x98] sm:$0x1]  ;;  %v8450_v46 = vpop.f32.mrb[35].mxu1  ;;  %v3766_v49 = vrot.slane %v3764_v38, 4 }
 0x186   : > { %8925 = vst [vmem:[#allocation15_spill] sm:$0xff] %v8436_v0  ;;  %8926 = vst [vmem:[#allocation16_spill] sm:$0xff] %v8440_v25  ;;  %v3421_v35 = vrot.slane %v3420_v2, 4  ;;  %v5999_v30 = vcombine.low %v3758_v41, %v3761_v56  ;;  %v8448_v23 = vpop.f32.mrb[32].mxu0  ;;  %v8453_v44 = vadd.f32 %v6489_v19, %v8242_v43  ;;  %v6492_v34 = vadd.f32 %v8331_v20, %v8329_v15  ;;  %v3636_v26 = vld [vmem:[#allocation2 + $0x9c] sm:$0xe] }
 0x187   : > { %v3428_v53 = vshrl.u32 %v3127_v3, 16  ;;  %v8457_v52 = vpop.f32.mrb[33].mxu0  ;;  %v8459_v41 = vpop.f32.mrb[36].mxu1  ;;  %v3416_v47 = vsel %vm7136_vm3, %v3411_v42, %v3415_v28  ;;  %v3431_v37 = vshll.u32 %v3127_v3, 16  ;;  %v3437_v2 = vshll.u32 %v3128_v6, 16 }
 0x188   : > { %8927 = vst [vmem:[#allocation17_spill] sm:$0xff] %v8453_v44  ;;  %v3426_v55 = vsel %vm7136_vm3, %v3421_v35, %v3425_v32  ;;  %6857 = vmatprep.mubr.bf16.mxu0 %v5999_v30  ;;  %v3637_v43 = vld [vmem:[#allocation2 + $0xa0] sm:$0xf]  ;;  %v8465_v38 = vpop.f32.mrb[34].mxu0  ;;  %v8467_v56 = vpop.f32.mrb[37].mxu1  ;;  %v3768_v20 = vsel %vm7471_vm14, %v3766_v49, %v3767_v7  ;;  %v8472_v19 = vadd.f32 %v6492_v34, %v8274_v40  ;;  %v3441_v3 = vshrl.u32 %v3128_v6, 16 }
 0x189   : > { %v5970_v15 = vcombine.low %v3416_v47, %v3426_v55  ;;  %v3430_v44 = vrot.slane %v3428_v53, 4  ;;  %v8474_v28 = vpop.f32.mrb[35].mxu0  ;;  %v6000_v42 = vcombine.low %v3765_v58, %v3768_v20  ;;  %v3433_v32 = vrot.slane %v3431_v37, 5  ;;  %v3638_v30 = vld [vmem:[#allocation2 + $0xa4] sm:$0x1]  ;;  %v8476_v29 = vpop.f32.mrb[38].mxu1 }
 0x18a   : > { %v3439_v35 = vrot.slane %v3437_v2, 5  ;;  %v3447_v63 = vshll.u32 %v3129_v4, 16  ;;  %v5985_v25 = vrot.slane %v3633_v14, 9  ;;  %v3771_v47 = vrot.slane %v3634_v51, 5  ;;  %v8478_v0 = vpop.f32.mrb[39].mxu1 }
 0x18b   : > { %5214 = vmatprep.mubr.bf16.mxu1 %v5970_v15  ;;  %v3774_v55 = vrot.slane %v3635_v59, 5  ;;  %v3434_v40 = vor.u32 %v3433_v32, %v3430_v44  ;;  %v3443_v7 = vrot.slane %v3441_v3, 4  ;;  %v5986_v49 = vrot.slane %v3636_v26, 9  ;;  %v3130_v51 = vld [vmem:[#allocation2 + $0xb4] sm:$0xf]  ;;  %v7014_v32 = vld [vmem:[#allocation2 + $0xa8] sm:$0xff]  }
 0x18c   : > { %5215 = vmatmul.mubr.bf16.gmra.mrb[124].mxu1 %v7013_v18  ;;  %v3778_v34 = vrot.slane %v3637_v43, 5  ;;  %v3449_v58 = vrot.slane %v3447_v63, 5  ;;  %v3772_v6 = vsel %vm7471_vm14, %v5985_v25, %v3771_v47  ;;  %v3773_v53 = vrot.slane %v3771_v47, 4  ;;  %v3131_v44 = vld [vmem:[#allocation2 + $0xb8] sm:$0xf] }
 0x18d   : > { %6858 = vmatmul.mubr.bf16.gmra.mrb[128].mxu0 %v6000_v42  ;;  %v3781_v37 = vrot.slane %v3638_v30, 5  ;;  %v3435_v2 = vrot.slane %v3434_v40, 4  ;;  %v3444_v15 = vor.u32 %v3443_v7, %v3439_v35  ;;  %v8488_v59 = vadd.f32 %v8337_v57, %v8333_v48  ;;  %v3132_v26 = vld [vmem:[#allocation2 + $0xbc] sm:$0x1]  ;;  %v3639_v48 = vld [vmem:[#allocation2 + $0xa8] sm:$0xe] }
 0x18e   : > { %v3779_v4 = vsel %vm7471_vm14, %v5986_v49, %v3778_v34  ;;  %v3780_v14 = vrot.slane %v3778_v34, 4  ;;  %v3775_v18 = vsel %vm7471_vm14, %v3773_v53, %v3774_v55  ;;  %v8492_v63 = vadd.f32 %v8363_v8, %v8355_v10  ;;  %v3640_v57 = vld [vmem:[#allocation2 + $0xac] sm:$0xf]  ;;  %v3641_v47 = vld [vmem:[#allocation2 + $0xb0] sm:$0x1] }
 0x18f   : > { %v6495_v25 = vadd.f32 %v8365_v13, %v8357_v1  ;;  %v3440_v43 = vsel %vm7136_vm3, %v3435_v2, %v3439_v35  ;;  %v3445_v20 = vrot.slane %v3444_v15, 4  ;;  %v6001_v42 = vcombine.low %v3772_v6, %v3775_v18  ;;  %v3642_v35 = vld [vmem:[#allocation2 + $0xb4] sm:$0xe]  ;;  %v3643_v6 = vld [vmem:[#allocation2 + $0xb8] sm:$0xf] }
 0x190   : > { %v3782_v3 = vsel %vm7471_vm14, %v3780_v14, %v3781_v37  ;;  %v6498_v1 = vadd.f32 %v8375_v24, %v8371_v54  ;;  %v3452_v13 = vshrl.u32 %v3130_v51, 16  ;;  %v3455_v7 = vshll.u32 %v3130_v51, 16  ;;  %v3644_v2 = vld [vmem:[#allocation2 + $0xbc] sm:$0x1] }
 0x191   : > { %v8500_v30 = vpop.f32.mrb[36].mxu0  ;;  %v6002_v10 = vcombine.low %v3779_v4, %v3782_v3  ;;  %v8503_v8 = vadd.f32 %v6495_v25, %v8302_v61  ;;  %v3450_v40 = vsel %vm7136_vm3, %v3445_v20, %v3449_v58  ;;  %6861 = vmatprep.mubr.bf16.mxu0 %v6001_v42  ;;  %v3461_v49 = vshll.u32 %v3131_v44, 16 }
 0x192   : > { %v8507_v55 = vpop.f32.mrb[37].mxu0  ;;  %v3465_v34 = vshrl.u32 %v3131_v44, 16  ;;  %v5971_v61 = vcombine.low %v3440_v43, %v3450_v40  ;;  %v8514_v37 = vadd.f32 %v6498_v1, %v8308_v27  ;;  %v3454_v24 = vrot.slane %v3452_v13, 4  ;;  %v3133_v40 = vld [vmem:[#allocation2 + $0xc0] sm:$0xf] }
 0x193   : > { %v8511_v53 = vpop.f32.mrb[38].mxu0  ;;  %v3471_v54 = vshll.u32 %v3132_v26, 16  ;;  %v8518_v4 = vpop.f32.mrb[40].mxu1  ;;  %v3457_v14 = vrot.slane %v3455_v7, 5  ;;  %v3463_v58 = vrot.slane %v3461_v49, 5  ;;  %v5987_v51 = vrot.slane %v3639_v48, 9 }
 0x194   : > { %v8516_v15 = vpop.f32.mrb[39].mxu0  ;;  %v3467_v18 = vrot.slane %v3465_v34, 4  ;;  %v8520_v25 = vpop.f32.mrb[41].mxu1  ;;  %5222 = vmatprep.mubr.bf16.mxu1 %v5971_v61  ;;  %v3785_v43 = vrot.slane %v3640_v57, 5  ;;  %v3788_v20 = vrot.slane %v3641_v47, 5  ;;  %v5988_v27 = vrot.slane %v3642_v35, 9 }
 0x195   : > { %6862 = vmatmul.mubr.bf16.gmra.mrb[132].mxu0 %v6002_v10  ;;  %v3473_v44 = vrot.slane %v3471_v54, 5  ;;  %v8522_v42 = vpop.f32.mrb[42].mxu1  ;;  %5223 = vmatmul.mubr.bf16.gmra.mrb[128].mxu1 %v7014_v32  ;;  %v3458_v26 = vor.u32 %v3457_v14, %v3454_v24  ;;  %v3792_v1 = vrot.slane %v3643_v6, 5  ;;  %v3795_v13 = vrot.slane %v3644_v2, 5  ;;  %v7015_v61 = vld [vmem:[#allocation2 + $0xb4] sm:$0xff]  }
 0x196   : > { %v3468_v3 = vor.u32 %v3467_v18, %v3463_v58  ;;  %v8524_v7 = vpop.f32.mrb[43].mxu1  ;;  %v3786_v48 = vsel %vm7471_vm14, %v5987_v51, %v3785_v43  ;;  %v3787_v49 = vrot.slane %v3785_v43, 4  ;;  %v8530_v10 = vadd.f32 %v8379_v5, %v8377_v36  ;;  %v3134_v5 = vld [vmem:[#allocation2 + $0xc4] sm:$0xf]  ;;  %v3135_v18 = vld [vmem:[#allocation2 + $0xc8] sm:$0x1] }
 0x197   : > { %v8534_v57 = vadd.f32 %v8383_v60, %v8381_v21  ;;  %v3459_v32 = vrot.slane %v3458_v26, 4  ;;  %v3793_v35 = vsel %vm7471_vm14, %v5988_v27, %v3792_v1  ;;  %v3794_v34 = vrot.slane %v3792_v1, 4  ;;  %v3645_v51 = vld [vmem:[#allocation2 + $0xc0] sm:$0xe]  ;;  %v3646_v43 = vld [vmem:[#allocation2 + $0xc4] sm:$0xf] }
 0x198   : > { %v3469_v47 = vrot.slane %v3468_v3, 4  ;;  %v3789_v6 = vsel %vm7471_vm14, %v3787_v49, %v3788_v20  ;;  %v6501_v24 = vadd.f32 %v8411_v45, %v8387_v22  ;;  %v6504_v36 = vadd.f32 %v8423_v12, %v8418_v39  ;;  %v8928_v39 = vld [vmem:[#allocation10_spill] sm:$0xff] }
 0x199   : > { %v3476_v54 = vshrl.u32 %v3133_v40, 16  ;;  %v3464_v21 = vsel %vm7136_vm3, %v3459_v32, %v3463_v58  ;;  %v6003_v2 = vcombine.low %v3786_v48, %v3789_v6  ;;  %v3796_v14 = vsel %vm7471_vm14, %v3794_v34, %v3795_v13  ;;  %v3647_v27 = vld [vmem:[#allocation2 + $0xc8] sm:$0x1]  ;;  %v3648_v58 = vld [vmem:[#allocation2 + $0xcc] sm:$0xe] }
 0x19a   : > { %v3474_v60 = vsel %vm7136_vm3, %v3469_v47, %v3473_v44  ;;  %v6004_v22 = vcombine.low %v3793_v35, %v3796_v14  ;;  %v8551_v45 = vadd.f32 %v6501_v24, %v8343_v17  ;;  %v8554_v12 = vadd.f32 %v6504_v36, %v8928_v39  ;;  %v3649_v48 = vld [vmem:[#allocation2 + $0xd0] sm:$0xf]  ;;  %v3650_v34 = vld [vmem:[#allocation2 + $0xd4] sm:$0x1] }
 0x19b   : > { %v5972_v20 = vcombine.low %v3464_v21, %v3474_v60  ;;  %v8556_v26 = vpop.f32.mrb[44].mxu1  ;;  %6865 = vmatprep.mubr.bf16.mxu0 %v6003_v2  ;;  %v3478_v44 = vrot.slane %v3476_v54, 4  ;;  %v3479_v3 = vshll.u32 %v3133_v40, 16  ;;  %v3485_v1 = vshll.u32 %v3134_v5, 16 }
 0x19c   : > { %v3489_v13 = vshrl.u32 %v3134_v5, 16  ;;  %v8558_v49 = vpop.f32.mrb[45].mxu1  ;;  %v3495_v32 = vshll.u32 %v3135_v18, 16  ;;  %v8562_v17 = vadd.f32 %v8457_v52, %v8448_v23  ;;  %v8566_v47 = vadd.f32 %v8474_v28, %v8465_v38  ;;  %v3136_v38 = vld [vmem:[#allocation2 + $0xcc] sm:$0xf] }
 0x19d   : > { %5230 = vmatprep.mubr.bf16.mxu1 %v5972_v20  ;;  %6866 = vmatmul.mubr.bf16.gmra.mrb[136].mxu0 %v6004_v22  ;;  %v5989_v35 = vrot.slane %v3645_v51, 9  ;;  %v8568_v6 = vpop.f32.mrb[46].mxu1  ;;  %v3481_v40 = vrot.slane %v3479_v3, 5  ;;  %v3487_v24 = vrot.slane %v3485_v1, 5  ;;  %v3799_v5 = vrot.slane %v3646_v43, 5 }
 0x19e   : > { %5231 = vmatmul.mubr.bf16.gmra.mrb[132].mxu1 %v7015_v61  ;;  %v3491_v36 = vrot.slane %v3489_v13, 4  ;;  %v6429_v54 = vpop.f32.mrb[40].mxu0  ;;  %v8570_v21 = vpop.f32.mrb[47].mxu1  ;;  %v3497_v60 = vrot.slane %v3495_v32, 5  ;;  %v3802_v2 = vrot.slane %v3647_v27, 5  ;;  %v6507_v23 = vadd.f32 %v8429_v11, %v8425_v62 }
 0x19f   : > { %v5990_v52 = vrot.slane %v3648_v58, 9  ;;  %v6430_v28 = vpop.f32.mrb[41].mxu0  ;;  %v3482_v14 = vor.u32 %v3481_v40, %v3478_v44  ;;  %v3800_v61 = vsel %vm7471_vm14, %v5989_v35, %v3799_v5  ;;  %v3801_v51 = vrot.slane %v3799_v5, 4  ;;  %v3137_v44 = vld [vmem:[#allocation2 + $0xd0] sm:$0xf] }
 0x1a0   : > { %v3492_v18 = vor.u32 %v3491_v36, %v3487_v24  ;;  %v6432_v20 = vpop.f32.mrb[42].mxu0  ;;  %v8577_v43 = vadd.f32 %v6507_v23, %v8393_v33  ;;  %v3806_v22 = vrot.slane %v3649_v48, 5  ;;  %v3809_v39 = vrot.slane %v3650_v34, 5  ;;  %v3138_v48 = vld [vmem:[#allocation2 + $0xd4] sm:$0x1]  ;;  %v7016_v34 = vld [vmem:[#allocation2 + $0xc0] sm:$0xff]  }
 0x1a1   : > { %v6510_v27 = vadd.f32 %v8450_v46, %v8444_v16  ;;  %v6433_v3 = vpop.f32.mrb[43].mxu0  ;;  %v3483_v62 = vrot.slane %v3482_v14, 4  ;;  %v3803_v58 = vsel %vm7471_vm14, %v3801_v51, %v3802_v2  ;;  %v3500_v1 = vshrl.u32 %v3136_v38, 16 }
 0x1a2   : > { %v3493_v11 = vrot.slane %v3492_v18, 4  ;;  %v6005_v13 = vcombine.low %v3800_v61, %v3803_v58  ;;  %v3807_v32 = vsel %vm7471_vm14, %v5990_v52, %v3806_v22  ;;  %v3808_v35 = vrot.slane %v3806_v22, 4 }
 0x1a3   : > { %v8586_v33 = vadd.f32 %v6510_v27, %v8401_v9  ;;  %v3488_v16 = vsel %vm7136_vm3, %v3483_v62, %v3487_v24  ;;  %v3502_v40 = vrot.slane %v3500_v1, 4  ;;  %v3503_v36 = vshll.u32 %v3136_v38, 16 }
 0x1a4   : > { %v3498_v46 = vsel %vm7136_vm3, %v3493_v11, %v3497_v60  ;;  %6869 = vmatprep.mubr.bf16.mxu0 %v6005_v13  ;;  %v3810_v2 = vsel %vm7471_vm14, %v3808_v35, %v3809_v39  ;;  %v3509_v23 = vshll.u32 %v3137_v44, 16  ;;  %v3513_v52 = vshrl.u32 %v3137_v44, 16  ;;  %v7017_v13 = vld [vmem:[#allocation2 + $0xcc] sm:$0xff]  }
 0x1a5   : > { %v5973_v5 = vcombine.low %v3488_v16, %v3498_v46  ;;  %v6006_v14 = vcombine.low %v3807_v32, %v3810_v2  ;;  %v3505_v9 = vrot.slane %v3503_v36, 5  ;;  %v3519_v18 = vshll.u32 %v3138_v48, 16 }
 0x1a6   : > { %v6425_v61 = vadd.f32 %v8507_v55, %v8500_v30  ;;  %v3511_v24 = vrot.slane %v3509_v23, 5  ;;  %v3515_v51 = vrot.slane %v3513_v52, 4  ;;  %v6428_v60 = vadd.f32 %v8516_v15, %v8511_v53  ;;  %v8929_v30 = vld [vmem:[#allocation15_spill] sm:$0xff] }
 0x1a7   : > { %5238 = vmatprep.mubr.bf16.mxu1 %v5973_v5  ;;  %v6513_v38 = vadd.f32 %v8467_v56, %v8459_v41  ;;  %6870 = vmatmul.mubr.bf16.gmra.mrb[140].mxu0 %v6006_v14  ;;  %v3506_v50 = vor.u32 %v3505_v9, %v3502_v40  ;;  %v3521_v22 = vrot.slane %v3519_v18, 5  ;;  %v6516_v39 = vadd.f32 %v8478_v0, %v8476_v29  ;;  %v8930_v41 = vld [vmem:[#allocation16_spill] sm:$0xff]  ;;  %v8931_v9 = vld [vmem:[#allocation13_spill] sm:$0xff] }
 0x1a8   : > { %5239 = vmatmul.mubr.bf16.gmra.mrb[136].mxu1 %v7016_v34  ;;  %v8602_v27 = vadd.f32 %v6430_v28, %v6429_v54  ;;  %v3516_v62 = vor.u32 %v3515_v51, %v3511_v24  ;;  %v8607_v11 = vadd.f32 %v6433_v3, %v6432_v20  ;;  %v6519_v53 = vadd.f32 %v8520_v25, %v8518_v4  ;;  %v6529_v0 = vpop.f32.mrb[48].mxu1 }
 0x1a9   : > { %v8605_v55 = vadd.f32 %v6513_v38, %v8929_v30  ;;  %v3507_v15 = vrot.slane %v3506_v50, 4  ;;  %v8612_v56 = vadd.f32 %v6516_v39, %v8930_v41  ;;  %v6522_v58 = vadd.f32 %v8524_v7, %v8522_v42  ;;  %v6530_v25 = vpop.f32.mrb[49].mxu1 }
 0x1aa   : > { %v6435_v44 = vpop.f32.mrb[44].mxu0  ;;  %v6525_v29 = vadd.f32 %v8558_v49, %v8556_v26  ;;  %v3517_v54 = vrot.slane %v3516_v62, 4  ;;  %v8619_v28 = vadd.f32 %v6519_v53, %v8488_v59  ;;  %v6528_v4 = vadd.f32 %v8570_v21, %v8568_v6  ;;  %v6532_v49 = vpop.f32.mrb[50].mxu1 }
 0x1ab   : > { %v6436_v20 = vpop.f32.mrb[45].mxu0  ;;  %v3512_v3 = vsel %vm7136_vm3, %v3507_v15, %v3511_v24  ;;  %v8626_v1 = vadd.f32 %v6522_v58, %v8492_v63  ;;  %v6531_v21 = vadd.f32 %v6530_v25, %v6529_v0  ;;  %v6533_v35 = vpop.f32.mrb[51].mxu1  ;;  %v8933_v0 = vld [vmem:[#allocation17_spill] sm:$0xff] }
 0x1ac   : > { %v6437_v42 = vadd.f32 %v6436_v20, %v6435_v44  ;;  %v6438_v7 = vpop.f32.mrb[46].mxu0  ;;  %v8629_v26 = vadd.f32 %v6525_v29, %v8530_v10  ;;  %v3522_v59 = vsel %vm7136_vm3, %v3517_v54, %v3521_v22  ;;  %v8634_v6 = vadd.f32 %v6528_v4, %v8534_v57 }
 0x1ad   : > { %v6439_v32 = vpop.f32.mrb[47].mxu0  ;;  %v5974_v48 = vcombine.low %v3512_v3, %v3522_v59  ;;  %v6534_v63 = vadd.f32 %v6533_v35, %v6532_v49  ;;  %v8637_v46 = vadd.f32 %v6531_v21, %v8562_v17 }
 0x1ae   : > { %v6440_v16 = vadd.f32 %v6439_v32, %v6438_v7 }
 0x1af   : > { %5246 = vmatprep.mubr.bf16.mxu1 %v5974_v48  ;;  %v8640_v10 = vadd.f32 %v6534_v63, %v8566_v47  ;;  %v8932_v47 = vld [vmem:[#allocation14_spill] sm:$0xff] }
 0x1b0   : > { %5247 = vmatmul.mubr.bf16.gmra.mrb[140].mxu1 %v7017_v13  ;;  %v6535_v34 = vpop.f32.mrb[52].mxu1 }
 0x1b1   : > { %v6536_v36 = vpop.f32.mrb[53].mxu1 }
 0x1b2   : > { %v6593_v31 = vpop.f32.mrb[48].mxu0  ;;  %v6537_v2 = vadd.f32 %v6536_v36, %v6535_v34  ;;  %v6538_v23 = vpop.f32.mrb[54].mxu1 }
 0x1b3   : > { %v6594_v40 = vpop.f32.mrb[49].mxu0  ;;  %v6539_v14 = vpop.f32.mrb[55].mxu1 }
 0x1b4   : > { %v6595_v5 = vadd.f32 %v6594_v40, %v6593_v31  ;;  %v6596_v57 = vpop.f32.mrb[50].mxu0  ;;  %v8645_v24 = vadd.f32 %v6537_v2, %v6425_v61  ;;  %v6540_v51 = vadd.f32 %v6539_v14, %v6538_v23 }
 0x1b5   : > { %v6597_v52 = vpop.f32.mrb[51].mxu0 }
 0x1b6   : > { %v8643_v18 = vadd.f32 %v6595_v5, %v8931_v9  ;;  %v6598_v17 = vadd.f32 %v6597_v52, %v6596_v57  ;;  %v8650_v50 = vadd.f32 %v6540_v51, %v6428_v60 }
 0x1b8   : > { %v8648_v38 = vadd.f32 %v6598_v17, %v8932_v47  ;;  %v6541_v39 = vpop.f32.mrb[56].mxu1  ;;  %v8934_v47 = vld [vmem:[#allocation4_spill] sm:$0xff] }
 0x1b9   : > { %v6542_v30 = vpop.f32.mrb[57].mxu1 }
 0x1ba   : > { %v6599_v22 = vpop.f32.mrb[52].mxu0  ;;  %v6543_v41 = vadd.f32 %v6542_v30, %v6541_v39  ;;  %v6544_v58 = vpop.f32.mrb[58].mxu1  ;;  %v8935_v39 = vld [vmem:[#allocation5_spill] sm:$0xff] }
 0x1bb   : > { %v6600_v62 = vpop.f32.mrb[53].mxu0  ;;  %v6545_v29 = vpop.f32.mrb[59].mxu1 }
 0x1bc   : > { %v6601_v53 = vadd.f32 %v6600_v62, %v6599_v22  ;;  %v6602_v15 = vpop.f32.mrb[54].mxu0  ;;  %v8656_v20 = vadd.f32 %v6543_v41, %v8602_v27  ;;  %v6546_v4 = vadd.f32 %v6545_v29, %v6544_v58 }
 0x1bd   : > { %v6603_v44 = vpop.f32.mrb[55].mxu0 }
 0x1be   : > { %v8653_v54 = vadd.f32 %v6601_v53, %v8933_v0  ;;  %v6604_v61 = vadd.f32 %v6603_v44, %v6602_v15  ;;  %v8662_v25 = vadd.f32 %v6546_v4, %v8607_v11 }
 0x1c0   : > { %v8659_v60 = vadd.f32 %v6604_v61, %v8472_v19  ;;  %v6547_v7 = vpop.f32.mrb[60].mxu1 }
 0x1c1   : > { %v6548_v59 = vpop.f32.mrb[61].mxu1 }
 0x1c2   : > { %v6605_v3 = vpop.f32.mrb[56].mxu0  ;;  %v6549_v21 = vadd.f32 %v6548_v59, %v6547_v7  ;;  %v6550_v35 = vpop.f32.mrb[62].mxu1  ;;  %v8936_v7 = vld [vmem:[#allocation6_spill] sm:$0xff] }
 0x1c3   : > { %v6606_v49 = vpop.f32.mrb[57].mxu0  ;;  %v6551_v63 = vpop.f32.mrb[63].mxu1 }
 0x1c4   : > { %v6607_v13 = vadd.f32 %v6606_v49, %v6605_v3  ;;  %v6608_v32 = vpop.f32.mrb[58].mxu0  ;;  %v8667_v34 = vadd.f32 %v6549_v21, %v6437_v42  ;;  %v6552_v19 = vadd.f32 %v6551_v63, %v6550_v35 }
 0x1c5   : > { %v6609_v48 = vpop.f32.mrb[59].mxu0 }
 0x1c6   : > { %v8665_v27 = vadd.f32 %v6607_v13, %v8503_v8  ;;  %v6610_v31 = vadd.f32 %v6609_v48, %v6608_v32  ;;  %v8672_v40 = vadd.f32 %v6552_v19, %v6440_v16  ;;  %v8937_v13 = vld [vmem:[#allocation7_spill] sm:$0xff] }
 0x1c8   : > { %v8670_v11 = vadd.f32 %v6610_v31, %v8514_v37  ;;  %v6553_v5 = vpop.f32.mrb[64].mxu1 }
 0x1c9   : > { %v6554_v2 = vpop.f32.mrb[65].mxu1 }
 0x1ca   : > { %v6611_v36 = vpop.f32.mrb[60].mxu0  ;;  %v6555_v14 = vadd.f32 %v6554_v2, %v6553_v5  ;;  %v6556_v9 = vpop.f32.mrb[66].mxu1 }
 0x1cb   : > { %v6612_v57 = vpop.f32.mrb[61].mxu0  ;;  %v6557_v8 = vpop.f32.mrb[67].mxu1 }
 0x1cc   : > { %v6613_v23 = vadd.f32 %v6612_v57, %v6611_v36  ;;  %v6614_v52 = vpop.f32.mrb[62].mxu0  ;;  %v8678_v22 = vadd.f32 %v6555_v14, %v8934_v47  ;;  %v6558_v37 = vadd.f32 %v6557_v8, %v6556_v9 }
 0x1cd   : > { %v6615_v17 = vpop.f32.mrb[63].mxu0 }
 0x1ce   : > { %v8675_v51 = vadd.f32 %v6613_v23, %v8551_v45  ;;  %v6616_v42 = vadd.f32 %v6615_v17, %v6614_v52  ;;  %v8684_v62 = vadd.f32 %v6558_v37, %v8935_v39  ;;  %v8938_v52 = vld [vmem:[#allocation8_spill] sm:$0xff]  ;;  %v8939_v17 = vld [vmem:[#allocation9_spill] sm:$0xff] }
 0x1d0   : > { %v8681_v16 = vadd.f32 %v6616_v42, %v8554_v12  ;;  %v6559_v53 = vpop.f32.mrb[68].mxu1 }
 0x1d1   : > { %v6560_v41 = vpop.f32.mrb[69].mxu1 }
 0x1d2   : > { %v6617_v30 = vpop.f32.mrb[64].mxu0  ;;  %v6561_v29 = vadd.f32 %v6560_v41, %v6559_v53  ;;  %v6562_v45 = vpop.f32.mrb[70].mxu1 }
 0x1d3   : > { %v6618_v15 = vpop.f32.mrb[65].mxu0  ;;  %v6563_v61 = vpop.f32.mrb[71].mxu1 }
 0x1d4   : > { %v6619_v58 = vadd.f32 %v6618_v15, %v6617_v30  ;;  %v6620_v44 = vpop.f32.mrb[66].mxu0  ;;  %v8690_v12 = vadd.f32 %v6561_v29, %v8936_v7  ;;  %v6564_v49 = vadd.f32 %v6563_v61, %v6562_v45 }
 0x1d5   : > { %v6621_v0 = vpop.f32.mrb[67].mxu0 }
 0x1d6   : > { %v8687_v4 = vadd.f32 %v6619_v58, %v8577_v43  ;;  %v6622_v3 = vadd.f32 %v6621_v0, %v6620_v44  ;;  %v8696_v32 = vadd.f32 %v6564_v49, %v8937_v13 }
 0x1d8   : > { %v8693_v59 = vadd.f32 %v6622_v3, %v8586_v33  ;;  %v6565_v35 = vpop.f32.mrb[72].mxu1 }
 0x1d9   : > { %v6566_v63 = vpop.f32.mrb[73].mxu1 }
 0x1da   : > { %v6623_v21 = vpop.f32.mrb[68].mxu0  ;;  %v6567_v36 = vadd.f32 %v6566_v63, %v6565_v35  ;;  %v6568_v43 = vpop.f32.mrb[74].mxu1 }
 0x1db   : > { %v6624_v48 = vpop.f32.mrb[69].mxu0  ;;  %v6569_v57 = vpop.f32.mrb[75].mxu1 }
 0x1dc   : > { %v6625_v31 = vadd.f32 %v6624_v48, %v6623_v21  ;;  %v6626_v19 = vpop.f32.mrb[70].mxu0  ;;  %v8702_v33 = vadd.f32 %v6567_v36, %v8938_v52  ;;  %v6570_v14 = vadd.f32 %v6569_v57, %v6568_v43 }
 0x1dd   : > { %v6627_v5 = vpop.f32.mrb[71].mxu0 }
 0x1de   : > { %v8699_v2 = vadd.f32 %v6625_v31, %v8605_v55  ;;  %v6628_v23 = vadd.f32 %v6627_v5, %v6626_v19  ;;  %v8708_v8 = vadd.f32 %v6570_v14, %v8939_v17  ;;  %v8940_v31 = vld [vmem:[#allocation11_spill] sm:$0xff] }
 0x1e0   : > { %v8705_v9 = vadd.f32 %v6628_v23, %v8612_v56 }
 0x1e2   : > { %v6629_v42 = vpop.f32.mrb[72].mxu0 }
 0x1e3   : > { %v6630_v47 = vpop.f32.mrb[73].mxu0 }
 0x1e4   : > { %v6631_v37 = vadd.f32 %v6630_v47, %v6629_v42  ;;  %v6632_v39 = vpop.f32.mrb[74].mxu0 }
 0x1e5   : > { %v6633_v30 = vpop.f32.mrb[75].mxu0 }
 0x1e6   : > { %v8711_v53 = vadd.f32 %v6631_v37, %v8619_v28  ;;  %v6634_v55 = vadd.f32 %v6633_v30, %v6632_v39 }
 0x1e8   : > { %v8714_v15 = vadd.f32 %v6634_v55, %v8626_v1 }
 0x1ea   : > { %v6635_v41 = vpop.f32.mrb[76].mxu0 }
 0x1eb   : > { %v6636_v58 = vpop.f32.mrb[77].mxu0 }
 0x1ec   : > { %v6637_v44 = vadd.f32 %v6636_v58, %v6635_v41  ;;  %v6638_v56 = vpop.f32.mrb[78].mxu0 }
 0x1ed   : > { %v6639_v29 = vpop.f32.mrb[79].mxu0 }
 0x1ee   : > { %v8717_v45 = vadd.f32 %v6637_v44, %v8629_v26  ;;  %v6640_v0 = vadd.f32 %v6639_v29, %v6638_v56 }
 0x1f0   : > { %v8720_v61 = vadd.f32 %v6640_v0, %v8634_v6  ;;  %v6571_v3 = vpop.f32.mrb[76].mxu1  ;;  %v8941_v6 = vld [vmem:[#allocation12_spill] sm:$0xff] }
 0x1f1   : > { %v6572_v28 = vpop.f32.mrb[77].mxu1 }
 0x1f2   : > { %v6641_v7 = vpop.f32.mrb[80].mxu0  ;;  %v6573_v13 = vadd.f32 %v6572_v28, %v6571_v3  ;;  %v6574_v1 = vpop.f32.mrb[78].mxu1 }
 0x1f3   : > { %v6642_v49 = vpop.f32.mrb[81].mxu0  ;;  %v6575_v48 = vpop.f32.mrb[79].mxu1 }
 0x1f4   : > { %v6643_v21 = vadd.f32 %v6642_v49, %v6641_v7  ;;  %v6644_v35 = vpop.f32.mrb[82].mxu0  ;;  %v8723_v19 = vadd.f32 %v6573_v13, %v8940_v31  ;;  %v6576_v36 = vadd.f32 %v6575_v48, %v6574_v1 }
 0x1f5   : > { %v6645_v63 = vpop.f32.mrb[83].mxu0 }
 0x1f6   : > { %v8726_v26 = vadd.f32 %v6643_v21, %v8637_v46  ;;  %v6646_v43 = vadd.f32 %v6645_v63, %v6644_v35  ;;  %v8729_v5 = vadd.f32 %v6576_v36, %v8941_v6 }
 0x1f8   : > { %v8732_v57 = vadd.f32 %v6646_v43, %v8640_v10  ;;  %v6705_v52 = vpop.f32.mrb[80].mxu1 }
 0x1f9   : > { %v6706_v17 = vpop.f32.mrb[81].mxu1 }
 0x1fa   : > { %v6647_v23 = vpop.f32.mrb[84].mxu0  ;;  %v6707_v47 = vadd.f32 %v6706_v17, %v6705_v52  ;;  %v6708_v39 = vpop.f32.mrb[82].mxu1 }
 0x1fb   : > { %v6648_v14 = vpop.f32.mrb[85].mxu0  ;;  %v6709_v55 = vpop.f32.mrb[83].mxu1 }
 0x1fc   : > { %v6649_v42 = vadd.f32 %v6648_v14, %v6647_v23  ;;  %v6650_v37 = vpop.f32.mrb[86].mxu0  ;;  %v6710_v58 = vadd.f32 %v6709_v55, %v6708_v39  ;;  %v8738_v44 = vadd.f32 %v6707_v47, %v8643_v18 }
 0x1fd   : > { %v6651_v30 = vpop.f32.mrb[87].mxu0 }
 0x1fe   : > { %v8735_v46 = vadd.f32 %v6649_v42, %v8645_v24  ;;  %v6652_v41 = vadd.f32 %v6651_v30, %v6650_v37  ;;  %v8744_v56 = vadd.f32 %v6710_v58, %v8648_v38 }
 0x200   : > { %v8741_v10 = vadd.f32 %v6652_v41, %v8650_v50  ;;  %v6711_v0 = vpop.f32.mrb[84].mxu1 }
 0x201   : > { %v6712_v7 = vpop.f32.mrb[85].mxu1 }
 0x202   : > { %v6653_v29 = vpop.f32.mrb[88].mxu0  ;;  %v6713_v49 = vadd.f32 %v6712_v7, %v6711_v0  ;;  %v6714_v24 = vpop.f32.mrb[86].mxu1 }
 0x203   : > { %v6654_v3 = vpop.f32.mrb[89].mxu0  ;;  %v6715_v1 = vpop.f32.mrb[87].mxu1 }
 0x204   : > { %v6655_v28 = vadd.f32 %v6654_v3, %v6653_v29  ;;  %v6656_v13 = vpop.f32.mrb[90].mxu0  ;;  %v6716_v48 = vadd.f32 %v6715_v1, %v6714_v24  ;;  %v8750_v50 = vadd.f32 %v6713_v49, %v8653_v54 }
 0x205   : > { %v6657_v21 = vpop.f32.mrb[91].mxu0 }
 0x206   : > { %v8747_v35 = vadd.f32 %v6655_v28, %v8656_v20  ;;  %v6658_v18 = vadd.f32 %v6657_v21, %v6656_v13  ;;  %v8756_v63 = vadd.f32 %v6716_v48, %v8659_v60 }
 0x208   : > { %v8753_v38 = vadd.f32 %v6658_v18, %v8662_v25  ;;  %v6717_v31 = vpop.f32.mrb[88].mxu1 }
 0x209   : > { %v6718_v43 = vpop.f32.mrb[89].mxu1 }
 0x20a   : > { %v6659_v36 = vpop.f32.mrb[92].mxu0  ;;  %v6719_v23 = vadd.f32 %v6718_v43, %v6717_v31  ;;  %v6720_v52 = vpop.f32.mrb[90].mxu1 }
 0x20b   : > { %v6660_v6 = vpop.f32.mrb[93].mxu0  ;;  %v6721_v17 = vpop.f32.mrb[91].mxu1 }
 0x20c   : > { %v6661_v14 = vadd.f32 %v6660_v6, %v6659_v36  ;;  %v6662_v20 = vpop.f32.mrb[94].mxu0  ;;  %v6722_v47 = vadd.f32 %v6721_v17, %v6720_v52  ;;  %v8759_v54 = vadd.f32 %v6719_v23, %v8665_v27 }
 0x20d   : > { %v6663_v42 = vpop.f32.mrb[95].mxu0 }
 0x20e   : > { %v8762_v25 = vadd.f32 %v6661_v14, %v8667_v34  ;;  %v6664_v37 = vadd.f32 %v6663_v42, %v6662_v20  ;;  %v8765_v60 = vadd.f32 %v6722_v47, %v8670_v11 }
 0x210   : > { %v8768_v39 = vadd.f32 %v6664_v37, %v8672_v40 }
 0x211   : > { %v6723_v30 = vpop.f32.mrb[92].mxu1 }
 0x212   : > { %v6724_v55 = vpop.f32.mrb[93].mxu1 }
 0x213   : > { %v6725_v41 = vadd.f32 %v6724_v55, %v6723_v30  ;;  %v6726_v58 = vpop.f32.mrb[94].mxu1 }
 0x214   : > { %v6665_v29 = vpop.f32.mrb[96].mxu0  ;;  %v6727_v0 = vpop.f32.mrb[95].mxu1 }
 0x215   : > { %v6666_v3 = vpop.f32.mrb[97].mxu0  ;;  %v6728_v7 = vadd.f32 %v6727_v0, %v6726_v58  ;;  %v8771_v27 = vadd.f32 %v6725_v41, %v8675_v51 }
 0x216   : > { %v6667_v34 = vadd.f32 %v6666_v3, %v6665_v29  ;;  %v6668_v28 = vpop.f32.mrb[98].mxu0 }
 0x217   : > { %v6669_v49 = vpop.f32.mrb[99].mxu0  ;;  %v8774_v11 = vadd.f32 %v6728_v7, %v8681_v16 }
 0x218   : > { %v8777_v40 = vadd.f32 %v6667_v34, %v8678_v22  ;;  %v6670_v13 = vadd.f32 %v6669_v49, %v6668_v28 }
 0x21a   : > { %v8780_v24 = vadd.f32 %v6670_v13, %v8684_v62 }
 0x21c   : > { %v6729_v21 = vpop.f32.mrb[96].mxu1 }
 0x21d   : > { %v6730_v1 = vpop.f32.mrb[97].mxu1 }
 0x21e   : > { %v6731_v18 = vadd.f32 %v6730_v1, %v6729_v21  ;;  %v6732_v48 = vpop.f32.mrb[98].mxu1  ;;  %v6671_v31 = vpop.f32.mrb[100].mxu0 }
 0x21f   : > { %v6733_v51 = vpop.f32.mrb[99].mxu1  ;;  %v6672_v36 = vpop.f32.mrb[101].mxu0 }
 0x220   : > { %v6734_v43 = vadd.f32 %v6733_v51, %v6732_v48  ;;  %v8783_v6 = vadd.f32 %v6731_v18, %v8687_v4  ;;  %v6673_v16 = vadd.f32 %v6672_v36, %v6671_v31  ;;  %v6674_v23 = vpop.f32.mrb[102].mxu0 }
 0x221   : > { %v6675_v52 = vpop.f32.mrb[103].mxu0 }
 0x222   : > { %v8786_v22 = vadd.f32 %v6734_v43, %v8693_v59  ;;  %v8789_v62 = vadd.f32 %v6673_v16, %v8690_v12  ;;  %v6676_v14 = vadd.f32 %v6675_v52, %v6674_v23 }
 0x224   : > { %v8792_v20 = vadd.f32 %v6676_v14, %v8696_v32 }
 0x226   : > { %v6735_v17 = vpop.f32.mrb[100].mxu1 }
 0x227   : > { %v6736_v42 = vpop.f32.mrb[101].mxu1 }
 0x228   : > { %v6737_v37 = vadd.f32 %v6736_v42, %v6735_v17  ;;  %v6738_v30 = vpop.f32.mrb[102].mxu1 }
 0x229   : > { %v6677_v47 = vpop.f32.mrb[104].mxu0  ;;  %v6739_v55 = vpop.f32.mrb[103].mxu1 }
 0x22a   : > { %v6678_v4 = vpop.f32.mrb[105].mxu0  ;;  %v6740_v29 = vadd.f32 %v6739_v55, %v6738_v30  ;;  %v8795_v59 = vadd.f32 %v6737_v37, %v8699_v2 }
 0x22b   : > { %v6679_v41 = vadd.f32 %v6678_v4, %v6677_v47  ;;  %v6680_v58 = vpop.f32.mrb[106].mxu0 }
 0x22c   : > { %v6681_v0 = vpop.f32.mrb[107].mxu0  ;;  %v8801_v32 = vadd.f32 %v6740_v29, %v8705_v9 }
 0x22d   : > { %v8798_v12 = vadd.f32 %v6679_v41, %v8702_v33  ;;  %v6682_v3 = vadd.f32 %v6681_v0, %v6680_v58 }
 0x22f   : > { %v8804_v7 = vadd.f32 %v6682_v3, %v8708_v8 }
 0x230   : > { %v6741_v34 = vpop.f32.mrb[104].mxu1 }
 0x231   : > { %v6742_v28 = vpop.f32.mrb[105].mxu1 }
 0x232   : > { %v6743_v49 = vadd.f32 %v6742_v28, %v6741_v34  ;;  %v6744_v13 = vpop.f32.mrb[106].mxu1 }
 0x233   : > { %v6745_v21 = vpop.f32.mrb[107].mxu1 }
 0x234   : > { %v6746_v1 = vadd.f32 %v6745_v21, %v6744_v13  ;;  %v8807_v2 = vadd.f32 %v6743_v49, %v8711_v53 }
 0x236   : > { %v8810_v18 = vadd.f32 %v6746_v1, %v8714_v15 }
 0x238   : > { %v6683_v33 = vpop.f32.mrb[108].mxu0  ;;  %v6747_v31 = vpop.f32.mrb[108].mxu1 }
 0x239   : > { %v6684_v48 = vpop.f32.mrb[109].mxu0  ;;  %v6748_v36 = vpop.f32.mrb[109].mxu1 }
 0x23a   : > { %v6685_v9 = vadd.f32 %v6684_v48, %v6683_v33  ;;  %v6686_v51 = vpop.f32.mrb[110].mxu0  ;;  %v6749_v43 = vadd.f32 %v6748_v36, %v6747_v31  ;;  %v6750_v16 = vpop.f32.mrb[110].mxu1 }
 0x23b   : > { %v6687_v8 = vpop.f32.mrb[111].mxu0  ;;  %v6751_v14 = vpop.f32.mrb[111].mxu1 }
 0x23c   : > { %v8813_v23 = vadd.f32 %v6685_v9, %v8723_v19  ;;  %v6688_v52 = vadd.f32 %v6687_v8, %v6686_v51  ;;  %v6752_v53 = vadd.f32 %v6751_v14, %v6750_v16  ;;  %v8816_v17 = vadd.f32 %v6749_v43, %v8717_v45 }
 0x23e   : > { %v8819_v15 = vadd.f32 %v6688_v52, %v8729_v5  ;;  %v8822_v42 = vadd.f32 %v6752_v53, %v8720_v61 }
 0x240   : > { %v6843_v47 = vpop.f32.mrb[112].mxu0 }
 0x241   : > { %v5298_v37 = vadd.f32 %v6843_v47, %v8750_v50  ;;  %v5289_v30 = vpop.f32.mrb[113].mxu0 }
 0x242   : > { %v5290_v4 = vadd.f32 %v5289_v30, %v8738_v44  ;;  %v6844_v19 = vpop.f32.mrb[114].mxu0 }
 0x243   : > { %v5301_v55 = vadd.f32 %v6844_v19, %v8756_v63  ;;  %v5292_v41 = vpop.f32.mrb[115].mxu0  ;;  %v5455_v34 = vmul.f32 %v5298_v37, %v5298_v37 }
 0x244   : > { %v5293_v45 = vadd.f32 %v5292_v41, %v8744_v56  ;;  %v6753_v61 = vpop.f32.mrb[112].mxu1  ;;  %v5453_v5 = vmul.f32 %v5290_v4, %v5290_v4 }
 0x245   : > { %v6251_v50 = vpack.c.bf16 %v5301_v55, %v5298_v37  ;;  %v6754_v58 = vpop.f32.mrb[113].mxu1  ;;  %v5456_v56 = vmul.f32 %v5301_v55, %v5301_v55 }
 0x246   : > { %v5416_v29 = vadd.f32 %v5293_v45, %v5290_v4  ;;  %v5454_v44 = vmul.f32 %v5293_v45, %v5293_v45  ;;  %v6246_v0 = vpack.c.bf16 %v5293_v45, %v5290_v4  ;;  %v6755_v3 = vadd.f32 %v6754_v58, %v6753_v61  ;;  %v6756_v63 = vpop.f32.mrb[114].mxu1 }
 0x247   : > { %6338 = vst [vmem:[%s8832_s11 + $0x8] sm:$0xff] %v6251_v50   ;;  %v6757_v28 = vpop.f32.mrb[115].mxu1 }
 0x248   : > { %v5417_v49 = vadd.f32 %v5416_v29, %v5298_v37  ;;  %v5485_v13 = vadd.f32 %v5454_v44, %v5453_v5  ;;  %6247 = vst [vmem:[%s8832_s11] sm:$0xff] %v6246_v0   ;;  %v6847_v21 = vpop.f32.mrb[116].mxu0  ;;  %v6758_v1 = vadd.f32 %v6757_v28, %v6756_v63  ;;  %v8838_v33 = vadd.f32 %v6755_v3, %v8726_v26 }
 0x249   : > { %v5314_v48 = vadd.f32 %v6847_v21, %v8771_v27  ;;  %v5305_v31 = vpop.f32.mrb[117].mxu0 }
 0x24a   : > { %v5486_v9 = vadd.f32 %v5485_v13, %v5455_v34  ;;  %v5306_v51 = vadd.f32 %v5305_v31, %v8759_v54  ;;  %v5418_v36 = vadd.f32 %v5417_v49, %v5301_v55  ;;  %v6848_v8 = vpop.f32.mrb[118].mxu0  ;;  %v8843_v43 = vadd.f32 %v6758_v1, %v8732_v57 }
 0x24b   : > { %v5317_v16 = vadd.f32 %v6848_v8, %v8774_v11  ;;  %v5308_v52 = vpop.f32.mrb[119].mxu0  ;;  %v5459_v45 = vmul.f32 %v5314_v48, %v5314_v48 }
 0x24c   : > { %v5419_v14 = vadd.f32 %v5418_v36, %v5306_v51  ;;  %v5457_v53 = vmul.f32 %v5306_v51, %v5306_v51  ;;  %v5487_v26 = vadd.f32 %v5486_v9, %v5456_v56  ;;  %v5309_v47 = vadd.f32 %v5308_v52, %v8765_v60  ;;  %v6759_v37 = vpop.f32.mrb[116].mxu1 }
 0x24d   : > { %v6261_v27 = vpack.c.bf16 %v5317_v16, %v5314_v48  ;;  %v6760_v55 = vpop.f32.mrb[117].mxu1  ;;  %v5460_v0 = vmul.f32 %v5317_v16, %v5317_v16 }
 0x24e   : > { %v5488_v30 = vadd.f32 %v5487_v26, %v5457_v53  ;;  %v5420_v4 = vadd.f32 %v5419_v14, %v5309_v47  ;;  %v5458_v54 = vmul.f32 %v5309_v47, %v5309_v47  ;;  %v6256_v19 = vpack.c.bf16 %v5309_v47, %v5306_v51  ;;  %v6762_v57 = vpop.f32.mrb[118].mxu1 }
 0x24f   : > { %6340 = vst [vmem:[%s8832_s11 + $0x18] sm:$0xff] %v6261_v27   ;;  %v6761_v41 = vadd.f32 %v6760_v55, %v6759_v37  ;;  %v6763_v50 = vpop.f32.mrb[119].mxu1 }
 0x250   : > { %v5421_v61 = vadd.f32 %v5420_v4, %v5314_v48  ;;  %v5489_v11 = vadd.f32 %v5488_v30, %v5458_v54  ;;  %6339 = vst [vmem:[%s8832_s11 + $0x10] sm:$0xff] %v6256_v19   ;;  %v6851_v5 = vpop.f32.mrb[120].mxu0  ;;  %v6764_v60 = vadd.f32 %v6763_v50, %v6762_v57 }
 0x251   : > { %v5330_v58 = vadd.f32 %v6851_v5, %v8795_v59  ;;  %v5321_v29 = vpop.f32.mrb[121].mxu0  ;;  %v5201_v44 = vadd.f32 %v6761_v41, %v8735_v46 }
 0x252   : > { %v5490_v3 = vadd.f32 %v5489_v11, %v5459_v45  ;;  %v5322_v63 = vadd.f32 %v5321_v29, %v8783_v6  ;;  %v5422_v34 = vadd.f32 %v5421_v61, %v5317_v16  ;;  %v6852_v28 = vpop.f32.mrb[122].mxu0  ;;  %v5204_v21 = vadd.f32 %v6764_v60, %v8741_v10 }
 0x253   : > { %v5333_v49 = vadd.f32 %v6852_v28, %v8801_v32  ;;  %v5324_v13 = vpop.f32.mrb[123].mxu0  ;;  %v5463_v32 = vmul.f32 %v5330_v58, %v5330_v58 }
 0x254   : > { %v5423_v1 = vadd.f32 %v5422_v34, %v5322_v63  ;;  %v5461_v56 = vmul.f32 %v5322_v63, %v5322_v63  ;;  %v5491_v59 = vadd.f32 %v5490_v3, %v5460_v0  ;;  %v5325_v48 = vadd.f32 %v5324_v13, %v8786_v22 }
 0x255   : > { %v6271_v31 = vpack.c.bf16 %v5333_v49, %v5330_v58  ;;  %v6765_v46 = vpop.f32.mrb[120].mxu1  ;;  %v5464_v30 = vmul.f32 %v5333_v49, %v5333_v49 }
 0x256   : > { %v5492_v9 = vadd.f32 %v5491_v59, %v5461_v56  ;;  %v5424_v51 = vadd.f32 %v5423_v1, %v5325_v48  ;;  %v5462_v36 = vmul.f32 %v5325_v48, %v5325_v48  ;;  %v6266_v6 = vpack.c.bf16 %v5325_v48, %v5322_v63  ;;  %v6766_v8 = vpop.f32.mrb[121].mxu1 }
 0x257   : > { %6342 = vst [vmem:[%s8832_s11 + $0x28] sm:$0xff] %v6271_v31   ;;  %v6767_v16 = vadd.f32 %v6766_v8, %v6765_v46  ;;  %v6768_v52 = vpop.f32.mrb[122].mxu1 }
 0x258   : > { %v5425_v14 = vadd.f32 %v5424_v51, %v5330_v58  ;;  %v5493_v53 = vadd.f32 %v5492_v9, %v5462_v36  ;;  %6341 = vst [vmem:[%s8832_s11 + $0x20] sm:$0xff] %v6266_v6   ;;  %v6855_v10 = vpop.f32.mrb[124].mxu0  ;;  %v6769_v26 = vpop.f32.mrb[123].mxu1 }
 0x259   : > { %v5346_v47 = vadd.f32 %v6855_v10, %v8816_v17  ;;  %v5337_v27 = vpop.f32.mrb[125].mxu0  ;;  %v6770_v22 = vadd.f32 %v6769_v26, %v6768_v52  ;;  %v5209_v37 = vadd.f32 %v6767_v16, %v8747_v35 }
 0x25a   : > { %v5494_v4 = vadd.f32 %v5493_v53, %v5463_v32  ;;  %v5338_v54 = vadd.f32 %v5337_v27, %v8807_v2  ;;  %v5426_v19 = vadd.f32 %v5425_v14, %v5333_v49  ;;  %v6856_v55 = vpop.f32.mrb[126].mxu0 }
 0x25b   : > { %v5349_v41 = vadd.f32 %v6856_v55, %v8822_v42  ;;  %v5340_v57 = vpop.f32.mrb[127].mxu0  ;;  %v8862_v45 = vadd.f32 %v6770_v22, %v8753_v38  ;;  %v5467_v0 = vmul.f32 %v5346_v47, %v5346_v47 }
 0x25c   : > { %v5427_v61 = vadd.f32 %v5426_v19, %v5338_v54  ;;  %v5465_v17 = vmul.f32 %v5338_v54, %v5338_v54  ;;  %v5495_v11 = vadd.f32 %v5494_v4, %v5464_v30  ;;  %v5341_v5 = vadd.f32 %v5340_v57, %v8810_v18 }
 0x25d   : > { %v6281_v35 = vpack.c.bf16 %v5349_v41, %v5346_v47  ;;  %v5468_v1 = vmul.f32 %v5349_v41, %v5349_v41 }
 0x25e   : > { %v5496_v50 = vadd.f32 %v5495_v11, %v5465_v17  ;;  %v5428_v58 = vadd.f32 %v5427_v61, %v5341_v5  ;;  %v5466_v29 = vmul.f32 %v5341_v5, %v5341_v5  ;;  %v6276_v60 = vpack.c.bf16 %v5341_v5, %v5338_v54 }
 0x25f   : > { %6344 = vst [vmem:[%s8832_s11 + $0x38] sm:$0xff] %v6281_v35   ;;  %v6771_v2 = vpop.f32.mrb[124].mxu1 }
 0x260   : > { %v5429_v3 = vadd.f32 %v5428_v58, %v5346_v47  ;;  %v5497_v42 = vadd.f32 %v5496_v50, %v5466_v29  ;;  %6343 = vst [vmem:[%s8832_s11 + $0x30] sm:$0xff] %v6276_v60   ;;  %v6859_v63 = vpop.f32.mrb[128].mxu0  ;;  %v6772_v34 = vpop.f32.mrb[125].mxu1 }
 0x261   : > { %v5362_v38 = vadd.f32 %v6859_v63, %v5201_v44  ;;  %v6773_v28 = vadd.f32 %v6772_v34, %v6771_v2  ;;  %v5353_v49 = vpop.f32.mrb[129].mxu0  ;;  %v6774_v13 = vpop.f32.mrb[126].mxu1 }
 0x262   : > { %v5498_v56 = vadd.f32 %v5497_v42, %v5467_v0  ;;  %v5354_v18 = vadd.f32 %v5353_v49, %v8838_v33  ;;  %v5430_v59 = vadd.f32 %v5429_v3, %v5349_v41  ;;  %v6860_v48 = vpop.f32.mrb[130].mxu0  ;;  %v6775_v31 = vpop.f32.mrb[127].mxu1 }
 0x263   : > { %v5365_v46 = vadd.f32 %v6860_v48, %v5204_v21  ;;  %v6776_v9 = vadd.f32 %v6775_v31, %v6774_v13  ;;  %v5356_v51 = vpop.f32.mrb[131].mxu0  ;;  %v5217_v36 = vadd.f32 %v6773_v28, %v8762_v25  ;;  %v5471_v26 = vmul.f32 %v5362_v38, %v5362_v38 }
 0x264   : > { %v5431_v6 = vadd.f32 %v5430_v59, %v5354_v18  ;;  %v5469_v8 = vmul.f32 %v5354_v18, %v5354_v18  ;;  %v5499_v44 = vadd.f32 %v5498_v56, %v5468_v1  ;;  %v5357_v16 = vadd.f32 %v5356_v51, %v8843_v43 }
 0x265   : > { %v6291_v52 = vpack.c.bf16 %v5365_v46, %v5362_v38  ;;  %v5220_v32 = vadd.f32 %v6776_v9, %v8768_v39  ;;  %v5472_v4 = vmul.f32 %v5365_v46, %v5365_v46 }
 0x266   : > { %v5500_v14 = vadd.f32 %v5499_v44, %v5469_v8  ;;  %v5432_v33 = vadd.f32 %v5431_v6, %v5357_v16  ;;  %v5470_v53 = vmul.f32 %v5357_v16, %v5357_v16  ;;  %v6286_v10 = vpack.c.bf16 %v5357_v16, %v5354_v18 }
 0x267   : > { %6346 = vst [vmem:[%s8832_s11 + $0x48] sm:$0xff] %v6291_v52  }
 0x268   : > { %v5433_v21 = vadd.f32 %v5432_v33, %v5362_v38  ;;  %v5501_v47 = vadd.f32 %v5500_v14, %v5470_v53  ;;  %6345 = vst [vmem:[%s8832_s11 + $0x40] sm:$0xff] %v6286_v10   ;;  %v6863_v27 = vpop.f32.mrb[132].mxu0  ;;  %v6777_v22 = vpop.f32.mrb[128].mxu1 }
 0x269   : > { %v5378_v25 = vadd.f32 %v6863_v27, %v5217_v36  ;;  %v5369_v30 = vpop.f32.mrb[133].mxu0  ;;  %v6778_v19 = vpop.f32.mrb[129].mxu1 }
 0x26a   : > { %v5502_v54 = vadd.f32 %v5501_v47, %v5471_v26  ;;  %v5370_v43 = vadd.f32 %v5369_v30, %v5209_v37  ;;  %v5434_v55 = vadd.f32 %v5433_v21, %v5365_v46  ;;  %v6864_v41 = vpop.f32.mrb[134].mxu0  ;;  %v6779_v39 = vadd.f32 %v6778_v19, %v6777_v22  ;;  %v6780_v57 = vpop.f32.mrb[130].mxu1 }
 0x26b   : > { %v5381_v61 = vadd.f32 %v6864_v41, %v5220_v32  ;;  %v5372_v17 = vpop.f32.mrb[135].mxu0  ;;  %v6781_v50 = vpop.f32.mrb[131].mxu1  ;;  %v5475_v34 = vmul.f32 %v5378_v25, %v5378_v25 }
 0x26c   : > { %v5435_v11 = vadd.f32 %v5434_v55, %v5370_v43  ;;  %v5473_v5 = vmul.f32 %v5370_v43, %v5370_v43  ;;  %v5503_v35 = vadd.f32 %v5502_v54, %v5472_v4  ;;  %v5373_v58 = vadd.f32 %v5372_v17, %v8862_v45 }
 0x26d   : > { %v6301_v29 = vpack.c.bf16 %v5381_v61, %v5378_v25  ;;  %v6782_v60 = vadd.f32 %v6781_v50, %v6780_v57  ;;  %v5225_v2 = vadd.f32 %v6779_v39, %v8777_v40  ;;  %v5476_v56 = vmul.f32 %v5381_v61, %v5381_v61 }
 0x26e   : > { %v5504_v0 = vadd.f32 %v5503_v35, %v5473_v5  ;;  %v5436_v37 = vadd.f32 %v5435_v11, %v5373_v58  ;;  %v5474_v3 = vmul.f32 %v5373_v58, %v5373_v58  ;;  %v6296_v42 = vpack.c.bf16 %v5373_v58, %v5370_v43 }
 0x26f   : > { %6348 = vst [vmem:[%s8832_s11 + $0x58] sm:$0xff] %v6301_v29   ;;  %v5228_v63 = vadd.f32 %v6782_v60, %v8780_v24 }
 0x270   : > { %v5437_v38 = vadd.f32 %v5436_v37, %v5378_v25  ;;  %v5505_v28 = vadd.f32 %v5504_v0, %v5474_v3  ;;  %6347 = vst [vmem:[%s8832_s11 + $0x50] sm:$0xff] %v6296_v42   ;;  %v6867_v49 = vpop.f32.mrb[136].mxu0 }
 0x271   : > { %v6783_v13 = vpop.f32.mrb[132].mxu1  ;;  %v5385_v1 = vpop.f32.mrb[137].mxu0 }
 0x272   : > { %v5506_v45 = vadd.f32 %v5505_v28, %v5475_v34  ;;  %v6784_v18 = vpop.f32.mrb[133].mxu1  ;;  %v5386_v59 = vadd.f32 %v5385_v1, %v5225_v2  ;;  %v5438_v48 = vadd.f32 %v5437_v38, %v5381_v61  ;;  %v6868_v40 = vpop.f32.mrb[138].mxu0 }
 0x273   : > { %v6785_v31 = vadd.f32 %v6784_v18, %v6783_v13  ;;  %v6786_v46 = vpop.f32.mrb[134].mxu1  ;;  %v5388_v9 = vpop.f32.mrb[139].mxu0 }
 0x274   : > { %v5439_v51 = vadd.f32 %v5438_v48, %v5386_v59  ;;  %v5477_v36 = vmul.f32 %v5386_v59, %v5386_v59  ;;  %v5507_v24 = vadd.f32 %v5506_v45, %v5476_v56  ;;  %v6787_v6 = vpop.f32.mrb[135].mxu1  ;;  %v5389_v8 = vadd.f32 %v5388_v9, %v5228_v63 }
 0x275   : > { %v5233_v44 = vadd.f32 %v6785_v31, %v8789_v62  ;;  %v6788_v16 = vadd.f32 %v6787_v6, %v6786_v46 }
 0x276   : > { %v5508_v52 = vadd.f32 %v5507_v24, %v5477_v36  ;;  %v5440_v32 = vadd.f32 %v5439_v51, %v5389_v8  ;;  %v5478_v14 = vmul.f32 %v5389_v8, %v5389_v8  ;;  %v6306_v33 = vpack.c.bf16 %v5389_v8, %v5386_v59 }
 0x277   : > { %v5394_v53 = vadd.f32 %v6867_v49, %v5233_v44  ;;  %v5236_v10 = vadd.f32 %v6788_v16, %v8792_v20 }
 0x278   : > { %v5509_v26 = vadd.f32 %v5508_v52, %v5478_v14  ;;  %6349 = vst [vmem:[%s8832_s11 + $0x60] sm:$0xff] %v6306_v33  }
 0x279   : > { %v5479_v21 = vmul.f32 %v5394_v53, %v5394_v53  ;;  %v5397_v47 = vadd.f32 %v6868_v40, %v5236_v10  ;;  %v5441_v27 = vadd.f32 %v5440_v32, %v5394_v53 }
 0x27a   : > { %v6871_v54 = vpop.f32.mrb[140].mxu0 }
 0x27b   : > { %v5480_v22 = vmul.f32 %v5397_v47, %v5397_v47  ;;  %v6311_v25 = vpack.c.bf16 %v5397_v47, %v5394_v53  ;;  %v5510_v30 = vadd.f32 %v5509_v26, %v5479_v21  ;;  %v6789_v4 = vpop.f32.mrb[136].mxu1  ;;  %v5442_v62 = vadd.f32 %v5441_v27, %v5397_v47  ;;  %v5401_v43 = vpop.f32.mrb[141].mxu0 }
 0x27c   : > { %v6790_v19 = vpop.f32.mrb[137].mxu1  ;;  %v6872_v57 = vpop.f32.mrb[142].mxu0 }
 0x27d   : > { %6350 = vst [vmem:[%s8832_s11 + $0x68] sm:$0xff] %v6311_v25   ;;  %v6791_v55 = vadd.f32 %v6790_v19, %v6789_v4  ;;  %v6792_v41 = vpop.f32.mrb[138].mxu1  ;;  %v5511_v39 = vadd.f32 %v5510_v30, %v5480_v22  ;;  %v5404_v20 = vpop.f32.mrb[143].mxu0 }
 0x27e   : > { %v6793_v61 = vpop.f32.mrb[139].mxu1 }
 0x27f   : > { %v6794_v17 = vadd.f32 %v6793_v61, %v6792_v41  ;;  %v5241_v11 = vadd.f32 %v6791_v55, %v8798_v12 }
 0x281   : > { %v5402_v5 = vadd.f32 %v5401_v43, %v5241_v11  ;;  %v5244_v35 = vadd.f32 %v6794_v17, %v8804_v7 }
 0x283   : > { %v5443_v50 = vadd.f32 %v5442_v62, %v5402_v5  ;;  %v5481_v58 = vmul.f32 %v5402_v5, %v5402_v5  ;;  %v5405_v29 = vadd.f32 %v5404_v20, %v5244_v35  ;;  %v6795_v60 = vpop.f32.mrb[140].mxu1 }
 0x284   : > { %v6796_v42 = vpop.f32.mrb[141].mxu1 }
 0x285   : > { %v5512_v2 = vadd.f32 %v5511_v39, %v5481_v58  ;;  %v5444_v0 = vadd.f32 %v5443_v50, %v5405_v29  ;;  %v5482_v37 = vmul.f32 %v5405_v29, %v5405_v29  ;;  %v6316_v3 = vpack.c.bf16 %v5405_v29, %v5402_v5  ;;  %v6798_v34 = vpop.f32.mrb[142].mxu1 }
 0x286   : > { %v6797_v63 = vadd.f32 %v6796_v42, %v6795_v60  ;;  %v6799_v28 = vpop.f32.mrb[143].mxu1 }
 0x287   : > { %v5513_v38 = vadd.f32 %v5512_v2, %v5482_v37  ;;  %6351 = vst [vmem:[%s8832_s11 + $0x70] sm:$0xff] %v6316_v3   ;;  %v6800_v49 = vadd.f32 %v6799_v28, %v6798_v34 }
 0x288   : > { %v5249_v12 = vadd.f32 %v6797_v63, %v8813_v23 }
 0x289   : > { %v5252_v7 = vadd.f32 %v6800_v49, %v8819_v15 }
 0x28a   : > { %v5410_v13 = vadd.f32 %v6871_v54, %v5249_v12 }
 0x28b   : > { %v5413_v45 = vadd.f32 %v6872_v57, %v5252_v7 }
 0x28c   : > { %v5445_v1 = vadd.f32 %v5444_v0, %v5410_v13  ;;  %v5483_v56 = vmul.f32 %v5410_v13, %v5410_v13 }
 0x28d   : > { %v5484_v48 = vmul.f32 %v5413_v45, %v5413_v45  ;;  %v6321_v40 = vpack.c.bf16 %v5413_v45, %v5410_v13 }
 0x28e   : > { %v5514_v18 = vadd.f32 %v5513_v38, %v5483_v56  ;;  %v5446_v59 = vadd.f32 %v5445_v1, %v5413_v45 }
 0x28f   : > { %6352 = vst [vmem:[%s8832_s11 + $0x78] sm:$0xff] %v6321_v40  }
 0x290   : > { %v5447_v31 = vrot.slane %v5446_v59, 4  ;;  %v5515_v46 = vadd.f32 %v5514_v18, %v5484_v48 }
 0x292   : > { %v5448_v9 = vadd.f32 %v5447_v31, %v5446_v59  ;;  %v5516_v51 = vrot.slane %v5515_v46, 4 }
 0x294   : > { %v5449_v36 = vrot.slane %v5448_v9, 2  ;;  %v5517_v24 = vadd.f32 %v5516_v51, %v5515_v46 }
 0x296   : > { %v5450_v23 = vadd.f32 %v5449_v36, %v5448_v9  ;;  %v5518_v6 = vrot.slane %v5517_v24, 2 }
 0x298   : > { %v5451_v8 = vrot.slane %v5450_v23, 1  ;;  %v5519_v44 = vadd.f32 %v5518_v6, %v5517_v24 }
 0x29a   : > { %v5520_v15 = vrot.slane %v5519_v44, 1  ;;  %v5452_v16 = vadd.f32 %v5451_v8, %v5450_v23 }
 0x29c   : > { %v5521_v52 = vadd.f32 %v5520_v15, %v5519_v44 }
 0x29e   : > { %v5523_v32 = vsel %vm419_vm0, %v5452_v16, %v5521_v52 }
 0x29f   : > { %5524 = vst [vmem:[%s235_s15] sm:$0x3] %v5523_v32 }
 0x2a0 PF: > { %s16_s18 = sadd.s32 1, %s7030_s18  }
 0x2a1   : > { %p13_p4 = scmp.ge.s32.totalorder %s16_s18, 4  }
 0x2a3   :  { %15 = sbr.rel (!%p13_p4) target bundleno = 1 (0x1), region = 81 }

</bundles_post_ra>
